<compile_context>
chip_gen: v7x
topology: tpu7x:2x2x1
jax: 0.10.0
libtpu: 0.0.40
codegen_flags: <defaults>
</compile_context>

<pallas_src>
import numpy as np
import jax
import jax.numpy as jnp
from jax import lax
from jax.experimental import pallas as pl
from jax.experimental.pallas import tpu as pltpu


_VMEM = pl.BlockSpec(memory_space=pltpu.MemorySpace.VMEM)


# ------------------------- parameter packing (one DMA) -------------------------

def pack_layout(N, D, H, L):
    """8-aligned row layout of the packed (rows, 128) f32 parameter/constant slab."""
    E = N * (N + 1) // 2
    ND = N * D
    layout = {}
    row = 0

    def add(name, r, c):
        nonlocal row
        row = ((row + 7) // 8) * 8          # 8-align every entry's start row
        layout[name] = (row, r, c)
        row += r

    add("w1", D, H)          # GraphConv1 weight
    add("w2", H, H)          # GraphConv2 weight
    add("eW", H, 2 * L)      # encode_11 | encode_12 merged
    add("d1w", L, L)         # decode_1
    add("d2w", L, E + ND)    # decode_2 (edge | node halves merged)
    add("eB", 1, 2 * L)
    add("d1b", 1, L)
    add("d2b", 1, E + ND)
    # triu selector constants (for in-kernel full-adjacency recovery, matmul-only)
    add("a_up", N, E)
    add("a_lo", N, E)
    add("b_up", E, N)
    add("b_lo", E, N)

    rows = ((row + 7) // 8) * 8
    max_col = max(c for (_, _, c) in layout.values())
    lanes = ((max_col + 127) // 128) * 128
    return layout, rows, lanes


def pack_params(params, N, D, H, L):
    layout, rows, lanes = pack_layout(N, D, H, L)
    iu_r, iu_c = np.triu_indices(N)          # row-major upper-triangle (matches torch.triu mask)
    rng_n = np.arange(N)
    a_up = (iu_r[None, :] == rng_n[:, None]).astype(np.float32)   # (N, E)
    a_lo = (iu_c[None, :] == rng_n[:, None]).astype(np.float32)   # (N, E)
    b_up = (iu_c[:, None] == rng_n[None, :]).astype(np.float32)   # (E, N)
    b_lo = (iu_r[:, None] == rng_n[None, :]).astype(np.float32)   # (E, N)

    entries = {
        "w1": params["w1"], "w2": params["w2"],
        "eW": jnp.concatenate([params["e11w"], params["e12w"]], axis=1),
        "d1w": params["d1w"],
        "d2w": params["d2w"],
        "eB": jnp.concatenate([params["e11b"], params["e12b"]], axis=1),
        "d1b": params["d1b"],
        "d2b": params["d2b"],
        "a_up": a_up, "a_lo": a_lo, "b_up": b_up, "b_lo": b_lo,
    }
    slab = jnp.zeros((rows, lanes), jnp.float32)
    for name, (r0, r, c) in layout.items():
        slab = slab.at[r0:r0 + r, :c].set(jnp.asarray(entries[name], jnp.float32))
    return slab


# ------------------------------ kernel helpers ------------------------------

def _bn_train(h, eps=1e-5):
    # nn.BatchNorm1d training mode (gamma=1, beta=0, biased batch variance).
    # Two-pass variance (mean, then mean of centered squares) to avoid E[x^2]-E[x]^2
    # cancellation; rsqrt goes to the EUP slot.
    mu = jnp.mean(h, axis=0, keepdims=True)
    c = h - mu
    var = jnp.mean(c * c, axis=0, keepdims=True)
    return c * lax.rsqrt(var + eps)


def _softplus(x):
    # numerically stable softplus with only exp/log/abs/max (safe Mosaic lowering)
    return jnp.maximum(x, 0.0) + jnp.log(1.0 + jnp.exp(-jnp.abs(x)))


# ------------------------------ fused pre kernel ------------------------------
# encoder + sigmoid + adjacency recovery + S factors + 50-iteration mpm, one kernel.

def make_pre_kernel(N, D, H, L, layout, mpm_iters=50):
    E = N * (N + 1) // 2
    ND = N * D

    def sl(ref, name):
        r0, r, c = layout[name]
        return ref[r0:r0 + r, 0:c]        # static slice, 8-aligned start row

    def kernel(in_ref, p_ref, out_ref):
        # packed per-call inputs: rows 0..N-1 adj, rows 8..8+N-1 x, row 16 eps
        adj = in_ref[0:N, 0:N]
        x = in_ref[8:8 + N, 0:D]
        eps = in_ref[16:17, 0:L]

        # --- GraphConv1 + BN1 + ReLU ---
        h = jnp.dot(adj, x, preferred_element_type=jnp.float32)
        h = jnp.dot(h, sl(p_ref, "w1"), preferred_element_type=jnp.float32)
        h = jnp.maximum(_bn_train(h), 0.0)

        # --- GraphConv2 + BN2 ---
        h = jnp.dot(adj, h, preferred_element_type=jnp.float32)
        h = jnp.dot(h, sl(p_ref, "w2"), preferred_element_type=jnp.float32)
        h = _bn_train(h)

        # --- sum pooling over nodes (pool='sum') ---
        g = jnp.sum(h, axis=0, keepdims=True)                       # (1, H)

        # --- MLP_VAE_plain (encode_11|encode_12 merged; decode_2 halves merged) ---
        zc = jnp.dot(g, sl(p_ref, "eW"),
                     preferred_element_type=jnp.float32) + sl(p_ref, "eB")   # (1, 2L)
        z_mu = zc[:, 0:L]
        z_ls = zc[:, L:2 * L]
        z = eps * jnp.exp(0.5 * z_ls) + z_mu
        y = jnp.dot(z, sl(p_ref, "d1w"),
                    preferred_element_type=jnp.float32) + sl(p_ref, "d1b")
        y = jnp.maximum(y, 0.0)
        dec = jnp.dot(y, sl(p_ref, "d2w"),
                      preferred_element_type=jnp.float32) + sl(p_ref, "d2b")  # (1, E+ND)
        logits = dec[:, 0:E]
        node_flat = dec[:, E:E + ND]
        probs = 1.0 / (1.0 + jnp.exp(-logits))                       # sigmoid, in-kernel

        # --- recover full reconstructed adjacency from the triu edge vector ---
        # upper[i,j] = probs[k] where (iu_r[k], iu_c[k]) == (i, j); lower = upper^T.
        # Pure matmuls with 0/1 selector constants -> no transposes / gathers in-kernel.
        upper = jnp.dot(sl(p_ref, "a_up") * probs, sl(p_ref, "b_up"),
                        preferred_element_type=jnp.float32)           # (N, N)
        lower = jnp.dot(sl(p_ref, "a_lo") * probs, sl(p_ref, "b_lo"),
                        preferred_element_type=jnp.float32)           # (N, N)
        ii = lax.broadcasted_iota(jnp.int32, (N, N), 0)
        jj = lax.broadcasted_iota(jnp.int32, (N, N), 1)
        eye = (ii == jj).astype(jnp.float32)
        off = 1.0 - eye
        dcol = jnp.sum(upper * eye, axis=1, keepdims=True)            # diag(upper) as column
        recon = upper + lower - eye * dcol                            # symmetric recon adjacency

        # --- S tensor factors (S[i,j,a,b] = u[i,j]*v[a,b] for i!=j; diag term sd) ---
        adiag_c = jnp.sum(adj * eye, axis=1, keepdims=True)           # (N,1) adj[i,i]
        adiag_r = jnp.sum(adj * eye, axis=0, keepdims=True)           # (1,N) adj[j,j]
        rdiag_c = jnp.sum(recon * eye, axis=1, keepdims=True)         # (N,1) recon[a,a]
        rdiag_r = jnp.sum(recon * eye, axis=0, keepdims=True)         # (1,N) recon[b,b]
        u = adj * adiag_c * adiag_r * off                             # (N,N), zero diagonal
        v = recon * rdiag_c * rdiag_r * off                           # (N,N), zero diagonal
        adj_feat = jnp.sum(adj, axis=1, keepdims=True)                # (N,1) degree features
        out_feat = jnp.sum(recon, axis=0, keepdims=True)              # (1,N) (recon symmetric)
        sim = 1.0 / (jnp.abs(adj_feat - out_feat) + 1.0)
        sd = adiag_c * rdiag_r * sim                                  # (N,N): S[i,i,a,a]

        # --- mpm: 50 iterations fully resident in VMEM/vregs ---
        # x_new[i,a] = x[i,a]*sd[i,a] + sum_{j!=i} u[i,j]*max_b(x[j,b]*v[a,b])
        # (u >= 0, so max factors out of the nonnegative adjacency weights.)
        x0 = jnp.full((N, N), 1.0 / N, jnp.float32)

        def body(_, xc):
            prod = xc[:, None, :] * v[None, :, :]                     # (j, a, b)
            m = jnp.max(prod, axis=-1)                                # (j, a)
            xn = xc * sd + jnp.dot(u, m, preferred_element_type=jnp.float32)
            nrm2 = jnp.sum(xn * xn, keepdims=True)                    # (1,1) Frobenius^2
            return xn * lax.rsqrt(nrm2)

        assignment = lax.fori_loop(0, mpm_iters, body, x0, unroll=True)

        # --- single lane-dense (16,128) output slab ---
        out_ref[...] = jnp.zeros_like(out_ref)
        out_ref[0:1, 0:E] = logits
        out_ref[1:2, 0:ND] = node_flat
        out_ref[2:3, 0:L] = z_mu
        out_ref[3:4, 0:L] = z_ls
        out_ref[8:8 + N, 0:N] = assignment

    return kernel


# ------------------------------ loss kernel ------------------------------
# Single (8,128) input slab:
#   row 0: edge logits (E)     row 1: permuted adjacency target (E)
#   row 2: node recon (N*D)    row 3: permuted feature target (N*D)
#   row 4: z_mu (L)            row 5: z_lsgms (L)

def make_loss_kernel(N, D, L):
    E = N * (N + 1) // 2
    ND = N * D
    inv_E = 1.0 / float(E)
    inv_NN = 1.0 / float(N * N)
    inv_ND = 1.0 / float(ND)

    def kernel(in_ref, loss_ref):
        xl = in_ref[0:1, 0:E]
        t = in_ref[1:2, 0:E]
        # BCE on sigmoid(logits) vs target, via softplus (stable); keep PyTorch
        # BCELoss' -100 log clamp for parity with F.binary_cross_entropy.
        logp = jnp.maximum(-_softplus(-xl), -100.0)
        log1mp = jnp.maximum(-_softplus(xl), -100.0)
        bce = -jnp.sum(t * logp + (1.0 - t) * log1mp, keepdims=True) * inv_E

        nf = in_ref[2:3, 0:ND]
        ft = in_ref[3:4, 0:ND]
        diff = nf - ft
        fea = jnp.sum(diff * diff, keepdims=True) * inv_ND

        zmu = in_ref[4:5, 0:L]
        zls = in_ref[5:6, 0:L]
        kl = -0.5 * jnp.sum(1.0 + zls - zmu * zmu - jnp.exp(zls), keepdims=True) * inv_NN

        loss_ref[...] = bce + kl + fea

    return kernel


# ------------------------------ kernel wrappers ------------------------------

def make_pre_call(N, D, H, L, layout):
    return pl.pallas_call(
        make_pre_kernel(N, D, H, L, layout),
        out_shape=jax.ShapeDtypeStruct((16, 128), jnp.float32),
        in_specs=[_VMEM, _VMEM],
        out_specs=_VMEM,
    )


def make_loss_call(N, D, L):
    return pl.pallas_call(
        make_loss_kernel(N, D, L),
        out_shape=jax.ShapeDtypeStruct((1, 1), jnp.float32),
        in_specs=[_VMEM],
        out_specs=_VMEM,
    )


# ------------------------- model builder (jitted glue) -------------------------

def build_graphvae(N, D, H, L):
    E = N * (N + 1) // 2
    ND = N * D
    layout, _, _ = pack_layout(N, D, H, L)
    pre_call = make_pre_call(N, D, H, L, layout)
    loss_call = make_loss_call(N, D, L)
    iu_r, iu_c = np.triu_indices(N)          # static row-major upper-tri indices

    @jax.jit
    def device_pre(x, adj, packed, noise_key):
        x = x.astype(jnp.float32)
        adj = adj.astype(jnp.float32)
        # TODO(synk): eps could be drawn in-kernel via pltpu.prng_seed +
        # pltpu.stateful_normal; kept as a jit-internal draw for portability.
        eps = jax.random.normal(noise_key, (1, L), dtype=jnp.float32)
        # One packed per-call input slab (adj | x | eps) -> one DMA into the kernel.
        in_slab = jnp.zeros((24, 128), jnp.float32)
        in_slab = in_slab.at[0:N, 0:N].set(adj)       # use_adj padding is identity at full size
        in_slab = in_slab.at[8:8 + N, 0:D].set(x)
        in_slab = in_slab.at[16:17, 0:L].set(eps)
        out_slab = pre_call(in_slab, packed)
        assignment = out_slab[8:8 + N, 0:N]
        return out_slab, assignment

    @jax.jit
    def device_post(out_slab, x, adj, ind):
        x = x.astype(jnp.float32)
        adj = adj.astype(jnp.float32)
        # TODO(synk): these tiny permutation gathers / triu extraction could be folded
        # into the loss kernel via selector matmuls; kept as plain XLA inside this jit.
        adj_perm = adj[ind, :][:, ind]
        feat_perm = x[ind, :]
        adj_vec = adj_perm[iu_r, iu_c]                # row-major upper triangle, (E,)
        li = jnp.zeros((8, 128), jnp.float32)
        li = li.at[0, 0:E].set(out_slab[0, 0:E])      # edge logits
        li = li.at[1, 0:E].set(adj_vec)               # adjacency target
        li = li.at[2, 0:ND].set(out_slab[1, 0:ND])    # node recon (flat, row-major)
        li = li.at[3, 0:ND].set(feat_perm.reshape(ND))
        li = li.at[4, 0:L].set(out_slab[2, 0:L])      # z_mu
        li = li.at[5, 0:L].set(out_slab[3, 0:L])      # z_lsgms
        return loss_call(li)[0, 0]

    return {"N": N, "D": D, "H": H, "L": L, "pre": device_pre, "post": device_post}


# ------------------------- host-side Hungarian matching -------------------------

def _assignment(assignment_np):
    cost = -assignment_np
    try:
        import scipy.optimize
        return scipy.optimize.linear_sum_assignment(cost)
    except Exception:
        # TODO(synk): Hungarian algorithm (scipy.optimize.linear_sum_assignment) has
        # no Pallas equivalent; greedy matching used as a host-side fallback.
        n = cost.shape[0]
        rows, cols, used_r, used_c = [], [], set(), set()
        for flat in np.argsort(cost, axis=None):
            r, c = divmod(int(flat), n)
            if r in used_r or c in used_c:
                continue
            rows.append(r)
            cols.append(c)
            used_r.add(r)
            used_c.add(c)
            if len(rows) == n:
                break
        rows, cols = np.asarray(rows), np.asarray(cols)
        order = np.argsort(rows)
        return rows[order], cols[order]


# ------------------------------ parameter init ------------------------------

def xavier_uniform(key, fan_in, fan_out, gain):
    bound = gain * np.sqrt(6.0 / (fan_in + fan_out))
    return jax.random.uniform(key, (fan_in, fan_out), jnp.float32, -bound, bound)


def init_params(key, D, H, L, N):
    out_dim = N * (N + 1) // 2 + D * N
    gain = float(np.sqrt(2.0))  # nn.init.calculate_gain('relu')
    ks = jax.random.split(key, 10)

    def linear(kw, kb, fin, fout):
        w = xavier_uniform(kw, fin, fout, gain)                      # stored (in, out)
        bb = 1.0 / np.sqrt(fin)
        b = jax.random.uniform(kb, (1, fout), jnp.float32, -bb, bb)
        return w, b

    params = {
        "w1": xavier_uniform(ks[0], D, H, gain),
        "w2": xavier_uniform(ks[1], H, H, gain),
    }
    params["e11w"], params["e11b"] = linear(ks[2], ks[3], H, L)
    params["e12w"], params["e12b"] = linear(ks[4], ks[5], H, L)
    params["d1w"], params["d1b"] = linear(ks[6], ks[7], L, L)
    params["d2w"], params["d2b"] = linear(ks[8], ks[9], L, out_dim)
    return params


# ------------------------------ full forward ------------------------------

def graphvae_forward(model, input_features, adj, packed_params, noise_key):
    N = model["N"]
    out_slab, assignment = model["pre"](input_features, adj, packed_params, noise_key)

    # Host round-trip: only the (N, N) assignment matrix comes back for matching;
    # only N int32 permutation indices go back to the device.
    row_ind, col_ind = _assignment(np.asarray(assignment))
    ind = np.zeros(N, dtype=np.int32)
    ind[col_ind] = row_ind                    # matches reference permute_adj direction

    loss = model["post"](out_slab, input_features, adj, jnp.asarray(ind, jnp.int32))
    return loss


# ----------------------------------- main -----------------------------------

if __name__ == "__main__":
    N, D, H, L = 8, 4, 32, 16   # max_num_nodes, input_dim, hidden_dim, latent_dim
    key = jax.random.PRNGKey(0)
    k_feat, k_adj, k_param, k_noise = jax.random.split(key, 4)

    input_features = jax.random.normal(k_feat, (N, D), dtype=jnp.float32)
    a = jax.random.uniform(k_adj, (N, N))
    adj = ((a + a.T) > 1.0).astype(jnp.float32)
    adj = adj.at[jnp.arange(N), jnp.arange(N)].set(1.0)              # self-loops

    model = build_graphvae(N, D, H, L)
    params = init_params(k_param, D, H, L, N)
    packed = pack_params(params, N, D, H, L)                         # one VMEM slab

    loss = graphvae_forward(model, input_features, adj, packed, k_noise)
    jax.block_until_ready(loss)
    print("KERNEL_OK")
</pallas_src>

<mosaic_0001>
module attributes {stable_mosaic.version = 11 : i64} {
  func.func @kernel(%arg0: memref<24x128xf32, #tpu.memory_space<vmem>>, %arg1: memref<224x128xf32, #tpu.memory_space<vmem>>, %arg2: memref<16x128xf32, #tpu.memory_space<vmem>>) attributes {dimension_semantics = [], scalar_prefetch = 0 : i64, scratch_operands = 0 : i64, tpu.core_type = #tpu.core_type<tc>} {
    %c0 = arith.constant 0 : index
    %c0_0 = arith.constant 0 : index
    %0 = vector.load %arg0[%c0, %c0_0] : memref<24x128xf32, #tpu.memory_space<vmem>>, vector<8x8xf32>
    %c8 = arith.constant 8 : index
    %c0_1 = arith.constant 0 : index
    %1 = vector.load %arg0[%c8, %c0_1] : memref<24x128xf32, #tpu.memory_space<vmem>>, vector<8x4xf32>
    %c16 = arith.constant 16 : index
    %c0_2 = arith.constant 0 : index
    %2 = vector.load %arg0[%c16, %c0_2] : memref<24x128xf32, #tpu.memory_space<vmem>>, vector<1x16xf32>
    %cst = arith.constant dense<0.000000e+00> : vector<8x4xf32>
    %3 = tpu.matmul %0, %1, %cst {dimension_numbers = #tpu.dot_dimension_numbers<[1], [0], [0], [1], [0, 0, 1, 1], [], []>} : vector<8x8xf32>, vector<8x4xf32>, vector<8x4xf32> -> vector<8x4xf32>
    %c0_3 = arith.constant 0 : index
    %c0_4 = arith.constant 0 : index
    %4 = vector.load %arg1[%c0_3, %c0_4] : memref<224x128xf32, #tpu.memory_space<vmem>>, vector<4x32xf32>
    %cst_5 = arith.constant dense<0.000000e+00> : vector<8x32xf32>
    %5 = tpu.matmul %3, %4, %cst_5 {dimension_numbers = #tpu.dot_dimension_numbers<[1], [0], [0], [1], [0, 0, 1, 1], [], []>} : vector<8x4xf32>, vector<4x32xf32>, vector<8x32xf32> -> vector<8x32xf32>
    %cst_6 = arith.constant dense<0.000000e+00> : vector<32xf32>
    %6 = vector.multi_reduction <add>, %5, %cst_6 [0] : vector<8x32xf32> to vector<32xf32>
    %7 = vector.shape_cast %6 : vector<32xf32> to vector<1x32xf32>
    %cst_7 = arith.constant 8.000000e+00 : f32
    %8 = vector.broadcast %cst_7 : f32 to vector<1x32xf32>
    %9 = arith.divf %7, %8 : vector<1x32xf32>
    %10 = vector.broadcast %9 : vector<1x32xf32> to vector<8x32xf32>
    %11 = arith.subf %5, %10 : vector<8x32xf32>
    %12 = arith.mulf %11, %11 : vector<8x32xf32>
    %cst_8 = arith.constant dense<0.000000e+00> : vector<32xf32>
    %13 = vector.multi_reduction <add>, %12, %cst_8 [0] : vector<8x32xf32> to vector<32xf32>
    %14 = vector.shape_cast %13 : vector<32xf32> to vector<1x32xf32>
    %cst_9 = arith.constant 8.000000e+00 : f32
    %15 = vector.broadcast %cst_9 : f32 to vector<1x32xf32>
    %16 = arith.divf %14, %15 : vector<1x32xf32>
    %cst_10 = arith.constant 9.99999974E-6 : f32
    %17 = vector.broadcast %cst_10 : f32 to vector<1x32xf32>
    %18 = arith.addf %16, %17 : vector<1x32xf32>
    %19 = math.rsqrt %18 : vector<1x32xf32>
    %20 = vector.broadcast %19 : vector<1x32xf32> to vector<8x32xf32>
    %21 = arith.mulf %11, %20 : vector<8x32xf32>
    %cst_11 = arith.constant 0.000000e+00 : f32
    %22 = vector.broadcast %cst_11 : f32 to vector<8x32xf32>
    %23 = arith.maximumf %21, %22 : vector<8x32xf32>
    %cst_12 = arith.constant dense<0.000000e+00> : vector<8x32xf32>
    %24 = tpu.matmul %0, %23, %cst_12 {dimension_numbers = #tpu.dot_dimension_numbers<[1], [0], [0], [1], [0, 0, 1, 1], [], []>} : vector<8x8xf32>, vector<8x32xf32>, vector<8x32xf32> -> vector<8x32xf32>
    %c8_13 = arith.constant 8 : index
    %c0_14 = arith.constant 0 : index
    %25 = vector.load %arg1[%c8_13, %c0_14] : memref<224x128xf32, #tpu.memory_space<vmem>>, vector<32x32xf32>
    %cst_15 = arith.constant dense<0.000000e+00> : vector<8x32xf32>
    %26 = tpu.matmul %24, %25, %cst_15 {dimension_numbers = #tpu.dot_dimension_numbers<[1], [0], [0], [1], [0, 0, 1, 1], [], []>} : vector<8x32xf32>, vector<32x32xf32>, vector<8x32xf32> -> vector<8x32xf32>
    %cst_16 = arith.constant dense<0.000000e+00> : vector<32xf32>
    %27 = vector.multi_reduction <add>, %26, %cst_16 [0] : vector<8x32xf32> to vector<32xf32>
    %28 = vector.shape_cast %27 : vector<32xf32> to vector<1x32xf32>
    %cst_17 = arith.constant 8.000000e+00 : f32
    %29 = vector.broadcast %cst_17 : f32 to vector<1x32xf32>
    %30 = arith.divf %28, %29 : vector<1x32xf32>
    %31 = vector.broadcast %30 : vector<1x32xf32> to vector<8x32xf32>
    %32 = arith.subf %26, %31 : vector<8x32xf32>
    %33 = arith.mulf %32, %32 : vector<8x32xf32>
    %cst_18 = arith.constant dense<0.000000e+00> : vector<32xf32>
    %34 = vector.multi_reduction <add>, %33, %cst_18 [0] : vector<8x32xf32> to vector<32xf32>
    %35 = vector.shape_cast %34 : vector<32xf32> to vector<1x32xf32>
    %cst_19 = arith.constant 8.000000e+00 : f32
    %36 = vector.broadcast %cst_19 : f32 to vector<1x32xf32>
    %37 = arith.divf %35, %36 : vector<1x32xf32>
    %cst_20 = arith.constant 9.99999974E-6 : f32
    %38 = vector.broadcast %cst_20 : f32 to vector<1x32xf32>
    %39 = arith.addf %37, %38 : vector<1x32xf32>
    %40 = math.rsqrt %39 : vector<1x32xf32>
    %41 = vector.broadcast %40 : vector<1x32xf32> to vector<8x32xf32>
    %42 = arith.mulf %32, %41 : vector<8x32xf32>
    %cst_21 = arith.constant dense<0.000000e+00> : vector<32xf32>
    %43 = vector.multi_reduction <add>, %42, %cst_21 [0] : vector<8x32xf32> to vector<32xf32>
    %44 = vector.shape_cast %43 : vector<32xf32> to vector<1x32xf32>
    %c40 = arith.constant 40 : index
    %c0_22 = arith.constant 0 : index
    %45 = vector.load %arg1[%c40, %c0_22] : memref<224x128xf32, #tpu.memory_space<vmem>>, vector<32x32xf32>
    %cst_23 = arith.constant dense<0.000000e+00> : vector<1x32xf32>
    %46 = tpu.matmul %44, %45, %cst_23 {dimension_numbers = #tpu.dot_dimension_numbers<[1], [0], [0], [1], [0, 0, 1, 1], [], []>} : vector<1x32xf32>, vector<32x32xf32>, vector<1x32xf32> -> vector<1x32xf32>
    %c104 = arith.constant 104 : index
    %c0_24 = arith.constant 0 : index
    %47 = vector.load %arg1[%c104, %c0_24] : memref<224x128xf32, #tpu.memory_space<vmem>>, vector<1x32xf32>
    %48 = arith.addf %46, %47 : vector<1x32xf32>
    %49 = vector.extract_strided_slice %48 {offsets = [0, 0], sizes = [1, 16], strides = [1, 1]} : vector<1x32xf32> to vector<1x16xf32>
    %50 = vector.extract_strided_slice %48 {offsets = [0, 16], sizes = [1, 16], strides = [1, 1]} : vector<1x32xf32> to vector<1x16xf32>
    %cst_25 = arith.constant 5.000000e-01 : f32
    %51 = vector.broadcast %cst_25 : f32 to vector<1x16xf32>
    %52 = arith.mulf %51, %50 : vector<1x16xf32>
    %53 = math.exp %52 : vector<1x16xf32>
    %54 = arith.mulf %2, %53 : vector<1x16xf32>
    %55 = arith.addf %54, %49 : vector<1x16xf32>
    %c72 = arith.constant 72 : index
    %c0_26 = arith.constant 0 : index
    %56 = vector.load %arg1[%c72, %c0_26] : memref<224x128xf32, #tpu.memory_space<vmem>>, vector<16x16xf32>
    %cst_27 = arith.constant dense<0.000000e+00> : vector<1x16xf32>
    %57 = tpu.matmul %55, %56, %cst_27 {dimension_numbers = #tpu.dot_dimension_numbers<[1], [0], [0], [1], [0, 0, 1, 1], [], []>} : vector<1x16xf32>, vector<16x16xf32>, vector<1x16xf32> -> vector<1x16xf32>
    %c112 = arith.constant 112 : index
    %c0_28 = arith.constant 0 : index
    %58 = vector.load %arg1[%c112, %c0_28] : memref<224x128xf32, #tpu.memory_space<vmem>>, vector<1x16xf32>
    %59 = arith.addf %57, %58 : vector<1x16xf32>
    %cst_29 = arith.constant 0.000000e+00 : f32
    %60 = vector.broadcast %cst_29 : f32 to vector<1x16xf32>
    %61 = arith.maximumf %59, %60 : vector<1x16xf32>
    %c88 = arith.constant 88 : index
    %c0_30 = arith.constant 0 : index
    %62 = vector.load %arg1[%c88, %c0_30] : memref<224x128xf32, #tpu.memory_space<vmem>>, vector<16x68xf32>
    %cst_31 = arith.constant dense<0.000000e+00> : vector<1x68xf32>
    %63 = tpu.matmul %61, %62, %cst_31 {dimension_numbers = #tpu.dot_dimension_numbers<[1], [0], [0], [1], [0, 0, 1, 1], [], []>} : vector<1x16xf32>, vector<16x68xf32>, vector<1x68xf32> -> vector<1x68xf32>
    %c120 = arith.constant 120 : index
    %c0_32 = arith.constant 0 : index
    %64 = vector.load %arg1[%c120, %c0_32] : memref<224x128xf32, #tpu.memory_space<vmem>>, vector<1x68xf32>
    %65 = arith.addf %63, %64 : vector<1x68xf32>
    %66 = vector.extract_strided_slice %65 {offsets = [0, 0], sizes = [1, 36], strides = [1, 1]} : vector<1x68xf32> to vector<1x36xf32>
    %67 = vector.extract_strided_slice %65 {offsets = [0, 36], sizes = [1, 32], strides = [1, 1]} : vector<1x68xf32> to vector<1x32xf32>
    %cst_33 = arith.constant 0.000000e+00 : f32
    %68 = vector.broadcast %cst_33 : f32 to vector<1x36xf32>
    %69 = arith.subf %68, %66 : vector<1x36xf32>
    %70 = math.exp %69 : vector<1x36xf32>
    %cst_34 = arith.constant 1.000000e+00 : f32
    %71 = vector.broadcast %cst_34 : f32 to vector<1x36xf32>
    %72 = arith.addf %71, %70 : vector<1x36xf32>
    %cst_35 = arith.constant 1.000000e+00 : f32
    %73 = vector.broadcast %cst_35 : f32 to vector<1x36xf32>
    %74 = arith.divf %73, %72 : vector<1x36xf32>
    %c128 = arith.constant 128 : index
    %c0_36 = arith.constant 0 : index
    %75 = vector.load %arg1[%c128, %c0_36] : memref<224x128xf32, #tpu.memory_space<vmem>>, vector<8x36xf32>
    %76 = vector.broadcast %74 : vector<1x36xf32> to vector<8x36xf32>
    %77 = arith.mulf %75, %76 : vector<8x36xf32>
    %c144 = arith.constant 144 : index
    %c0_37 = arith.constant 0 : index
    %78 = vector.load %arg1[%c144, %c0_37] : memref<224x128xf32, #tpu.memory_space<vmem>>, vector<36x8xf32>
    %cst_38 = arith.constant dense<0.000000e+00> : vector<8x8xf32>
    %79 = tpu.matmul %77, %78, %cst_38 {dimension_numbers = #tpu.dot_dimension_numbers<[1], [0], [0], [1], [0, 0, 1, 1], [], []>} : vector<8x36xf32>, vector<36x8xf32>, vector<8x8xf32> -> vector<8x8xf32>
    %c136 = arith.constant 136 : index
    %c0_39 = arith.constant 0 : index
    %80 = vector.load %arg1[%c136, %c0_39] : memref<224x128xf32, #tpu.memory_space<vmem>>, vector<8x36xf32>
    %81 = vector.broadcast %74 : vector<1x36xf32> to vector<8x36xf32>
    %82 = arith.mulf %80, %81 : vector<8x36xf32>
    %c184 = arith.constant 184 : index
    %c0_40 = arith.constant 0 : index
    %83 = vector.load %arg1[%c184, %c0_40] : memref<224x128xf32, #tpu.memory_space<vmem>>, vector<36x8xf32>
    %cst_41 = arith.constant dense<0.000000e+00> : vector<8x8xf32>
    %84 = tpu.matmul %82, %83, %cst_41 {dimension_numbers = #tpu.dot_dimension_numbers<[1], [0], [0], [1], [0, 0, 1, 1], [], []>} : vector<8x36xf32>, vector<36x8xf32>, vector<8x8xf32> -> vector<8x8xf32>
    %85 = tpu.iota {dimensions = array<i32: 0>} : vector<8x8xi32>
    %86 = tpu.iota {dimensions = array<i32: 1>} : vector<8x8xi32>
    %87 = arith.cmpi eq, %85, %86 : vector<8x8xi32>
    %88 = arith.extui %87 : vector<8x8xi1> to vector<8x8xi32>
    %89 = arith.sitofp %88 : vector<8x8xi32> to vector<8x8xf32>
    %cst_42 = arith.constant 1.000000e+00 : f32
    %90 = vector.broadcast %cst_42 : f32 to vector<8x8xf32>
    %91 = arith.subf %90, %89 : vector<8x8xf32>
    %92 = arith.mulf %79, %89 : vector<8x8xf32>
    %cst_43 = arith.constant dense<0.000000e+00> : vector<8xf32>
    %93 = vector.multi_reduction <add>, %92, %cst_43 [1] : vector<8x8xf32> to vector<8xf32>
    %94 = vector.shape_cast %93 : vector<8xf32> to vector<8x1xf32>
    %95 = arith.addf %79, %84 : vector<8x8xf32>
    %96 = vector.broadcast %94 : vector<8x1xf32> to vector<8x8xf32>
    %97 = arith.mulf %89, %96 : vector<8x8xf32>
    %98 = arith.subf %95, %97 : vector<8x8xf32>
    %99 = arith.mulf %0, %89 : vector<8x8xf32>
    %cst_44 = arith.constant dense<0.000000e+00> : vector<8xf32>
    %100 = vector.multi_reduction <add>, %99, %cst_44 [1] : vector<8x8xf32> to vector<8xf32>
    %101 = vector.shape_cast %100 : vector<8xf32> to vector<8x1xf32>
    %102 = arith.mulf %0, %89 : vector<8x8xf32>
    %cst_45 = arith.constant dense<0.000000e+00> : vector<8xf32>
    %103 = vector.multi_reduction <add>, %102, %cst_45 [0] : vector<8x8xf32> to vector<8xf32>
    %104 = vector.shape_cast %103 : vector<8xf32> to vector<1x8xf32>
    %105 = arith.mulf %98, %89 : vector<8x8xf32>
    %cst_46 = arith.constant dense<0.000000e+00> : vector<8xf32>
    %106 = vector.multi_reduction <add>, %105, %cst_46 [1] : vector<8x8xf32> to vector<8xf32>
    %107 = vector.shape_cast %106 : vector<8xf32> to vector<8x1xf32>
    %108 = arith.mulf %98, %89 : vector<8x8xf32>
    %cst_47 = arith.constant dense<0.000000e+00> : vector<8xf32>
    %109 = vector.multi_reduction <add>, %108, %cst_47 [0] : vector<8x8xf32> to vector<8xf32>
    %110 = vector.shape_cast %109 : vector<8xf32> to vector<1x8xf32>
    %111 = vector.broadcast %101 : vector<8x1xf32> to vector<8x8xf32>
    %112 = arith.mulf %0, %111 : vector<8x8xf32>
    %113 = vector.broadcast %104 : vector<1x8xf32> to vector<8x8xf32>
    %114 = arith.mulf %112, %113 : vector<8x8xf32>
    %115 = arith.mulf %114, %91 : vector<8x8xf32>
    %116 = vector.broadcast %107 : vector<8x1xf32> to vector<8x8xf32>
    %117 = arith.mulf %98, %116 : vector<8x8xf32>
    %118 = vector.broadcast %110 : vector<1x8xf32> to vector<8x8xf32>
    %119 = arith.mulf %117, %118 : vector<8x8xf32>
    %120 = arith.mulf %119, %91 : vector<8x8xf32>
    %cst_48 = arith.constant dense<0.000000e+00> : vector<8xf32>
    %121 = vector.multi_reduction <add>, %0, %cst_48 [1] : vector<8x8xf32> to vector<8xf32>
    %122 = vector.shape_cast %121 : vector<8xf32> to vector<8x1xf32>
    %cst_49 = arith.constant dense<0.000000e+00> : vector<8xf32>
    %123 = vector.multi_reduction <add>, %98, %cst_49 [0] : vector<8x8xf32> to vector<8xf32>
    %124 = vector.shape_cast %123 : vector<8xf32> to vector<1x8xf32>
    %125 = vector.broadcast %122 : vector<8x1xf32> to vector<8x8xf32>
    %126 = vector.broadcast %124 : vector<1x8xf32> to vector<8x8xf32>
    %127 = arith.subf %125, %126 : vector<8x8xf32>
    %128 = math.absf %127 : vector<8x8xf32>
    %cst_50 = arith.constant 1.000000e+00 : f32
    %129 = vector.broadcast %cst_50 : f32 to vector<8x8xf32>
    %130 = arith.addf %128, %129 : vector<8x8xf32>
    %cst_51 = arith.constant 1.000000e+00 : f32
    %131 = vector.broadcast %cst_51 : f32 to vector<8x8xf32>
    %132 = arith.divf %131, %130 : vector<8x8xf32>
    %133 = vector.broadcast %101 : vector<8x1xf32> to vector<8x8xf32>
    %134 = vector.broadcast %110 : vector<1x8xf32> to vector<8x8xf32>
    %135 = arith.mulf %133, %134 : vector<8x8xf32>
    %136 = arith.mulf %135, %132 : vector<8x8xf32>
    %cst_52 = arith.constant 1.250000e-01 : f32
    %137 = vector.broadcast %cst_52 : f32 to vector<8x8xf32>
    %c0_i32 = arith.constant 0 : i32
    %138 = vector.shape_cast %137 : vector<8x8xf32> to vector<8x1x8xf32>
    %139 = vector.shape_cast %120 : vector<8x8xf32> to vector<1x8x8xf32>
    %140 = vector.broadcast %138 : vector<8x1x8xf32> to vector<8x8x8xf32>
    %141 = vector.broadcast %139 : vector<1x8x8xf32> to vector<8x8x8xf32>
    %142 = arith.mulf %140, %141 : vector<8x8x8xf32>
    %cst_53 = arith.constant dense<0xFF800000> : vector<8x8xf32>
    %143 = vector.multi_reduction <maximumf>, %142, %cst_53 [2] : vector<8x8x8xf32> to vector<8x8xf32>
    %144 = arith.mulf %137, %136 : vector<8x8xf32>
    %cst_54 = arith.constant dense<0.000000e+00> : vector<8x8xf32>
    %145 = tpu.matmul %115, %143, %cst_54 {dimension_numbers = #tpu.dot_dimension_numbers<[1], [0], [0], [1], [0, 0, 1, 1], [], []>} : vector<8x8xf32>, vector<8x8xf32>, vector<8x8xf32> -> vector<8x8xf32>
    %146 = arith.addf %144, %145 : vector<8x8xf32>
    %147 = arith.mulf %146, %146 : vector<8x8xf32>
    %148 = vector.shape_cast %147 : vector<8x8xf32> to vector<1x8x8xf32>
    %cst_55 = arith.constant dense<0.000000e+00> : vector<1xf32>
    %149 = vector.multi_reduction <add>, %148, %cst_55 [1, 2] : vector<1x8x8xf32> to vector<1xf32>
    %150 = vector.shape_cast %149 : vector<1xf32> to vector<1x1x1xf32>
    %151 = vector.extract %150[0, 0, 0] : f32 from vector<1x1x1xf32>
    %152 = vector.broadcast %151 : f32 to vector<1x1xf32>
    %153 = math.rsqrt %152 : vector<1x1xf32>
    %154 = vector.broadcast %153 : vector<1x1xf32> to vector<8x8xf32>
    %155 = arith.mulf %146, %154 : vector<8x8xf32>
    %c1_i32 = arith.constant 1 : i32
    %156 = vector.shape_cast %155 : vector<8x8xf32> to vector<8x1x8xf32>
    %157 = vector.shape_cast %120 : vector<8x8xf32> to vector<1x8x8xf32>
    %158 = vector.broadcast %156 : vector<8x1x8xf32> to vector<8x8x8xf32>
    %159 = vector.broadcast %157 : vector<1x8x8xf32> to vector<8x8x8xf32>
    %160 = arith.mulf %158, %159 : vector<8x8x8xf32>
    %cst_56 = arith.constant dense<0xFF800000> : vector<8x8xf32>
    %161 = vector.multi_reduction <maximumf>, %160, %cst_56 [2] : vector<8x8x8xf32> to vector<8x8xf32>
    %162 = arith.mulf %155, %136 : vector<8x8xf32>
    %cst_57 = arith.constant dense<0.000000e+00> : vector<8x8xf32>
    %163 = tpu.matmul %115, %161, %cst_57 {dimension_numbers = #tpu.dot_dimension_numbers<[1], [0], [0], [1], [0, 0, 1, 1], [], []>} : vector<8x8xf32>, vector<8x8xf32>, vector<8x8xf32> -> vector<8x8xf32>
    %164 = arith.addf %162, %163 : vector<8x8xf32>
    %165 = arith.mulf %164, %164 : vector<8x8xf32>
    %166 = vector.shape_cast %165 : vector<8x8xf32> to vector<1x8x8xf32>
    %cst_58 = arith.constant dense<0.000000e+00> : vector<1xf32>
    %167 = vector.multi_reduction <add>, %166, %cst_58 [1, 2] : vector<1x8x8xf32> to vector<1xf32>
    %168 = vector.shape_cast %167 : vector<1xf32> to vector<1x1x1xf32>
    %169 = vector.extract %168[0, 0, 0] : f32 from vector<1x1x1xf32>
    %170 = vector.broadcast %169 : f32 to vector<1x1xf32>
    %171 = math.rsqrt %170 : vector<1x1xf32>
    %172 = vector.broadcast %171 : vector<1x1xf32> to vector<8x8xf32>
    %173 = arith.mulf %164, %172 : vector<8x8xf32>
    %c2_i32 = arith.constant 2 : i32
    %174 = vector.shape_cast %173 : vector<8x8xf32> to vector<8x1x8xf32>
    %175 = vector.shape_cast %120 : vector<8x8xf32> to vector<1x8x8xf32>
    %176 = vector.broadcast %174 : vector<8x1x8xf32> to vector<8x8x8xf32>
    %177 = vector.broadcast %175 : vector<1x8x8xf32> to vector<8x8x8xf32>
    %178 = arith.mulf %176, %177 : vector<8x8x8xf32>
    %cst_59 = arith.constant dense<0xFF800000> : vector<8x8xf32>
    %179 = vector.multi_reduction <maximumf>, %178, %cst_59 [2] : vector<8x8x8xf32> to vector<8x8xf32>
    %180 = arith.mulf %173, %136 : vector<8x8xf32>
    %cst_60 = arith.constant dense<0.000000e+00> : vector<8x8xf32>
    %181 = tpu.matmul %115, %179, %cst_60 {dimension_numbers = #tpu.dot_dimension_numbers<[1], [0], [0], [1], [0, 0, 1, 1], [], []>} : vector<8x8xf32>, vector<8x8xf32>, vector<8x8xf32> -> vector<8x8xf32>
    %182 = arith.addf %180, %181 : vector<8x8xf32>
    %183 = arith.mulf %182, %182 : vector<8x8xf32>
    %184 = vector.shape_cast %183 : vector<8x8xf32> to vector<1x8x8xf32>
    %cst_61 = arith.constant dense<0.000000e+00> : vector<1xf32>
    %185 = vector.multi_reduction <add>, %184, %cst_61 [1, 2] : vector<1x8x8xf32> to vector<1xf32>
    %186 = vector.shape_cast %185 : vector<1xf32> to vector<1x1x1xf32>
    %187 = vector.extract %186[0, 0, 0] : f32 from vector<1x1x1xf32>
    %188 = vector.broadcast %187 : f32 to vector<1x1xf32>
    %189 = math.rsqrt %188 : vector<1x1xf32>
    %190 = vector.broadcast %189 : vector<1x1xf32> to vector<8x8xf32>
    %191 = arith.mulf %182, %190 : vector<8x8xf32>
    %c3_i32 = arith.constant 3 : i32
    %192 = vector.shape_cast %191 : vector<8x8xf32> to vector<8x1x8xf32>
    %193 = vector.shape_cast %120 : vector<8x8xf32> to vector<1x8x8xf32>
    %194 = vector.broadcast %192 : vector<8x1x8xf32> to vector<8x8x8xf32>
    %195 = vector.broadcast %193 : vector<1x8x8xf32> to vector<8x8x8xf32>
    %196 = arith.mulf %194, %195 : vector<8x8x8xf32>
    %cst_62 = arith.constant dense<0xFF800000> : vector<8x8xf32>
    %197 = vector.multi_reduction <maximumf>, %196, %cst_62 [2] : vector<8x8x8xf32> to vector<8x8xf32>
    %198 = arith.mulf %191, %136 : vector<8x8xf32>
    %cst_63 = arith.constant dense<0.000000e+00> : vector<8x8xf32>
    %199 = tpu.matmul %115, %197, %cst_63 {dimension_numbers = #tpu.dot_dimension_numbers<[1], [0], [0], [1], [0, 0, 1, 1], [], []>} : vector<8x8xf32>, vector<8x8xf32>, vector<8x8xf32> -> vector<8x8xf32>
    %200 = arith.addf %198, %199 : vector<8x8xf32>
    %201 = arith.mulf %200, %200 : vector<8x8xf32>
    %202 = vector.shape_cast %201 : vector<8x8xf32> to vector<1x8x8xf32>
    %cst_64 = arith.constant dense<0.000000e+00> : vector<1xf32>
    %203 = vector.multi_reduction <add>, %202, %cst_64 [1, 2] : vector<1x8x8xf32> to vector<1xf32>
    %204 = vector.shape_cast %203 : vector<1xf32> to vector<1x1x1xf32>
    %205 = vector.extract %204[0, 0, 0] : f32 from vector<1x1x1xf32>
    %206 = vector.broadcast %205 : f32 to vector<1x1xf32>
    %207 = math.rsqrt %206 : vector<1x1xf32>
    %208 = vector.broadcast %207 : vector<1x1xf32> to vector<8x8xf32>
    %209 = arith.mulf %200, %208 : vector<8x8xf32>
    %c4_i32 = arith.constant 4 : i32
    %210 = vector.shape_cast %209 : vector<8x8xf32> to vector<8x1x8xf32>
    %211 = vector.shape_cast %120 : vector<8x8xf32> to vector<1x8x8xf32>
    %212 = vector.broadcast %210 : vector<8x1x8xf32> to vector<8x8x8xf32>
    %213 = vector.broadcast %211 : vector<1x8x8xf32> to vector<8x8x8xf32>
    %214 = arith.mulf %212, %213 : vector<8x8x8xf32>
    %cst_65 = arith.constant dense<0xFF800000> : vector<8x8xf32>
    %215 = vector.multi_reduction <maximumf>, %214, %cst_65 [2] : vector<8x8x8xf32> to vector<8x8xf32>
    %216 = arith.mulf %209, %136 : vector<8x8xf32>
    %cst_66 = arith.constant dense<0.000000e+00> : vector<8x8xf32>
    %217 = tpu.matmul %115, %215, %cst_66 {dimension_numbers = #tpu.dot_dimension_numbers<[1], [0], [0], [1], [0, 0, 1, 1], [], []>} : vector<8x8xf32>, vector<8x8xf32>, vector<8x8xf32> -> vector<8x8xf32>
    %218 = arith.addf %216, %217 : vector<8x8xf32>
    %219 = arith.mulf %218, %218 : vector<8x8xf32>
    %220 = vector.shape_cast %219 : vector<8x8xf32> to vector<1x8x8xf32>
    %cst_67 = arith.constant dense<0.000000e+00> : vector<1xf32>
    %221 = vector.multi_reduction <add>, %220, %cst_67 [1, 2] : vector<1x8x8xf32> to vector<1xf32>
    %222 = vector.shape_cast %221 : vector<1xf32> to vector<1x1x1xf32>
    %223 = vector.extract %222[0, 0, 0] : f32 from vector<1x1x1xf32>
    %224 = vector.broadcast %223 : f32 to vector<1x1xf32>
    %225 = math.rsqrt %224 : vector<1x1xf32>
    %226 = vector.broadcast %225 : vector<1x1xf32> to vector<8x8xf32>
    %227 = arith.mulf %218, %226 : vector<8x8xf32>
    %c5_i32 = arith.constant 5 : i32
    %228 = vector.shape_cast %227 : vector<8x8xf32> to vector<8x1x8xf32>
    %229 = vector.shape_cast %120 : vector<8x8xf32> to vector<1x8x8xf32>
    %230 = vector.broadcast %228 : vector<8x1x8xf32> to vector<8x8x8xf32>
    %231 = vector.broadcast %229 : vector<1x8x8xf32> to vector<8x8x8xf32>
    %232 = arith.mulf %230, %231 : vector<8x8x8xf32>
    %cst_68 = arith.constant dense<0xFF800000> : vector<8x8xf32>
    %233 = vector.multi_reduction <maximumf>, %232, %cst_68 [2] : vector<8x8x8xf32> to vector<8x8xf32>
    %234 = arith.mulf %227, %136 : vector<8x8xf32>
    %cst_69 = arith.constant dense<0.000000e+00> : vector<8x8xf32>
    %235 = tpu.matmul %115, %233, %cst_69 {dimension_numbers = #tpu.dot_dimension_numbers<[1], [0], [0], [1], [0, 0, 1, 1], [], []>} : vector<8x8xf32>, vector<8x8xf32>, vector<8x8xf32> -> vector<8x8xf32>
    %236 = arith.addf %234, %235 : vector<8x8xf32>
    %237 = arith.mulf %236, %236 : vector<8x8xf32>
    %238 = vector.shape_cast %237 : vector<8x8xf32> to vector<1x8x8xf32>
    %cst_70 = arith.constant dense<0.000000e+00> : vector<1xf32>
    %239 = vector.multi_reduction <add>, %238, %cst_70 [1, 2] : vector<1x8x8xf32> to vector<1xf32>
    %240 = vector.shape_cast %239 : vector<1xf32> to vector<1x1x1xf32>
    %241 = vector.extract %240[0, 0, 0] : f32 from vector<1x1x1xf32>
    %242 = vector.broadcast %241 : f32 to vector<1x1xf32>
    %243 = math.rsqrt %242 : vector<1x1xf32>
    %244 = vector.broadcast %243 : vector<1x1xf32> to vector<8x8xf32>
    %245 = arith.mulf %236, %244 : vector<8x8xf32>
    %c6_i32 = arith.constant 6 : i32
    %246 = vector.shape_cast %245 : vector<8x8xf32> to vector<8x1x8xf32>
    %247 = vector.shape_cast %120 : vector<8x8xf32> to vector<1x8x8xf32>
    %248 = vector.broadcast %246 : vector<8x1x8xf32> to vector<8x8x8xf32>
    %249 = vector.broadcast %247 : vector<1x8x8xf32> to vector<8x8x8xf32>
    %250 = arith.mulf %248, %249 : vector<8x8x8xf32>
    %cst_71 = arith.constant dense<0xFF800000> : vector<8x8xf32>
    %251 = vector.multi_reduction <maximumf>, %250, %cst_71 [2] : vector<8x8x8xf32> to vector<8x8xf32>
    %252 = arith.mulf %245, %136 : vector<8x8xf32>
    %cst_72 = arith.constant dense<0.000000e+00> : vector<8x8xf32>
    %253 = tpu.matmul %115, %251, %cst_72 {dimension_numbers = #tpu.dot_dimension_numbers<[1], [0], [0], [1], [0, 0, 1, 1], [], []>} : vector<8x8xf32>, vector<8x8xf32>, vector<8x8xf32> -> vector<8x8xf32>
    %254 = arith.addf %252, %253 : vector<8x8xf32>
    %255 = arith.mulf %254, %254 : vector<8x8xf32>
    %256 = vector.shape_cast %255 : vector<8x8xf32> to vector<1x8x8xf32>
    %cst_73 = arith.constant dense<0.000000e+00> : vector<1xf32>
    %257 = vector.multi_reduction <add>, %256, %cst_73 [1, 2] : vector<1x8x8xf32> to vector<1xf32>
    %258 = vector.shape_cast %257 : vector<1xf32> to vector<1x1x1xf32>
    %259 = vector.extract %258[0, 0, 0] : f32 from vector<1x1x1xf32>
    %260 = vector.broadcast %259 : f32 to vector<1x1xf32>
    %261 = math.rsqrt %260 : vector<1x1xf32>
    %262 = vector.broadcast %261 : vector<1x1xf32> to vector<8x8xf32>
    %263 = arith.mulf %254, %262 : vector<8x8xf32>
    %c7_i32 = arith.constant 7 : i32
    %264 = vector.shape_cast %263 : vector<8x8xf32> to vector<8x1x8xf32>
    %265 = vector.shape_cast %120 : vector<8x8xf32> to vector<1x8x8xf32>
    %266 = vector.broadcast %264 : vector<8x1x8xf32> to vector<8x8x8xf32>
    %267 = vector.broadcast %265 : vector<1x8x8xf32> to vector<8x8x8xf32>
    %268 = arith.mulf %266, %267 : vector<8x8x8xf32>
    %cst_74 = arith.constant dense<0xFF800000> : vector<8x8xf32>
    %269 = vector.multi_reduction <maximumf>, %268, %cst_74 [2] : vector<8x8x8xf32> to vector<8x8xf32>
    %270 = arith.mulf %263, %136 : vector<8x8xf32>
    %cst_75 = arith.constant dense<0.000000e+00> : vector<8x8xf32>
    %271 = tpu.matmul %115, %269, %cst_75 {dimension_numbers = #tpu.dot_dimension_numbers<[1], [0], [0], [1], [0, 0, 1, 1], [], []>} : vector<8x8xf32>, vector<8x8xf32>, vector<8x8xf32> -> vector<8x8xf32>
    %272 = arith.addf %270, %271 : vector<8x8xf32>
    %273 = arith.mulf %272, %272 : vector<8x8xf32>
    %274 = vector.shape_cast %273 : vector<8x8xf32> to vector<1x8x8xf32>
    %cst_76 = arith.constant dense<0.000000e+00> : vector<1xf32>
    %275 = vector.multi_reduction <add>, %274, %cst_76 [1, 2] : vector<1x8x8xf32> to vector<1xf32>
    %276 = vector.shape_cast %275 : vector<1xf32> to vector<1x1x1xf32>
    %277 = vector.extract %276[0, 0, 0] : f32 from vector<1x1x1xf32>
    %278 = vector.broadcast %277 : f32 to vector<1x1xf32>
    %279 = math.rsqrt %278 : vector<1x1xf32>
    %280 = vector.broadcast %279 : vector<1x1xf32> to vector<8x8xf32>
    %281 = arith.mulf %272, %280 : vector<8x8xf32>
    %c8_i32 = arith.constant 8 : i32
    %282 = vector.shape_cast %281 : vector<8x8xf32> to vector<8x1x8xf32>
    %283 = vector.shape_cast %120 : vector<8x8xf32> to vector<1x8x8xf32>
    %284 = vector.broadcast %282 : vector<8x1x8xf32> to vector<8x8x8xf32>
    %285 = vector.broadcast %283 : vector<1x8x8xf32> to vector<8x8x8xf32>
    %286 = arith.mulf %284, %285 : vector<8x8x8xf32>
    %cst_77 = arith.constant dense<0xFF800000> : vector<8x8xf32>
    %287 = vector.multi_reduction <maximumf>, %286, %cst_77 [2] : vector<8x8x8xf32> to vector<8x8xf32>
    %288 = arith.mulf %281, %136 : vector<8x8xf32>
    %cst_78 = arith.constant dense<0.000000e+00> : vector<8x8xf32>
    %289 = tpu.matmul %115, %287, %cst_78 {dimension_numbers = #tpu.dot_dimension_numbers<[1], [0], [0], [1], [0, 0, 1, 1], [], []>} : vector<8x8xf32>, vector<8x8xf32>, vector<8x8xf32> -> vector<8x8xf32>
    %290 = arith.addf %288, %289 : vector<8x8xf32>
    %291 = arith.mulf %290, %290 : vector<8x8xf32>
    %292 = vector.shape_cast %291 : vector<8x8xf32> to vector<1x8x8xf32>
    %cst_79 = arith.constant dense<0.000000e+00> : vector<1xf32>
    %293 = vector.multi_reduction <add>, %292, %cst_79 [1, 2] : vector<1x8x8xf32> to vector<1xf32>
    %294 = vector.shape_cast %293 : vector<1xf32> to vector<1x1x1xf32>
    %295 = vector.extract %294[0, 0, 0] : f32 from vector<1x1x1xf32>
    %296 = vector.broadcast %295 : f32 to vector<1x1xf32>
    %297 = math.rsqrt %296 : vector<1x1xf32>
    %298 = vector.broadcast %297 : vector<1x1xf32> to vector<8x8xf32>
    %299 = arith.mulf %290, %298 : vector<8x8xf32>
    %c9_i32 = arith.constant 9 : i32
    %300 = vector.shape_cast %299 : vector<8x8xf32> to vector<8x1x8xf32>
    %301 = vector.shape_cast %120 : vector<8x8xf32> to vector<1x8x8xf32>
    %302 = vector.broadcast %300 : vector<8x1x8xf32> to vector<8x8x8xf32>
    %303 = vector.broadcast %301 : vector<1x8x8xf32> to vector<8x8x8xf32>
    %304 = arith.mulf %302, %303 : vector<8x8x8xf32>
    %cst_80 = arith.constant dense<0xFF800000> : vector<8x8xf32>
    %305 = vector.multi_reduction <maximumf>, %304, %cst_80 [2] : vector<8x8x8xf32> to vector<8x8xf32>
    %306 = arith.mulf %299, %136 : vector<8x8xf32>
    %cst_81 = arith.constant dense<0.000000e+00> : vector<8x8xf32>
    %307 = tpu.matmul %115, %305, %cst_81 {dimension_numbers = #tpu.dot_dimension_numbers<[1], [0], [0], [1], [0, 0, 1, 1], [], []>} : vector<8x8xf32>, vector<8x8xf32>, vector<8x8xf32> -> vector<8x8xf32>
    %308 = arith.addf %306, %307 : vector<8x8xf32>
    %309 = arith.mulf %308, %308 : vector<8x8xf32>
    %310 = vector.shape_cast %309 : vector<8x8xf32> to vector<1x8x8xf32>
    %cst_82 = arith.constant dense<0.000000e+00> : vector<1xf32>
    %311 = vector.multi_reduction <add>, %310, %cst_82 [1, 2] : vector<1x8x8xf32> to vector<1xf32>
    %312 = vector.shape_cast %311 : vector<1xf32> to vector<1x1x1xf32>
    %313 = vector.extract %312[0, 0, 0] : f32 from vector<1x1x1xf32>
    %314 = vector.broadcast %313 : f32 to vector<1x1xf32>
    %315 = math.rsqrt %314 : vector<1x1xf32>
    %316 = vector.broadcast %315 : vector<1x1xf32> to vector<8x8xf32>
    %317 = arith.mulf %308, %316 : vector<8x8xf32>
    %c10_i32 = arith.constant 10 : i32
    %318 = vector.shape_cast %317 : vector<8x8xf32> to vector<8x1x8xf32>
    %319 = vector.shape_cast %120 : vector<8x8xf32> to vector<1x8x8xf32>
    %320 = vector.broadcast %318 : vector<8x1x8xf32> to vector<8x8x8xf32>
    %321 = vector.broadcast %319 : vector<1x8x8xf32> to vector<8x8x8xf32>
    %322 = arith.mulf %320, %321 : vector<8x8x8xf32>
    %cst_83 = arith.constant dense<0xFF800000> : vector<8x8xf32>
    %323 = vector.multi_reduction <maximumf>, %322, %cst_83 [2] : vector<8x8x8xf32> to vector<8x8xf32>
    %324 = arith.mulf %317, %136 : vector<8x8xf32>
    %cst_84 = arith.constant dense<0.000000e+00> : vector<8x8xf32>
    %325 = tpu.matmul %115, %323, %cst_84 {dimension_numbers = #tpu.dot_dimension_numbers<[1], [0], [0], [1], [0, 0, 1, 1], [], []>} : vector<8x8xf32>, vector<8x8xf32>, vector<8x8xf32> -> vector<8x8xf32>
    %326 = arith.addf %324, %325 : vector<8x8xf32>
    %327 = arith.mulf %326, %326 : vector<8x8xf32>
    %328 = vector.shape_cast %327 : vector<8x8xf32> to vector<1x8x8xf32>
    %cst_85 = arith.constant dense<0.000000e+00> : vector<1xf32>
    %329 = vector.multi_reduction <add>, %328, %cst_85 [1, 2] : vector<1x8x8xf32> to vector<1xf32>
    %330 = vector.shape_cast %329 : vector<1xf32> to vector<1x1x1xf32>
    %331 = vector.extract %330[0, 0, 0] : f32 from vector<1x1x1xf32>
    %332 = vector.broadcast %331 : f32 to vector<1x1xf32>
    %333 = math.rsqrt %332 : vector<1x1xf32>
    %334 = vector.broadcast %333 : vector<1x1xf32> to vector<8x8xf32>
    %335 = arith.mulf %326, %334 : vector<8x8xf32>
    %c11_i32 = arith.constant 11 : i32
    %336 = vector.shape_cast %335 : vector<8x8xf32> to vector<8x1x8xf32>
    %337 = vector.shape_cast %120 : vector<8x8xf32> to vector<1x8x8xf32>
    %338 = vector.broadcast %336 : vector<8x1x8xf32> to vector<8x8x8xf32>
    %339 = vector.broadcast %337 : vector<1x8x8xf32> to vector<8x8x8xf32>
    %340 = arith.mulf %338, %339 : vector<8x8x8xf32>
    %cst_86 = arith.constant dense<0xFF800000> : vector<8x8xf32>
    %341 = vector.multi_reduction <maximumf>, %340, %cst_86 [2] : vector<8x8x8xf32> to vector<8x8xf32>
    %342 = arith.mulf %335, %136 : vector<8x8xf32>
    %cst_87 = arith.constant dense<0.000000e+00> : vector<8x8xf32>
    %343 = tpu.matmul %115, %341, %cst_87 {dimension_numbers = #tpu.dot_dimension_numbers<[1], [0], [0], [1], [0, 0, 1, 1], [], []>} : vector<8x8xf32>, vector<8x8xf32>, vector<8x8xf32> -> vector<8x8xf32>
    %344 = arith.addf %342, %343 : vector<8x8xf32>
    %345 = arith.mulf %344, %344 : vector<8x8xf32>
    %346 = vector.shape_cast %345 : vector<8x8xf32> to vector<1x8x8xf32>
    %cst_88 = arith.constant dense<0.000000e+00> : vector<1xf32>
    %347 = vector.multi_reduction <add>, %346, %cst_88 [1, 2] : vector<1x8x8xf32> to vector<1xf32>
    %348 = vector.shape_cast %347 : vector<1xf32> to vector<1x1x1xf32>
    %349 = vector.extract %348[0, 0, 0] : f32 from vector<1x1x1xf32>
    %350 = vector.broadcast %349 : f32 to vector<1x1xf32>
    %351 = math.rsqrt %350 : vector<1x1xf32>
    %352 = vector.broadcast %351 : vector<1x1xf32> to vector<8x8xf32>
    %353 = arith.mulf %344, %352 : vector<8x8xf32>
    %c12_i32 = arith.constant 12 : i32
    %354 = vector.shape_cast %353 : vector<8x8xf32> to vector<8x1x8xf32>
    %355 = vector.shape_cast %120 : vector<8x8xf32> to vector<1x8x8xf32>
    %356 = vector.broadcast %354 : vector<8x1x8xf32> to vector<8x8x8xf32>
    %357 = vector.broadcast %355 : vector<1x8x8xf32> to vector<8x8x8xf32>
    %358 = arith.mulf %356, %357 : vector<8x8x8xf32>
    %cst_89 = arith.constant dense<0xFF800000> : vector<8x8xf32>
    %359 = vector.multi_reduction <maximumf>, %358, %cst_89 [2] : vector<8x8x8xf32> to vector<8x8xf32>
    %360 = arith.mulf %353, %136 : vector<8x8xf32>
    %cst_90 = arith.constant dense<0.000000e+00> : vector<8x8xf32>
    %361 = tpu.matmul %115, %359, %cst_90 {dimension_numbers = #tpu.dot_dimension_numbers<[1], [0], [0], [1], [0, 0, 1, 1], [], []>} : vector<8x8xf32>, vector<8x8xf32>, vector<8x8xf32> -> vector<8x8xf32>
    %362 = arith.addf %360, %361 : vector<8x8xf32>
    %363 = arith.mulf %362, %362 : vector<8x8xf32>
    %364 = vector.shape_cast %363 : vector<8x8xf32> to vector<1x8x8xf32>
    %cst_91 = arith.constant dense<0.000000e+00> : vector<1xf32>
    %365 = vector.multi_reduction <add>, %364, %cst_91 [1, 2] : vector<1x8x8xf32> to vector<1xf32>
    %366 = vector.shape_cast %365 : vector<1xf32> to vector<1x1x1xf32>
    %367 = vector.extract %366[0, 0, 0] : f32 from vector<1x1x1xf32>
    %368 = vector.broadcast %367 : f32 to vector<1x1xf32>
    %369 = math.rsqrt %368 : vector<1x1xf32>
    %370 = vector.broadcast %369 : vector<1x1xf32> to vector<8x8xf32>
    %371 = arith.mulf %362, %370 : vector<8x8xf32>
    %c13_i32 = arith.constant 13 : i32
    %372 = vector.shape_cast %371 : vector<8x8xf32> to vector<8x1x8xf32>
    %373 = vector.shape_cast %120 : vector<8x8xf32> to vector<1x8x8xf32>
    %374 = vector.broadcast %372 : vector<8x1x8xf32> to vector<8x8x8xf32>
    %375 = vector.broadcast %373 : vector<1x8x8xf32> to vector<8x8x8xf32>
    %376 = arith.mulf %374, %375 : vector<8x8x8xf32>
    %cst_92 = arith.constant dense<0xFF800000> : vector<8x8xf32>
    %377 = vector.multi_reduction <maximumf>, %376, %cst_92 [2] : vector<8x8x8xf32> to vector<8x8xf32>
    %378 = arith.mulf %371, %136 : vector<8x8xf32>
    %cst_93 = arith.constant dense<0.000000e+00> : vector<8x8xf32>
    %379 = tpu.matmul %115, %377, %cst_93 {dimension_numbers = #tpu.dot_dimension_numbers<[1], [0], [0], [1], [0, 0, 1, 1], [], []>} : vector<8x8xf32>, vector<8x8xf32>, vector<8x8xf32> -> vector<8x8xf32>
    %380 = arith.addf %378, %379 : vector<8x8xf32>
    %381 = arith.mulf %380, %380 : vector<8x8xf32>
    %382 = vector.shape_cast %381 : vector<8x8xf32> to vector<1x8x8xf32>
    %cst_94 = arith.constant dense<0.000000e+00> : vector<1xf32>
    %383 = vector.multi_reduction <add>, %382, %cst_94 [1, 2] : vector<1x8x8xf32> to vector<1xf32>
    %384 = vector.shape_cast %383 : vector<1xf32> to vector<1x1x1xf32>
    %385 = vector.extract %384[0, 0, 0] : f32 from vector<1x1x1xf32>
    %386 = vector.broadcast %385 : f32 to vector<1x1xf32>
    %387 = math.rsqrt %386 : vector<1x1xf32>
    %388 = vector.broadcast %387 : vector<1x1xf32> to vector<8x8xf32>
    %389 = arith.mulf %380, %388 : vector<8x8xf32>
    %c14_i32 = arith.constant 14 : i32
    %390 = vector.shape_cast %389 : vector<8x8xf32> to vector<8x1x8xf32>
    %391 = vector.shape_cast %120 : vector<8x8xf32> to vector<1x8x8xf32>
    %392 = vector.broadcast %390 : vector<8x1x8xf32> to vector<8x8x8xf32>
    %393 = vector.broadcast %391 : vector<1x8x8xf32> to vector<8x8x8xf32>
    %394 = arith.mulf %392, %393 : vector<8x8x8xf32>
    %cst_95 = arith.constant dense<0xFF800000> : vector<8x8xf32>
    %395 = vector.multi_reduction <maximumf>, %394, %cst_95 [2] : vector<8x8x8xf32> to vector<8x8xf32>
    %396 = arith.mulf %389, %136 : vector<8x8xf32>
    %cst_96 = arith.constant dense<0.000000e+00> : vector<8x8xf32>
    %397 = tpu.matmul %115, %395, %cst_96 {dimension_numbers = #tpu.dot_dimension_numbers<[1], [0], [0], [1], [0, 0, 1, 1], [], []>} : vector<8x8xf32>, vector<8x8xf32>, vector<8x8xf32> -> vector<8x8xf32>
    %398 = arith.addf %396, %397 : vector<8x8xf32>
    %399 = arith.mulf %398, %398 : vector<8x8xf32>
    %400 = vector.shape_cast %399 : vector<8x8xf32> to vector<1x8x8xf32>
    %cst_97 = arith.constant dense<0.000000e+00> : vector<1xf32>
    %401 = vector.multi_reduction <add>, %400, %cst_97 [1, 2] : vector<1x8x8xf32> to vector<1xf32>
    %402 = vector.shape_cast %401 : vector<1xf32> to vector<1x1x1xf32>
    %403 = vector.extract %402[0, 0, 0] : f32 from vector<1x1x1xf32>
    %404 = vector.broadcast %403 : f32 to vector<1x1xf32>
    %405 = math.rsqrt %404 : vector<1x1xf32>
    %406 = vector.broadcast %405 : vector<1x1xf32> to vector<8x8xf32>
    %407 = arith.mulf %398, %406 : vector<8x8xf32>
    %c15_i32 = arith.constant 15 : i32
    %408 = vector.shape_cast %407 : vector<8x8xf32> to vector<8x1x8xf32>
    %409 = vector.shape_cast %120 : vector<8x8xf32> to vector<1x8x8xf32>
    %410 = vector.broadcast %408 : vector<8x1x8xf32> to vector<8x8x8xf32>
    %411 = vector.broadcast %409 : vector<1x8x8xf32> to vector<8x8x8xf32>
    %412 = arith.mulf %410, %411 : vector<8x8x8xf32>
    %cst_98 = arith.constant dense<0xFF800000> : vector<8x8xf32>
    %413 = vector.multi_reduction <maximumf>, %412, %cst_98 [2] : vector<8x8x8xf32> to vector<8x8xf32>
    %414 = arith.mulf %407, %136 : vector<8x8xf32>
    %cst_99 = arith.constant dense<0.000000e+00> : vector<8x8xf32>
    %415 = tpu.matmul %115, %413, %cst_99 {dimension_numbers = #tpu.dot_dimension_numbers<[1], [0], [0], [1], [0, 0, 1, 1], [], []>} : vector<8x8xf32>, vector<8x8xf32>, vector<8x8xf32> -> vector<8x8xf32>
    %416 = arith.addf %414, %415 : vector<8x8xf32>
    %417 = arith.mulf %416, %416 : vector<8x8xf32>
    %418 = vector.shape_cast %417 : vector<8x8xf32> to vector<1x8x8xf32>
    %cst_100 = arith.constant dense<0.000000e+00> : vector<1xf32>
    %419 = vector.multi_reduction <add>, %418, %cst_100 [1, 2] : vector<1x8x8xf32> to vector<1xf32>
    %420 = vector.shape_cast %419 : vector<1xf32> to vector<1x1x1xf32>
    %421 = vector.extract %420[0, 0, 0] : f32 from vector<1x1x1xf32>
    %422 = vector.broadcast %421 : f32 to vector<1x1xf32>
    %423 = math.rsqrt %422 : vector<1x1xf32>
    %424 = vector.broadcast %423 : vector<1x1xf32> to vector<8x8xf32>
    %425 = arith.mulf %416, %424 : vector<8x8xf32>
    %c16_i32 = arith.constant 16 : i32
    %426 = vector.shape_cast %425 : vector<8x8xf32> to vector<8x1x8xf32>
    %427 = vector.shape_cast %120 : vector<8x8xf32> to vector<1x8x8xf32>
    %428 = vector.broadcast %426 : vector<8x1x8xf32> to vector<8x8x8xf32>
    %429 = vector.broadcast %427 : vector<1x8x8xf32> to vector<8x8x8xf32>
    %430 = arith.mulf %428, %429 : vector<8x8x8xf32>
    %cst_101 = arith.constant dense<0xFF800000> : vector<8x8xf32>
    %431 = vector.multi_reduction <maximumf>, %430, %cst_101 [2] : vector<8x8x8xf32> to vector<8x8xf32>
    %432 = arith.mulf %425, %136 : vector<8x8xf32>
    %cst_102 = arith.constant dense<0.000000e+00> : vector<8x8xf32>
    %433 = tpu.matmul %115, %431, %cst_102 {dimension_numbers = #tpu.dot_dimension_numbers<[1], [0], [0], [1], [0, 0, 1, 1], [], []>} : vector<8x8xf32>, vector<8x8xf32>, vector<8x8xf32> -> vector<8x8xf32>
    %434 = arith.addf %432, %433 : vector<8x8xf32>
    %435 = arith.mulf %434, %434 : vector<8x8xf32>
    %436 = vector.shape_cast %435 : vector<8x8xf32> to vector<1x8x8xf32>
    %cst_103 = arith.constant dense<0.000000e+00> : vector<1xf32>
    %437 = vector.multi_reduction <add>, %436, %cst_103 [1, 2] : vector<1x8x8xf32> to vector<1xf32>
    %438 = vector.shape_cast %437 : vector<1xf32> to vector<1x1x1xf32>
    %439 = vector.extract %438[0, 0, 0] : f32 from vector<1x1x1xf32>
    %440 = vector.broadcast %439 : f32 to vector<1x1xf32>
    %441 = math.rsqrt %440 : vector<1x1xf32>
    %442 = vector.broadcast %441 : vector<1x1xf32> to vector<8x8xf32>
    %443 = arith.mulf %434, %442 : vector<8x8xf32>
    %c17_i32 = arith.constant 17 : i32
    %444 = vector.shape_cast %443 : vector<8x8xf32> to vector<8x1x8xf32>
    %445 = vector.shape_cast %120 : vector<8x8xf32> to vector<1x8x8xf32>
    %446 = vector.broadcast %444 : vector<8x1x8xf32> to vector<8x8x8xf32>
    %447 = vector.broadcast %445 : vector<1x8x8xf32> to vector<8x8x8xf32>
    %448 = arith.mulf %446, %447 : vector<8x8x8xf32>
    %cst_104 = arith.constant dense<0xFF800000> : vector<8x8xf32>
    %449 = vector.multi_reduction <maximumf>, %448, %cst_104 [2] : vector<8x8x8xf32> to vector<8x8xf32>
    %450 = arith.mulf %443, %136 : vector<8x8xf32>
    %cst_105 = arith.constant dense<0.000000e+00> : vector<8x8xf32>
    %451 = tpu.matmul %115, %449, %cst_105 {dimension_numbers = #tpu.dot_dimension_numbers<[1], [0], [0], [1], [0, 0, 1, 1], [], []>} : vector<8x8xf32>, vector<8x8xf32>, vector<8x8xf32> -> vector<8x8xf32>
    %452 = arith.addf %450, %451 : vector<8x8xf32>
    %453 = arith.mulf %452, %452 : vector<8x8xf32>
    %454 = vector.shape_cast %453 : vector<8x8xf32> to vector<1x8x8xf32>
    %cst_106 = arith.constant dense<0.000000e+00> : vector<1xf32>
    %455 = vector.multi_reduction <add>, %454, %cst_106 [1, 2] : vector<1x8x8xf32> to vector<1xf32>
    %456 = vector.shape_cast %455 : vector<1xf32> to vector<1x1x1xf32>
    %457 = vector.extract %456[0, 0, 0] : f32 from vector<1x1x1xf32>
    %458 = vector.broadcast %457 : f32 to vector<1x1xf32>
    %459 = math.rsqrt %458 : vector<1x1xf32>
    %460 = vector.broadcast %459 : vector<1x1xf32> to vector<8x8xf32>
    %461 = arith.mulf %452, %460 : vector<8x8xf32>
    %c18_i32 = arith.constant 18 : i32
    %462 = vector.shape_cast %461 : vector<8x8xf32> to vector<8x1x8xf32>
    %463 = vector.shape_cast %120 : vector<8x8xf32> to vector<1x8x8xf32>
    %464 = vector.broadcast %462 : vector<8x1x8xf32> to vector<8x8x8xf32>
    %465 = vector.broadcast %463 : vector<1x8x8xf32> to vector<8x8x8xf32>
    %466 = arith.mulf %464, %465 : vector<8x8x8xf32>
    %cst_107 = arith.constant dense<0xFF800000> : vector<8x8xf32>
    %467 = vector.multi_reduction <maximumf>, %466, %cst_107 [2] : vector<8x8x8xf32> to vector<8x8xf32>
    %468 = arith.mulf %461, %136 : vector<8x8xf32>
    %cst_108 = arith.constant dense<0.000000e+00> : vector<8x8xf32>
    %469 = tpu.matmul %115, %467, %cst_108 {dimension_numbers = #tpu.dot_dimension_numbers<[1], [0], [0], [1], [0, 0, 1, 1], [], []>} : vector<8x8xf32>, vector<8x8xf32>, vector<8x8xf32> -> vector<8x8xf32>
    %470 = arith.addf %468, %469 : vector<8x8xf32>
    %471 = arith.mulf %470, %470 : vector<8x8xf32>
    %472 = vector.shape_cast %471 : vector<8x8xf32> to vector<1x8x8xf32>
    %cst_109 = arith.constant dense<0.000000e+00> : vector<1xf32>
    %473 = vector.multi_reduction <add>, %472, %cst_109 [1, 2] : vector<1x8x8xf32> to vector<1xf32>
    %474 = vector.shape_cast %473 : vector<1xf32> to vector<1x1x1xf32>
    %475 = vector.extract %474[0, 0, 0] : f32 from vector<1x1x1xf32>
    %476 = vector.broadcast %475 : f32 to vector<1x1xf32>
    %477 = math.rsqrt %476 : vector<1x1xf32>
    %478 = vector.broadcast %477 : vector<1x1xf32> to vector<8x8xf32>
    %479 = arith.mulf %470, %478 : vector<8x8xf32>
    %c19_i32 = arith.constant 19 : i32
    %480 = vector.shape_cast %479 : vector<8x8xf32> to vector<8x1x8xf32>
    %481 = vector.shape_cast %120 : vector<8x8xf32> to vector<1x8x8xf32>
    %482 = vector.broadcast %480 : vector<8x1x8xf32> to vector<8x8x8xf32>
    %483 = vector.broadcast %481 : vector<1x8x8xf32> to vector<8x8x8xf32>
    %484 = arith.mulf %482, %483 : vector<8x8x8xf32>
    %cst_110 = arith.constant dense<0xFF800000> : vector<8x8xf32>
    %485 = vector.multi_reduction <maximumf>, %484, %cst_110 [2] : vector<8x8x8xf32> to vector<8x8xf32>
    %486 = arith.mulf %479, %136 : vector<8x8xf32>
    %cst_111 = arith.constant dense<0.000000e+00> : vector<8x8xf32>
    %487 = tpu.matmul %115, %485, %cst_111 {dimension_numbers = #tpu.dot_dimension_numbers<[1], [0], [0], [1], [0, 0, 1, 1], [], []>} : vector<8x8xf32>, vector<8x8xf32>, vector<8x8xf32> -> vector<8x8xf32>
    %488 = arith.addf %486, %487 : vector<8x8xf32>
    %489 = arith.mulf %488, %488 : vector<8x8xf32>
    %490 = vector.shape_cast %489 : vector<8x8xf32> to vector<1x8x8xf32>
    %cst_112 = arith.constant dense<0.000000e+00> : vector<1xf32>
    %491 = vector.multi_reduction <add>, %490, %cst_112 [1, 2] : vector<1x8x8xf32> to vector<1xf32>
    %492 = vector.shape_cast %491 : vector<1xf32> to vector<1x1x1xf32>
    %493 = vector.extract %492[0, 0, 0] : f32 from vector<1x1x1xf32>
    %494 = vector.broadcast %493 : f32 to vector<1x1xf32>
    %495 = math.rsqrt %494 : vector<1x1xf32>
    %496 = vector.broadcast %495 : vector<1x1xf32> to vector<8x8xf32>
    %497 = arith.mulf %488, %496 : vector<8x8xf32>
    %c20_i32 = arith.constant 20 : i32
    %498 = vector.shape_cast %497 : vector<8x8xf32> to vector<8x1x8xf32>
    %499 = vector.shape_cast %120 : vector<8x8xf32> to vector<1x8x8xf32>
    %500 = vector.broadcast %498 : vector<8x1x8xf32> to vector<8x8x8xf32>
    %501 = vector.broadcast %499 : vector<1x8x8xf32> to vector<8x8x8xf32>
    %502 = arith.mulf %500, %501 : vector<8x8x8xf32>
    %cst_113 = arith.constant dense<0xFF800000> : vector<8x8xf32>
    %503 = vector.multi_reduction <maximumf>, %502, %cst_113 [2] : vector<8x8x8xf32> to vector<8x8xf32>
    %504 = arith.mulf %497, %136 : vector<8x8xf32>
    %cst_114 = arith.constant dense<0.000000e+00> : vector<8x8xf32>
    %505 = tpu.matmul %115, %503, %cst_114 {dimension_numbers = #tpu.dot_dimension_numbers<[1], [0], [0], [1], [0, 0, 1, 1], [], []>} : vector<8x8xf32>, vector<8x8xf32>, vector<8x8xf32> -> vector<8x8xf32>
    %506 = arith.addf %504, %505 : vector<8x8xf32>
    %507 = arith.mulf %506, %506 : vector<8x8xf32>
    %508 = vector.shape_cast %507 : vector<8x8xf32> to vector<1x8x8xf32>
    %cst_115 = arith.constant dense<0.000000e+00> : vector<1xf32>
    %509 = vector.multi_reduction <add>, %508, %cst_115 [1, 2] : vector<1x8x8xf32> to vector<1xf32>
    %510 = vector.shape_cast %509 : vector<1xf32> to vector<1x1x1xf32>
    %511 = vector.extract %510[0, 0, 0] : f32 from vector<1x1x1xf32>
    %512 = vector.broadcast %511 : f32 to vector<1x1xf32>
    %513 = math.rsqrt %512 : vector<1x1xf32>
    %514 = vector.broadcast %513 : vector<1x1xf32> to vector<8x8xf32>
    %515 = arith.mulf %506, %514 : vector<8x8xf32>
    %c21_i32 = arith.constant 21 : i32
    %516 = vector.shape_cast %515 : vector<8x8xf32> to vector<8x1x8xf32>
    %517 = vector.shape_cast %120 : vector<8x8xf32> to vector<1x8x8xf32>
    %518 = vector.broadcast %516 : vector<8x1x8xf32> to vector<8x8x8xf32>
    %519 = vector.broadcast %517 : vector<1x8x8xf32> to vector<8x8x8xf32>
    %520 = arith.mulf %518, %519 : vector<8x8x8xf32>
    %cst_116 = arith.constant dense<0xFF800000> : vector<8x8xf32>
    %521 = vector.multi_reduction <maximumf>, %520, %cst_116 [2] : vector<8x8x8xf32> to vector<8x8xf32>
    %522 = arith.mulf %515, %136 : vector<8x8xf32>
    %cst_117 = arith.constant dense<0.000000e+00> : vector<8x8xf32>
    %523 = tpu.matmul %115, %521, %cst_117 {dimension_numbers = #tpu.dot_dimension_numbers<[1], [0], [0], [1], [0, 0, 1, 1], [], []>} : vector<8x8xf32>, vector<8x8xf32>, vector<8x8xf32> -> vector<8x8xf32>
    %524 = arith.addf %522, %523 : vector<8x8xf32>
    %525 = arith.mulf %524, %524 : vector<8x8xf32>
    %526 = vector.shape_cast %525 : vector<8x8xf32> to vector<1x8x8xf32>
    %cst_118 = arith.constant dense<0.000000e+00> : vector<1xf32>
    %527 = vector.multi_reduction <add>, %526, %cst_118 [1, 2] : vector<1x8x8xf32> to vector<1xf32>
    %528 = vector.shape_cast %527 : vector<1xf32> to vector<1x1x1xf32>
    %529 = vector.extract %528[0, 0, 0] : f32 from vector<1x1x1xf32>
    %530 = vector.broadcast %529 : f32 to vector<1x1xf32>
    %531 = math.rsqrt %530 : vector<1x1xf32>
    %532 = vector.broadcast %531 : vector<1x1xf32> to vector<8x8xf32>
    %533 = arith.mulf %524, %532 : vector<8x8xf32>
    %c22_i32 = arith.constant 22 : i32
    %534 = vector.shape_cast %533 : vector<8x8xf32> to vector<8x1x8xf32>
    %535 = vector.shape_cast %120 : vector<8x8xf32> to vector<1x8x8xf32>
    %536 = vector.broadcast %534 : vector<8x1x8xf32> to vector<8x8x8xf32>
    %537 = vector.broadcast %535 : vector<1x8x8xf32> to vector<8x8x8xf32>
    %538 = arith.mulf %536, %537 : vector<8x8x8xf32>
    %cst_119 = arith.constant dense<0xFF800000> : vector<8x8xf32>
    %539 = vector.multi_reduction <maximumf>, %538, %cst_119 [2] : vector<8x8x8xf32> to vector<8x8xf32>
    %540 = arith.mulf %533, %136 : vector<8x8xf32>
    %cst_120 = arith.constant dense<0.000000e+00> : vector<8x8xf32>
    %541 = tpu.matmul %115, %539, %cst_120 {dimension_numbers = #tpu.dot_dimension_numbers<[1], [0], [0], [1], [0, 0, 1, 1], [], []>} : vector<8x8xf32>, vector<8x8xf32>, vector<8x8xf32> -> vector<8x8xf32>
    %542 = arith.addf %540, %541 : vector<8x8xf32>
    %543 = arith.mulf %542, %542 : vector<8x8xf32>
    %544 = vector.shape_cast %543 : vector<8x8xf32> to vector<1x8x8xf32>
    %cst_121 = arith.constant dense<0.000000e+00> : vector<1xf32>
    %545 = vector.multi_reduction <add>, %544, %cst_121 [1, 2] : vector<1x8x8xf32> to vector<1xf32>
    %546 = vector.shape_cast %545 : vector<1xf32> to vector<1x1x1xf32>
    %547 = vector.extract %546[0, 0, 0] : f32 from vector<1x1x1xf32>
    %548 = vector.broadcast %547 : f32 to vector<1x1xf32>
    %549 = math.rsqrt %548 : vector<1x1xf32>
    %550 = vector.broadcast %549 : vector<1x1xf32> to vector<8x8xf32>
    %551 = arith.mulf %542, %550 : vector<8x8xf32>
    %c23_i32 = arith.constant 23 : i32
    %552 = vector.shape_cast %551 : vector<8x8xf32> to vector<8x1x8xf32>
    %553 = vector.shape_cast %120 : vector<8x8xf32> to vector<1x8x8xf32>
    %554 = vector.broadcast %552 : vector<8x1x8xf32> to vector<8x8x8xf32>
    %555 = vector.broadcast %553 : vector<1x8x8xf32> to vector<8x8x8xf32>
    %556 = arith.mulf %554, %555 : vector<8x8x8xf32>
    %cst_122 = arith.constant dense<0xFF800000> : vector<8x8xf32>
    %557 = vector.multi_reduction <maximumf>, %556, %cst_122 [2] : vector<8x8x8xf32> to vector<8x8xf32>
    %558 = arith.mulf %551, %136 : vector<8x8xf32>
    %cst_123 = arith.constant dense<0.000000e+00> : vector<8x8xf32>
    %559 = tpu.matmul %115, %557, %cst_123 {dimension_numbers = #tpu.dot_dimension_numbers<[1], [0], [0], [1], [0, 0, 1, 1], [], []>} : vector<8x8xf32>, vector<8x8xf32>, vector<8x8xf32> -> vector<8x8xf32>
    %560 = arith.addf %558, %559 : vector<8x8xf32>
    %561 = arith.mulf %560, %560 : vector<8x8xf32>
    %562 = vector.shape_cast %561 : vector<8x8xf32> to vector<1x8x8xf32>
    %cst_124 = arith.constant dense<0.000000e+00> : vector<1xf32>
    %563 = vector.multi_reduction <add>, %562, %cst_124 [1, 2] : vector<1x8x8xf32> to vector<1xf32>
    %564 = vector.shape_cast %563 : vector<1xf32> to vector<1x1x1xf32>
    %565 = vector.extract %564[0, 0, 0] : f32 from vector<1x1x1xf32>
    %566 = vector.broadcast %565 : f32 to vector<1x1xf32>
    %567 = math.rsqrt %566 : vector<1x1xf32>
    %568 = vector.broadcast %567 : vector<1x1xf32> to vector<8x8xf32>
    %569 = arith.mulf %560, %568 : vector<8x8xf32>
    %c24_i32 = arith.constant 24 : i32
    %570 = vector.shape_cast %569 : vector<8x8xf32> to vector<8x1x8xf32>
    %571 = vector.shape_cast %120 : vector<8x8xf32> to vector<1x8x8xf32>
    %572 = vector.broadcast %570 : vector<8x1x8xf32> to vector<8x8x8xf32>
    %573 = vector.broadcast %571 : vector<1x8x8xf32> to vector<8x8x8xf32>
    %574 = arith.mulf %572, %573 : vector<8x8x8xf32>
    %cst_125 = arith.constant dense<0xFF800000> : vector<8x8xf32>
    %575 = vector.multi_reduction <maximumf>, %574, %cst_125 [2] : vector<8x8x8xf32> to vector<8x8xf32>
    %576 = arith.mulf %569, %136 : vector<8x8xf32>
    %cst_126 = arith.constant dense<0.000000e+00> : vector<8x8xf32>
    %577 = tpu.matmul %115, %575, %cst_126 {dimension_numbers = #tpu.dot_dimension_numbers<[1], [0], [0], [1], [0, 0, 1, 1], [], []>} : vector<8x8xf32>, vector<8x8xf32>, vector<8x8xf32> -> vector<8x8xf32>
    %578 = arith.addf %576, %577 : vector<8x8xf32>
    %579 = arith.mulf %578, %578 : vector<8x8xf32>
    %580 = vector.shape_cast %579 : vector<8x8xf32> to vector<1x8x8xf32>
    %cst_127 = arith.constant dense<0.000000e+00> : vector<1xf32>
    %581 = vector.multi_reduction <add>, %580, %cst_127 [1, 2] : vector<1x8x8xf32> to vector<1xf32>
    %582 = vector.shape_cast %581 : vector<1xf32> to vector<1x1x1xf32>
    %583 = vector.extract %582[0, 0, 0] : f32 from vector<1x1x1xf32>
    %584 = vector.broadcast %583 : f32 to vector<1x1xf32>
    %585 = math.rsqrt %584 : vector<1x1xf32>
    %586 = vector.broadcast %585 : vector<1x1xf32> to vector<8x8xf32>
    %587 = arith.mulf %578, %586 : vector<8x8xf32>
    %c25_i32 = arith.constant 25 : i32
    %588 = vector.shape_cast %587 : vector<8x8xf32> to vector<8x1x8xf32>
    %589 = vector.shape_cast %120 : vector<8x8xf32> to vector<1x8x8xf32>
    %590 = vector.broadcast %588 : vector<8x1x8xf32> to vector<8x8x8xf32>
    %591 = vector.broadcast %589 : vector<1x8x8xf32> to vector<8x8x8xf32>
    %592 = arith.mulf %590, %591 : vector<8x8x8xf32>
    %cst_128 = arith.constant dense<0xFF800000> : vector<8x8xf32>
    %593 = vector.multi_reduction <maximumf>, %592, %cst_128 [2] : vector<8x8x8xf32> to vector<8x8xf32>
    %594 = arith.mulf %587, %136 : vector<8x8xf32>
    %cst_129 = arith.constant dense<0.000000e+00> : vector<8x8xf32>
    %595 = tpu.matmul %115, %593, %cst_129 {dimension_numbers = #tpu.dot_dimension_numbers<[1], [0], [0], [1], [0, 0, 1, 1], [], []>} : vector<8x8xf32>, vector<8x8xf32>, vector<8x8xf32> -> vector<8x8xf32>
    %596 = arith.addf %594, %595 : vector<8x8xf32>
    %597 = arith.mulf %596, %596 : vector<8x8xf32>
    %598 = vector.shape_cast %597 : vector<8x8xf32> to vector<1x8x8xf32>
    %cst_130 = arith.constant dense<0.000000e+00> : vector<1xf32>
    %599 = vector.multi_reduction <add>, %598, %cst_130 [1, 2] : vector<1x8x8xf32> to vector<1xf32>
    %600 = vector.shape_cast %599 : vector<1xf32> to vector<1x1x1xf32>
    %601 = vector.extract %600[0, 0, 0] : f32 from vector<1x1x1xf32>
    %602 = vector.broadcast %601 : f32 to vector<1x1xf32>
    %603 = math.rsqrt %602 : vector<1x1xf32>
    %604 = vector.broadcast %603 : vector<1x1xf32> to vector<8x8xf32>
    %605 = arith.mulf %596, %604 : vector<8x8xf32>
    %c26_i32 = arith.constant 26 : i32
    %606 = vector.shape_cast %605 : vector<8x8xf32> to vector<8x1x8xf32>
    %607 = vector.shape_cast %120 : vector<8x8xf32> to vector<1x8x8xf32>
    %608 = vector.broadcast %606 : vector<8x1x8xf32> to vector<8x8x8xf32>
    %609 = vector.broadcast %607 : vector<1x8x8xf32> to vector<8x8x8xf32>
    %610 = arith.mulf %608, %609 : vector<8x8x8xf32>
    %cst_131 = arith.constant dense<0xFF800000> : vector<8x8xf32>
    %611 = vector.multi_reduction <maximumf>, %610, %cst_131 [2] : vector<8x8x8xf32> to vector<8x8xf32>
    %612 = arith.mulf %605, %136 : vector<8x8xf32>
    %cst_132 = arith.constant dense<0.000000e+00> : vector<8x8xf32>
    %613 = tpu.matmul %115, %611, %cst_132 {dimension_numbers = #tpu.dot_dimension_numbers<[1], [0], [0], [1], [0, 0, 1, 1], [], []>} : vector<8x8xf32>, vector<8x8xf32>, vector<8x8xf32> -> vector<8x8xf32>
    %614 = arith.addf %612, %613 : vector<8x8xf32>
    %615 = arith.mulf %614, %614 : vector<8x8xf32>
    %616 = vector.shape_cast %615 : vector<8x8xf32> to vector<1x8x8xf32>
    %cst_133 = arith.constant dense<0.000000e+00> : vector<1xf32>
    %617 = vector.multi_reduction <add>, %616, %cst_133 [1, 2] : vector<1x8x8xf32> to vector<1xf32>
    %618 = vector.shape_cast %617 : vector<1xf32> to vector<1x1x1xf32>
    %619 = vector.extract %618[0, 0, 0] : f32 from vector<1x1x1xf32>
    %620 = vector.broadcast %619 : f32 to vector<1x1xf32>
    %621 = math.rsqrt %620 : vector<1x1xf32>
    %622 = vector.broadcast %621 : vector<1x1xf32> to vector<8x8xf32>
    %623 = arith.mulf %614, %622 : vector<8x8xf32>
    %c27_i32 = arith.constant 27 : i32
    %624 = vector.shape_cast %623 : vector<8x8xf32> to vector<8x1x8xf32>
    %625 = vector.shape_cast %120 : vector<8x8xf32> to vector<1x8x8xf32>
    %626 = vector.broadcast %624 : vector<8x1x8xf32> to vector<8x8x8xf32>
    %627 = vector.broadcast %625 : vector<1x8x8xf32> to vector<8x8x8xf32>
    %628 = arith.mulf %626, %627 : vector<8x8x8xf32>
    %cst_134 = arith.constant dense<0xFF800000> : vector<8x8xf32>
    %629 = vector.multi_reduction <maximumf>, %628, %cst_134 [2] : vector<8x8x8xf32> to vector<8x8xf32>
    %630 = arith.mulf %623, %136 : vector<8x8xf32>
    %cst_135 = arith.constant dense<0.000000e+00> : vector<8x8xf32>
    %631 = tpu.matmul %115, %629, %cst_135 {dimension_numbers = #tpu.dot_dimension_numbers<[1], [0], [0], [1], [0, 0, 1, 1], [], []>} : vector<8x8xf32>, vector<8x8xf32>, vector<8x8xf32> -> vector<8x8xf32>
    %632 = arith.addf %630, %631 : vector<8x8xf32>
    %633 = arith.mulf %632, %632 : vector<8x8xf32>
    %634 = vector.shape_cast %633 : vector<8x8xf32> to vector<1x8x8xf32>
    %cst_136 = arith.constant dense<0.000000e+00> : vector<1xf32>
    %635 = vector.multi_reduction <add>, %634, %cst_136 [1, 2] : vector<1x8x8xf32> to vector<1xf32>
    %636 = vector.shape_cast %635 : vector<1xf32> to vector<1x1x1xf32>
    %637 = vector.extract %636[0, 0, 0] : f32 from vector<1x1x1xf32>
    %638 = vector.broadcast %637 : f32 to vector<1x1xf32>
    %639 = math.rsqrt %638 : vector<1x1xf32>
    %640 = vector.broadcast %639 : vector<1x1xf32> to vector<8x8xf32>
    %641 = arith.mulf %632, %640 : vector<8x8xf32>
    %c28_i32 = arith.constant 28 : i32
    %642 = vector.shape_cast %641 : vector<8x8xf32> to vector<8x1x8xf32>
    %643 = vector.shape_cast %120 : vector<8x8xf32> to vector<1x8x8xf32>
    %644 = vector.broadcast %642 : vector<8x1x8xf32> to vector<8x8x8xf32>
    %645 = vector.broadcast %643 : vector<1x8x8xf32> to vector<8x8x8xf32>
    %646 = arith.mulf %644, %645 : vector<8x8x8xf32>
    %cst_137 = arith.constant dense<0xFF800000> : vector<8x8xf32>
    %647 = vector.multi_reduction <maximumf>, %646, %cst_137 [2] : vector<8x8x8xf32> to vector<8x8xf32>
    %648 = arith.mulf %641, %136 : vector<8x8xf32>
    %cst_138 = arith.constant dense<0.000000e+00> : vector<8x8xf32>
    %649 = tpu.matmul %115, %647, %cst_138 {dimension_numbers = #tpu.dot_dimension_numbers<[1], [0], [0], [1], [0, 0, 1, 1], [], []>} : vector<8x8xf32>, vector<8x8xf32>, vector<8x8xf32> -> vector<8x8xf32>
    %650 = arith.addf %648, %649 : vector<8x8xf32>
    %651 = arith.mulf %650, %650 : vector<8x8xf32>
    %652 = vector.shape_cast %651 : vector<8x8xf32> to vector<1x8x8xf32>
    %cst_139 = arith.constant dense<0.000000e+00> : vector<1xf32>
    %653 = vector.multi_reduction <add>, %652, %cst_139 [1, 2] : vector<1x8x8xf32> to vector<1xf32>
    %654 = vector.shape_cast %653 : vector<1xf32> to vector<1x1x1xf32>
    %655 = vector.extract %654[0, 0, 0] : f32 from vector<1x1x1xf32>
    %656 = vector.broadcast %655 : f32 to vector<1x1xf32>
    %657 = math.rsqrt %656 : vector<1x1xf32>
    %658 = vector.broadcast %657 : vector<1x1xf32> to vector<8x8xf32>
    %659 = arith.mulf %650, %658 : vector<8x8xf32>
    %c29_i32 = arith.constant 29 : i32
    %660 = vector.shape_cast %659 : vector<8x8xf32> to vector<8x1x8xf32>
    %661 = vector.shape_cast %120 : vector<8x8xf32> to vector<1x8x8xf32>
    %662 = vector.broadcast %660 : vector<8x1x8xf32> to vector<8x8x8xf32>
    %663 = vector.broadcast %661 : vector<1x8x8xf32> to vector<8x8x8xf32>
    %664 = arith.mulf %662, %663 : vector<8x8x8xf32>
    %cst_140 = arith.constant dense<0xFF800000> : vector<8x8xf32>
    %665 = vector.multi_reduction <maximumf>, %664, %cst_140 [2] : vector<8x8x8xf32> to vector<8x8xf32>
    %666 = arith.mulf %659, %136 : vector<8x8xf32>
    %cst_141 = arith.constant dense<0.000000e+00> : vector<8x8xf32>
    %667 = tpu.matmul %115, %665, %cst_141 {dimension_numbers = #tpu.dot_dimension_numbers<[1], [0], [0], [1], [0, 0, 1, 1], [], []>} : vector<8x8xf32>, vector<8x8xf32>, vector<8x8xf32> -> vector<8x8xf32>
    %668 = arith.addf %666, %667 : vector<8x8xf32>
    %669 = arith.mulf %668, %668 : vector<8x8xf32>
    %670 = vector.shape_cast %669 : vector<8x8xf32> to vector<1x8x8xf32>
    %cst_142 = arith.constant dense<0.000000e+00> : vector<1xf32>
    %671 = vector.multi_reduction <add>, %670, %cst_142 [1, 2] : vector<1x8x8xf32> to vector<1xf32>
    %672 = vector.shape_cast %671 : vector<1xf32> to vector<1x1x1xf32>
    %673 = vector.extract %672[0, 0, 0] : f32 from vector<1x1x1xf32>
    %674 = vector.broadcast %673 : f32 to vector<1x1xf32>
    %675 = math.rsqrt %674 : vector<1x1xf32>
    %676 = vector.broadcast %675 : vector<1x1xf32> to vector<8x8xf32>
    %677 = arith.mulf %668, %676 : vector<8x8xf32>
    %c30_i32 = arith.constant 30 : i32
    %678 = vector.shape_cast %677 : vector<8x8xf32> to vector<8x1x8xf32>
    %679 = vector.shape_cast %120 : vector<8x8xf32> to vector<1x8x8xf32>
    %680 = vector.broadcast %678 : vector<8x1x8xf32> to vector<8x8x8xf32>
    %681 = vector.broadcast %679 : vector<1x8x8xf32> to vector<8x8x8xf32>
    %682 = arith.mulf %680, %681 : vector<8x8x8xf32>
    %cst_143 = arith.constant dense<0xFF800000> : vector<8x8xf32>
    %683 = vector.multi_reduction <maximumf>, %682, %cst_143 [2] : vector<8x8x8xf32> to vector<8x8xf32>
    %684 = arith.mulf %677, %136 : vector<8x8xf32>
    %cst_144 = arith.constant dense<0.000000e+00> : vector<8x8xf32>
    %685 = tpu.matmul %115, %683, %cst_144 {dimension_numbers = #tpu.dot_dimension_numbers<[1], [0], [0], [1], [0, 0, 1, 1], [], []>} : vector<8x8xf32>, vector<8x8xf32>, vector<8x8xf32> -> vector<8x8xf32>
    %686 = arith.addf %684, %685 : vector<8x8xf32>
    %687 = arith.mulf %686, %686 : vector<8x8xf32>
    %688 = vector.shape_cast %687 : vector<8x8xf32> to vector<1x8x8xf32>
    %cst_145 = arith.constant dense<0.000000e+00> : vector<1xf32>
    %689 = vector.multi_reduction <add>, %688, %cst_145 [1, 2] : vector<1x8x8xf32> to vector<1xf32>
    %690 = vector.shape_cast %689 : vector<1xf32> to vector<1x1x1xf32>
    %691 = vector.extract %690[0, 0, 0] : f32 from vector<1x1x1xf32>
    %692 = vector.broadcast %691 : f32 to vector<1x1xf32>
    %693 = math.rsqrt %692 : vector<1x1xf32>
    %694 = vector.broadcast %693 : vector<1x1xf32> to vector<8x8xf32>
    %695 = arith.mulf %686, %694 : vector<8x8xf32>
    %c31_i32 = arith.constant 31 : i32
    %696 = vector.shape_cast %695 : vector<8x8xf32> to vector<8x1x8xf32>
    %697 = vector.shape_cast %120 : vector<8x8xf32> to vector<1x8x8xf32>
    %698 = vector.broadcast %696 : vector<8x1x8xf32> to vector<8x8x8xf32>
    %699 = vector.broadcast %697 : vector<1x8x8xf32> to vector<8x8x8xf32>
    %700 = arith.mulf %698, %699 : vector<8x8x8xf32>
    %cst_146 = arith.constant dense<0xFF800000> : vector<8x8xf32>
    %701 = vector.multi_reduction <maximumf>, %700, %cst_146 [2] : vector<8x8x8xf32> to vector<8x8xf32>
    %702 = arith.mulf %695, %136 : vector<8x8xf32>
    %cst_147 = arith.constant dense<0.000000e+00> : vector<8x8xf32>
    %703 = tpu.matmul %115, %701, %cst_147 {dimension_numbers = #tpu.dot_dimension_numbers<[1], [0], [0], [1], [0, 0, 1, 1], [], []>} : vector<8x8xf32>, vector<8x8xf32>, vector<8x8xf32> -> vector<8x8xf32>
    %704 = arith.addf %702, %703 : vector<8x8xf32>
    %705 = arith.mulf %704, %704 : vector<8x8xf32>
    %706 = vector.shape_cast %705 : vector<8x8xf32> to vector<1x8x8xf32>
    %cst_148 = arith.constant dense<0.000000e+00> : vector<1xf32>
    %707 = vector.multi_reduction <add>, %706, %cst_148 [1, 2] : vector<1x8x8xf32> to vector<1xf32>
    %708 = vector.shape_cast %707 : vector<1xf32> to vector<1x1x1xf32>
    %709 = vector.extract %708[0, 0, 0] : f32 from vector<1x1x1xf32>
    %710 = vector.broadcast %709 : f32 to vector<1x1xf32>
    %711 = math.rsqrt %710 : vector<1x1xf32>
    %712 = vector.broadcast %711 : vector<1x1xf32> to vector<8x8xf32>
    %713 = arith.mulf %704, %712 : vector<8x8xf32>
    %c32_i32 = arith.constant 32 : i32
    %714 = vector.shape_cast %713 : vector<8x8xf32> to vector<8x1x8xf32>
    %715 = vector.shape_cast %120 : vector<8x8xf32> to vector<1x8x8xf32>
    %716 = vector.broadcast %714 : vector<8x1x8xf32> to vector<8x8x8xf32>
    %717 = vector.broadcast %715 : vector<1x8x8xf32> to vector<8x8x8xf32>
    %718 = arith.mulf %716, %717 : vector<8x8x8xf32>
    %cst_149 = arith.constant dense<0xFF800000> : vector<8x8xf32>
    %719 = vector.multi_reduction <maximumf>, %718, %cst_149 [2] : vector<8x8x8xf32> to vector<8x8xf32>
    %720 = arith.mulf %713, %136 : vector<8x8xf32>
    %cst_150 = arith.constant dense<0.000000e+00> : vector<8x8xf32>
    %721 = tpu.matmul %115, %719, %cst_150 {dimension_numbers = #tpu.dot_dimension_numbers<[1], [0], [0], [1], [0, 0, 1, 1], [], []>} : vector<8x8xf32>, vector<8x8xf32>, vector<8x8xf32> -> vector<8x8xf32>
    %722 = arith.addf %720, %721 : vector<8x8xf32>
    %723 = arith.mulf %722, %722 : vector<8x8xf32>
    %724 = vector.shape_cast %723 : vector<8x8xf32> to vector<1x8x8xf32>
    %cst_151 = arith.constant dense<0.000000e+00> : vector<1xf32>
    %725 = vector.multi_reduction <add>, %724, %cst_151 [1, 2] : vector<1x8x8xf32> to vector<1xf32>
    %726 = vector.shape_cast %725 : vector<1xf32> to vector<1x1x1xf32>
    %727 = vector.extract %726[0, 0, 0] : f32 from vector<1x1x1xf32>
    %728 = vector.broadcast %727 : f32 to vector<1x1xf32>
    %729 = math.rsqrt %728 : vector<1x1xf32>
    %730 = vector.broadcast %729 : vector<1x1xf32> to vector<8x8xf32>
    %731 = arith.mulf %722, %730 : vector<8x8xf32>
    %c33_i32 = arith.constant 33 : i32
    %732 = vector.shape_cast %731 : vector<8x8xf32> to vector<8x1x8xf32>
    %733 = vector.shape_cast %120 : vector<8x8xf32> to vector<1x8x8xf32>
    %734 = vector.broadcast %732 : vector<8x1x8xf32> to vector<8x8x8xf32>
    %735 = vector.broadcast %733 : vector<1x8x8xf32> to vector<8x8x8xf32>
    %736 = arith.mulf %734, %735 : vector<8x8x8xf32>
    %cst_152 = arith.constant dense<0xFF800000> : vector<8x8xf32>
    %737 = vector.multi_reduction <maximumf>, %736, %cst_152 [2] : vector<8x8x8xf32> to vector<8x8xf32>
    %738 = arith.mulf %731, %136 : vector<8x8xf32>
    %cst_153 = arith.constant dense<0.000000e+00> : vector<8x8xf32>
    %739 = tpu.matmul %115, %737, %cst_153 {dimension_numbers = #tpu.dot_dimension_numbers<[1], [0], [0], [1], [0, 0, 1, 1], [], []>} : vector<8x8xf32>, vector<8x8xf32>, vector<8x8xf32> -> vector<8x8xf32>
    %740 = arith.addf %738, %739 : vector<8x8xf32>
    %741 = arith.mulf %740, %740 : vector<8x8xf32>
    %742 = vector.shape_cast %741 : vector<8x8xf32> to vector<1x8x8xf32>
    %cst_154 = arith.constant dense<0.000000e+00> : vector<1xf32>
    %743 = vector.multi_reduction <add>, %742, %cst_154 [1, 2] : vector<1x8x8xf32> to vector<1xf32>
    %744 = vector.shape_cast %743 : vector<1xf32> to vector<1x1x1xf32>
    %745 = vector.extract %744[0, 0, 0] : f32 from vector<1x1x1xf32>
    %746 = vector.broadcast %745 : f32 to vector<1x1xf32>
    %747 = math.rsqrt %746 : vector<1x1xf32>
    %748 = vector.broadcast %747 : vector<1x1xf32> to vector<8x8xf32>
    %749 = arith.mulf %740, %748 : vector<8x8xf32>
    %c34_i32 = arith.constant 34 : i32
    %750 = vector.shape_cast %749 : vector<8x8xf32> to vector<8x1x8xf32>
    %751 = vector.shape_cast %120 : vector<8x8xf32> to vector<1x8x8xf32>
    %752 = vector.broadcast %750 : vector<8x1x8xf32> to vector<8x8x8xf32>
    %753 = vector.broadcast %751 : vector<1x8x8xf32> to vector<8x8x8xf32>
    %754 = arith.mulf %752, %753 : vector<8x8x8xf32>
    %cst_155 = arith.constant dense<0xFF800000> : vector<8x8xf32>
    %755 = vector.multi_reduction <maximumf>, %754, %cst_155 [2] : vector<8x8x8xf32> to vector<8x8xf32>
    %756 = arith.mulf %749, %136 : vector<8x8xf32>
    %cst_156 = arith.constant dense<0.000000e+00> : vector<8x8xf32>
    %757 = tpu.matmul %115, %755, %cst_156 {dimension_numbers = #tpu.dot_dimension_numbers<[1], [0], [0], [1], [0, 0, 1, 1], [], []>} : vector<8x8xf32>, vector<8x8xf32>, vector<8x8xf32> -> vector<8x8xf32>
    %758 = arith.addf %756, %757 : vector<8x8xf32>
    %759 = arith.mulf %758, %758 : vector<8x8xf32>
    %760 = vector.shape_cast %759 : vector<8x8xf32> to vector<1x8x8xf32>
    %cst_157 = arith.constant dense<0.000000e+00> : vector<1xf32>
    %761 = vector.multi_reduction <add>, %760, %cst_157 [1, 2] : vector<1x8x8xf32> to vector<1xf32>
    %762 = vector.shape_cast %761 : vector<1xf32> to vector<1x1x1xf32>
    %763 = vector.extract %762[0, 0, 0] : f32 from vector<1x1x1xf32>
    %764 = vector.broadcast %763 : f32 to vector<1x1xf32>
    %765 = math.rsqrt %764 : vector<1x1xf32>
    %766 = vector.broadcast %765 : vector<1x1xf32> to vector<8x8xf32>
    %767 = arith.mulf %758, %766 : vector<8x8xf32>
    %c35_i32 = arith.constant 35 : i32
    %768 = vector.shape_cast %767 : vector<8x8xf32> to vector<8x1x8xf32>
    %769 = vector.shape_cast %120 : vector<8x8xf32> to vector<1x8x8xf32>
    %770 = vector.broadcast %768 : vector<8x1x8xf32> to vector<8x8x8xf32>
    %771 = vector.broadcast %769 : vector<1x8x8xf32> to vector<8x8x8xf32>
    %772 = arith.mulf %770, %771 : vector<8x8x8xf32>
    %cst_158 = arith.constant dense<0xFF800000> : vector<8x8xf32>
    %773 = vector.multi_reduction <maximumf>, %772, %cst_158 [2] : vector<8x8x8xf32> to vector<8x8xf32>
    %774 = arith.mulf %767, %136 : vector<8x8xf32>
    %cst_159 = arith.constant dense<0.000000e+00> : vector<8x8xf32>
    %775 = tpu.matmul %115, %773, %cst_159 {dimension_numbers = #tpu.dot_dimension_numbers<[1], [0], [0], [1], [0, 0, 1, 1], [], []>} : vector<8x8xf32>, vector<8x8xf32>, vector<8x8xf32> -> vector<8x8xf32>
    %776 = arith.addf %774, %775 : vector<8x8xf32>
    %777 = arith.mulf %776, %776 : vector<8x8xf32>
    %778 = vector.shape_cast %777 : vector<8x8xf32> to vector<1x8x8xf32>
    %cst_160 = arith.constant dense<0.000000e+00> : vector<1xf32>
    %779 = vector.multi_reduction <add>, %778, %cst_160 [1, 2] : vector<1x8x8xf32> to vector<1xf32>
    %780 = vector.shape_cast %779 : vector<1xf32> to vector<1x1x1xf32>
    %781 = vector.extract %780[0, 0, 0] : f32 from vector<1x1x1xf32>
    %782 = vector.broadcast %781 : f32 to vector<1x1xf32>
    %783 = math.rsqrt %782 : vector<1x1xf32>
    %784 = vector.broadcast %783 : vector<1x1xf32> to vector<8x8xf32>
    %785 = arith.mulf %776, %784 : vector<8x8xf32>
    %c36_i32 = arith.constant 36 : i32
    %786 = vector.shape_cast %785 : vector<8x8xf32> to vector<8x1x8xf32>
    %787 = vector.shape_cast %120 : vector<8x8xf32> to vector<1x8x8xf32>
    %788 = vector.broadcast %786 : vector<8x1x8xf32> to vector<8x8x8xf32>
    %789 = vector.broadcast %787 : vector<1x8x8xf32> to vector<8x8x8xf32>
    %790 = arith.mulf %788, %789 : vector<8x8x8xf32>
    %cst_161 = arith.constant dense<0xFF800000> : vector<8x8xf32>
    %791 = vector.multi_reduction <maximumf>, %790, %cst_161 [2] : vector<8x8x8xf32> to vector<8x8xf32>
    %792 = arith.mulf %785, %136 : vector<8x8xf32>
    %cst_162 = arith.constant dense<0.000000e+00> : vector<8x8xf32>
    %793 = tpu.matmul %115, %791, %cst_162 {dimension_numbers = #tpu.dot_dimension_numbers<[1], [0], [0], [1], [0, 0, 1, 1], [], []>} : vector<8x8xf32>, vector<8x8xf32>, vector<8x8xf32> -> vector<8x8xf32>
    %794 = arith.addf %792, %793 : vector<8x8xf32>
    %795 = arith.mulf %794, %794 : vector<8x8xf32>
    %796 = vector.shape_cast %795 : vector<8x8xf32> to vector<1x8x8xf32>
    %cst_163 = arith.constant dense<0.000000e+00> : vector<1xf32>
    %797 = vector.multi_reduction <add>, %796, %cst_163 [1, 2] : vector<1x8x8xf32> to vector<1xf32>
    %798 = vector.shape_cast %797 : vector<1xf32> to vector<1x1x1xf32>
    %799 = vector.extract %798[0, 0, 0] : f32 from vector<1x1x1xf32>
    %800 = vector.broadcast %799 : f32 to vector<1x1xf32>
    %801 = math.rsqrt %800 : vector<1x1xf32>
    %802 = vector.broadcast %801 : vector<1x1xf32> to vector<8x8xf32>
    %803 = arith.mulf %794, %802 : vector<8x8xf32>
    %c37_i32 = arith.constant 37 : i32
    %804 = vector.shape_cast %803 : vector<8x8xf32> to vector<8x1x8xf32>
    %805 = vector.shape_cast %120 : vector<8x8xf32> to vector<1x8x8xf32>
    %806 = vector.broadcast %804 : vector<8x1x8xf32> to vector<8x8x8xf32>
    %807 = vector.broadcast %805 : vector<1x8x8xf32> to vector<8x8x8xf32>
    %808 = arith.mulf %806, %807 : vector<8x8x8xf32>
    %cst_164 = arith.constant dense<0xFF800000> : vector<8x8xf32>
    %809 = vector.multi_reduction <maximumf>, %808, %cst_164 [2] : vector<8x8x8xf32> to vector<8x8xf32>
    %810 = arith.mulf %803, %136 : vector<8x8xf32>
    %cst_165 = arith.constant dense<0.000000e+00> : vector<8x8xf32>
    %811 = tpu.matmul %115, %809, %cst_165 {dimension_numbers = #tpu.dot_dimension_numbers<[1], [0], [0], [1], [0, 0, 1, 1], [], []>} : vector<8x8xf32>, vector<8x8xf32>, vector<8x8xf32> -> vector<8x8xf32>
    %812 = arith.addf %810, %811 : vector<8x8xf32>
    %813 = arith.mulf %812, %812 : vector<8x8xf32>
    %814 = vector.shape_cast %813 : vector<8x8xf32> to vector<1x8x8xf32>
    %cst_166 = arith.constant dense<0.000000e+00> : vector<1xf32>
    %815 = vector.multi_reduction <add>, %814, %cst_166 [1, 2] : vector<1x8x8xf32> to vector<1xf32>
    %816 = vector.shape_cast %815 : vector<1xf32> to vector<1x1x1xf32>
    %817 = vector.extract %816[0, 0, 0] : f32 from vector<1x1x1xf32>
    %818 = vector.broadcast %817 : f32 to vector<1x1xf32>
    %819 = math.rsqrt %818 : vector<1x1xf32>
    %820 = vector.broadcast %819 : vector<1x1xf32> to vector<8x8xf32>
    %821 = arith.mulf %812, %820 : vector<8x8xf32>
    %c38_i32 = arith.constant 38 : i32
    %822 = vector.shape_cast %821 : vector<8x8xf32> to vector<8x1x8xf32>
    %823 = vector.shape_cast %120 : vector<8x8xf32> to vector<1x8x8xf32>
    %824 = vector.broadcast %822 : vector<8x1x8xf32> to vector<8x8x8xf32>
    %825 = vector.broadcast %823 : vector<1x8x8xf32> to vector<8x8x8xf32>
    %826 = arith.mulf %824, %825 : vector<8x8x8xf32>
    %cst_167 = arith.constant dense<0xFF800000> : vector<8x8xf32>
    %827 = vector.multi_reduction <maximumf>, %826, %cst_167 [2] : vector<8x8x8xf32> to vector<8x8xf32>
    %828 = arith.mulf %821, %136 : vector<8x8xf32>
    %cst_168 = arith.constant dense<0.000000e+00> : vector<8x8xf32>
    %829 = tpu.matmul %115, %827, %cst_168 {dimension_numbers = #tpu.dot_dimension_numbers<[1], [0], [0], [1], [0, 0, 1, 1], [], []>} : vector<8x8xf32>, vector<8x8xf32>, vector<8x8xf32> -> vector<8x8xf32>
    %830 = arith.addf %828, %829 : vector<8x8xf32>
    %831 = arith.mulf %830, %830 : vector<8x8xf32>
    %832 = vector.shape_cast %831 : vector<8x8xf32> to vector<1x8x8xf32>
    %cst_169 = arith.constant dense<0.000000e+00> : vector<1xf32>
    %833 = vector.multi_reduction <add>, %832, %cst_169 [1, 2] : vector<1x8x8xf32> to vector<1xf32>
    %834 = vector.shape_cast %833 : vector<1xf32> to vector<1x1x1xf32>
    %835 = vector.extract %834[0, 0, 0] : f32 from vector<1x1x1xf32>
    %836 = vector.broadcast %835 : f32 to vector<1x1xf32>
    %837 = math.rsqrt %836 : vector<1x1xf32>
    %838 = vector.broadcast %837 : vector<1x1xf32> to vector<8x8xf32>
    %839 = arith.mulf %830, %838 : vector<8x8xf32>
    %c39_i32 = arith.constant 39 : i32
    %840 = vector.shape_cast %839 : vector<8x8xf32> to vector<8x1x8xf32>
    %841 = vector.shape_cast %120 : vector<8x8xf32> to vector<1x8x8xf32>
    %842 = vector.broadcast %840 : vector<8x1x8xf32> to vector<8x8x8xf32>
    %843 = vector.broadcast %841 : vector<1x8x8xf32> to vector<8x8x8xf32>
    %844 = arith.mulf %842, %843 : vector<8x8x8xf32>
    %cst_170 = arith.constant dense<0xFF800000> : vector<8x8xf32>
    %845 = vector.multi_reduction <maximumf>, %844, %cst_170 [2] : vector<8x8x8xf32> to vector<8x8xf32>
    %846 = arith.mulf %839, %136 : vector<8x8xf32>
    %cst_171 = arith.constant dense<0.000000e+00> : vector<8x8xf32>
    %847 = tpu.matmul %115, %845, %cst_171 {dimension_numbers = #tpu.dot_dimension_numbers<[1], [0], [0], [1], [0, 0, 1, 1], [], []>} : vector<8x8xf32>, vector<8x8xf32>, vector<8x8xf32> -> vector<8x8xf32>
    %848 = arith.addf %846, %847 : vector<8x8xf32>
    %849 = arith.mulf %848, %848 : vector<8x8xf32>
    %850 = vector.shape_cast %849 : vector<8x8xf32> to vector<1x8x8xf32>
    %cst_172 = arith.constant dense<0.000000e+00> : vector<1xf32>
    %851 = vector.multi_reduction <add>, %850, %cst_172 [1, 2] : vector<1x8x8xf32> to vector<1xf32>
    %852 = vector.shape_cast %851 : vector<1xf32> to vector<1x1x1xf32>
    %853 = vector.extract %852[0, 0, 0] : f32 from vector<1x1x1xf32>
    %854 = vector.broadcast %853 : f32 to vector<1x1xf32>
    %855 = math.rsqrt %854 : vector<1x1xf32>
    %856 = vector.broadcast %855 : vector<1x1xf32> to vector<8x8xf32>
    %857 = arith.mulf %848, %856 : vector<8x8xf32>
    %c40_i32 = arith.constant 40 : i32
    %858 = vector.shape_cast %857 : vector<8x8xf32> to vector<8x1x8xf32>
    %859 = vector.shape_cast %120 : vector<8x8xf32> to vector<1x8x8xf32>
    %860 = vector.broadcast %858 : vector<8x1x8xf32> to vector<8x8x8xf32>
    %861 = vector.broadcast %859 : vector<1x8x8xf32> to vector<8x8x8xf32>
    %862 = arith.mulf %860, %861 : vector<8x8x8xf32>
    %cst_173 = arith.constant dense<0xFF800000> : vector<8x8xf32>
    %863 = vector.multi_reduction <maximumf>, %862, %cst_173 [2] : vector<8x8x8xf32> to vector<8x8xf32>
    %864 = arith.mulf %857, %136 : vector<8x8xf32>
    %cst_174 = arith.constant dense<0.000000e+00> : vector<8x8xf32>
    %865 = tpu.matmul %115, %863, %cst_174 {dimension_numbers = #tpu.dot_dimension_numbers<[1], [0], [0], [1], [0, 0, 1, 1], [], []>} : vector<8x8xf32>, vector<8x8xf32>, vector<8x8xf32> -> vector<8x8xf32>
    %866 = arith.addf %864, %865 : vector<8x8xf32>
    %867 = arith.mulf %866, %866 : vector<8x8xf32>
    %868 = vector.shape_cast %867 : vector<8x8xf32> to vector<1x8x8xf32>
    %cst_175 = arith.constant dense<0.000000e+00> : vector<1xf32>
    %869 = vector.multi_reduction <add>, %868, %cst_175 [1, 2] : vector<1x8x8xf32> to vector<1xf32>
    %870 = vector.shape_cast %869 : vector<1xf32> to vector<1x1x1xf32>
    %871 = vector.extract %870[0, 0, 0] : f32 from vector<1x1x1xf32>
    %872 = vector.broadcast %871 : f32 to vector<1x1xf32>
    %873 = math.rsqrt %872 : vector<1x1xf32>
    %874 = vector.broadcast %873 : vector<1x1xf32> to vector<8x8xf32>
    %875 = arith.mulf %866, %874 : vector<8x8xf32>
    %c41_i32 = arith.constant 41 : i32
    %876 = vector.shape_cast %875 : vector<8x8xf32> to vector<8x1x8xf32>
    %877 = vector.shape_cast %120 : vector<8x8xf32> to vector<1x8x8xf32>
    %878 = vector.broadcast %876 : vector<8x1x8xf32> to vector<8x8x8xf32>
    %879 = vector.broadcast %877 : vector<1x8x8xf32> to vector<8x8x8xf32>
    %880 = arith.mulf %878, %879 : vector<8x8x8xf32>
    %cst_176 = arith.constant dense<0xFF800000> : vector<8x8xf32>
    %881 = vector.multi_reduction <maximumf>, %880, %cst_176 [2] : vector<8x8x8xf32> to vector<8x8xf32>
    %882 = arith.mulf %875, %136 : vector<8x8xf32>
    %cst_177 = arith.constant dense<0.000000e+00> : vector<8x8xf32>
    %883 = tpu.matmul %115, %881, %cst_177 {dimension_numbers = #tpu.dot_dimension_numbers<[1], [0], [0], [1], [0, 0, 1, 1], [], []>} : vector<8x8xf32>, vector<8x8xf32>, vector<8x8xf32> -> vector<8x8xf32>
    %884 = arith.addf %882, %883 : vector<8x8xf32>
    %885 = arith.mulf %884, %884 : vector<8x8xf32>
    %886 = vector.shape_cast %885 : vector<8x8xf32> to vector<1x8x8xf32>
    %cst_178 = arith.constant dense<0.000000e+00> : vector<1xf32>
    %887 = vector.multi_reduction <add>, %886, %cst_178 [1, 2] : vector<1x8x8xf32> to vector<1xf32>
    %888 = vector.shape_cast %887 : vector<1xf32> to vector<1x1x1xf32>
    %889 = vector.extract %888[0, 0, 0] : f32 from vector<1x1x1xf32>
    %890 = vector.broadcast %889 : f32 to vector<1x1xf32>
    %891 = math.rsqrt %890 : vector<1x1xf32>
    %892 = vector.broadcast %891 : vector<1x1xf32> to vector<8x8xf32>
    %893 = arith.mulf %884, %892 : vector<8x8xf32>
    %c42_i32 = arith.constant 42 : i32
    %894 = vector.shape_cast %893 : vector<8x8xf32> to vector<8x1x8xf32>
    %895 = vector.shape_cast %120 : vector<8x8xf32> to vector<1x8x8xf32>
    %896 = vector.broadcast %894 : vector<8x1x8xf32> to vector<8x8x8xf32>
    %897 = vector.broadcast %895 : vector<1x8x8xf32> to vector<8x8x8xf32>
    %898 = arith.mulf %896, %897 : vector<8x8x8xf32>
    %cst_179 = arith.constant dense<0xFF800000> : vector<8x8xf32>
    %899 = vector.multi_reduction <maximumf>, %898, %cst_179 [2] : vector<8x8x8xf32> to vector<8x8xf32>
    %900 = arith.mulf %893, %136 : vector<8x8xf32>
    %cst_180 = arith.constant dense<0.000000e+00> : vector<8x8xf32>
    %901 = tpu.matmul %115, %899, %cst_180 {dimension_numbers = #tpu.dot_dimension_numbers<[1], [0], [0], [1], [0, 0, 1, 1], [], []>} : vector<8x8xf32>, vector<8x8xf32>, vector<8x8xf32> -> vector<8x8xf32>
    %902 = arith.addf %900, %901 : vector<8x8xf32>
    %903 = arith.mulf %902, %902 : vector<8x8xf32>
    %904 = vector.shape_cast %903 : vector<8x8xf32> to vector<1x8x8xf32>
    %cst_181 = arith.constant dense<0.000000e+00> : vector<1xf32>
    %905 = vector.multi_reduction <add>, %904, %cst_181 [1, 2] : vector<1x8x8xf32> to vector<1xf32>
    %906 = vector.shape_cast %905 : vector<1xf32> to vector<1x1x1xf32>
    %907 = vector.extract %906[0, 0, 0] : f32 from vector<1x1x1xf32>
    %908 = vector.broadcast %907 : f32 to vector<1x1xf32>
    %909 = math.rsqrt %908 : vector<1x1xf32>
    %910 = vector.broadcast %909 : vector<1x1xf32> to vector<8x8xf32>
    %911 = arith.mulf %902, %910 : vector<8x8xf32>
    %c43_i32 = arith.constant 43 : i32
    %912 = vector.shape_cast %911 : vector<8x8xf32> to vector<8x1x8xf32>
    %913 = vector.shape_cast %120 : vector<8x8xf32> to vector<1x8x8xf32>
    %914 = vector.broadcast %912 : vector<8x1x8xf32> to vector<8x8x8xf32>
    %915 = vector.broadcast %913 : vector<1x8x8xf32> to vector<8x8x8xf32>
    %916 = arith.mulf %914, %915 : vector<8x8x8xf32>
    %cst_182 = arith.constant dense<0xFF800000> : vector<8x8xf32>
    %917 = vector.multi_reduction <maximumf>, %916, %cst_182 [2] : vector<8x8x8xf32> to vector<8x8xf32>
    %918 = arith.mulf %911, %136 : vector<8x8xf32>
    %cst_183 = arith.constant dense<0.000000e+00> : vector<8x8xf32>
    %919 = tpu.matmul %115, %917, %cst_183 {dimension_numbers = #tpu.dot_dimension_numbers<[1], [0], [0], [1], [0, 0, 1, 1], [], []>} : vector<8x8xf32>, vector<8x8xf32>, vector<8x8xf32> -> vector<8x8xf32>
    %920 = arith.addf %918, %919 : vector<8x8xf32>
    %921 = arith.mulf %920, %920 : vector<8x8xf32>
    %922 = vector.shape_cast %921 : vector<8x8xf32> to vector<1x8x8xf32>
    %cst_184 = arith.constant dense<0.000000e+00> : vector<1xf32>
    %923 = vector.multi_reduction <add>, %922, %cst_184 [1, 2] : vector<1x8x8xf32> to vector<1xf32>
    %924 = vector.shape_cast %923 : vector<1xf32> to vector<1x1x1xf32>
    %925 = vector.extract %924[0, 0, 0] : f32 from vector<1x1x1xf32>
    %926 = vector.broadcast %925 : f32 to vector<1x1xf32>
    %927 = math.rsqrt %926 : vector<1x1xf32>
    %928 = vector.broadcast %927 : vector<1x1xf32> to vector<8x8xf32>
    %929 = arith.mulf %920, %928 : vector<8x8xf32>
    %c44_i32 = arith.constant 44 : i32
    %930 = vector.shape_cast %929 : vector<8x8xf32> to vector<8x1x8xf32>
    %931 = vector.shape_cast %120 : vector<8x8xf32> to vector<1x8x8xf32>
    %932 = vector.broadcast %930 : vector<8x1x8xf32> to vector<8x8x8xf32>
    %933 = vector.broadcast %931 : vector<1x8x8xf32> to vector<8x8x8xf32>
    %934 = arith.mulf %932, %933 : vector<8x8x8xf32>
    %cst_185 = arith.constant dense<0xFF800000> : vector<8x8xf32>
    %935 = vector.multi_reduction <maximumf>, %934, %cst_185 [2] : vector<8x8x8xf32> to vector<8x8xf32>
    %936 = arith.mulf %929, %136 : vector<8x8xf32>
    %cst_186 = arith.constant dense<0.000000e+00> : vector<8x8xf32>
    %937 = tpu.matmul %115, %935, %cst_186 {dimension_numbers = #tpu.dot_dimension_numbers<[1], [0], [0], [1], [0, 0, 1, 1], [], []>} : vector<8x8xf32>, vector<8x8xf32>, vector<8x8xf32> -> vector<8x8xf32>
    %938 = arith.addf %936, %937 : vector<8x8xf32>
    %939 = arith.mulf %938, %938 : vector<8x8xf32>
    %940 = vector.shape_cast %939 : vector<8x8xf32> to vector<1x8x8xf32>
    %cst_187 = arith.constant dense<0.000000e+00> : vector<1xf32>
    %941 = vector.multi_reduction <add>, %940, %cst_187 [1, 2] : vector<1x8x8xf32> to vector<1xf32>
    %942 = vector.shape_cast %941 : vector<1xf32> to vector<1x1x1xf32>
    %943 = vector.extract %942[0, 0, 0] : f32 from vector<1x1x1xf32>
    %944 = vector.broadcast %943 : f32 to vector<1x1xf32>
    %945 = math.rsqrt %944 : vector<1x1xf32>
    %946 = vector.broadcast %945 : vector<1x1xf32> to vector<8x8xf32>
    %947 = arith.mulf %938, %946 : vector<8x8xf32>
    %c45_i32 = arith.constant 45 : i32
    %948 = vector.shape_cast %947 : vector<8x8xf32> to vector<8x1x8xf32>
    %949 = vector.shape_cast %120 : vector<8x8xf32> to vector<1x8x8xf32>
    %950 = vector.broadcast %948 : vector<8x1x8xf32> to vector<8x8x8xf32>
    %951 = vector.broadcast %949 : vector<1x8x8xf32> to vector<8x8x8xf32>
    %952 = arith.mulf %950, %951 : vector<8x8x8xf32>
    %cst_188 = arith.constant dense<0xFF800000> : vector<8x8xf32>
    %953 = vector.multi_reduction <maximumf>, %952, %cst_188 [2] : vector<8x8x8xf32> to vector<8x8xf32>
    %954 = arith.mulf %947, %136 : vector<8x8xf32>
    %cst_189 = arith.constant dense<0.000000e+00> : vector<8x8xf32>
    %955 = tpu.matmul %115, %953, %cst_189 {dimension_numbers = #tpu.dot_dimension_numbers<[1], [0], [0], [1], [0, 0, 1, 1], [], []>} : vector<8x8xf32>, vector<8x8xf32>, vector<8x8xf32> -> vector<8x8xf32>
    %956 = arith.addf %954, %955 : vector<8x8xf32>
    %957 = arith.mulf %956, %956 : vector<8x8xf32>
    %958 = vector.shape_cast %957 : vector<8x8xf32> to vector<1x8x8xf32>
    %cst_190 = arith.constant dense<0.000000e+00> : vector<1xf32>
    %959 = vector.multi_reduction <add>, %958, %cst_190 [1, 2] : vector<1x8x8xf32> to vector<1xf32>
    %960 = vector.shape_cast %959 : vector<1xf32> to vector<1x1x1xf32>
    %961 = vector.extract %960[0, 0, 0] : f32 from vector<1x1x1xf32>
    %962 = vector.broadcast %961 : f32 to vector<1x1xf32>
    %963 = math.rsqrt %962 : vector<1x1xf32>
    %964 = vector.broadcast %963 : vector<1x1xf32> to vector<8x8xf32>
    %965 = arith.mulf %956, %964 : vector<8x8xf32>
    %c46_i32 = arith.constant 46 : i32
    %966 = vector.shape_cast %965 : vector<8x8xf32> to vector<8x1x8xf32>
    %967 = vector.shape_cast %120 : vector<8x8xf32> to vector<1x8x8xf32>
    %968 = vector.broadcast %966 : vector<8x1x8xf32> to vector<8x8x8xf32>
    %969 = vector.broadcast %967 : vector<1x8x8xf32> to vector<8x8x8xf32>
    %970 = arith.mulf %968, %969 : vector<8x8x8xf32>
    %cst_191 = arith.constant dense<0xFF800000> : vector<8x8xf32>
    %971 = vector.multi_reduction <maximumf>, %970, %cst_191 [2] : vector<8x8x8xf32> to vector<8x8xf32>
    %972 = arith.mulf %965, %136 : vector<8x8xf32>
    %cst_192 = arith.constant dense<0.000000e+00> : vector<8x8xf32>
    %973 = tpu.matmul %115, %971, %cst_192 {dimension_numbers = #tpu.dot_dimension_numbers<[1], [0], [0], [1], [0, 0, 1, 1], [], []>} : vector<8x8xf32>, vector<8x8xf32>, vector<8x8xf32> -> vector<8x8xf32>
    %974 = arith.addf %972, %973 : vector<8x8xf32>
    %975 = arith.mulf %974, %974 : vector<8x8xf32>
    %976 = vector.shape_cast %975 : vector<8x8xf32> to vector<1x8x8xf32>
    %cst_193 = arith.constant dense<0.000000e+00> : vector<1xf32>
    %977 = vector.multi_reduction <add>, %976, %cst_193 [1, 2] : vector<1x8x8xf32> to vector<1xf32>
    %978 = vector.shape_cast %977 : vector<1xf32> to vector<1x1x1xf32>
    %979 = vector.extract %978[0, 0, 0] : f32 from vector<1x1x1xf32>
    %980 = vector.broadcast %979 : f32 to vector<1x1xf32>
    %981 = math.rsqrt %980 : vector<1x1xf32>
    %982 = vector.broadcast %981 : vector<1x1xf32> to vector<8x8xf32>
    %983 = arith.mulf %974, %982 : vector<8x8xf32>
    %c47_i32 = arith.constant 47 : i32
    %984 = vector.shape_cast %983 : vector<8x8xf32> to vector<8x1x8xf32>
    %985 = vector.shape_cast %120 : vector<8x8xf32> to vector<1x8x8xf32>
    %986 = vector.broadcast %984 : vector<8x1x8xf32> to vector<8x8x8xf32>
    %987 = vector.broadcast %985 : vector<1x8x8xf32> to vector<8x8x8xf32>
    %988 = arith.mulf %986, %987 : vector<8x8x8xf32>
    %cst_194 = arith.constant dense<0xFF800000> : vector<8x8xf32>
    %989 = vector.multi_reduction <maximumf>, %988, %cst_194 [2] : vector<8x8x8xf32> to vector<8x8xf32>
    %990 = arith.mulf %983, %136 : vector<8x8xf32>
    %cst_195 = arith.constant dense<0.000000e+00> : vector<8x8xf32>
    %991 = tpu.matmul %115, %989, %cst_195 {dimension_numbers = #tpu.dot_dimension_numbers<[1], [0], [0], [1], [0, 0, 1, 1], [], []>} : vector<8x8xf32>, vector<8x8xf32>, vector<8x8xf32> -> vector<8x8xf32>
    %992 = arith.addf %990, %991 : vector<8x8xf32>
    %993 = arith.mulf %992, %992 : vector<8x8xf32>
    %994 = vector.shape_cast %993 : vector<8x8xf32> to vector<1x8x8xf32>
    %cst_196 = arith.constant dense<0.000000e+00> : vector<1xf32>
    %995 = vector.multi_reduction <add>, %994, %cst_196 [1, 2] : vector<1x8x8xf32> to vector<1xf32>
    %996 = vector.shape_cast %995 : vector<1xf32> to vector<1x1x1xf32>
    %997 = vector.extract %996[0, 0, 0] : f32 from vector<1x1x1xf32>
    %998 = vector.broadcast %997 : f32 to vector<1x1xf32>
    %999 = math.rsqrt %998 : vector<1x1xf32>
    %1000 = vector.broadcast %999 : vector<1x1xf32> to vector<8x8xf32>
    %1001 = arith.mulf %992, %1000 : vector<8x8xf32>
    %c48_i32 = arith.constant 48 : i32
    %1002 = vector.shape_cast %1001 : vector<8x8xf32> to vector<8x1x8xf32>
    %1003 = vector.shape_cast %120 : vector<8x8xf32> to vector<1x8x8xf32>
    %1004 = vector.broadcast %1002 : vector<8x1x8xf32> to vector<8x8x8xf32>
    %1005 = vector.broadcast %1003 : vector<1x8x8xf32> to vector<8x8x8xf32>
    %1006 = arith.mulf %1004, %1005 : vector<8x8x8xf32>
    %cst_197 = arith.constant dense<0xFF800000> : vector<8x8xf32>
    %1007 = vector.multi_reduction <maximumf>, %1006, %cst_197 [2] : vector<8x8x8xf32> to vector<8x8xf32>
    %1008 = arith.mulf %1001, %136 : vector<8x8xf32>
    %cst_198 = arith.constant dense<0.000000e+00> : vector<8x8xf32>
    %1009 = tpu.matmul %115, %1007, %cst_198 {dimension_numbers = #tpu.dot_dimension_numbers<[1], [0], [0], [1], [0, 0, 1, 1], [], []>} : vector<8x8xf32>, vector<8x8xf32>, vector<8x8xf32> -> vector<8x8xf32>
    %1010 = arith.addf %1008, %1009 : vector<8x8xf32>
    %1011 = arith.mulf %1010, %1010 : vector<8x8xf32>
    %1012 = vector.shape_cast %1011 : vector<8x8xf32> to vector<1x8x8xf32>
    %cst_199 = arith.constant dense<0.000000e+00> : vector<1xf32>
    %1013 = vector.multi_reduction <add>, %1012, %cst_199 [1, 2] : vector<1x8x8xf32> to vector<1xf32>
    %1014 = vector.shape_cast %1013 : vector<1xf32> to vector<1x1x1xf32>
    %1015 = vector.extract %1014[0, 0, 0] : f32 from vector<1x1x1xf32>
    %1016 = vector.broadcast %1015 : f32 to vector<1x1xf32>
    %1017 = math.rsqrt %1016 : vector<1x1xf32>
    %1018 = vector.broadcast %1017 : vector<1x1xf32> to vector<8x8xf32>
    %1019 = arith.mulf %1010, %1018 : vector<8x8xf32>
    %c49_i32 = arith.constant 49 : i32
    %1020 = vector.shape_cast %1019 : vector<8x8xf32> to vector<8x1x8xf32>
    %1021 = vector.shape_cast %120 : vector<8x8xf32> to vector<1x8x8xf32>
    %1022 = vector.broadcast %1020 : vector<8x1x8xf32> to vector<8x8x8xf32>
    %1023 = vector.broadcast %1021 : vector<1x8x8xf32> to vector<8x8x8xf32>
    %1024 = arith.mulf %1022, %1023 : vector<8x8x8xf32>
    %cst_200 = arith.constant dense<0xFF800000> : vector<8x8xf32>
    %1025 = vector.multi_reduction <maximumf>, %1024, %cst_200 [2] : vector<8x8x8xf32> to vector<8x8xf32>
    %1026 = arith.mulf %1019, %136 : vector<8x8xf32>
    %cst_201 = arith.constant dense<0.000000e+00> : vector<8x8xf32>
    %1027 = tpu.matmul %115, %1025, %cst_201 {dimension_numbers = #tpu.dot_dimension_numbers<[1], [0], [0], [1], [0, 0, 1, 1], [], []>} : vector<8x8xf32>, vector<8x8xf32>, vector<8x8xf32> -> vector<8x8xf32>
    %1028 = arith.addf %1026, %1027 : vector<8x8xf32>
    %1029 = arith.mulf %1028, %1028 : vector<8x8xf32>
    %1030 = vector.shape_cast %1029 : vector<8x8xf32> to vector<1x8x8xf32>
    %cst_202 = arith.constant dense<0.000000e+00> : vector<1xf32>
    %1031 = vector.multi_reduction <add>, %1030, %cst_202 [1, 2] : vector<1x8x8xf32> to vector<1xf32>
    %1032 = vector.shape_cast %1031 : vector<1xf32> to vector<1x1x1xf32>
    %1033 = vector.extract %1032[0, 0, 0] : f32 from vector<1x1x1xf32>
    %1034 = vector.broadcast %1033 : f32 to vector<1x1xf32>
    %1035 = math.rsqrt %1034 : vector<1x1xf32>
    %1036 = vector.broadcast %1035 : vector<1x1xf32> to vector<8x8xf32>
    %1037 = arith.mulf %1028, %1036 : vector<8x8xf32>
    %cst_203 = arith.constant 0.000000e+00 : f32
    %1038 = vector.broadcast %cst_203 : f32 to vector<16x128xf32>
    %c0_204 = arith.constant 0 : index
    %c0_205 = arith.constant 0 : index
    %1039 = vector.load %arg2[%c0_204, %c0_205] : memref<16x128xf32, #tpu.memory_space<vmem>>, vector<16x128xf32>
    tpu.vector_store %arg2[%c0_204, %c0_205], %1038 {strides = array<i32>} : memref<16x128xf32, #tpu.memory_space<vmem>>, vector<16x128xf32>,
    %c0_206 = arith.constant 0 : index
    %c0_207 = arith.constant 0 : index
    %1040 = vector.load %arg2[%c0_206, %c0_207] : memref<16x128xf32, #tpu.memory_space<vmem>>, vector<1x36xf32>
    tpu.vector_store %arg2[%c0_206, %c0_207], %66 {strides = array<i32>} : memref<16x128xf32, #tpu.memory_space<vmem>>, vector<1x36xf32>,
    %c1 = arith.constant 1 : index
    %c0_208 = arith.constant 0 : index
    %1041 = vector.load %arg2[%c1, %c0_208] : memref<16x128xf32, #tpu.memory_space<vmem>>, vector<1x32xf32>
    tpu.vector_store %arg2[%c1, %c0_208], %67 {strides = array<i32>} : memref<16x128xf32, #tpu.memory_space<vmem>>, vector<1x32xf32>,
    %c2 = arith.constant 2 : index
    %c0_209 = arith.constant 0 : index
    %1042 = vector.load %arg2[%c2, %c0_209] : memref<16x128xf32, #tpu.memory_space<vmem>>, vector<1x16xf32>
    tpu.vector_store %arg2[%c2, %c0_209], %49 {strides = array<i32>} : memref<16x128xf32, #tpu.memory_space<vmem>>, vector<1x16xf32>,
    %c3 = arith.constant 3 : index
    %c0_210 = arith.constant 0 : index
    %1043 = vector.load %arg2[%c3, %c0_210] : memref<16x128xf32, #tpu.memory_space<vmem>>, vector<1x16xf32>
    tpu.vector_store %arg2[%c3, %c0_210], %50 {strides = array<i32>} : memref<16x128xf32, #tpu.memory_space<vmem>>, vector<1x16xf32>,
    %c8_211 = arith.constant 8 : index
    %c0_212 = arith.constant 0 : index
    %1044 = vector.load %arg2[%c8_211, %c0_212] : memref<16x128xf32, #tpu.memory_space<vmem>>, vector<8x8xf32>
    tpu.vector_store %arg2[%c8_211, %c0_212], %1037 {strides = array<i32>} : memref<16x128xf32, #tpu.memory_space<vmem>>, vector<8x8xf32>,
    return
  }
}

</mosaic_0001>

<bundles_post_ra>
// kernel: device_pre.1
= control target key start
LH: loop header
LB: loop body
LE: loop exit
PB: predicated region body
PF: predicated region fallthrough
CT: control target
= control target key end

     0   :  { %7 = vsyncpa [#allocation3], 0  ;;  %s14342_s9 = smov [#allocation2]   ;;  %s17395_s0 = inlined_call_operand.vmem [shape: f32[24,128], index: 0, kind: input, shape index: {}]   ;;  %s17396_s1 = inlined_call_operand.hbm [shape: f32[224,128], index: 1, kind: input, shape index: {}]   ;;  %s17397_s2 = inlined_call_operand.vmem [shape: f32[16,128], index: 2, kind: output, shape index: {}]  }
   0x1   :  { %s15_s10 = sshll.u32 %s14342_s9, 4  ;;  %s14318_s13 = scalar_lea.hbm %s17396_s1, 3584  ;;  %s16_s10 = int_to_ptr.vmem [resolvable:$true] %s15_s10 }
   0x2   :  { %p14319_p0 = scmp.ne.s32.totalorder %s17396_s1, %s14318_s13  ;;  %p14322_p1 = scmp.lt.u32.totalorder %s14318_s13, %s17396_s1 }
   0x4   :  { %p14324_p2 = pnand %p14322_p1, %p14319_p0 }
   0x6   :  { %14327 = shalt.err (!%p14324_p2)
}
   0x7   :  { %s14328_s18 = scalar_lea.vmem %s16_s10, 3584  ;;  %p14333_p4 = scmp.lt.s32.totalorder %s16_s10, %s16_s10 }
   0x8   :  { %p14329_p3 = scmp.ne.s32.totalorder %s16_s10, %s14328_s18  ;;  %p14334_p5 = scmp.lt.s32.totalorder %s14328_s18, %s14328_s18 }
   0xa   :  { %p14335_p6 = por %p14334_p5, %p14333_p4 }
   0xc   :  { %p14336_p7 = pnand %p14335_p6, %p14329_p3 }
   0xe   :  { %14339 = shalt.err (!%p14336_p7)
}
   0xf   :  { %s14343_s19 = smov 128   ;;  %s14344_s20 = smov 8  }
  0x10   :  { %21 = dma.hbm_to_vmem [thread:$0]  %s17396_s1, 3584, %s16_s10, [#allocation3], %s14343_s19, %s14343_s19, %s14344_s20  }
  0x11   :  { %14340 = dma.done.wait [#allocation3], 3584  }
  0x12   :  { %14341 = vsyncadd [#allocation3], 4294963712  ;;  %v14345_v0 = vmov 0.0   ;;  %vm14346_vm0 = vmmov 0   ;;  %vm28_vm1 = vcmask 64512   ;;  %v26_v1 = vld [vmem:[%s17395_s0 + $0x8] sm:$0xff] }
  0x13   :  { %13732 = vmatprep.subr.mxu0 %v14345_v0  ;;  %13512 = vst [vmem:[%s17397_s2] sm:$0xff] %v14345_v0  ;;  %13513 = vst [vmem:[%s17397_s2 + $0x8] sm:$0xff] %v14345_v0  ;;  %13734 = vmatprep.mubr.msk.f32.mxu0 %vm14346_vm0, %v14345_v0  ;;  %v14398_v2 = vld [vmem:[%s17395_s0] sm:$0xff]  ;;  %vm107_vm2 = vcmask 1043456   ;;  %vm103_vm3 = vcmask 31744   ;;  %v275_v6 = vld [vmem:[#allocation2 + $0x8] sm:$0xff]  ;;  %v14347_v9 = vmov 0.0|0.0  }
  0x14   :  { %13737 = vmatprep.subr.mxu1 %v14345_v0  ;;  %13739 = vmatprep.mubr.msk.f32.mxu1 %vm14346_vm0, %v14345_v0  ;;  %v102_v3 = vld [vmem:[#allocation2] sm:$0xf]  ;;  %v276_v7 = vld [vmem:[#allocation2 + $0x10] sm:$0xff]  ;;  %v277_v8 = vld [vmem:[#allocation2 + $0x18] sm:$0xff]  ;;  %vm181_vm4 = vcmask 261120   ;;  %vm13522_vm5 = vcmask 122880  }
  0x15   :  { %13733 = vmatpush3.msra.mxu0 %v26_v1  ;;  %13738 = vmatpush3.msk.msra.mxu1 %vm107_vm2, %v102_v3  ;;  %v14060_v10 = vpack.c.bf16 %v276_v7, %v275_v6  ;;  %v278_v11 = vld [vmem:[#allocation2 + $0x20] sm:$0xff]  ;;  %v380_v39 = vld [vmem:[#allocation2 + $0x28] sm:$0xff]  ;;  %v381_v40 = vld [vmem:[#allocation2 + $0x30] sm:$0xff]  ;;  %s14348_s4 = smov 112   ;;  %vm470_vm6 = vcmask 130048   ;;  %vm13514_vm7 = vcmask 286720  }
  0x16   :  { %13735 = vmatmul.mubr.msk.f32.vlgmr.msra.gmra.mrb[0].mxu0 %vm28_vm1, %v14398_v2  ;;  %13742 = vmatprep.subr.mxu0 %v14345_v0  ;;  %v14063_v12 = vpack.c.bf16 %v278_v11, %v277_v8  ;;  %v14066_v41 = vpack.c.bf16 %v381_v40, %v380_v39  ;;  %v382_v42 = vld [vmem:[#allocation2 + $0x38] sm:$0xff]  ;;  %v383_v43 = vld [vmem:[#allocation2 + $0x40] sm:$0xff]  ;;  %vm638_vm8 = vcmask 293888   ;;  %vm866_vm10 = vcmask 1041409  }
  0x17   :  { %13744 = vmatprep.mubr.msk.f32.mxu0 %vm14346_vm0, %v14345_v0  ;;  %14059 = vmatprep.subr.bf16.mxu1 %v14347_v9  ;;  %v14069_v44 = vpack.c.bf16 %v383_v43, %v382_v42  ;;  %v718_v40 = vld [vmem:[#allocation2 + $0xc0] sm:$0xff]  ;;  %v636_v42 = vld [vmem:[#allocation2 + $0xa8] sm:$0xff]  ;;  %vm867_vm11 = vcmask 1042434   ;;  %vm869_vm12 = vcmask 1043459   ;;  %vm871_vm13 = vcmask 1044484  }
  0x18   :  { %vm873_vm14 = vcmask 1045509   ;;  %vm875_vm15 = vcmask 1046534  }
  0xe9   :  { %v98_v4 = vpop.f32.mrb[0].mxu0 }
  0xea   :  { %v13736_v5 = vpop.f32.mrb[1].mxu0  ;;  %13740 = vmatmul.mubr.msk.f32.vlgmr.msra.gmra.mrb[0].mxu1 %vm103_vm3, %v98_v4 }
  0xeb   :  { %13755 = vmatprep.mubr.msk.f32.mxu1 %vm14346_vm0, %v14345_v0  ;;  %14061 = vmatpush3.bf16.msra.mxu1 %v14060_v10 }
  0xec   :  { %14062 = vmatprep.subr.bf16.mxu1 %v14347_v9 }
  0xef   :  { %14064 = vmatpush3.bf16.msra.mxu1 %v14063_v12 }
  0xf0   :  { %14071 = vmatprep.subr.bf16.mxu1 %v14347_v9 }
 0x1bd   :  { %v177_v13 = vpop.f32.mrb[0].mxu1 }
 0x1be   :  { %v182_v14 = vsel %vm181_vm4, %v177_v13, 0.0  ;;  %v13741_v15 = vpop.f32.mrb[1].mxu1 }
 0x1bf   :  { %v183_v16 = vrot.slane %v182_v14, 4 }
 0x1c1   :  { %v184_v17 = vadd.f32 %v183_v16, %v182_v14  ;;  %v384_v14 = vld [vmem:[#allocation2 + $0x68] sm:$0x1] }
 0x1c3   :  { %v185_v18 = vrot.slane %v184_v17, 2 }
 0x1c5   :  { %v186_v19 = vadd.f32 %v185_v18, %v184_v17 }
 0x1c7   :  { %v187_v20 = vrot.slane %v186_v19, 1 }
 0x1c9   :  { %v188_v21 = vadd.f32 %v187_v20, %v186_v19  ;;  %v467_v19 = vld [vmem:[#allocation2 + $0x48] sm:$0xff]  ;;  %v468_v20 = vld [vmem:[#allocation2 + $0x50] sm:$0xff] }
 0x1cb   :  { %v190_v22 = vmul.f32 0.125, %v188_v21  ;;  %v14072_v21 = vpack.c.bf16 %v468_v20, %v467_v19 }
 0x1cd   :  { %v191_v23 = vsub.f32 %v177_v13, %v190_v22 }
 0x1cf   :  { %v192_v24 = vmul.f32 %v191_v23, %v191_v23 }
 0x1d1   :  { %v193_v25 = vsel %vm181_vm4, %v192_v24, 0.0  ;;  %v27_v24 = vld [vmem:[%s17395_s0 + $0x10] sm:$0x1] }
 0x1d2   :  { %v194_v26 = vrot.slane %v193_v25, 4 }
 0x1d4   :  { %v195_v27 = vadd.f32 %v194_v26, %v193_v25 }
 0x1d6   :  { %v196_v28 = vrot.slane %v195_v27, 2 }
 0x1d8   :  { %v197_v29 = vadd.f32 %v196_v28, %v195_v27  ;;  %v545_v28 = vld [vmem:[#allocation2 + $0x58] sm:$0xff] }
 0x1da   :  { %v198_v30 = vrot.slane %v197_v29, 1 }
 0x1dc   :  { %v199_v31 = vadd.f32 %v198_v30, %v197_v29  ;;  %v546_v29 = vld [vmem:[#allocation2 + $0x60] sm:$0xff] }
 0x1dd   :  { %v14075_v30 = vpack.c.bf16 %v546_v29, %v545_v28 }
 0x1de   :  { %v200_v32 = vmul.f32 0.125, %v199_v31  ;;  %v469_v31 = vld [vmem:[#allocation2 + $0x70] sm:$0x1] }
 0x1e0   :  { %v201_v33 = vadd.f32 1e-05, %v200_v32 }
 0x1e2   :  { %14198 = vrsqrt.f32 %v201_v33 }
 0x1ec   :  { %v14199_v34 = vpop.eup %14198 }
 0x1ed   :  { %v203_v35 = vmul.f32 %v14199_v34, %v191_v23 }
 0x1ef   :  { %v204_v36 = vmax.f32 %v203_v35, 0.0 }
 0x1f1   :  { %13743 = vmatpush3.msra.mxu0 %v204_v36  ;;  %v633_v36 = vld [vmem:[#allocation2 + $0x90] sm:$0xff] }
 0x1f2   :  { %13745 = vmatmul.mubr.msk.f32.vlgmr.msra.gmra.mrb[2].mxu0 %vm28_vm1, %v14398_v2  ;;  %14065 = vmatprep.subr.bf16.mxu0 %v14347_v9 }
 0x1f3   :  { %13766 = vmatprep.mubr.msk.f32.mxu0 %vm14346_vm0, %v14345_v0  ;;  %14067 = vmatpush3.bf16.msra.mxu0 %v14066_v41  ;;  %v635_v41 = vld [vmem:[#allocation2 + $0xa0] sm:$0xff] }
 0x1f4   :  { %14068 = vmatprep.subr.bf16.mxu0 %v14347_v9 }
 0x1f7   :  { %14070 = vmatpush3.bf16.msra.mxu0 %v14069_v44  ;;  %v719_v44 = vld [vmem:[#allocation2 + $0xc8] sm:$0xff] }
 0x1f8   :  { %14074 = vmatprep.subr.bf16.mxu0 %v14347_v9 }
 0x2c5   :  { %v271_v37 = vpop.f32.mrb[2].mxu0 }
 0x2c6   :  { %v13746_v38 = vpop.f32.mrb[3].mxu0  ;;  %13756 = vmatmul.mubr.msk.f32.vlgmr.msra.gmra.mrb[2].mxu1 %vm181_vm4, %v271_v37  ;;  %v634_v37 = vld [vmem:[#allocation2 + $0x98] sm:$0xff] }
 0x2c7   :  { %13773 = vmatprep.mubr.msk.f32.mxu1 %vm14346_vm0, %v14345_v0  ;;  %14073 = vmatpush3.bf16.msra.mxu1 %v14072_v21  ;;  %v717_v38 = vld [vmem:[#allocation2 + $0xb8] sm:$0xff]  ;;  %v14078_v39 = vpack.c.bf16 %v634_v37, %v633_v36 }
 0x2c8   :  { %14077 = vmatprep.subr.bf16.mxu1 %v14347_v9  ;;  %v14084_v43 = vpack.c.bf16 %v718_v40, %v717_v38 }
 0x399   :  { %v348_v45 = vpop.f32.mrb[2].mxu1 }
 0x39a   :  { %v352_v46 = vsel %vm181_vm4, %v348_v45, 0.0  ;;  %v13757_v47 = vpop.f32.mrb[3].mxu1 }
 0x39b   :  { %v353_v48 = vrot.slane %v352_v46, 4 }
 0x39d   :  { %v354_v49 = vadd.f32 %v353_v48, %v352_v46  ;;  %v14081_v46 = vpack.c.bf16 %v636_v42, %v635_v41  ;;  %v637_v48 = vld [vmem:[#allocation2 + $0xb0] sm:$0xf] }
 0x39f   :  { %v355_v50 = vrot.slane %v354_v49, 2 }
 0x3a1   :  { %v356_v51 = vadd.f32 %v355_v50, %v354_v49  ;;  %v721_v49 = vld [vmem:[#allocation2 + $0xd8] sm:$0xf] }
 0x3a2   :  { %v547_v50 = vld [vmem:[#allocation2 + $0x78] sm:$0x1] }
 0x3a3   :  { %v357_v52 = vrot.slane %v356_v51, 1 }
 0x3a5   :  { %v358_v53 = vadd.f32 %v357_v52, %v356_v51 }
 0x3a7   :  { %v359_v54 = vmul.f32 0.125, %v358_v53 }
 0x3a9   :  { %v360_v55 = vsub.f32 %v348_v45, %v359_v54  ;;  %v720_v45 = vld [vmem:[#allocation2 + $0xd0] sm:$0xff] }
 0x3aa   :  { %v14087_v47 = vpack.c.bf16 %v720_v45, %v719_v44 }
 0x3ab   :  { %v361_v56 = vmul.f32 %v360_v55, %v360_v55 }
 0x3ad   :  { %v362_v57 = vsel %vm181_vm4, %v361_v56, 0.0 }
 0x3ae   :  { %v363_v58 = vrot.slane %v362_v57, 4 }
 0x3b0   :  { %v364_v59 = vadd.f32 %v363_v58, %v362_v57  ;;  %v628_v57 = vlaneseq }
 0x3b2   :  { %v365_v60 = vrot.slane %v364_v59, 2  ;;  %v14463_v58 = vshrl.u32 %v628_v57, 7 }
 0x3b4   :  { %v366_v61 = vadd.f32 %v365_v60, %v364_v59  ;;  %v14466_v59 = vsub.s32 0, %v14463_v58 }
 0x3b6   :  { %v367_v62 = vrot.slane %v366_v61, 1 }
 0x3b8   :  { %v368_v63 = vadd.f32 %v367_v62, %v366_v61  ;;  %v627_v61 = vld [vmem:[#allocation2 + $0x80] sm:$0xff]  ;;  %v715_v62 = vld [vmem:[#allocation2 + $0x88] sm:$0xff] }
 0x3ba   :  { %v369_v1 = vmul.f32 0.125, %v368_v63 }
 0x3bc   :  { %v370_v3 = vadd.f32 1e-05, %v369_v1 }
 0x3be   :  { %14200 = vrsqrt.f32 %v370_v3 }
 0x3c8   :  { %v14201_v4 = vpop.eup %14200 }
 0x3c9   :  { %v372_v5 = vmul.f32 %v14201_v4, %v360_v55  ;;  %v801_v4 = vand.u32 127, %v628_v57 }
 0x3cb   :  { %v373_v6 = vsel %vm181_vm4, %v372_v5, 0.0  ;;  %vm802_vm9 = vcmp.eq.s32.totalorder %v14463_v58, %v801_v4  ;;  %v14487_v45 = vsub.s32 %v801_v4, %v14463_v58 }
 0x3cc   :  { %v374_v7 = vrot.slane %v373_v6, 4  ;;  %v13547_v5 = vsel %vm802_vm9, 1.0, %v14345_v0 }
 0x3cd   :  { %v813_v19 = vmul.f32 %v13547_v5, %v14398_v2  ;;  %v805_v28 = vsub.f32 1.0, %v13547_v5 }
 0x3ce   :  { %v375_v8 = vadd.f32 %v374_v7, %v373_v6 }
 0x3cf   :  { %v814_v21 = vsel %vm28_vm1, %v813_v19, 0.0 }
 0x3d0   :  { %v376_v10 = vrot.slane %v375_v8, 2  ;;  %v817_v36 = vrot.slane %v814_v21, 4 }
 0x3d2   :  { %v377_v11 = vadd.f32 %v376_v10, %v375_v8  ;;  %v818_v37 = vadd.f32 %v817_v36, %v814_v21 }
 0x3d4   :  { %v378_v12 = vrot.slane %v377_v11, 1  ;;  %v819_v38 = vrot.slane %v818_v37, 2 }
 0x3d6   :  { %v379_v13 = vadd.f32 %v378_v12, %v377_v11 }
 0x3d8   :  { %13767 = vmatmul.mubr.msk.f32.vlgmr.msra.gmra.mrb[4].mxu0 %vm181_vm4, %v379_v13 }
 0x3d9   :  { %13780 = vmatprep.mubr.msk.f32.mxu0 %vm14346_vm0, %v14345_v0  ;;  %14076 = vmatpush3.bf16.msra.mxu0 %v14075_v30 }
 0x3da   :  { %14083 = vmatprep.subr.bf16.mxu0 %v14347_v9 }
 0x4ab   :  { %v454_v15 = vpop.f32.mrb[4].mxu0 }
 0x4ac   :  { %v14429_v16 = vadd.f32 %v454_v15, %v384_v14  ;;  %v13768_v17 = vpop.f32.mrb[5].mxu0 }
 0x4ae   :  { %v458_v18 = vmul.f32 0.5, %v14429_v16  ;;  %13523 = vst.msk [vmem:[%s17397_s2 + $0x2] sm:$0x1] %vm13522_vm5, %v14429_v16 }
 0x4b0   :  { %v459_v22 = vmul.f32 1.442695, %v458_v18 }
 0x4b2   :  { %14202 = vpow2.f32 %v459_v22 }
 0x4bc   :  { %v14203_v23 = vpop.eup %14202 }
 0x4bd   :  { %462 = vrot.lane.b32.xlu0 %v14203_v23, %s14348_s4 }
 0x52f   :  { %v463_v25 = vpop.permute.xlu0 %462 }
 0x530   :  { %v465_v26 = vmul.f32 %v463_v25, %v27_v24 }
 0x532   :  { %v466_v27 = vadd.f32 %v465_v26, %v14429_v16 }
 0x534   :  { %13774 = vmatmul.mubr.msk.f32.vlgmr.msra.gmra.mrb[4].mxu1 %vm470_vm6, %v466_v27 }
 0x535   :  { %13793 = vmatprep.mubr.msk.f32.mxu1 %vm14346_vm0, %v14345_v0  ;;  %14079 = vmatpush3.bf16.msra.mxu1 %v14078_v39  ;;  %v820_v39 = vadd.f32 %v819_v38, %v818_v37 }
 0x536   :  { %14080 = vmatprep.subr.bf16.mxu1 %v14347_v9 }
 0x537   :  { %v821_v40 = vrot.slane %v820_v39, 1 }
 0x539   :  { %14082 = vmatpush3.bf16.msra.mxu1 %v14081_v46  ;;  %v822_v42 = vadd.f32 %v821_v40, %v820_v39 }
 0x53a   :  { %13791 = vmatprep.subr.mxu1 %v14345_v0 }
 0x53d   :  { %13792 = vmatpush3.msk.msra.mxu1 %vm107_vm2, %v637_v48 }
 0x53e   :  { %13809 = vmatprep.subr.mxu1 %v14345_v0 }
 0x607   :  { %v540_v32 = vpop.f32.mrb[4].mxu1 }
 0x608   :  { %v541_v33 = vadd.f32 %v540_v32, %v469_v31  ;;  %v13775_v34 = vpop.f32.mrb[5].mxu1 }
 0x60a   :  { %v544_v35 = vmax.f32 %v541_v33, 0.0 }
 0x60c   :  { %13781 = vmatmul.mubr.msk.f32.vlgmr.msra.gmra.mrb[6].mxu0 %vm470_vm6, %v544_v35  ;;  %v839_v35 = vsel %vm28_vm1, %v14398_v2, 0.0 }
 0x60d   :  { %13806 = vmatprep.mubr.msk.f32.mxu0 %vm14346_vm0, %v14345_v0  ;;  %14085 = vmatpush3.bf16.msra.mxu0 %v14084_v43 }
 0x60e   :  { %14086 = vmatprep.subr.bf16.mxu0 %v14347_v9 }
 0x611   :  { %14088 = vmatpush3.bf16.msra.mxu0 %v14087_v47 }
 0x612   :  { %13804 = vmatprep.subr.mxu0 %v14345_v0 }
 0x615   :  { %13805 = vmatpush3.msk.msra.mxu0 %vm107_vm2, %v721_v49  ;;  %vm877_vm2 = vcmask 1047559  }
 0x616   :  { %13814 = vmatprep.subr.mxu0 %v14345_v0 }
 0x6df   :  { %v617_v51 = vpop.f32.mrb[6].mxu0 }
 0x6e0   :  { %v14456_v9 = vadd.f32 %v617_v51, %v547_v50  ;;  %v13782_v52 = vpop.f32.mrb[7].mxu0 }
 0x6e2   :  { %v621_v53 = vsub.f32 0.0, %v14456_v9  ;;  %13515 = vst.msk [vmem:[%s17397_s2] sm:$0x1] %vm13514_vm7, %v14456_v9 }
 0x6e4   :  { %v622_v54 = vmul.f32 1.442695, %v621_v53 }
 0x6e6   :  { %14204 = vpow2.f32 %v622_v54 }
 0x6f0   :  { %v14205_v55 = vpop.eup %14204 }
 0x6f1   :  { %v624_v56 = vadd.f32 1.0, %v14205_v55 }
 0x6f3   :  { %14206 = vrcp.f32 %v624_v56 }
 0x6fd   :  { %v14207_v60 = vpop.eup %14206 }
 0x6fe   :  { %v631_v63 = vrot.slane %v14207_v60, %v14466_v59 }
 0x700   :  { %v632_v1 = vmul.f32 %v631_v63, %v627_v61  ;;  %v716_v3 = vmul.f32 %v715_v62, %v631_v63 }
 0x702   :  { %13794 = vmatmul.mubr.msk.f32.vlgmr.msra.gmra.mrb[6].mxu1 %vm638_vm8, %v632_v1  ;;  %13807 = vmatmul.mubr.msk.f32.vlgmr.msra.gmra.mrb[8].mxu0 %vm638_vm8, %v716_v3 }
 0x703   :  { %13811 = vmatprep.mubr.msk.f32.mxu1 %vm14346_vm0, %v14345_v0  ;;  %13816 = vmatprep.mubr.msk.f32.mxu0 %vm14346_vm0, %v14345_v0 }
 0x7d5   :  { %v711_v6 = vpop.f32.mrb[6].mxu1  ;;  %v794_v7 = vpop.f32.mrb[8].mxu0 }
 0x7d6   :  { %v806_v8 = vmul.f32 %v13547_v5, %v711_v6  ;;  %v810_v10 = vadd.f32 %v794_v7, %v711_v6  ;;  %v13795_v11 = vpop.f32.mrb[7].mxu1  ;;  %v13808_v12 = vpop.f32.mrb[9].mxu0 }
 0x7d8   :  { %v807_v13 = vsel %vm28_vm1, %v806_v8, 0.0 }
 0x7d9   :  { %808 = vadd.xlane.f32.xlu0 %v807_v13 }
 0x866   :  { %v809_v14 = vpop.xlane.xlu0 %808 }
 0x867   :  { %v811_v15 = vmul.f32 %v13547_v5, %v809_v14 }
 0x869   :  { %v812_v17 = vsub.f32 %v810_v10, %v811_v15 }
 0x86b   :  { %v823_v18 = vmul.f32 %v13547_v5, %v812_v17 }
 0x86d   :  { %v824_v20 = vsel %vm28_vm1, %v823_v18, 0.0  ;;  %v14349_v18 = vmov 1966171168  }
 0x86e   :  { %825 = vadd.xlane.f32.xlu1 %v824_v20  ;;  %v827_v22 = vrot.slane %v824_v20, 4  ;;  %v971_v19 = vunpack.c.l.s4 %v14349_v18 }
 0x870   :  { %v828_v23 = vadd.f32 %v827_v22, %v824_v20  ;;  %v972_v20 = vunpack.c.0.s8 %v971_v19 }
 0x872   :  { %815 = vadd.xlane.f32.xlu1 %v814_v21  ;;  %v829_v24 = vrot.slane %v828_v23, 2  ;;  %v14503_v21 = vsub.s32 %v972_v20, %v14463_v58 }
 0x874   :  { %v830_v25 = vadd.f32 %v829_v24, %v828_v23 }
 0x876   :  { %v831_v26 = vrot.slane %v830_v25, 1 }
 0x878   :  { %v832_v29 = vadd.f32 %v831_v26, %v830_v25 }
 0x8fb   :  { %v826_v27 = vpop.xlane.xlu1 %825 }
 0x8fc   :  { %v836_v30 = vmul.f32 %v826_v27, %v812_v17 }
 0x8fe   :  { %v837_v31 = vmul.f32 %v836_v30, %v832_v29 }
 0x8ff   :  { %v816_v41 = vpop.xlane.xlu1 %815 }
 0x900   :  { %v14479_v32 = vmul.f32 %v837_v31, %v805_v28  ;;  %v833_v43 = vmul.f32 %v816_v41, %v14398_v2  ;;  %v842_v2 = vsel %vm28_vm1, %v812_v17, 0.0  ;;  %v854_v62 = vmul.f32 %v832_v29, %v816_v41 }
 0x901   :  { %v843_v49 = vrot.slane %v842_v2, 4 }
 0x902   :  { %v856_v33 = vmul.f32 0.125, %v14479_v32  ;;  %v834_v44 = vmul.f32 %v833_v43, %v822_v42 }
 0x903   :  { %v844_v50 = vadd.f32 %v843_v49, %v842_v2 }
 0x904   :  { %v857_v34 = vsel %vm28_vm1, %v856_v33, -inf  ;;  %v14489_v46 = vmul.f32 %v834_v44, %v805_v28 }
 0x905   :  { %858 = vmax.xlane.f32.xlu1 %v857_v34  ;;  %v845_v51 = vrot.slane %v844_v50, 2 }
 0x907   :  { %v846_v52 = vadd.f32 %v845_v51, %v844_v50 }
 0x909   :  { %840 = vadd.xlane.f32.xlu1 %v839_v35  ;;  %v847_v53 = vrot.slane %v846_v52, 1 }
 0x90b   :  { %v848_v55 = vadd.f32 %v847_v53, %v846_v52 }
 0x992   :  { %v859_v47 = vpop.xlane.xlu1 %858 }
 0x993   :  { %v865_v48 = vrot.slane %v859_v47, %v14487_v45 }
 0x995   :  { %13810 = vmatpush3.msra.mxu1 %v865_v48 }
 0x996   :  { %13812 = vmatmul.mubr.msk.f32.vlgmr.msra.gmra.mrb[8].mxu1 %vm28_vm1, %v14489_v46  ;;  %13819 = vmatprep.subr.mxu1 %v14345_v0  ;;  %v841_v54 = vpop.xlane.xlu1 %840 }
 0x997   :  { %13821 = vmatprep.mubr.msk.f32.mxu1 %vm14346_vm0, %v14345_v0  ;;  %v849_v56 = vsub.f32 %v841_v54, %v848_v55 }
 0x999   :  { %v850_v57 = vand.u32 2147483647, %v849_v56 }
 0x99b   :  { %v851_v60 = vadd.f32 1.0, %v850_v57 }
 0x99d   :  { %14208 = vrcp.f32 %v851_v60 }
 0x9a7   :  { %v14209_v61 = vpop.eup %14208 }
 0x9a8   :  { %v14498_v63 = vmul.f32 %v14209_v61, %v854_v62 }
 0x9aa   :  { %v860_v1 = vmul.f32 0.125, %v14498_v63 }
 0xa69   :  { %v949_v3 = vpop.f32.mrb[8].mxu1 }
 0xa6a   :  { %v953_v4 = vadd.f32 %v949_v3, %v860_v1  ;;  %v13813_v5 = vpop.f32.mrb[9].mxu1 }
 0xa6c   :  { %v954_v6 = vmul.f32 %v953_v4, %v953_v4 }
 0xa6e   :  { %v955_v7 = vsel %vm28_vm1, %v954_v6, 0.0 }
 0xa6f   :  { %956 = vadd.xlane.f32.xlu1 %v955_v7 }
 0xafc   :  { %v957_v8 = vpop.xlane.xlu1 %956 }
 0xafd   :  { %v958_v10 = vrot.slane %v957_v8, 4 }
 0xaff   :  { %v959_v11 = vadd.f32 %v958_v10, %v957_v8 }
 0xb01   :  { %v960_v12 = vrot.slane %v959_v11, 2 }
 0xb03   :  { %v961_v13 = vadd.f32 %v960_v12, %v959_v11 }
 0xb05   :  { %v962_v14 = vrot.slane %v961_v13, 1 }
 0xb07   :  { %v963_v15 = vadd.f32 %v962_v14, %v961_v13 }
 0xb09   :  { %14089 = vpush %v963_v15 }
 0xb3a   :  { %s14090_s8 = spop %14089 }
 0xb3b   :  { %v965_v17 = vstv %s14090_s8 }
 0xb3c   :  { %14210 = vrsqrt.f32 %v965_v17 }
 0xb46   :  { %v14211_v22 = vpop.eup %14210 }
 0xb47   :  { %v14505_v23 = vmul.f32 %v14211_v22, %v953_v4 }
 0xb49   :  { %v976_v24 = vrot.slane %v14505_v23, %v14503_v21  ;;  %v969_v25 = vcombine.high %v14505_v23, %v14505_v23 }
 0xb4b   :  { %v992_v26 = vrot.slane %v976_v24, %v14503_v21  ;;  %v983_v27 = vrot.slane %v969_v25, %v14503_v21  ;;  %v984_v28 = vcombine.high %v976_v24, %v976_v24 }
 0xb4d   :  { %v1021_v29 = vrot.slane %v992_v26, %v14466_v59  ;;  %v999_v30 = vrot.slane %v983_v27, %v14503_v21  ;;  %v1006_v58 = vrot.slane %v984_v28, %v14503_v21  ;;  %v1014_v31 = vcombine.high %v992_v26, %v992_v26 }
 0xb4e   :  { %v985_v39 = vcombine.high %v983_v27, %v983_v27 }
 0xb4f   :  { %v1058_v33 = vmul.f32 %v1021_v29, %v14479_v32  ;;  %v1037_v34 = vrot.slane %v999_v30, %v14466_v59  ;;  %v1025_v35 = vrot.slane %v1006_v58, %v14466_v59  ;;  %v1015_v36 = vcombine.high %v999_v30, %v999_v30 }
 0xb50   :  { %v1029_v37 = vrot.slane %v1014_v31, %v14466_v59  ;;  %v1016_v38 = vcombine.high %v1006_v58, %v1006_v58  ;;  %v1013_v50 = vrot.slane %v985_v39, %v14503_v21  ;;  %v1090_v30 = vmul.f32 %v14505_v23, %v14498_v63 }
 0xb51   :  { %v1066_v40 = vsel %vm28_vm1, %v1058_v33, -inf  ;;  %v1062_v41 = vmul.f32 %v1037_v34, %v14479_v32  ;;  %v1059_v42 = vmul.f32 %v1025_v35, %v14479_v32  ;;  %v1045_v43 = vrot.slane %v1015_v36, %v14466_v59 }
 0xb52   :  { %1067 = vmax.xlane.f32.xlu1 %v1066_v40  ;;  %v1060_v2 = vmul.f32 %v1029_v37, %v14479_v32  ;;  %v1033_v49 = vrot.slane %v1016_v38, %v14466_v59  ;;  %v1041_v54 = vrot.slane %v1013_v50, %v14466_v59  ;;  %v1017_v55 = vcombine.high %v1013_v50, %v1013_v50 }
 0xb53   :  { %v1078_v44 = vsel %vm28_vm1, %v1062_v41, -inf  ;;  %v1064_v47 = vmul.f32 %v1045_v43, %v14479_v32  ;;  %v1069_v48 = vsel %vm28_vm1, %v1059_v42, -inf }
 0xb54   :  { %1079 = vmax.xlane.f32.xlu0 %v1078_v44  ;;  %v1072_v52 = vsel %vm28_vm1, %v1060_v2, -inf  ;;  %v1061_v53 = vmul.f32 %v1033_v49, %v14479_v32  ;;  %v1063_v57 = vmul.f32 %v1041_v54, %v14479_v32  ;;  %v1049_v60 = vrot.slane %v1017_v55, %v14466_v59 }
 0xb55   :  { %v1084_v51 = vsel %vm28_vm1, %v1064_v47, -inf }
 0xb56   :  { %1070 = vmax.xlane.f32.xlu1 %v1069_v48  ;;  %v1075_v56 = vsel %vm28_vm1, %v1061_v53, -inf  ;;  %v1081_v61 = vsel %vm28_vm1, %v1063_v57, -inf  ;;  %v1065_v62 = vmul.f32 %v1049_v60, %v14479_v32 }
 0xb58   :  { %1085 = vmax.xlane.f32.xlu0 %v1084_v51  ;;  %v1087_v1 = vsel %vm28_vm1, %v1065_v62, -inf }
 0xb5a   :  { %1073 = vmax.xlane.f32.xlu1 %v1072_v52 }
 0xb5e   :  { %1076 = vmax.xlane.f32.xlu1 %v1075_v56 }
 0xb62   :  { %1082 = vmax.xlane.f32.xlu1 %v1081_v61 }
 0xb66   :  { %1088 = vmax.xlane.f32.xlu1 %v1087_v1 }
 0xbdf   :  { %v1068_v3 = vpop.xlane.xlu1 %1067 }
 0xbe0   :  { %v1102_v8 = vrot.slane %v1068_v3, %v14487_v45 }
 0xbe1   :  { %v1080_v10 = vpop.xlane.xlu0 %1079 }
 0xbe2   :  { %v1118_v17 = vrot.slane %v1080_v10, %v14487_v45 }
 0xbe3   :  { %v1071_v4 = vpop.xlane.xlu1 %1070 }
 0xbe4   :  { %v1106_v6 = vrot.slane %v1071_v4, %v14487_v45 }
 0xbe5   :  { %v1086_v19 = vpop.xlane.xlu0 %1085 }
 0xbe6   :  { %v1131_v12 = vsel %vm866_vm10, %v1106_v6, %v1102_v8  ;;  %v1126_v25 = vrot.slane %v1086_v19, %v14487_v45 }
 0xbe7   :  { %v1074_v5 = vpop.xlane.xlu1 %1073 }
 0xbe8   :  { %v1110_v7 = vrot.slane %v1074_v5, %v14487_v45 }
 0xbea   :  { %v1132_v14 = vsel %vm867_vm11, %v1110_v7, %v1131_v12 }
 0xbeb   :  { %v1077_v11 = vpop.xlane.xlu1 %1076 }
 0xbec   :  { %v1114_v13 = vrot.slane %v1077_v11, %v14487_v45 }
 0xbee   :  { %v1133_v15 = vsel %vm869_vm12, %v1114_v13, %v1132_v14 }
 0xbef   :  { %v1083_v18 = vpop.xlane.xlu1 %1082  ;;  %v1134_v22 = vsel %vm871_vm13, %v1118_v17, %v1133_v15 }
 0xbf0   :  { %v1122_v20 = vrot.slane %v1083_v18, %v14487_v45 }
 0xbf2   :  { %v1135_v24 = vsel %vm873_vm14, %v1122_v20, %v1134_v22 }
 0xbf3   :  { %v1089_v26 = vpop.xlane.xlu1 %1088  ;;  %v1136_v28 = vsel %vm875_vm15, %v1126_v25, %v1135_v24 }
 0xbf4   :  { %v1130_v27 = vrot.slane %v1089_v26, %v14487_v45 }
 0xbf6   :  { %v1137_v29 = vsel %vm877_vm2, %v1130_v27, %v1136_v28 }
 0xbf7   :  { %13815 = vmatpush3.msra.mxu0 %v1137_v29 }
 0xbf8   :  { %13817 = vmatmul.mubr.msk.f32.vlgmr.msra.gmra.mrb[10].mxu0 %vm28_vm1, %v14489_v46  ;;  %13824 = vmatprep.subr.mxu0 %v14345_v0 }
 0xbf9   :  { %13826 = vmatprep.mubr.msk.f32.mxu0 %vm14346_vm0, %v14345_v0 }
 0xccb   :  { %v1205_v58 = vpop.f32.mrb[10].mxu0 }
 0xccc   :  { %v1209_v31 = vadd.f32 %v1205_v58, %v1090_v30  ;;  %v13818_v33 = vpop.f32.mrb[11].mxu0 }
 0xcce   :  { %v1210_v34 = vmul.f32 %v1209_v31, %v1209_v31 }
 0xcd0   :  { %v1211_v35 = vsel %vm28_vm1, %v1210_v34, 0.0 }
 0xcd1   :  { %1212 = vadd.xlane.f32.xlu0 %v1211_v35 }
 0xd5e   :  { %v1213_v36 = vpop.xlane.xlu0 %1212 }
 0xd5f   :  { %v1214_v37 = vrot.slane %v1213_v36, 4 }
 0xd61   :  { %v1215_v38 = vadd.f32 %v1214_v37, %v1213_v36 }
 0xd63   :  { %v1216_v39 = vrot.slane %v1215_v38, 2 }
 0xd65   :  { %v1217_v40 = vadd.f32 %v1216_v39, %v1215_v38 }
 0xd67   :  { %v1218_v41 = vrot.slane %v1217_v40, 1 }
 0xd69   :  { %v1219_v42 = vadd.f32 %v1218_v41, %v1217_v40 }
 0xd6b   :  { %14091 = vpush %v1219_v42 }
 0xd9c   :  { %s14092_s9 = spop %14091 }
 0xd9d   :  { %v1221_v43 = vstv %s14092_s9 }
 0xd9e   :  { %14212 = vrsqrt.f32 %v1221_v43 }
 0xda8   :  { %v14213_v44 = vpop.eup %14212 }
 0xda9   :  { %v14563_v23 = vmul.f32 %v14213_v44, %v1209_v31 }
 0xdab   :  { %v1232_v47 = vrot.slane %v14563_v23, %v14503_v21  ;;  %v1225_v48 = vcombine.high %v14563_v23, %v14563_v23 }
 0xdad   :  { %v1248_v2 = vrot.slane %v1232_v47, %v14503_v21  ;;  %v1240_v49 = vcombine.high %v1232_v47, %v1232_v47  ;;  %v1239_v50 = vrot.slane %v1225_v48, %v14503_v21 }
 0xdaf   :  { %v1277_v51 = vrot.slane %v1248_v2, %v14466_v59  ;;  %v1262_v52 = vrot.slane %v1240_v49, %v14503_v21  ;;  %v1270_v53 = vcombine.high %v1248_v2, %v1248_v2  ;;  %v1255_v54 = vrot.slane %v1239_v50, %v14503_v21 }
 0xdb0   :  { %v1241_v55 = vcombine.high %v1239_v50, %v1239_v50 }
 0xdb1   :  { %v1314_v56 = vmul.f32 %v1277_v51, %v14479_v32  ;;  %v1281_v57 = vrot.slane %v1262_v52, %v14466_v59  ;;  %v1285_v60 = vrot.slane %v1270_v53, %v14466_v59  ;;  %v1272_v61 = vcombine.high %v1262_v52, %v1262_v52 }
 0xdb2   :  { %v1293_v62 = vrot.slane %v1255_v54, %v14466_v59  ;;  %v1269_v1 = vrot.slane %v1241_v55, %v14503_v21  ;;  %v1271_v3 = vcombine.high %v1255_v54, %v1255_v54  ;;  %v1346_v52 = vmul.f32 %v14563_v23, %v14498_v63 }
 0xdb3   :  { %v1322_v4 = vsel %vm28_vm1, %v1314_v56, -inf  ;;  %v1315_v5 = vmul.f32 %v1281_v57, %v14479_v32  ;;  %v1316_v6 = vmul.f32 %v1285_v60, %v14479_v32  ;;  %v1289_v7 = vrot.slane %v1272_v61, %v14466_v59 }
 0xdb4   :  { %1323 = vmax.xlane.f32.xlu1 %v1322_v4  ;;  %v1297_v11 = vrot.slane %v1269_v1, %v14466_v59  ;;  %v1273_v12 = vcombine.high %v1269_v1, %v1269_v1  ;;  %v1318_v14 = vmul.f32 %v1293_v62, %v14479_v32  ;;  %v1301_v15 = vrot.slane %v1271_v3, %v14466_v59 }
 0xdb5   :  { %v1325_v8 = vsel %vm28_vm1, %v1315_v5, -inf  ;;  %v1317_v10 = vmul.f32 %v1289_v7, %v14479_v32  ;;  %v1328_v13 = vsel %vm28_vm1, %v1316_v6, -inf }
 0xdb6   :  { %1326 = vmax.xlane.f32.xlu0 %v1325_v8  ;;  %v1319_v18 = vmul.f32 %v1297_v11, %v14479_v32  ;;  %v1305_v19 = vrot.slane %v1273_v12, %v14466_v59  ;;  %v1334_v20 = vsel %vm28_vm1, %v1318_v14, -inf  ;;  %v1320_v22 = vmul.f32 %v1301_v15, %v14479_v32 }
 0xdb7   :  { %v1331_v17 = vsel %vm28_vm1, %v1317_v10, -inf }
 0xdb8   :  { %1329 = vmax.xlane.f32.xlu1 %v1328_v13  ;;  %v1337_v24 = vsel %vm28_vm1, %v1319_v18, -inf  ;;  %v1321_v25 = vmul.f32 %v1305_v19, %v14479_v32  ;;  %v1340_v26 = vsel %vm28_vm1, %v1320_v22, -inf }
 0xdba   :  { %1332 = vmax.xlane.f32.xlu0 %v1331_v17  ;;  %v1343_v27 = vsel %vm28_vm1, %v1321_v25, -inf }
 0xdbc   :  { %1335 = vmax.xlane.f32.xlu1 %v1334_v20 }
 0xdbe   :  { %1338 = vmax.xlane.f32.xlu0 %v1337_v24 }
 0xdc0   :  { %1341 = vmax.xlane.f32.xlu1 %v1340_v26 }
 0xdc2   :  { %1344 = vmax.xlane.f32.xlu0 %v1343_v27 }
 0xe41   :  { %v1324_v28 = vpop.xlane.xlu1 %1323 }
 0xe42   :  { %v1358_v30 = vrot.slane %v1324_v28, %v14487_v45 }
 0xe43   :  { %v1327_v29 = vpop.xlane.xlu0 %1326 }
 0xe44   :  { %v1362_v58 = vrot.slane %v1327_v29, %v14487_v45 }
 0xe45   :  { %v1330_v31 = vpop.xlane.xlu1 %1329 }
 0xe46   :  { %v1387_v33 = vsel %vm866_vm10, %v1362_v58, %v1358_v30  ;;  %v1366_v34 = vrot.slane %v1330_v31, %v14487_v45 }
 0xe47   :  { %v1333_v35 = vpop.xlane.xlu0 %1332 }
 0xe48   :  { %v1388_v36 = vsel %vm867_vm11, %v1366_v34, %v1387_v33  ;;  %v1370_v37 = vrot.slane %v1333_v35, %v14487_v45 }
 0xe49   :  { %v1336_v38 = vpop.xlane.xlu1 %1335 }
 0xe4a   :  { %v1389_v39 = vsel %vm869_vm12, %v1370_v37, %v1388_v36  ;;  %v1374_v40 = vrot.slane %v1336_v38, %v14487_v45 }
 0xe4b   :  { %v1339_v41 = vpop.xlane.xlu0 %1338 }
 0xe4c   :  { %v1390_v42 = vsel %vm871_vm13, %v1374_v40, %v1389_v39  ;;  %v1378_v43 = vrot.slane %v1339_v41, %v14487_v45 }
 0xe4d   :  { %v1342_v44 = vpop.xlane.xlu1 %1341 }
 0xe4e   :  { %v1391_v47 = vsel %vm873_vm14, %v1378_v43, %v1390_v42  ;;  %v1382_v48 = vrot.slane %v1342_v44, %v14487_v45 }
 0xe4f   :  { %v1345_v2 = vpop.xlane.xlu0 %1344 }
 0xe50   :  { %v1386_v49 = vrot.slane %v1345_v2, %v14487_v45  ;;  %v1392_v50 = vsel %vm875_vm15, %v1382_v48, %v1391_v47 }
 0xe52   :  { %v1393_v51 = vsel %vm877_vm2, %v1386_v49, %v1392_v50 }
 0xe53   :  { %13820 = vmatpush3.msra.mxu1 %v1393_v51 }
 0xe54   :  { %13822 = vmatmul.mubr.msk.f32.vlgmr.msra.gmra.mrb[10].mxu1 %vm28_vm1, %v14489_v46  ;;  %13829 = vmatprep.subr.mxu1 %v14345_v0 }
 0xe55   :  { %13831 = vmatprep.mubr.msk.f32.mxu1 %vm14346_vm0, %v14345_v0 }
 0xf27   :  { %v1461_v53 = vpop.f32.mrb[10].mxu1 }
 0xf28   :  { %v1465_v54 = vadd.f32 %v1461_v53, %v1346_v52  ;;  %v13823_v55 = vpop.f32.mrb[11].mxu1 }
 0xf2a   :  { %v1466_v56 = vmul.f32 %v1465_v54, %v1465_v54 }
 0xf2c   :  { %v1467_v57 = vsel %vm28_vm1, %v1466_v56, 0.0 }
 0xf2d   :  { %1468 = vadd.xlane.f32.xlu1 %v1467_v57 }
 0xfba   :  { %v1469_v60 = vpop.xlane.xlu1 %1468 }
 0xfbb   :  { %v1470_v61 = vrot.slane %v1469_v60, 4 }
 0xfbd   :  { %v1471_v62 = vadd.f32 %v1470_v61, %v1469_v60 }
 0xfbf   :  { %v1472_v1 = vrot.slane %v1471_v62, 2 }
 0xfc1   :  { %v1473_v3 = vadd.f32 %v1472_v1, %v1471_v62 }
 0xfc3   :  { %v1474_v4 = vrot.slane %v1473_v3, 1 }
 0xfc5   :  { %v1475_v5 = vadd.f32 %v1474_v4, %v1473_v3 }
 0xfc7   :  { %14093 = vpush %v1475_v5 }
 0xff8   :  { %s14094_s10 = spop %14093 }
 0xff9   :  { %v1477_v0 = vstv %s14094_s10 }
 0xffa   :  { %14214 = vrsqrt.f32 %v1477_v0 }
0x1004   :  { %v14215_v6 = vpop.eup %14214 }
0x1005   :  { %v14621_v23 = vmul.f32 %v14215_v6, %v1465_v54 }
0x1007   :  { %v1488_v7 = vrot.slane %v14621_v23, %v14503_v21  ;;  %v1481_v8 = vcombine.high %v14621_v23, %v14621_v23 }
0x1009   :  { %v1504_v10 = vrot.slane %v1488_v7, %v14503_v21  ;;  %v1496_v11 = vcombine.high %v1488_v7, %v1488_v7  ;;  %v1495_v12 = vrot.slane %v1481_v8, %v14503_v21 }
0x100b   :  { %v1533_v13 = vrot.slane %v1504_v10, %v14466_v59  ;;  %v1518_v14 = vrot.slane %v1496_v11, %v14503_v21  ;;  %v1526_v15 = vcombine.high %v1504_v10, %v1504_v10  ;;  %v1511_v17 = vrot.slane %v1495_v12, %v14503_v21 }
0x100c   :  { %v1497_v18 = vcombine.high %v1495_v12, %v1495_v12 }
0x100d   :  { %v1570_v19 = vmul.f32 %v1533_v13, %v14479_v32  ;;  %v1537_v20 = vrot.slane %v1518_v14, %v14466_v59  ;;  %v1541_v22 = vrot.slane %v1526_v15, %v14466_v59  ;;  %v1528_v24 = vcombine.high %v1518_v14, %v1518_v14  ;;  %v14676_v13 = vld [vmem:[%s17397_s2 + $0x8] sm:$0xff] }
0x100e   :  { %v1549_v25 = vrot.slane %v1511_v17, %v14466_v59  ;;  %v1525_v26 = vrot.slane %v1497_v18, %v14503_v21  ;;  %v1527_v27 = vcombine.high %v1511_v17, %v1511_v17  ;;  %v1602_v14 = vmul.f32 %v14621_v23, %v14498_v63 }
0x100f   :  { %v1578_v28 = vsel %vm28_vm1, %v1570_v19, -inf  ;;  %v1571_v29 = vmul.f32 %v1537_v20, %v14479_v32  ;;  %v1572_v30 = vmul.f32 %v1541_v22, %v14479_v32  ;;  %v1545_v58 = vrot.slane %v1528_v24, %v14466_v59 }
0x1010   :  { %1579 = vmax.xlane.f32.xlu0 %v1578_v28  ;;  %v1553_v34 = vrot.slane %v1525_v26, %v14466_v59  ;;  %v1529_v35 = vcombine.high %v1525_v26, %v1525_v26  ;;  %v1574_v37 = vmul.f32 %v1549_v25, %v14479_v32  ;;  %v1557_v38 = vrot.slane %v1527_v27, %v14466_v59 }
0x1011   :  { %v1581_v31 = vsel %vm28_vm1, %v1571_v29, -inf  ;;  %v1573_v33 = vmul.f32 %v1545_v58, %v14479_v32  ;;  %v1584_v36 = vsel %vm28_vm1, %v1572_v30, -inf }
0x1012   :  { %1582 = vmax.xlane.f32.xlu1 %v1581_v31  ;;  %v1575_v40 = vmul.f32 %v1553_v34, %v14479_v32  ;;  %v1561_v41 = vrot.slane %v1529_v35, %v14466_v59  ;;  %v1590_v42 = vsel %vm28_vm1, %v1574_v37, -inf  ;;  %v1576_v43 = vmul.f32 %v1557_v38, %v14479_v32 }
0x1013   :  { %v1587_v39 = vsel %vm28_vm1, %v1573_v33, -inf }
0x1014   :  { %1585 = vmax.xlane.f32.xlu0 %v1584_v36  ;;  %v1593_v44 = vsel %vm28_vm1, %v1575_v40, -inf  ;;  %v1577_v47 = vmul.f32 %v1561_v41, %v14479_v32  ;;  %v1596_v48 = vsel %vm28_vm1, %v1576_v43, -inf }
0x1016   :  { %1588 = vmax.xlane.f32.xlu1 %v1587_v39  ;;  %v1599_v2 = vsel %vm28_vm1, %v1577_v47, -inf }
0x1018   :  { %1591 = vmax.xlane.f32.xlu0 %v1590_v42 }
0x101a   :  { %1594 = vmax.xlane.f32.xlu1 %v1593_v44 }
0x101c   :  { %1597 = vmax.xlane.f32.xlu0 %v1596_v48 }
0x101e   :  { %1600 = vmax.xlane.f32.xlu1 %v1599_v2 }
0x109d   :  { %v1580_v49 = vpop.xlane.xlu0 %1579 }
0x109e   :  { %v1614_v51 = vrot.slane %v1580_v49, %v14487_v45 }
0x109f   :  { %v1583_v50 = vpop.xlane.xlu1 %1582 }
0x10a0   :  { %v1618_v52 = vrot.slane %v1583_v50, %v14487_v45 }
0x10a1   :  { %v1586_v53 = vpop.xlane.xlu0 %1585 }
0x10a2   :  { %v1643_v54 = vsel %vm866_vm10, %v1618_v52, %v1614_v51  ;;  %v1622_v55 = vrot.slane %v1586_v53, %v14487_v45 }
0x10a3   :  { %v1589_v56 = vpop.xlane.xlu1 %1588 }
0x10a4   :  { %v1644_v57 = vsel %vm867_vm11, %v1622_v55, %v1643_v54  ;;  %v1626_v60 = vrot.slane %v1589_v56, %v14487_v45 }
0x10a5   :  { %v1592_v61 = vpop.xlane.xlu0 %1591 }
0x10a6   :  { %v1645_v62 = vsel %vm869_vm12, %v1626_v60, %v1644_v57  ;;  %v1630_v1 = vrot.slane %v1592_v61, %v14487_v45 }
0x10a7   :  { %v1595_v3 = vpop.xlane.xlu1 %1594 }
0x10a8   :  { %v1646_v4 = vsel %vm871_vm13, %v1630_v1, %v1645_v62  ;;  %v1634_v5 = vrot.slane %v1595_v3, %v14487_v45 }
0x10a9   :  { %v1598_v0 = vpop.xlane.xlu0 %1597 }
0x10aa   :  { %v1647_v6 = vsel %vm873_vm14, %v1634_v5, %v1646_v4  ;;  %v1638_v7 = vrot.slane %v1598_v0, %v14487_v45 }
0x10ab   :  { %v1601_v8 = vpop.xlane.xlu1 %1600 }
0x10ac   :  { %v1642_v10 = vrot.slane %v1601_v8, %v14487_v45  ;;  %v1648_v11 = vsel %vm875_vm15, %v1638_v7, %v1647_v6 }
0x10ae   :  { %v1649_v12 = vsel %vm877_vm2, %v1642_v10, %v1648_v11 }
0x10af   :  { %13825 = vmatpush3.msra.mxu0 %v1649_v12 }
0x10b0   :  { %13827 = vmatmul.mubr.msk.f32.vlgmr.msra.gmra.mrb[12].mxu0 %vm28_vm1, %v14489_v46  ;;  %13834 = vmatprep.subr.mxu0 %v14676_v13 }
0x10b1   :  { %13836 = vmatprep.mubr.msk.f32.mxu0 %vm14346_vm0, %v14676_v13 }
0x1183   :  { %v1717_v15 = vpop.f32.mrb[12].mxu0 }
0x1184   :  { %v1721_v17 = vadd.f32 %v1717_v15, %v1602_v14  ;;  %v13828_v18 = vpop.f32.mrb[13].mxu0 }
0x1186   :  { %v1722_v19 = vmul.f32 %v1721_v17, %v1721_v17 }
0x1188   :  { %v1723_v20 = vsel %vm28_vm1, %v1722_v19, 0.0 }
0x1189   :  { %1724 = vadd.xlane.f32.xlu0 %v1723_v20 }
0x1216   :  { %v1725_v22 = vpop.xlane.xlu0 %1724 }
0x1217   :  { %v1726_v24 = vrot.slane %v1725_v22, 4 }
0x1219   :  { %v1727_v25 = vadd.f32 %v1726_v24, %v1725_v22 }
0x121b   :  { %v1728_v26 = vrot.slane %v1727_v25, 2 }
0x121d   :  { %v1729_v27 = vadd.f32 %v1728_v26, %v1727_v25 }
0x121f   :  { %v1730_v28 = vrot.slane %v1729_v27, 1 }
0x1221   :  { %v1731_v29 = vadd.f32 %v1730_v28, %v1729_v27 }
0x1223   :  { %14095 = vpush %v1731_v29 }
0x1254   :  { %s14096_s13 = spop %14095 }
0x1255   :  { %v1733_v30 = vstv %s14096_s13 }
0x1256   :  { %14216 = vrsqrt.f32 %v1733_v30 }
0x1260   :  { %v14217_v58 = vpop.eup %14216 }
0x1261   :  { %v14684_v23 = vmul.f32 %v14217_v58, %v1721_v17 }
0x1263   :  { %v1744_v31 = vrot.slane %v14684_v23, %v14503_v21  ;;  %v1737_v33 = vcombine.high %v14684_v23, %v14684_v23 }
0x1265   :  { %v1760_v34 = vrot.slane %v1744_v31, %v14503_v21  ;;  %v1752_v35 = vcombine.high %v1744_v31, %v1744_v31  ;;  %v1751_v36 = vrot.slane %v1737_v33, %v14503_v21 }
0x1267   :  { %v1789_v37 = vrot.slane %v1760_v34, %v14466_v59  ;;  %v1774_v38 = vrot.slane %v1752_v35, %v14503_v21  ;;  %v1782_v39 = vcombine.high %v1760_v34, %v1760_v34  ;;  %v1767_v40 = vrot.slane %v1751_v36, %v14503_v21 }
0x1268   :  { %v1753_v41 = vcombine.high %v1751_v36, %v1751_v36 }
0x1269   :  { %v1826_v42 = vmul.f32 %v1789_v37, %v14479_v32  ;;  %v1793_v43 = vrot.slane %v1774_v38, %v14466_v59  ;;  %v1797_v44 = vrot.slane %v1782_v39, %v14466_v59  ;;  %v1784_v47 = vcombine.high %v1774_v38, %v1774_v38 }
0x126a   :  { %v1805_v48 = vrot.slane %v1767_v40, %v14466_v59  ;;  %v1781_v2 = vrot.slane %v1753_v41, %v14503_v21  ;;  %v1783_v49 = vcombine.high %v1767_v40, %v1767_v40  ;;  %v1858_v38 = vmul.f32 %v14684_v23, %v14498_v63 }
0x126b   :  { %v1834_v50 = vsel %vm28_vm1, %v1826_v42, -inf  ;;  %v1827_v51 = vmul.f32 %v1793_v43, %v14479_v32  ;;  %v1828_v52 = vmul.f32 %v1797_v44, %v14479_v32  ;;  %v1801_v53 = vrot.slane %v1784_v47, %v14466_v59 }
0x126c   :  { %1835 = vmax.xlane.f32.xlu1 %v1834_v50  ;;  %v1809_v56 = vrot.slane %v1781_v2, %v14466_v59  ;;  %v1785_v57 = vcombine.high %v1781_v2, %v1781_v2  ;;  %v1830_v61 = vmul.f32 %v1805_v48, %v14479_v32  ;;  %v1813_v62 = vrot.slane %v1783_v49, %v14466_v59 }
0x126d   :  { %v1837_v54 = vsel %vm28_vm1, %v1827_v51, -inf  ;;  %v1829_v55 = vmul.f32 %v1801_v53, %v14479_v32  ;;  %v1840_v60 = vsel %vm28_vm1, %v1828_v52, -inf }
0x126e   :  { %1838 = vmax.xlane.f32.xlu0 %v1837_v54  ;;  %v1831_v3 = vmul.f32 %v1809_v56, %v14479_v32  ;;  %v1817_v4 = vrot.slane %v1785_v57, %v14466_v59  ;;  %v1846_v5 = vsel %vm28_vm1, %v1830_v61, -inf  ;;  %v1832_v0 = vmul.f32 %v1813_v62, %v14479_v32 }
0x126f   :  { %v1843_v1 = vsel %vm28_vm1, %v1829_v55, -inf }
0x1270   :  { %1841 = vmax.xlane.f32.xlu1 %v1840_v60  ;;  %v1849_v6 = vsel %vm28_vm1, %v1831_v3, -inf  ;;  %v1833_v7 = vmul.f32 %v1817_v4, %v14479_v32  ;;  %v1852_v8 = vsel %vm28_vm1, %v1832_v0, -inf }
0x1272   :  { %1844 = vmax.xlane.f32.xlu0 %v1843_v1  ;;  %v1855_v10 = vsel %vm28_vm1, %v1833_v7, -inf }
0x1274   :  { %1847 = vmax.xlane.f32.xlu1 %v1846_v5 }
0x1276   :  { %1850 = vmax.xlane.f32.xlu0 %v1849_v6 }
0x1278   :  { %1853 = vmax.xlane.f32.xlu1 %v1852_v8 }
0x127a   :  { %1856 = vmax.xlane.f32.xlu0 %v1855_v10 }
0x12f9   :  { %v1836_v11 = vpop.xlane.xlu1 %1835 }
0x12fa   :  { %v1870_v14 = vrot.slane %v1836_v11, %v14487_v45 }
0x12fb   :  { %v1839_v12 = vpop.xlane.xlu0 %1838 }
0x12fc   :  { %v1874_v15 = vrot.slane %v1839_v12, %v14487_v45 }
0x12fd   :  { %v1842_v17 = vpop.xlane.xlu1 %1841 }
0x12fe   :  { %v1899_v18 = vsel %vm866_vm10, %v1874_v15, %v1870_v14  ;;  %v1878_v19 = vrot.slane %v1842_v17, %v14487_v45 }
0x12ff   :  { %v1845_v20 = vpop.xlane.xlu0 %1844 }
0x1300   :  { %v1900_v22 = vsel %vm867_vm11, %v1878_v19, %v1899_v18  ;;  %v1882_v24 = vrot.slane %v1845_v20, %v14487_v45 }
0x1301   :  { %v1848_v25 = vpop.xlane.xlu1 %1847 }
0x1302   :  { %v1901_v26 = vsel %vm869_vm12, %v1882_v24, %v1900_v22  ;;  %v1886_v27 = vrot.slane %v1848_v25, %v14487_v45 }
0x1303   :  { %v1851_v28 = vpop.xlane.xlu0 %1850 }
0x1304   :  { %v1902_v29 = vsel %vm871_vm13, %v1886_v27, %v1901_v26  ;;  %v1890_v30 = vrot.slane %v1851_v28, %v14487_v45 }
0x1305   :  { %v1854_v58 = vpop.xlane.xlu1 %1853 }
0x1306   :  { %v1903_v31 = vsel %vm873_vm14, %v1890_v30, %v1902_v29  ;;  %v1894_v33 = vrot.slane %v1854_v58, %v14487_v45 }
0x1307   :  { %v1857_v34 = vpop.xlane.xlu0 %1856 }
0x1308   :  { %v1898_v35 = vrot.slane %v1857_v34, %v14487_v45  ;;  %v1904_v36 = vsel %vm875_vm15, %v1894_v33, %v1903_v31 }
0x130a   :  { %v1905_v37 = vsel %vm877_vm2, %v1898_v35, %v1904_v36 }
0x130b   :  { %13830 = vmatpush3.msra.mxu1 %v1905_v37 }
0x130c   :  { %13832 = vmatmul.mubr.msk.f32.vlgmr.msra.gmra.mrb[12].mxu1 %vm28_vm1, %v14489_v46  ;;  %13839 = vmatprep.subr.mxu1 %v14676_v13 }
0x130d   :  { %13841 = vmatprep.mubr.msk.f32.mxu1 %vm14346_vm0, %v14676_v13 }
0x13df   :  { %v1973_v39 = vpop.f32.mrb[12].mxu1 }
0x13e0   :  { %v1977_v40 = vadd.f32 %v1973_v39, %v1858_v38  ;;  %v13833_v41 = vpop.f32.mrb[13].mxu1 }
0x13e2   :  { %v1978_v42 = vmul.f32 %v1977_v40, %v1977_v40 }
0x13e4   :  { %v1979_v43 = vsel %vm28_vm1, %v1978_v42, 0.0 }
0x13e5   :  { %1980 = vadd.xlane.f32.xlu1 %v1979_v43 }
0x1472   :  { %v1981_v44 = vpop.xlane.xlu1 %1980 }
0x1473   :  { %v1982_v47 = vrot.slane %v1981_v44, 4 }
0x1475   :  { %v1983_v48 = vadd.f32 %v1982_v47, %v1981_v44 }
0x1477   :  { %v1984_v2 = vrot.slane %v1983_v48, 2 }
0x1479   :  { %v1985_v49 = vadd.f32 %v1984_v2, %v1983_v48 }
0x147b   :  { %v1986_v50 = vrot.slane %v1985_v49, 1 }
0x147d   :  { %v1987_v51 = vadd.f32 %v1986_v50, %v1985_v49 }
0x147f   :  { %14097 = vpush %v1987_v51 }
0x14b0   :  { %s14098_s14 = spop %14097 }
0x14b1   :  { %v1989_v52 = vstv %s14098_s14 }
0x14b2   :  { %14218 = vrsqrt.f32 %v1989_v52 }
0x14bc   :  { %v14219_v53 = vpop.eup %14218 }
0x14bd   :  { %v14742_v23 = vmul.f32 %v14219_v53, %v1977_v40 }
0x14bf   :  { %v2000_v54 = vrot.slane %v14742_v23, %v14503_v21  ;;  %v1993_v55 = vcombine.high %v14742_v23, %v14742_v23 }
0x14c1   :  { %v2016_v56 = vrot.slane %v2000_v54, %v14503_v21  ;;  %v2008_v57 = vcombine.high %v2000_v54, %v2000_v54  ;;  %v2007_v60 = vrot.slane %v1993_v55, %v14503_v21 }
0x14c3   :  { %v2045_v61 = vrot.slane %v2016_v56, %v14466_v59  ;;  %v2030_v62 = vrot.slane %v2008_v57, %v14503_v21  ;;  %v2038_v1 = vcombine.high %v2016_v56, %v2016_v56  ;;  %v2023_v3 = vrot.slane %v2007_v60, %v14503_v21 }
0x14c4   :  { %v2009_v4 = vcombine.high %v2007_v60, %v2007_v60 }
0x14c5   :  { %v2082_v5 = vmul.f32 %v2045_v61, %v14479_v32  ;;  %v2049_v0 = vrot.slane %v2030_v62, %v14466_v59  ;;  %v2053_v6 = vrot.slane %v2038_v1, %v14466_v59  ;;  %v2040_v7 = vcombine.high %v2030_v62, %v2030_v62 }
0x14c6   :  { %v2061_v8 = vrot.slane %v2023_v3, %v14466_v59  ;;  %v2037_v10 = vrot.slane %v2009_v4, %v14503_v21  ;;  %v2039_v11 = vcombine.high %v2023_v3, %v2023_v3  ;;  %v2114_v62 = vmul.f32 %v14742_v23, %v14498_v63 }
0x14c7   :  { %v2090_v12 = vsel %vm28_vm1, %v2082_v5, -inf  ;;  %v2083_v14 = vmul.f32 %v2049_v0, %v14479_v32  ;;  %v2084_v15 = vmul.f32 %v2053_v6, %v14479_v32  ;;  %v2057_v17 = vrot.slane %v2040_v7, %v14466_v59 }
0x14c8   :  { %2091 = vmax.xlane.f32.xlu0 %v2090_v12  ;;  %v2065_v20 = vrot.slane %v2037_v10, %v14466_v59  ;;  %v2041_v22 = vcombine.high %v2037_v10, %v2037_v10  ;;  %v2086_v25 = vmul.f32 %v2061_v8, %v14479_v32  ;;  %v2069_v26 = vrot.slane %v2039_v11, %v14466_v59 }
0x14c9   :  { %v2093_v18 = vsel %vm28_vm1, %v2083_v14, -inf  ;;  %v2085_v19 = vmul.f32 %v2057_v17, %v14479_v32  ;;  %v2096_v24 = vsel %vm28_vm1, %v2084_v15, -inf }
0x14ca   :  { %2094 = vmax.xlane.f32.xlu1 %v2093_v18  ;;  %v2087_v28 = vmul.f32 %v2065_v20, %v14479_v32  ;;  %v2073_v29 = vrot.slane %v2041_v22, %v14466_v59  ;;  %v2102_v30 = vsel %vm28_vm1, %v2086_v25, -inf  ;;  %v2088_v58 = vmul.f32 %v2069_v26, %v14479_v32 }
0x14cb   :  { %v2099_v27 = vsel %vm28_vm1, %v2085_v19, -inf }
0x14cc   :  { %2097 = vmax.xlane.f32.xlu0 %v2096_v24  ;;  %v2105_v31 = vsel %vm28_vm1, %v2087_v28, -inf  ;;  %v2089_v33 = vmul.f32 %v2073_v29, %v14479_v32  ;;  %v2108_v34 = vsel %vm28_vm1, %v2088_v58, -inf }
0x14ce   :  { %2100 = vmax.xlane.f32.xlu1 %v2099_v27  ;;  %v2111_v35 = vsel %vm28_vm1, %v2089_v33, -inf }
0x14d0   :  { %2103 = vmax.xlane.f32.xlu0 %v2102_v30 }
0x14d2   :  { %2106 = vmax.xlane.f32.xlu1 %v2105_v31 }
0x14d4   :  { %2109 = vmax.xlane.f32.xlu0 %v2108_v34 }
0x14d6   :  { %2112 = vmax.xlane.f32.xlu1 %v2111_v35 }
0x1555   :  { %v2092_v36 = vpop.xlane.xlu0 %2091 }
0x1556   :  { %v2126_v38 = vrot.slane %v2092_v36, %v14487_v45 }
0x1557   :  { %v2095_v37 = vpop.xlane.xlu1 %2094 }
0x1558   :  { %v2130_v39 = vrot.slane %v2095_v37, %v14487_v45 }
0x1559   :  { %v2098_v40 = vpop.xlane.xlu0 %2097 }
0x155a   :  { %v2155_v41 = vsel %vm866_vm10, %v2130_v39, %v2126_v38  ;;  %v2134_v42 = vrot.slane %v2098_v40, %v14487_v45 }
0x155b   :  { %v2101_v43 = vpop.xlane.xlu1 %2100 }
0x155c   :  { %v2156_v44 = vsel %vm867_vm11, %v2134_v42, %v2155_v41  ;;  %v2138_v47 = vrot.slane %v2101_v43, %v14487_v45 }
0x155d   :  { %v2104_v48 = vpop.xlane.xlu0 %2103 }
0x155e   :  { %v2157_v2 = vsel %vm869_vm12, %v2138_v47, %v2156_v44  ;;  %v2142_v49 = vrot.slane %v2104_v48, %v14487_v45 }
0x155f   :  { %v2107_v50 = vpop.xlane.xlu1 %2106 }
0x1560   :  { %v2158_v51 = vsel %vm871_vm13, %v2142_v49, %v2157_v2  ;;  %v2146_v52 = vrot.slane %v2107_v50, %v14487_v45 }
0x1561   :  { %v2110_v53 = vpop.xlane.xlu0 %2109 }
0x1562   :  { %v2159_v54 = vsel %vm873_vm14, %v2146_v52, %v2158_v51  ;;  %v2150_v55 = vrot.slane %v2110_v53, %v14487_v45 }
0x1563   :  { %v2113_v56 = vpop.xlane.xlu1 %2112 }
0x1564   :  { %v2154_v57 = vrot.slane %v2113_v56, %v14487_v45  ;;  %v2160_v60 = vsel %vm875_vm15, %v2150_v55, %v2159_v54 }
0x1566   :  { %v2161_v61 = vsel %vm877_vm2, %v2154_v57, %v2160_v60 }
0x1567   :  { %13835 = vmatpush3.msra.mxu0 %v2161_v61 }
0x1568   :  { %13837 = vmatmul.mubr.msk.f32.vlgmr.msra.gmra.mrb[14].mxu0 %vm28_vm1, %v14489_v46  ;;  %13844 = vmatprep.subr.mxu0 %v14676_v13 }
0x1569   :  { %13846 = vmatprep.mubr.msk.f32.mxu0 %vm14346_vm0, %v14676_v13 }
0x163b   :  { %v2229_v1 = vpop.f32.mrb[14].mxu0 }
0x163c   :  { %v2233_v3 = vadd.f32 %v2229_v1, %v2114_v62  ;;  %v13838_v4 = vpop.f32.mrb[15].mxu0 }
0x163e   :  { %v2234_v5 = vmul.f32 %v2233_v3, %v2233_v3 }
0x1640   :  { %v2235_v0 = vsel %vm28_vm1, %v2234_v5, 0.0 }
0x1641   :  { %2236 = vadd.xlane.f32.xlu0 %v2235_v0 }
0x16ce   :  { %v2237_v6 = vpop.xlane.xlu0 %2236 }
0x16cf   :  { %v2238_v7 = vrot.slane %v2237_v6, 4 }
0x16d1   :  { %v2239_v8 = vadd.f32 %v2238_v7, %v2237_v6 }
0x16d3   :  { %v2240_v10 = vrot.slane %v2239_v8, 2 }
0x16d5   :  { %v2241_v11 = vadd.f32 %v2240_v10, %v2239_v8 }
0x16d7   :  { %v2242_v12 = vrot.slane %v2241_v11, 1 }
0x16d9   :  { %v2243_v14 = vadd.f32 %v2242_v12, %v2241_v11 }
0x16db   :  { %14099 = vpush %v2243_v14 }
0x170c   :  { %s14100_s15 = spop %14099 }
0x170d   :  { %v2245_v15 = vstv %s14100_s15  ;;  %s14350_s15 = smov 92  }
0x170e   :  { %14220 = vrsqrt.f32 %v2245_v15 }
0x1718   :  { %v14221_v17 = vpop.eup %14220 }
0x1719   :  { %v14800_v23 = vmul.f32 %v14221_v17, %v2233_v3 }
0x171b   :  { %v2256_v18 = vrot.slane %v14800_v23, %v14503_v21  ;;  %v2249_v19 = vcombine.high %v14800_v23, %v14800_v23 }
0x171d   :  { %v2272_v20 = vrot.slane %v2256_v18, %v14503_v21  ;;  %v2264_v22 = vcombine.high %v2256_v18, %v2256_v18  ;;  %v2263_v24 = vrot.slane %v2249_v19, %v14503_v21 }
0x171f   :  { %v2301_v25 = vrot.slane %v2272_v20, %v14466_v59  ;;  %v2286_v26 = vrot.slane %v2264_v22, %v14503_v21  ;;  %v2294_v27 = vcombine.high %v2272_v20, %v2272_v20  ;;  %v2279_v28 = vrot.slane %v2263_v24, %v14503_v21 }
0x1720   :  { %v2265_v29 = vcombine.high %v2263_v24, %v2263_v24 }
0x1721   :  { %v2338_v30 = vmul.f32 %v2301_v25, %v14479_v32  ;;  %v2305_v58 = vrot.slane %v2286_v26, %v14466_v59  ;;  %v2309_v31 = vrot.slane %v2294_v27, %v14466_v59  ;;  %v2296_v33 = vcombine.high %v2286_v26, %v2286_v26 }
0x1722   :  { %v2317_v34 = vrot.slane %v2279_v28, %v14466_v59  ;;  %v2293_v35 = vrot.slane %v2265_v29, %v14503_v21  ;;  %v2295_v36 = vcombine.high %v2279_v28, %v2279_v28  ;;  %v2370_v26 = vmul.f32 %v14800_v23, %v14498_v63 }
0x1723   :  { %v2346_v37 = vsel %vm28_vm1, %v2338_v30, -inf  ;;  %v2339_v38 = vmul.f32 %v2305_v58, %v14479_v32  ;;  %v2340_v39 = vmul.f32 %v2309_v31, %v14479_v32  ;;  %v2313_v40 = vrot.slane %v2296_v33, %v14466_v59 }
0x1724   :  { %2347 = vmax.xlane.f32.xlu1 %v2346_v37  ;;  %v2321_v43 = vrot.slane %v2293_v35, %v14466_v59  ;;  %v2297_v44 = vcombine.high %v2293_v35, %v2293_v35  ;;  %v2342_v48 = vmul.f32 %v2317_v34, %v14479_v32  ;;  %v2325_v2 = vrot.slane %v2295_v36, %v14466_v59 }
0x1725   :  { %v2349_v41 = vsel %vm28_vm1, %v2339_v38, -inf  ;;  %v2341_v42 = vmul.f32 %v2313_v40, %v14479_v32  ;;  %v2352_v47 = vsel %vm28_vm1, %v2340_v39, -inf }
0x1726   :  { %2350 = vmax.xlane.f32.xlu0 %v2349_v41  ;;  %v2343_v50 = vmul.f32 %v2321_v43, %v14479_v32  ;;  %v2329_v51 = vrot.slane %v2297_v44, %v14466_v59  ;;  %v2358_v52 = vsel %vm28_vm1, %v2342_v48, -inf  ;;  %v2344_v53 = vmul.f32 %v2325_v2, %v14479_v32 }
0x1727   :  { %v2355_v49 = vsel %vm28_vm1, %v2341_v42, -inf }
0x1728   :  { %2353 = vmax.xlane.f32.xlu1 %v2352_v47  ;;  %v2361_v54 = vsel %vm28_vm1, %v2343_v50, -inf  ;;  %v2345_v55 = vmul.f32 %v2329_v51, %v14479_v32  ;;  %v2364_v56 = vsel %vm28_vm1, %v2344_v53, -inf }
0x172a   :  { %2356 = vmax.xlane.f32.xlu0 %v2355_v49  ;;  %v2367_v57 = vsel %vm28_vm1, %v2345_v55, -inf }
0x172c   :  { %2359 = vmax.xlane.f32.xlu1 %v2358_v52 }
0x172e   :  { %2362 = vmax.xlane.f32.xlu0 %v2361_v54 }
0x1730   :  { %2365 = vmax.xlane.f32.xlu1 %v2364_v56 }
0x1732   :  { %2368 = vmax.xlane.f32.xlu0 %v2367_v57 }
0x17b1   :  { %v2348_v60 = vpop.xlane.xlu1 %2347 }
0x17b2   :  { %v2382_v62 = vrot.slane %v2348_v60, %v14487_v45 }
0x17b3   :  { %v2351_v61 = vpop.xlane.xlu0 %2350 }
0x17b4   :  { %v2386_v1 = vrot.slane %v2351_v61, %v14487_v45 }
0x17b5   :  { %v2354_v3 = vpop.xlane.xlu1 %2353 }
0x17b6   :  { %v2411_v4 = vsel %vm866_vm10, %v2386_v1, %v2382_v62  ;;  %v2390_v5 = vrot.slane %v2354_v3, %v14487_v45 }
0x17b7   :  { %v2357_v0 = vpop.xlane.xlu0 %2356 }
0x17b8   :  { %v2412_v6 = vsel %vm867_vm11, %v2390_v5, %v2411_v4  ;;  %v2394_v7 = vrot.slane %v2357_v0, %v14487_v45 }
0x17b9   :  { %v2360_v8 = vpop.xlane.xlu1 %2359 }
0x17ba   :  { %v2413_v10 = vsel %vm869_vm12, %v2394_v7, %v2412_v6  ;;  %v2398_v11 = vrot.slane %v2360_v8, %v14487_v45 }
0x17bb   :  { %v2363_v12 = vpop.xlane.xlu0 %2362 }
0x17bc   :  { %v2414_v14 = vsel %vm871_vm13, %v2398_v11, %v2413_v10  ;;  %v2402_v15 = vrot.slane %v2363_v12, %v14487_v45 }
0x17bd   :  { %v2366_v17 = vpop.xlane.xlu1 %2365 }
0x17be   :  { %v2415_v18 = vsel %vm873_vm14, %v2402_v15, %v2414_v14  ;;  %v2406_v19 = vrot.slane %v2366_v17, %v14487_v45 }
0x17bf   :  { %v2369_v20 = vpop.xlane.xlu0 %2368 }
0x17c0   :  { %v2410_v22 = vrot.slane %v2369_v20, %v14487_v45  ;;  %v2416_v24 = vsel %vm875_vm15, %v2406_v19, %v2415_v18 }
0x17c2   :  { %v2417_v25 = vsel %vm877_vm2, %v2410_v22, %v2416_v24 }
0x17c3   :  { %13840 = vmatpush3.msra.mxu1 %v2417_v25 }
0x17c4   :  { %13842 = vmatmul.mubr.msk.f32.vlgmr.msra.gmra.mrb[14].mxu1 %vm28_vm1, %v14489_v46  ;;  %13849 = vmatprep.subr.mxu1 %v14676_v13 }
0x17c5   :  { %13851 = vmatprep.mubr.msk.f32.mxu1 %vm14346_vm0, %v14676_v13 }
0x1897   :  { %v2485_v27 = vpop.f32.mrb[14].mxu1 }
0x1898   :  { %v2489_v28 = vadd.f32 %v2485_v27, %v2370_v26  ;;  %v13843_v29 = vpop.f32.mrb[15].mxu1 }
0x189a   :  { %v2490_v30 = vmul.f32 %v2489_v28, %v2489_v28 }
0x189c   :  { %v2491_v58 = vsel %vm28_vm1, %v2490_v30, 0.0 }
0x189d   :  { %2492 = vadd.xlane.f32.xlu1 %v2491_v58 }
0x192a   :  { %v2493_v31 = vpop.xlane.xlu1 %2492 }
0x192b   :  { %v2494_v33 = vrot.slane %v2493_v31, 4 }
0x192d   :  { %v2495_v34 = vadd.f32 %v2494_v33, %v2493_v31 }
0x192f   :  { %v2496_v35 = vrot.slane %v2495_v34, 2 }
0x1931   :  { %v2497_v36 = vadd.f32 %v2496_v35, %v2495_v34 }
0x1933   :  { %v2498_v37 = vrot.slane %v2497_v36, 1 }
0x1935   :  { %v2499_v38 = vadd.f32 %v2498_v37, %v2497_v36 }
0x1937   :  { %14101 = vpush %v2499_v38 }
0x1968   :  { %s14102_s16 = spop %14101 }
0x1969   :  { %v2501_v39 = vstv %s14102_s16 }
0x196a   :  { %14222 = vrsqrt.f32 %v2501_v39 }
0x1974   :  { %v14223_v40 = vpop.eup %14222 }
0x1975   :  { %v14858_v23 = vmul.f32 %v14223_v40, %v2489_v28 }
0x1977   :  { %v2512_v41 = vrot.slane %v14858_v23, %v14503_v21  ;;  %v2505_v42 = vcombine.high %v14858_v23, %v14858_v23 }
0x1979   :  { %v2528_v43 = vrot.slane %v2512_v41, %v14503_v21  ;;  %v2520_v44 = vcombine.high %v2512_v41, %v2512_v41  ;;  %v2519_v47 = vrot.slane %v2505_v42, %v14503_v21 }
0x197b   :  { %v2557_v48 = vrot.slane %v2528_v43, %v14466_v59  ;;  %v2542_v2 = vrot.slane %v2520_v44, %v14503_v21  ;;  %v2550_v49 = vcombine.high %v2528_v43, %v2528_v43  ;;  %v2535_v50 = vrot.slane %v2519_v47, %v14503_v21 }
0x197c   :  { %v2521_v51 = vcombine.high %v2519_v47, %v2519_v47 }
0x197d   :  { %v2594_v52 = vmul.f32 %v2557_v48, %v14479_v32  ;;  %v2561_v53 = vrot.slane %v2542_v2, %v14466_v59  ;;  %v2565_v54 = vrot.slane %v2550_v49, %v14466_v59  ;;  %v2552_v55 = vcombine.high %v2542_v2, %v2542_v2 }
0x197e   :  { %v2573_v56 = vrot.slane %v2535_v50, %v14466_v59  ;;  %v2549_v57 = vrot.slane %v2521_v51, %v14503_v21  ;;  %v2551_v60 = vcombine.high %v2535_v50, %v2535_v50  ;;  %v2626_v2 = vmul.f32 %v14858_v23, %v14498_v63 }
0x197f   :  { %v2602_v61 = vsel %vm28_vm1, %v2594_v52, -inf  ;;  %v2595_v62 = vmul.f32 %v2561_v53, %v14479_v32  ;;  %v2596_v1 = vmul.f32 %v2565_v54, %v14479_v32  ;;  %v2569_v3 = vrot.slane %v2552_v55, %v14466_v59 }
0x1980   :  { %2603 = vmax.xlane.f32.xlu0 %v2602_v61  ;;  %v2577_v0 = vrot.slane %v2549_v57, %v14466_v59  ;;  %v2553_v6 = vcombine.high %v2549_v57, %v2549_v57  ;;  %v2598_v8 = vmul.f32 %v2573_v56, %v14479_v32  ;;  %v2581_v10 = vrot.slane %v2551_v60, %v14466_v59 }
0x1981   :  { %v2605_v4 = vsel %vm28_vm1, %v2595_v62, -inf  ;;  %v2597_v5 = vmul.f32 %v2569_v3, %v14479_v32  ;;  %v2608_v7 = vsel %vm28_vm1, %v2596_v1, -inf }
0x1982   :  { %2606 = vmax.xlane.f32.xlu1 %v2605_v4  ;;  %v2599_v12 = vmul.f32 %v2577_v0, %v14479_v32  ;;  %v2585_v14 = vrot.slane %v2553_v6, %v14466_v59  ;;  %v2614_v15 = vsel %vm28_vm1, %v2598_v8, -inf  ;;  %v2600_v17 = vmul.f32 %v2581_v10, %v14479_v32 }
0x1983   :  { %v2611_v11 = vsel %vm28_vm1, %v2597_v5, -inf }
0x1984   :  { %2609 = vmax.xlane.f32.xlu0 %v2608_v7  ;;  %v2617_v18 = vsel %vm28_vm1, %v2599_v12, -inf  ;;  %v2601_v19 = vmul.f32 %v2585_v14, %v14479_v32  ;;  %v2620_v20 = vsel %vm28_vm1, %v2600_v17, -inf }
0x1986   :  { %2612 = vmax.xlane.f32.xlu1 %v2611_v11  ;;  %v2623_v22 = vsel %vm28_vm1, %v2601_v19, -inf }
0x1988   :  { %2615 = vmax.xlane.f32.xlu0 %v2614_v15 }
0x198a   :  { %2618 = vmax.xlane.f32.xlu1 %v2617_v18 }
0x198c   :  { %2621 = vmax.xlane.f32.xlu0 %v2620_v20 }
0x198e   :  { %2624 = vmax.xlane.f32.xlu1 %v2623_v22 }
0x1a0d   :  { %v2604_v24 = vpop.xlane.xlu0 %2603 }
0x1a0e   :  { %v2638_v26 = vrot.slane %v2604_v24, %v14487_v45 }
0x1a0f   :  { %v2607_v25 = vpop.xlane.xlu1 %2606 }
0x1a10   :  { %v2642_v27 = vrot.slane %v2607_v25, %v14487_v45 }
0x1a11   :  { %v2610_v28 = vpop.xlane.xlu0 %2609 }
0x1a12   :  { %v2667_v29 = vsel %vm866_vm10, %v2642_v27, %v2638_v26  ;;  %v2646_v30 = vrot.slane %v2610_v28, %v14487_v45 }
0x1a13   :  { %v2613_v58 = vpop.xlane.xlu1 %2612 }
0x1a14   :  { %v2668_v31 = vsel %vm867_vm11, %v2646_v30, %v2667_v29  ;;  %v2650_v33 = vrot.slane %v2613_v58, %v14487_v45 }
0x1a15   :  { %v2616_v34 = vpop.xlane.xlu0 %2615 }
0x1a16   :  { %v2669_v35 = vsel %vm869_vm12, %v2650_v33, %v2668_v31  ;;  %v2654_v36 = vrot.slane %v2616_v34, %v14487_v45 }
0x1a17   :  { %v2619_v37 = vpop.xlane.xlu1 %2618 }
0x1a18   :  { %v2670_v38 = vsel %vm871_vm13, %v2654_v36, %v2669_v35  ;;  %v2658_v39 = vrot.slane %v2619_v37, %v14487_v45 }
0x1a19   :  { %v2622_v40 = vpop.xlane.xlu0 %2621 }
0x1a1a   :  { %v2671_v41 = vsel %vm873_vm14, %v2658_v39, %v2670_v38  ;;  %v2662_v42 = vrot.slane %v2622_v40, %v14487_v45 }
0x1a1b   :  { %v2625_v43 = vpop.xlane.xlu1 %2624 }
0x1a1c   :  { %v2666_v44 = vrot.slane %v2625_v43, %v14487_v45  ;;  %v2672_v47 = vsel %vm875_vm15, %v2662_v42, %v2671_v41 }
0x1a1e   :  { %v2673_v48 = vsel %vm877_vm2, %v2666_v44, %v2672_v47 }
0x1a1f   :  { %13845 = vmatpush3.msra.mxu0 %v2673_v48 }
0x1a20   :  { %13847 = vmatmul.mubr.msk.f32.vlgmr.msra.gmra.mrb[16].mxu0 %vm28_vm1, %v14489_v46  ;;  %13854 = vmatprep.subr.mxu0 %v14676_v13 }
0x1a21   :  { %13856 = vmatprep.mubr.msk.f32.mxu0 %vm14346_vm0, %v14676_v13 }
0x1af3   :  { %v2741_v49 = vpop.f32.mrb[16].mxu0 }
0x1af4   :  { %v2745_v50 = vadd.f32 %v2741_v49, %v2626_v2  ;;  %v13848_v51 = vpop.f32.mrb[17].mxu0 }
0x1af6   :  { %v2746_v52 = vmul.f32 %v2745_v50, %v2745_v50 }
0x1af8   :  { %v2747_v53 = vsel %vm28_vm1, %v2746_v52, 0.0 }
0x1af9   :  { %2748 = vadd.xlane.f32.xlu0 %v2747_v53 }
0x1b86   :  { %v2749_v54 = vpop.xlane.xlu0 %2748 }
0x1b87   :  { %v2750_v55 = vrot.slane %v2749_v54, 4 }
0x1b89   :  { %v2751_v56 = vadd.f32 %v2750_v55, %v2749_v54 }
0x1b8b   :  { %v2752_v57 = vrot.slane %v2751_v56, 2 }
0x1b8d   :  { %v2753_v60 = vadd.f32 %v2752_v57, %v2751_v56 }
0x1b8f   :  { %v2754_v61 = vrot.slane %v2753_v60, 1 }
0x1b91   :  { %v2755_v62 = vadd.f32 %v2754_v61, %v2753_v60 }
0x1b93   :  { %14103 = vpush %v2755_v62 }
0x1bc4   :  { %s14104_s17 = spop %14103 }
0x1bc5   :  { %v2757_v1 = vstv %s14104_s17 }
0x1bc6   :  { %14224 = vrsqrt.f32 %v2757_v1 }
0x1bd0   :  { %v14225_v3 = vpop.eup %14224 }
0x1bd1   :  { %v14916_v23 = vmul.f32 %v14225_v3, %v2745_v50 }
0x1bd3   :  { %v2768_v4 = vrot.slane %v14916_v23, %v14503_v21  ;;  %v2761_v5 = vcombine.high %v14916_v23, %v14916_v23 }
0x1bd5   :  { %v2784_v0 = vrot.slane %v2768_v4, %v14503_v21  ;;  %v2776_v6 = vcombine.high %v2768_v4, %v2768_v4  ;;  %v2775_v7 = vrot.slane %v2761_v5, %v14503_v21 }
0x1bd7   :  { %v2813_v8 = vrot.slane %v2784_v0, %v14466_v59  ;;  %v2798_v10 = vrot.slane %v2776_v6, %v14503_v21  ;;  %v2806_v11 = vcombine.high %v2784_v0, %v2784_v0  ;;  %v2791_v12 = vrot.slane %v2775_v7, %v14503_v21 }
0x1bd8   :  { %v2777_v14 = vcombine.high %v2775_v7, %v2775_v7 }
0x1bd9   :  { %v2850_v15 = vmul.f32 %v2813_v8, %v14479_v32  ;;  %v2817_v17 = vrot.slane %v2798_v10, %v14466_v59  ;;  %v2821_v18 = vrot.slane %v2806_v11, %v14466_v59  ;;  %v2808_v19 = vcombine.high %v2798_v10, %v2798_v10 }
0x1bda   :  { %v2829_v20 = vrot.slane %v2791_v12, %v14466_v59  ;;  %v2805_v22 = vrot.slane %v2777_v14, %v14503_v21  ;;  %v2807_v24 = vcombine.high %v2791_v12, %v2791_v12  ;;  %v2882_v10 = vmul.f32 %v14916_v23, %v14498_v63 }
0x1bdb   :  { %v2858_v25 = vsel %vm28_vm1, %v2850_v15, -inf  ;;  %v2851_v26 = vmul.f32 %v2817_v17, %v14479_v32  ;;  %v2852_v27 = vmul.f32 %v2821_v18, %v14479_v32  ;;  %v2825_v28 = vrot.slane %v2808_v19, %v14466_v59 }
0x1bdc   :  { %2859 = vmax.xlane.f32.xlu1 %v2858_v25  ;;  %v2833_v58 = vrot.slane %v2805_v22, %v14466_v59  ;;  %v2809_v31 = vcombine.high %v2805_v22, %v2805_v22  ;;  %v2854_v34 = vmul.f32 %v2829_v20, %v14479_v32  ;;  %v2837_v35 = vrot.slane %v2807_v24, %v14466_v59 }
0x1bdd   :  { %v2861_v29 = vsel %vm28_vm1, %v2851_v26, -inf  ;;  %v2853_v30 = vmul.f32 %v2825_v28, %v14479_v32  ;;  %v2864_v33 = vsel %vm28_vm1, %v2852_v27, -inf }
0x1bde   :  { %2862 = vmax.xlane.f32.xlu0 %v2861_v29  ;;  %v2855_v37 = vmul.f32 %v2833_v58, %v14479_v32  ;;  %v2841_v38 = vrot.slane %v2809_v31, %v14466_v59  ;;  %v2870_v39 = vsel %vm28_vm1, %v2854_v34, -inf  ;;  %v2856_v40 = vmul.f32 %v2837_v35, %v14479_v32 }
0x1bdf   :  { %v2867_v36 = vsel %vm28_vm1, %v2853_v30, -inf }
0x1be0   :  { %2865 = vmax.xlane.f32.xlu1 %v2864_v33  ;;  %v2873_v41 = vsel %vm28_vm1, %v2855_v37, -inf  ;;  %v2857_v42 = vmul.f32 %v2841_v38, %v14479_v32  ;;  %v2876_v43 = vsel %vm28_vm1, %v2856_v40, -inf }
0x1be2   :  { %2868 = vmax.xlane.f32.xlu0 %v2867_v36  ;;  %v2879_v44 = vsel %vm28_vm1, %v2857_v42, -inf }
0x1be4   :  { %2871 = vmax.xlane.f32.xlu1 %v2870_v39 }
0x1be6   :  { %2874 = vmax.xlane.f32.xlu0 %v2873_v41 }
0x1be8   :  { %2877 = vmax.xlane.f32.xlu1 %v2876_v43 }
0x1bea   :  { %2880 = vmax.xlane.f32.xlu0 %v2879_v44 }
0x1c69   :  { %v2860_v47 = vpop.xlane.xlu1 %2859 }
0x1c6a   :  { %v2894_v2 = vrot.slane %v2860_v47, %v14487_v45 }
0x1c6b   :  { %v2863_v48 = vpop.xlane.xlu0 %2862 }
0x1c6c   :  { %v2898_v49 = vrot.slane %v2863_v48, %v14487_v45 }
0x1c6d   :  { %v2866_v50 = vpop.xlane.xlu1 %2865 }
0x1c6e   :  { %v2923_v51 = vsel %vm866_vm10, %v2898_v49, %v2894_v2  ;;  %v2902_v52 = vrot.slane %v2866_v50, %v14487_v45 }
0x1c6f   :  { %v2869_v53 = vpop.xlane.xlu0 %2868 }
0x1c70   :  { %v2924_v54 = vsel %vm867_vm11, %v2902_v52, %v2923_v51  ;;  %v2906_v55 = vrot.slane %v2869_v53, %v14487_v45 }
0x1c71   :  { %v2872_v56 = vpop.xlane.xlu1 %2871 }
0x1c72   :  { %v2925_v57 = vsel %vm869_vm12, %v2906_v55, %v2924_v54  ;;  %v2910_v60 = vrot.slane %v2872_v56, %v14487_v45 }
0x1c73   :  { %v2875_v61 = vpop.xlane.xlu0 %2874 }
0x1c74   :  { %v2926_v62 = vsel %vm871_vm13, %v2910_v60, %v2925_v57  ;;  %v2914_v1 = vrot.slane %v2875_v61, %v14487_v45 }
0x1c75   :  { %v2878_v3 = vpop.xlane.xlu1 %2877 }
0x1c76   :  { %v2927_v4 = vsel %vm873_vm14, %v2914_v1, %v2926_v62  ;;  %v2918_v5 = vrot.slane %v2878_v3, %v14487_v45 }
0x1c77   :  { %v2881_v0 = vpop.xlane.xlu0 %2880 }
0x1c78   :  { %v2922_v6 = vrot.slane %v2881_v0, %v14487_v45  ;;  %v2928_v7 = vsel %vm875_vm15, %v2918_v5, %v2927_v4 }
0x1c7a   :  { %v2929_v8 = vsel %vm877_vm2, %v2922_v6, %v2928_v7 }
0x1c7b   :  { %13850 = vmatpush3.msra.mxu1 %v2929_v8 }
0x1c7c   :  { %13852 = vmatmul.mubr.msk.f32.vlgmr.msra.gmra.mrb[16].mxu1 %vm28_vm1, %v14489_v46  ;;  %13859 = vmatprep.subr.mxu1 %v14676_v13 }
0x1c7d   :  { %13861 = vmatprep.mubr.msk.f32.mxu1 %vm14346_vm0, %v14676_v13 }
0x1d4f   :  { %v2997_v11 = vpop.f32.mrb[16].mxu1 }
0x1d50   :  { %v3001_v12 = vadd.f32 %v2997_v11, %v2882_v10  ;;  %v13853_v14 = vpop.f32.mrb[17].mxu1 }
0x1d52   :  { %v3002_v15 = vmul.f32 %v3001_v12, %v3001_v12 }
0x1d54   :  { %v3003_v17 = vsel %vm28_vm1, %v3002_v15, 0.0 }
0x1d55   :  { %3004 = vadd.xlane.f32.xlu1 %v3003_v17 }
0x1de2   :  { %v3005_v18 = vpop.xlane.xlu1 %3004 }
0x1de3   :  { %v3006_v19 = vrot.slane %v3005_v18, 4 }
0x1de5   :  { %v3007_v20 = vadd.f32 %v3006_v19, %v3005_v18 }
0x1de7   :  { %v3008_v22 = vrot.slane %v3007_v20, 2 }
0x1de9   :  { %v3009_v24 = vadd.f32 %v3008_v22, %v3007_v20 }
0x1deb   :  { %v3010_v25 = vrot.slane %v3009_v24, 1 }
0x1ded   :  { %v3011_v26 = vadd.f32 %v3010_v25, %v3009_v24 }
0x1def   :  { %14105 = vpush %v3011_v26 }
0x1e20   :  { %s14106_s18 = spop %14105 }
0x1e21   :  { %v3013_v13 = vstv %s14106_s18 }
0x1e22   :  { %14226 = vrsqrt.f32 %v3013_v13 }
0x1e2c   :  { %v14227_v27 = vpop.eup %14226 }
0x1e2d   :  { %v14974_v23 = vmul.f32 %v14227_v27, %v3001_v12 }
0x1e2f   :  { %v3024_v28 = vrot.slane %v14974_v23, %v14503_v21  ;;  %v3017_v29 = vcombine.high %v14974_v23, %v14974_v23 }
0x1e31   :  { %v3040_v30 = vrot.slane %v3024_v28, %v14503_v21  ;;  %v3032_v58 = vcombine.high %v3024_v28, %v3024_v28  ;;  %v3031_v31 = vrot.slane %v3017_v29, %v14503_v21 }
0x1e33   :  { %v3069_v33 = vrot.slane %v3040_v30, %v14466_v59  ;;  %v3054_v34 = vrot.slane %v3032_v58, %v14503_v21  ;;  %v3062_v35 = vcombine.high %v3040_v30, %v3040_v30  ;;  %v3047_v36 = vrot.slane %v3031_v31, %v14503_v21 }
0x1e34   :  { %v3033_v37 = vcombine.high %v3031_v31, %v3031_v31 }
0x1e35   :  { %v3106_v38 = vmul.f32 %v3069_v33, %v14479_v32  ;;  %v3073_v39 = vrot.slane %v3054_v34, %v14466_v59  ;;  %v3077_v40 = vrot.slane %v3062_v35, %v14466_v59  ;;  %v3064_v41 = vcombine.high %v3054_v34, %v3054_v34  ;;  %v15029_v33 = vld [vmem:[%s17397_s2 + $0x8] sm:$0xff] }
0x1e36   :  { %v3085_v42 = vrot.slane %v3047_v36, %v14466_v59  ;;  %v3061_v43 = vrot.slane %v3033_v37, %v14503_v21  ;;  %v3063_v44 = vcombine.high %v3047_v36, %v3047_v36  ;;  %v3138_v34 = vmul.f32 %v14974_v23, %v14498_v63 }
0x1e37   :  { %v3114_v47 = vsel %vm28_vm1, %v3106_v38, -inf  ;;  %v3107_v48 = vmul.f32 %v3073_v39, %v14479_v32  ;;  %v3108_v2 = vmul.f32 %v3077_v40, %v14479_v32  ;;  %v3081_v49 = vrot.slane %v3064_v41, %v14466_v59 }
0x1e38   :  { %3115 = vmax.xlane.f32.xlu0 %v3114_v47  ;;  %v3089_v52 = vrot.slane %v3061_v43, %v14466_v59  ;;  %v3065_v53 = vcombine.high %v3061_v43, %v3061_v43  ;;  %v3110_v55 = vmul.f32 %v3085_v42, %v14479_v32  ;;  %v3093_v56 = vrot.slane %v3063_v44, %v14466_v59 }
0x1e39   :  { %v3117_v50 = vsel %vm28_vm1, %v3107_v48, -inf  ;;  %v3109_v51 = vmul.f32 %v3081_v49, %v14479_v32  ;;  %v3120_v54 = vsel %vm28_vm1, %v3108_v2, -inf }
0x1e3a   :  { %3118 = vmax.xlane.f32.xlu1 %v3117_v50  ;;  %v3111_v60 = vmul.f32 %v3089_v52, %v14479_v32  ;;  %v3097_v61 = vrot.slane %v3065_v53, %v14466_v59  ;;  %v3126_v62 = vsel %vm28_vm1, %v3110_v55, -inf  ;;  %v3112_v1 = vmul.f32 %v3093_v56, %v14479_v32 }
0x1e3b   :  { %v3123_v57 = vsel %vm28_vm1, %v3109_v51, -inf }
0x1e3c   :  { %3121 = vmax.xlane.f32.xlu0 %v3120_v54  ;;  %v3129_v3 = vsel %vm28_vm1, %v3111_v60, -inf  ;;  %v3113_v4 = vmul.f32 %v3097_v61, %v14479_v32  ;;  %v3132_v5 = vsel %vm28_vm1, %v3112_v1, -inf }
0x1e3e   :  { %3124 = vmax.xlane.f32.xlu1 %v3123_v57  ;;  %v3135_v0 = vsel %vm28_vm1, %v3113_v4, -inf }
0x1e40   :  { %3127 = vmax.xlane.f32.xlu0 %v3126_v62 }
0x1e42   :  { %3130 = vmax.xlane.f32.xlu1 %v3129_v3 }
0x1e44   :  { %3133 = vmax.xlane.f32.xlu0 %v3132_v5 }
0x1e46   :  { %3136 = vmax.xlane.f32.xlu1 %v3135_v0 }
0x1ec5   :  { %v3116_v6 = vpop.xlane.xlu0 %3115 }
0x1ec6   :  { %v3150_v8 = vrot.slane %v3116_v6, %v14487_v45 }
0x1ec7   :  { %v3119_v7 = vpop.xlane.xlu1 %3118 }
0x1ec8   :  { %v3154_v10 = vrot.slane %v3119_v7, %v14487_v45 }
0x1ec9   :  { %v3122_v11 = vpop.xlane.xlu0 %3121 }
0x1eca   :  { %v3179_v12 = vsel %vm866_vm10, %v3154_v10, %v3150_v8  ;;  %v3158_v14 = vrot.slane %v3122_v11, %v14487_v45 }
0x1ecb   :  { %v3125_v15 = vpop.xlane.xlu1 %3124 }
0x1ecc   :  { %v3180_v17 = vsel %vm867_vm11, %v3158_v14, %v3179_v12  ;;  %v3162_v18 = vrot.slane %v3125_v15, %v14487_v45 }
0x1ecd   :  { %v3128_v19 = vpop.xlane.xlu0 %3127 }
0x1ece   :  { %v3181_v20 = vsel %vm869_vm12, %v3162_v18, %v3180_v17  ;;  %v3166_v22 = vrot.slane %v3128_v19, %v14487_v45 }
0x1ecf   :  { %v3131_v24 = vpop.xlane.xlu1 %3130 }
0x1ed0   :  { %v3182_v25 = vsel %vm871_vm13, %v3166_v22, %v3181_v20  ;;  %v3170_v26 = vrot.slane %v3131_v24, %v14487_v45 }
0x1ed1   :  { %v3134_v13 = vpop.xlane.xlu0 %3133 }
0x1ed2   :  { %v3183_v27 = vsel %vm873_vm14, %v3170_v26, %v3182_v25  ;;  %v3174_v28 = vrot.slane %v3134_v13, %v14487_v45 }
0x1ed3   :  { %v3137_v29 = vpop.xlane.xlu1 %3136 }
0x1ed4   :  { %v3178_v30 = vrot.slane %v3137_v29, %v14487_v45  ;;  %v3184_v58 = vsel %vm875_vm15, %v3174_v28, %v3183_v27 }
0x1ed6   :  { %v3185_v31 = vsel %vm877_vm2, %v3178_v30, %v3184_v58 }
0x1ed7   :  { %13855 = vmatpush3.msra.mxu0 %v3185_v31 }
0x1ed8   :  { %13857 = vmatmul.mubr.msk.f32.vlgmr.msra.gmra.mrb[18].mxu0 %vm28_vm1, %v14489_v46  ;;  %13864 = vmatprep.subr.mxu0 %v15029_v33 }
0x1ed9   :  { %13866 = vmatprep.mubr.msk.f32.mxu0 %vm14346_vm0, %v15029_v33 }
0x1fab   :  { %v3253_v35 = vpop.f32.mrb[18].mxu0 }
0x1fac   :  { %v3257_v36 = vadd.f32 %v3253_v35, %v3138_v34  ;;  %v13858_v37 = vpop.f32.mrb[19].mxu0 }
0x1fae   :  { %v3258_v38 = vmul.f32 %v3257_v36, %v3257_v36 }
0x1fb0   :  { %v3259_v39 = vsel %vm28_vm1, %v3258_v38, 0.0 }
0x1fb1   :  { %3260 = vadd.xlane.f32.xlu0 %v3259_v39 }
0x203e   :  { %v3261_v40 = vpop.xlane.xlu0 %3260 }
0x203f   :  { %v3262_v41 = vrot.slane %v3261_v40, 4 }
0x2041   :  { %v3263_v42 = vadd.f32 %v3262_v41, %v3261_v40 }
0x2043   :  { %v3264_v43 = vrot.slane %v3263_v42, 2 }
0x2045   :  { %v3265_v44 = vadd.f32 %v3264_v43, %v3263_v42 }
0x2047   :  { %v3266_v47 = vrot.slane %v3265_v44, 1 }
0x2049   :  { %v3267_v48 = vadd.f32 %v3266_v47, %v3265_v44 }
0x204b   :  { %14107 = vpush %v3267_v48 }
0x207c   :  { %s14108_s21 = spop %14107 }
0x207d   :  { %v3269_v2 = vstv %s14108_s21 }
0x207e   :  { %14228 = vrsqrt.f32 %v3269_v2 }
0x2088   :  { %v14229_v49 = vpop.eup %14228 }
0x2089   :  { %v15037_v23 = vmul.f32 %v14229_v49, %v3257_v36 }
0x208b   :  { %v3280_v50 = vrot.slane %v15037_v23, %v14503_v21  ;;  %v3273_v51 = vcombine.high %v15037_v23, %v15037_v23 }
0x208d   :  { %v3296_v52 = vrot.slane %v3280_v50, %v14503_v21  ;;  %v3288_v53 = vcombine.high %v3280_v50, %v3280_v50  ;;  %v3287_v54 = vrot.slane %v3273_v51, %v14503_v21 }
0x208f   :  { %v3325_v55 = vrot.slane %v3296_v52, %v14466_v59  ;;  %v3310_v56 = vrot.slane %v3288_v53, %v14503_v21  ;;  %v3318_v57 = vcombine.high %v3296_v52, %v3296_v52  ;;  %v3303_v60 = vrot.slane %v3287_v54, %v14503_v21 }
0x2090   :  { %v3289_v61 = vcombine.high %v3287_v54, %v3287_v54 }
0x2091   :  { %v3362_v62 = vmul.f32 %v3325_v55, %v14479_v32  ;;  %v3329_v1 = vrot.slane %v3310_v56, %v14466_v59  ;;  %v3333_v3 = vrot.slane %v3318_v57, %v14466_v59  ;;  %v3320_v4 = vcombine.high %v3310_v56, %v3310_v56 }
0x2092   :  { %v3341_v5 = vrot.slane %v3303_v60, %v14466_v59  ;;  %v3317_v0 = vrot.slane %v3289_v61, %v14503_v21  ;;  %v3319_v6 = vcombine.high %v3303_v60, %v3303_v60  ;;  %v3394_v56 = vmul.f32 %v15037_v23, %v14498_v63 }
0x2093   :  { %v3370_v7 = vsel %vm28_vm1, %v3362_v62, -inf  ;;  %v3363_v8 = vmul.f32 %v3329_v1, %v14479_v32  ;;  %v3364_v10 = vmul.f32 %v3333_v3, %v14479_v32  ;;  %v3337_v11 = vrot.slane %v3320_v4, %v14466_v59 }
0x2094   :  { %3371 = vmax.xlane.f32.xlu1 %v3370_v7  ;;  %v3345_v15 = vrot.slane %v3317_v0, %v14466_v59  ;;  %v3321_v17 = vcombine.high %v3317_v0, %v3317_v0  ;;  %v3366_v19 = vmul.f32 %v3341_v5, %v14479_v32  ;;  %v3349_v20 = vrot.slane %v3319_v6, %v14466_v59 }
0x2095   :  { %v3373_v12 = vsel %vm28_vm1, %v3363_v8, -inf  ;;  %v3365_v14 = vmul.f32 %v3337_v11, %v14479_v32  ;;  %v3376_v18 = vsel %vm28_vm1, %v3364_v10, -inf }
0x2096   :  { %3374 = vmax.xlane.f32.xlu0 %v3373_v12  ;;  %v3367_v24 = vmul.f32 %v3345_v15, %v14479_v32  ;;  %v3353_v25 = vrot.slane %v3321_v17, %v14466_v59  ;;  %v3382_v26 = vsel %vm28_vm1, %v3366_v19, -inf  ;;  %v3368_v13 = vmul.f32 %v3349_v20, %v14479_v32 }
0x2097   :  { %v3379_v22 = vsel %vm28_vm1, %v3365_v14, -inf }
0x2098   :  { %3377 = vmax.xlane.f32.xlu1 %v3376_v18  ;;  %v3385_v27 = vsel %vm28_vm1, %v3367_v24, -inf  ;;  %v3369_v28 = vmul.f32 %v3353_v25, %v14479_v32  ;;  %v3388_v29 = vsel %vm28_vm1, %v3368_v13, -inf }
0x209a   :  { %3380 = vmax.xlane.f32.xlu0 %v3379_v22  ;;  %v3391_v30 = vsel %vm28_vm1, %v3369_v28, -inf }
0x209c   :  { %3383 = vmax.xlane.f32.xlu1 %v3382_v26 }
0x209e   :  { %3386 = vmax.xlane.f32.xlu0 %v3385_v27 }
0x20a0   :  { %3389 = vmax.xlane.f32.xlu1 %v3388_v29 }
0x20a2   :  { %3392 = vmax.xlane.f32.xlu0 %v3391_v30 }
0x2121   :  { %v3372_v58 = vpop.xlane.xlu1 %3371 }
0x2122   :  { %v3406_v34 = vrot.slane %v3372_v58, %v14487_v45 }
0x2123   :  { %v3375_v31 = vpop.xlane.xlu0 %3374 }
0x2124   :  { %v3410_v35 = vrot.slane %v3375_v31, %v14487_v45 }
0x2125   :  { %v3378_v36 = vpop.xlane.xlu1 %3377 }
0x2126   :  { %v3435_v37 = vsel %vm866_vm10, %v3410_v35, %v3406_v34  ;;  %v3414_v38 = vrot.slane %v3378_v36, %v14487_v45 }
0x2127   :  { %v3381_v39 = vpop.xlane.xlu0 %3380 }
0x2128   :  { %v3436_v40 = vsel %vm867_vm11, %v3414_v38, %v3435_v37  ;;  %v3418_v41 = vrot.slane %v3381_v39, %v14487_v45 }
0x2129   :  { %v3384_v42 = vpop.xlane.xlu1 %3383 }
0x212a   :  { %v3437_v43 = vsel %vm869_vm12, %v3418_v41, %v3436_v40  ;;  %v3422_v44 = vrot.slane %v3384_v42, %v14487_v45 }
0x212b   :  { %v3387_v47 = vpop.xlane.xlu0 %3386 }
0x212c   :  { %v3438_v48 = vsel %vm871_vm13, %v3422_v44, %v3437_v43  ;;  %v3426_v2 = vrot.slane %v3387_v47, %v14487_v45 }
0x212d   :  { %v3390_v49 = vpop.xlane.xlu1 %3389 }
0x212e   :  { %v3439_v50 = vsel %vm873_vm14, %v3426_v2, %v3438_v48  ;;  %v3430_v51 = vrot.slane %v3390_v49, %v14487_v45 }
0x212f   :  { %v3393_v52 = vpop.xlane.xlu0 %3392 }
0x2130   :  { %v3434_v53 = vrot.slane %v3393_v52, %v14487_v45  ;;  %v3440_v54 = vsel %vm875_vm15, %v3430_v51, %v3439_v50 }
0x2132   :  { %v3441_v55 = vsel %vm877_vm2, %v3434_v53, %v3440_v54 }
0x2133   :  { %13860 = vmatpush3.msra.mxu1 %v3441_v55 }
0x2134   :  { %13862 = vmatmul.mubr.msk.f32.vlgmr.msra.gmra.mrb[18].mxu1 %vm28_vm1, %v14489_v46  ;;  %13869 = vmatprep.subr.mxu1 %v15029_v33 }
0x2135   :  { %13871 = vmatprep.mubr.msk.f32.mxu1 %vm14346_vm0, %v15029_v33 }
0x2207   :  { %v3509_v57 = vpop.f32.mrb[18].mxu1 }
0x2208   :  { %v3513_v60 = vadd.f32 %v3509_v57, %v3394_v56  ;;  %v13863_v61 = vpop.f32.mrb[19].mxu1 }
0x220a   :  { %v3514_v62 = vmul.f32 %v3513_v60, %v3513_v60 }
0x220c   :  { %v3515_v1 = vsel %vm28_vm1, %v3514_v62, 0.0 }
0x220d   :  { %3516 = vadd.xlane.f32.xlu1 %v3515_v1 }
0x229a   :  { %v3517_v3 = vpop.xlane.xlu1 %3516 }
0x229b   :  { %v3518_v4 = vrot.slane %v3517_v3, 4 }
0x229d   :  { %v3519_v5 = vadd.f32 %v3518_v4, %v3517_v3 }
0x229f   :  { %v3520_v0 = vrot.slane %v3519_v5, 2 }
0x22a1   :  { %v3521_v6 = vadd.f32 %v3520_v0, %v3519_v5 }
0x22a3   :  { %v3522_v7 = vrot.slane %v3521_v6, 1 }
0x22a5   :  { %v3523_v8 = vadd.f32 %v3522_v7, %v3521_v6 }
0x22a7   :  { %14109 = vpush %v3523_v8 }
0x22d8   :  { %s14110_s22 = spop %14109 }
0x22d9   :  { %v3525_v10 = vstv %s14110_s22 }
0x22da   :  { %14230 = vrsqrt.f32 %v3525_v10 }
0x22e4   :  { %v14231_v11 = vpop.eup %14230 }
0x22e5   :  { %v15095_v23 = vmul.f32 %v14231_v11, %v3513_v60 }
0x22e7   :  { %v3536_v12 = vrot.slane %v15095_v23, %v14503_v21  ;;  %v3529_v14 = vcombine.high %v15095_v23, %v15095_v23 }
0x22e9   :  { %v3552_v15 = vrot.slane %v3536_v12, %v14503_v21  ;;  %v3544_v17 = vcombine.high %v3536_v12, %v3536_v12  ;;  %v3543_v18 = vrot.slane %v3529_v14, %v14503_v21 }
0x22eb   :  { %v3581_v19 = vrot.slane %v3552_v15, %v14466_v59  ;;  %v3566_v20 = vrot.slane %v3544_v17, %v14503_v21  ;;  %v3574_v22 = vcombine.high %v3552_v15, %v3552_v15  ;;  %v3559_v24 = vrot.slane %v3543_v18, %v14503_v21 }
0x22ec   :  { %v3545_v25 = vcombine.high %v3543_v18, %v3543_v18 }
0x22ed   :  { %v3618_v26 = vmul.f32 %v3581_v19, %v14479_v32  ;;  %v3585_v13 = vrot.slane %v3566_v20, %v14466_v59  ;;  %v3589_v27 = vrot.slane %v3574_v22, %v14466_v59  ;;  %v3576_v28 = vcombine.high %v3566_v20, %v3566_v20 }
0x22ee   :  { %v3597_v29 = vrot.slane %v3559_v24, %v14466_v59  ;;  %v3573_v30 = vrot.slane %v3545_v25, %v14503_v21  ;;  %v3575_v58 = vcombine.high %v3559_v24, %v3559_v24  ;;  %v3650_v20 = vmul.f32 %v15095_v23, %v14498_v63 }
0x22ef   :  { %v3626_v31 = vsel %vm28_vm1, %v3618_v26, -inf  ;;  %v3619_v34 = vmul.f32 %v3585_v13, %v14479_v32  ;;  %v3620_v35 = vmul.f32 %v3589_v27, %v14479_v32  ;;  %v3593_v36 = vrot.slane %v3576_v28, %v14466_v59 }
0x22f0   :  { %3627 = vmax.xlane.f32.xlu0 %v3626_v31  ;;  %v3601_v39 = vrot.slane %v3573_v30, %v14466_v59  ;;  %v3577_v40 = vcombine.high %v3573_v30, %v3573_v30  ;;  %v3622_v42 = vmul.f32 %v3597_v29, %v14479_v32  ;;  %v3605_v43 = vrot.slane %v3575_v58, %v14466_v59 }
0x22f1   :  { %v3629_v37 = vsel %vm28_vm1, %v3619_v34, -inf  ;;  %v3621_v38 = vmul.f32 %v3593_v36, %v14479_v32  ;;  %v3632_v41 = vsel %vm28_vm1, %v3620_v35, -inf }
0x22f2   :  { %3630 = vmax.xlane.f32.xlu1 %v3629_v37  ;;  %v3623_v47 = vmul.f32 %v3601_v39, %v14479_v32  ;;  %v3609_v48 = vrot.slane %v3577_v40, %v14466_v59  ;;  %v3638_v2 = vsel %vm28_vm1, %v3622_v42, -inf  ;;  %v3624_v49 = vmul.f32 %v3605_v43, %v14479_v32 }
0x22f3   :  { %v3635_v44 = vsel %vm28_vm1, %v3621_v38, -inf }
0x22f4   :  { %3633 = vmax.xlane.f32.xlu0 %v3632_v41  ;;  %v3641_v50 = vsel %vm28_vm1, %v3623_v47, -inf  ;;  %v3625_v51 = vmul.f32 %v3609_v48, %v14479_v32  ;;  %v3644_v52 = vsel %vm28_vm1, %v3624_v49, -inf }
0x22f6   :  { %3636 = vmax.xlane.f32.xlu1 %v3635_v44  ;;  %v3647_v53 = vsel %vm28_vm1, %v3625_v51, -inf }
0x22f8   :  { %3639 = vmax.xlane.f32.xlu0 %v3638_v2 }
0x22fa   :  { %3642 = vmax.xlane.f32.xlu1 %v3641_v50 }
0x22fc   :  { %3645 = vmax.xlane.f32.xlu0 %v3644_v52 }
0x22fe   :  { %3648 = vmax.xlane.f32.xlu1 %v3647_v53 }
0x237d   :  { %v3628_v54 = vpop.xlane.xlu0 %3627 }
0x237e   :  { %v3662_v56 = vrot.slane %v3628_v54, %v14487_v45 }
0x237f   :  { %v3631_v55 = vpop.xlane.xlu1 %3630 }
0x2380   :  { %v3666_v57 = vrot.slane %v3631_v55, %v14487_v45 }
0x2381   :  { %v3634_v60 = vpop.xlane.xlu0 %3633 }
0x2382   :  { %v3691_v61 = vsel %vm866_vm10, %v3666_v57, %v3662_v56  ;;  %v3670_v62 = vrot.slane %v3634_v60, %v14487_v45 }
0x2383   :  { %v3637_v1 = vpop.xlane.xlu1 %3636 }
0x2384   :  { %v3692_v3 = vsel %vm867_vm11, %v3670_v62, %v3691_v61  ;;  %v3674_v4 = vrot.slane %v3637_v1, %v14487_v45 }
0x2385   :  { %v3640_v5 = vpop.xlane.xlu0 %3639 }
0x2386   :  { %v3693_v0 = vsel %vm869_vm12, %v3674_v4, %v3692_v3  ;;  %v3678_v6 = vrot.slane %v3640_v5, %v14487_v45 }
0x2387   :  { %v3643_v7 = vpop.xlane.xlu1 %3642 }
0x2388   :  { %v3694_v8 = vsel %vm871_vm13, %v3678_v6, %v3693_v0  ;;  %v3682_v10 = vrot.slane %v3643_v7, %v14487_v45 }
0x2389   :  { %v3646_v11 = vpop.xlane.xlu0 %3645 }
0x238a   :  { %v3695_v12 = vsel %vm873_vm14, %v3682_v10, %v3694_v8  ;;  %v3686_v14 = vrot.slane %v3646_v11, %v14487_v45 }
0x238b   :  { %v3649_v15 = vpop.xlane.xlu1 %3648 }
0x238c   :  { %v3690_v17 = vrot.slane %v3649_v15, %v14487_v45  ;;  %v3696_v18 = vsel %vm875_vm15, %v3686_v14, %v3695_v12 }
0x238e   :  { %v3697_v19 = vsel %vm877_vm2, %v3690_v17, %v3696_v18 }
0x238f   :  { %13865 = vmatpush3.msra.mxu0 %v3697_v19 }
0x2390   :  { %13867 = vmatmul.mubr.msk.f32.vlgmr.msra.gmra.mrb[20].mxu0 %vm28_vm1, %v14489_v46  ;;  %13874 = vmatprep.subr.mxu0 %v15029_v33 }
0x2391   :  { %13876 = vmatprep.mubr.msk.f32.mxu0 %vm14346_vm0, %v15029_v33 }
0x2463   :  { %v3765_v22 = vpop.f32.mrb[20].mxu0 }
0x2464   :  { %v3769_v24 = vadd.f32 %v3765_v22, %v3650_v20  ;;  %v13868_v25 = vpop.f32.mrb[21].mxu0 }
0x2466   :  { %v3770_v26 = vmul.f32 %v3769_v24, %v3769_v24 }
0x2468   :  { %v3771_v13 = vsel %vm28_vm1, %v3770_v26, 0.0 }
0x2469   :  { %3772 = vadd.xlane.f32.xlu0 %v3771_v13 }
0x24f6   :  { %v3773_v27 = vpop.xlane.xlu0 %3772 }
0x24f7   :  { %v3774_v28 = vrot.slane %v3773_v27, 4 }
0x24f9   :  { %v3775_v29 = vadd.f32 %v3774_v28, %v3773_v27 }
0x24fb   :  { %v3776_v30 = vrot.slane %v3775_v29, 2 }
0x24fd   :  { %v3777_v58 = vadd.f32 %v3776_v30, %v3775_v29 }
0x24ff   :  { %v3778_v31 = vrot.slane %v3777_v58, 1 }
0x2501   :  { %v3779_v34 = vadd.f32 %v3778_v31, %v3777_v58 }
0x2503   :  { %14111 = vpush %v3779_v34 }
0x2534   :  { %s14112_s23 = spop %14111 }
0x2535   :  { %v3781_v35 = vstv %s14112_s23 }
0x2536   :  { %14232 = vrsqrt.f32 %v3781_v35 }
0x2540   :  { %v14233_v36 = vpop.eup %14232 }
0x2541   :  { %v15153_v23 = vmul.f32 %v14233_v36, %v3769_v24 }
0x2543   :  { %v3792_v37 = vrot.slane %v15153_v23, %v14503_v21  ;;  %v3785_v38 = vcombine.high %v15153_v23, %v15153_v23 }
0x2545   :  { %v3808_v39 = vrot.slane %v3792_v37, %v14503_v21  ;;  %v3800_v40 = vcombine.high %v3792_v37, %v3792_v37  ;;  %v3799_v41 = vrot.slane %v3785_v38, %v14503_v21 }
0x2547   :  { %v3837_v42 = vrot.slane %v3808_v39, %v14466_v59  ;;  %v3822_v43 = vrot.slane %v3800_v40, %v14503_v21  ;;  %v3830_v44 = vcombine.high %v3808_v39, %v3808_v39  ;;  %v3815_v47 = vrot.slane %v3799_v41, %v14503_v21 }
0x2548   :  { %v3801_v48 = vcombine.high %v3799_v41, %v3799_v41 }
0x2549   :  { %v3874_v2 = vmul.f32 %v3837_v42, %v14479_v32  ;;  %v3841_v49 = vrot.slane %v3822_v43, %v14466_v59  ;;  %v3845_v50 = vrot.slane %v3830_v44, %v14466_v59  ;;  %v3832_v51 = vcombine.high %v3822_v43, %v3822_v43 }
0x254a   :  { %v3853_v52 = vrot.slane %v3815_v47, %v14466_v59  ;;  %v3829_v53 = vrot.slane %v3801_v48, %v14503_v21  ;;  %v3831_v54 = vcombine.high %v3815_v47, %v3815_v47  ;;  %v3906_v43 = vmul.f32 %v15153_v23, %v14498_v63 }
0x254b   :  { %v3882_v55 = vsel %vm28_vm1, %v3874_v2, -inf  ;;  %v3875_v56 = vmul.f32 %v3841_v49, %v14479_v32  ;;  %v3876_v57 = vmul.f32 %v3845_v50, %v14479_v32  ;;  %v3849_v60 = vrot.slane %v3832_v51, %v14466_v59 }
0x254c   :  { %3883 = vmax.xlane.f32.xlu1 %v3882_v55  ;;  %v3857_v1 = vrot.slane %v3829_v53, %v14466_v59  ;;  %v3833_v3 = vcombine.high %v3829_v53, %v3829_v53  ;;  %v3878_v5 = vmul.f32 %v3853_v52, %v14479_v32  ;;  %v3861_v0 = vrot.slane %v3831_v54, %v14466_v59 }
0x254d   :  { %v3885_v61 = vsel %vm28_vm1, %v3875_v56, -inf  ;;  %v3877_v62 = vmul.f32 %v3849_v60, %v14479_v32  ;;  %v3888_v4 = vsel %vm28_vm1, %v3876_v57, -inf }
0x254e   :  { %3886 = vmax.xlane.f32.xlu0 %v3885_v61  ;;  %v3879_v7 = vmul.f32 %v3857_v1, %v14479_v32  ;;  %v3865_v8 = vrot.slane %v3833_v3, %v14466_v59  ;;  %v3894_v10 = vsel %vm28_vm1, %v3878_v5, -inf  ;;  %v3880_v11 = vmul.f32 %v3861_v0, %v14479_v32 }
0x254f   :  { %v3891_v6 = vsel %vm28_vm1, %v3877_v62, -inf }
0x2550   :  { %3889 = vmax.xlane.f32.xlu1 %v3888_v4  ;;  %v3897_v12 = vsel %vm28_vm1, %v3879_v7, -inf  ;;  %v3881_v14 = vmul.f32 %v3865_v8, %v14479_v32  ;;  %v3900_v15 = vsel %vm28_vm1, %v3880_v11, -inf }
0x2552   :  { %3892 = vmax.xlane.f32.xlu0 %v3891_v6  ;;  %v3903_v17 = vsel %vm28_vm1, %v3881_v14, -inf }
0x2554   :  { %3895 = vmax.xlane.f32.xlu1 %v3894_v10 }
0x2556   :  { %3898 = vmax.xlane.f32.xlu0 %v3897_v12 }
0x2558   :  { %3901 = vmax.xlane.f32.xlu1 %v3900_v15 }
0x255a   :  { %3904 = vmax.xlane.f32.xlu0 %v3903_v17 }
0x25d9   :  { %v3884_v18 = vpop.xlane.xlu1 %3883 }
0x25da   :  { %v3918_v20 = vrot.slane %v3884_v18, %v14487_v45 }
0x25db   :  { %v3887_v19 = vpop.xlane.xlu0 %3886 }
0x25dc   :  { %v3922_v22 = vrot.slane %v3887_v19, %v14487_v45 }
0x25dd   :  { %v3890_v24 = vpop.xlane.xlu1 %3889 }
0x25de   :  { %v3947_v25 = vsel %vm866_vm10, %v3922_v22, %v3918_v20  ;;  %v3926_v26 = vrot.slane %v3890_v24, %v14487_v45 }
0x25df   :  { %v3893_v13 = vpop.xlane.xlu0 %3892 }
0x25e0   :  { %v3948_v27 = vsel %vm867_vm11, %v3926_v26, %v3947_v25  ;;  %v3930_v28 = vrot.slane %v3893_v13, %v14487_v45 }
0x25e1   :  { %v3896_v29 = vpop.xlane.xlu1 %3895 }
0x25e2   :  { %v3949_v30 = vsel %vm869_vm12, %v3930_v28, %v3948_v27  ;;  %v3934_v58 = vrot.slane %v3896_v29, %v14487_v45 }
0x25e3   :  { %v3899_v31 = vpop.xlane.xlu0 %3898 }
0x25e4   :  { %v3950_v34 = vsel %vm871_vm13, %v3934_v58, %v3949_v30  ;;  %v3938_v35 = vrot.slane %v3899_v31, %v14487_v45 }
0x25e5   :  { %v3902_v36 = vpop.xlane.xlu1 %3901 }
0x25e6   :  { %v3951_v37 = vsel %vm873_vm14, %v3938_v35, %v3950_v34  ;;  %v3942_v38 = vrot.slane %v3902_v36, %v14487_v45 }
0x25e7   :  { %v3905_v39 = vpop.xlane.xlu0 %3904 }
0x25e8   :  { %v3946_v40 = vrot.slane %v3905_v39, %v14487_v45  ;;  %v3952_v41 = vsel %vm875_vm15, %v3942_v38, %v3951_v37 }
0x25ea   :  { %v3953_v42 = vsel %vm877_vm2, %v3946_v40, %v3952_v41 }
0x25eb   :  { %13870 = vmatpush3.msra.mxu1 %v3953_v42 }
0x25ec   :  { %13872 = vmatmul.mubr.msk.f32.vlgmr.msra.gmra.mrb[20].mxu1 %vm28_vm1, %v14489_v46  ;;  %13879 = vmatprep.subr.mxu1 %v15029_v33 }
0x25ed   :  { %13881 = vmatprep.mubr.msk.f32.mxu1 %vm14346_vm0, %v15029_v33 }
0x26bf   :  { %v4021_v44 = vpop.f32.mrb[20].mxu1 }
0x26c0   :  { %v4025_v47 = vadd.f32 %v4021_v44, %v3906_v43  ;;  %v13873_v48 = vpop.f32.mrb[21].mxu1 }
0x26c2   :  { %v4026_v2 = vmul.f32 %v4025_v47, %v4025_v47 }
0x26c4   :  { %v4027_v49 = vsel %vm28_vm1, %v4026_v2, 0.0 }
0x26c5   :  { %4028 = vadd.xlane.f32.xlu1 %v4027_v49 }
0x2752   :  { %v4029_v50 = vpop.xlane.xlu1 %4028 }
0x2753   :  { %v4030_v51 = vrot.slane %v4029_v50, 4 }
0x2755   :  { %v4031_v52 = vadd.f32 %v4030_v51, %v4029_v50 }
0x2757   :  { %v4032_v53 = vrot.slane %v4031_v52, 2 }
0x2759   :  { %v4033_v54 = vadd.f32 %v4032_v53, %v4031_v52 }
0x275b   :  { %v4034_v55 = vrot.slane %v4033_v54, 1 }
0x275d   :  { %v4035_v56 = vadd.f32 %v4034_v55, %v4033_v54 }
0x275f   :  { %14113 = vpush %v4035_v56 }
0x2790   :  { %s14114_s24 = spop %14113 }
0x2791   :  { %v4037_v57 = vstv %s14114_s24 }
0x2792   :  { %14234 = vrsqrt.f32 %v4037_v57 }
0x279c   :  { %v14235_v60 = vpop.eup %14234 }
0x279d   :  { %v15211_v23 = vmul.f32 %v14235_v60, %v4025_v47 }
0x279f   :  { %v4048_v61 = vrot.slane %v15211_v23, %v14503_v21  ;;  %v4041_v62 = vcombine.high %v15211_v23, %v15211_v23 }
0x27a1   :  { %v4064_v1 = vrot.slane %v4048_v61, %v14503_v21  ;;  %v4056_v3 = vcombine.high %v4048_v61, %v4048_v61  ;;  %v4055_v4 = vrot.slane %v4041_v62, %v14503_v21 }
0x27a3   :  { %v4093_v5 = vrot.slane %v4064_v1, %v14466_v59  ;;  %v4078_v0 = vrot.slane %v4056_v3, %v14503_v21  ;;  %v4086_v6 = vcombine.high %v4064_v1, %v4064_v1  ;;  %v4071_v7 = vrot.slane %v4055_v4, %v14503_v21 }
0x27a4   :  { %v4057_v8 = vcombine.high %v4055_v4, %v4055_v4 }
0x27a5   :  { %v4130_v10 = vmul.f32 %v4093_v5, %v14479_v32  ;;  %v4097_v11 = vrot.slane %v4078_v0, %v14466_v59  ;;  %v4101_v12 = vrot.slane %v4086_v6, %v14466_v59  ;;  %v4088_v14 = vcombine.high %v4078_v0, %v4078_v0 }
0x27a6   :  { %v4109_v15 = vrot.slane %v4071_v7, %v14466_v59  ;;  %v4085_v17 = vrot.slane %v4057_v8, %v14503_v21  ;;  %v4087_v18 = vcombine.high %v4071_v7, %v4071_v7  ;;  %v4162_v0 = vmul.f32 %v15211_v23, %v14498_v63 }
0x27a7   :  { %v4138_v19 = vsel %vm28_vm1, %v4130_v10, -inf  ;;  %v4131_v20 = vmul.f32 %v4097_v11, %v14479_v32  ;;  %v4132_v22 = vmul.f32 %v4101_v12, %v14479_v32  ;;  %v4105_v24 = vrot.slane %v4088_v14, %v14466_v59 }
0x27a8   :  { %4139 = vmax.xlane.f32.xlu0 %v4138_v19  ;;  %v4113_v13 = vrot.slane %v4085_v17, %v14466_v59  ;;  %v4089_v27 = vcombine.high %v4085_v17, %v4085_v17  ;;  %v4134_v29 = vmul.f32 %v4109_v15, %v14479_v32  ;;  %v4117_v30 = vrot.slane %v4087_v18, %v14466_v59 }
0x27a9   :  { %v4141_v25 = vsel %vm28_vm1, %v4131_v20, -inf  ;;  %v4133_v26 = vmul.f32 %v4105_v24, %v14479_v32  ;;  %v4144_v28 = vsel %vm28_vm1, %v4132_v22, -inf }
0x27aa   :  { %4142 = vmax.xlane.f32.xlu1 %v4141_v25  ;;  %v4135_v31 = vmul.f32 %v4113_v13, %v14479_v32  ;;  %v4121_v34 = vrot.slane %v4089_v27, %v14466_v59  ;;  %v4150_v35 = vsel %vm28_vm1, %v4134_v29, -inf  ;;  %v4136_v36 = vmul.f32 %v4117_v30, %v14479_v32 }
0x27ab   :  { %v4147_v58 = vsel %vm28_vm1, %v4133_v26, -inf }
0x27ac   :  { %4145 = vmax.xlane.f32.xlu0 %v4144_v28  ;;  %v4153_v37 = vsel %vm28_vm1, %v4135_v31, -inf  ;;  %v4137_v38 = vmul.f32 %v4121_v34, %v14479_v32  ;;  %v4156_v39 = vsel %vm28_vm1, %v4136_v36, -inf }
0x27ae   :  { %4148 = vmax.xlane.f32.xlu1 %v4147_v58  ;;  %v4159_v40 = vsel %vm28_vm1, %v4137_v38, -inf }
0x27b0   :  { %4151 = vmax.xlane.f32.xlu0 %v4150_v35 }
0x27b2   :  { %4154 = vmax.xlane.f32.xlu1 %v4153_v37 }
0x27b4   :  { %4157 = vmax.xlane.f32.xlu0 %v4156_v39 }
0x27b6   :  { %4160 = vmax.xlane.f32.xlu1 %v4159_v40 }
0x2835   :  { %v4140_v41 = vpop.xlane.xlu0 %4139 }
0x2836   :  { %v4174_v43 = vrot.slane %v4140_v41, %v14487_v45 }
0x2837   :  { %v4143_v42 = vpop.xlane.xlu1 %4142 }
0x2838   :  { %v4178_v44 = vrot.slane %v4143_v42, %v14487_v45 }
0x2839   :  { %v4146_v47 = vpop.xlane.xlu0 %4145 }
0x283a   :  { %v4203_v48 = vsel %vm866_vm10, %v4178_v44, %v4174_v43  ;;  %v4182_v2 = vrot.slane %v4146_v47, %v14487_v45 }
0x283b   :  { %v4149_v49 = vpop.xlane.xlu1 %4148 }
0x283c   :  { %v4204_v50 = vsel %vm867_vm11, %v4182_v2, %v4203_v48  ;;  %v4186_v51 = vrot.slane %v4149_v49, %v14487_v45 }
0x283d   :  { %v4152_v52 = vpop.xlane.xlu0 %4151 }
0x283e   :  { %v4205_v53 = vsel %vm869_vm12, %v4186_v51, %v4204_v50  ;;  %v4190_v54 = vrot.slane %v4152_v52, %v14487_v45 }
0x283f   :  { %v4155_v55 = vpop.xlane.xlu1 %4154 }
0x2840   :  { %v4206_v56 = vsel %vm871_vm13, %v4190_v54, %v4205_v53  ;;  %v4194_v57 = vrot.slane %v4155_v55, %v14487_v45 }
0x2841   :  { %v4158_v60 = vpop.xlane.xlu0 %4157 }
0x2842   :  { %v4207_v61 = vsel %vm873_vm14, %v4194_v57, %v4206_v56  ;;  %v4198_v62 = vrot.slane %v4158_v60, %v14487_v45 }
0x2843   :  { %v4161_v1 = vpop.xlane.xlu1 %4160 }
0x2844   :  { %v4202_v3 = vrot.slane %v4161_v1, %v14487_v45  ;;  %v4208_v4 = vsel %vm875_vm15, %v4198_v62, %v4207_v61 }
0x2846   :  { %v4209_v5 = vsel %vm877_vm2, %v4202_v3, %v4208_v4 }
0x2847   :  { %13875 = vmatpush3.msra.mxu0 %v4209_v5 }
0x2848   :  { %13877 = vmatmul.mubr.msk.f32.vlgmr.msra.gmra.mrb[22].mxu0 %vm28_vm1, %v14489_v46  ;;  %13884 = vmatprep.subr.mxu0 %v15029_v33 }
0x2849   :  { %13886 = vmatprep.mubr.msk.f32.mxu0 %vm14346_vm0, %v15029_v33 }
0x291b   :  { %v4277_v6 = vpop.f32.mrb[22].mxu0 }
0x291c   :  { %v4281_v7 = vadd.f32 %v4277_v6, %v4162_v0  ;;  %v13878_v8 = vpop.f32.mrb[23].mxu0 }
0x291e   :  { %v4282_v10 = vmul.f32 %v4281_v7, %v4281_v7 }
0x2920   :  { %v4283_v11 = vsel %vm28_vm1, %v4282_v10, 0.0 }
0x2921   :  { %4284 = vadd.xlane.f32.xlu0 %v4283_v11 }
0x29ae   :  { %v4285_v12 = vpop.xlane.xlu0 %4284 }
0x29af   :  { %v4286_v14 = vrot.slane %v4285_v12, 4 }
0x29b1   :  { %v4287_v15 = vadd.f32 %v4286_v14, %v4285_v12 }
0x29b3   :  { %v4288_v17 = vrot.slane %v4287_v15, 2 }
0x29b5   :  { %v4289_v18 = vadd.f32 %v4288_v17, %v4287_v15 }
0x29b7   :  { %v4290_v19 = vrot.slane %v4289_v18, 1 }
0x29b9   :  { %v4291_v20 = vadd.f32 %v4290_v19, %v4289_v18 }
0x29bb   :  { %14115 = vpush %v4291_v20 }
0x29ec   :  { %s14116_s25 = spop %14115 }
0x29ed   :  { %v4293_v22 = vstv %s14116_s25 }
0x29ee   :  { %14236 = vrsqrt.f32 %v4293_v22 }
0x29f8   :  { %v14237_v24 = vpop.eup %14236 }
0x29f9   :  { %v15269_v23 = vmul.f32 %v14237_v24, %v4281_v7 }
0x29fb   :  { %v4304_v25 = vrot.slane %v15269_v23, %v14503_v21  ;;  %v4297_v26 = vcombine.high %v15269_v23, %v15269_v23 }
0x29fd   :  { %v4320_v13 = vrot.slane %v4304_v25, %v14503_v21  ;;  %v4312_v27 = vcombine.high %v4304_v25, %v4304_v25  ;;  %v4311_v28 = vrot.slane %v4297_v26, %v14503_v21 }
0x29ff   :  { %v4349_v29 = vrot.slane %v4320_v13, %v14466_v59  ;;  %v4334_v30 = vrot.slane %v4312_v27, %v14503_v21  ;;  %v4342_v58 = vcombine.high %v4320_v13, %v4320_v13  ;;  %v4327_v31 = vrot.slane %v4311_v28, %v14503_v21 }
0x2a00   :  { %v4313_v34 = vcombine.high %v4311_v28, %v4311_v28 }
0x2a01   :  { %v4386_v35 = vmul.f32 %v4349_v29, %v14479_v32  ;;  %v4353_v36 = vrot.slane %v4334_v30, %v14466_v59  ;;  %v4357_v37 = vrot.slane %v4342_v58, %v14466_v59  ;;  %v4344_v38 = vcombine.high %v4334_v30, %v4334_v30 }
0x2a02   :  { %v4365_v39 = vrot.slane %v4327_v31, %v14466_v59  ;;  %v4341_v40 = vrot.slane %v4313_v34, %v14503_v21  ;;  %v4343_v41 = vcombine.high %v4327_v31, %v4327_v31  ;;  %v4418_v30 = vmul.f32 %v15269_v23, %v14498_v63 }
0x2a03   :  { %v4394_v42 = vsel %vm28_vm1, %v4386_v35, -inf  ;;  %v4387_v43 = vmul.f32 %v4353_v36, %v14479_v32  ;;  %v4388_v44 = vmul.f32 %v4357_v37, %v14479_v32  ;;  %v4361_v47 = vrot.slane %v4344_v38, %v14466_v59 }
0x2a04   :  { %4395 = vmax.xlane.f32.xlu1 %v4394_v42  ;;  %v4369_v49 = vrot.slane %v4341_v40, %v14466_v59  ;;  %v4345_v50 = vcombine.high %v4341_v40, %v4341_v40  ;;  %v4390_v52 = vmul.f32 %v4365_v39, %v14479_v32  ;;  %v4373_v53 = vrot.slane %v4343_v41, %v14466_v59 }
0x2a05   :  { %v4397_v48 = vsel %vm28_vm1, %v4387_v43, -inf  ;;  %v4389_v2 = vmul.f32 %v4361_v47, %v14479_v32  ;;  %v4400_v51 = vsel %vm28_vm1, %v4388_v44, -inf }
0x2a06   :  { %4398 = vmax.xlane.f32.xlu0 %v4397_v48  ;;  %v4391_v55 = vmul.f32 %v4369_v49, %v14479_v32  ;;  %v4377_v56 = vrot.slane %v4345_v50, %v14466_v59  ;;  %v4406_v57 = vsel %vm28_vm1, %v4390_v52, -inf  ;;  %v4392_v60 = vmul.f32 %v4373_v53, %v14479_v32 }
0x2a07   :  { %v4403_v54 = vsel %vm28_vm1, %v4389_v2, -inf }
0x2a08   :  { %4401 = vmax.xlane.f32.xlu1 %v4400_v51  ;;  %v4409_v61 = vsel %vm28_vm1, %v4391_v55, -inf  ;;  %v4393_v62 = vmul.f32 %v4377_v56, %v14479_v32  ;;  %v4412_v1 = vsel %vm28_vm1, %v4392_v60, -inf }
0x2a0a   :  { %4404 = vmax.xlane.f32.xlu0 %v4403_v54  ;;  %v4415_v3 = vsel %vm28_vm1, %v4393_v62, -inf }
0x2a0c   :  { %4407 = vmax.xlane.f32.xlu1 %v4406_v57 }
0x2a0e   :  { %4410 = vmax.xlane.f32.xlu0 %v4409_v61 }
0x2a10   :  { %4413 = vmax.xlane.f32.xlu1 %v4412_v1 }
0x2a12   :  { %4416 = vmax.xlane.f32.xlu0 %v4415_v3 }
0x2a91   :  { %v4396_v4 = vpop.xlane.xlu1 %4395 }
0x2a92   :  { %v4430_v0 = vrot.slane %v4396_v4, %v14487_v45 }
0x2a93   :  { %v4399_v5 = vpop.xlane.xlu0 %4398 }
0x2a94   :  { %v4434_v6 = vrot.slane %v4399_v5, %v14487_v45 }
0x2a95   :  { %v4402_v7 = vpop.xlane.xlu1 %4401 }
0x2a96   :  { %v4459_v8 = vsel %vm866_vm10, %v4434_v6, %v4430_v0  ;;  %v4438_v10 = vrot.slane %v4402_v7, %v14487_v45 }
0x2a97   :  { %v4405_v11 = vpop.xlane.xlu0 %4404 }
0x2a98   :  { %v4460_v12 = vsel %vm867_vm11, %v4438_v10, %v4459_v8  ;;  %v4442_v14 = vrot.slane %v4405_v11, %v14487_v45 }
0x2a99   :  { %v4408_v15 = vpop.xlane.xlu1 %4407 }
0x2a9a   :  { %v4461_v17 = vsel %vm869_vm12, %v4442_v14, %v4460_v12  ;;  %v4446_v18 = vrot.slane %v4408_v15, %v14487_v45 }
0x2a9b   :  { %v4411_v19 = vpop.xlane.xlu0 %4410 }
0x2a9c   :  { %v4462_v20 = vsel %vm871_vm13, %v4446_v18, %v4461_v17  ;;  %v4450_v22 = vrot.slane %v4411_v19, %v14487_v45 }
0x2a9d   :  { %v4414_v24 = vpop.xlane.xlu1 %4413 }
0x2a9e   :  { %v4463_v25 = vsel %vm873_vm14, %v4450_v22, %v4462_v20  ;;  %v4454_v26 = vrot.slane %v4414_v24, %v14487_v45 }
0x2a9f   :  { %v4417_v13 = vpop.xlane.xlu0 %4416 }
0x2aa0   :  { %v4458_v27 = vrot.slane %v4417_v13, %v14487_v45  ;;  %v4464_v28 = vsel %vm875_vm15, %v4454_v26, %v4463_v25 }
0x2aa2   :  { %v4465_v29 = vsel %vm877_vm2, %v4458_v27, %v4464_v28 }
0x2aa3   :  { %13880 = vmatpush3.msra.mxu1 %v4465_v29 }
0x2aa4   :  { %13882 = vmatmul.mubr.msk.f32.vlgmr.msra.gmra.mrb[22].mxu1 %vm28_vm1, %v14489_v46  ;;  %13889 = vmatprep.subr.mxu1 %v15029_v33 }
0x2aa5   :  { %13891 = vmatprep.mubr.msk.f32.mxu1 %vm14346_vm0, %v15029_v33 }
0x2b77   :  { %v4533_v58 = vpop.f32.mrb[22].mxu1 }
0x2b78   :  { %v4537_v31 = vadd.f32 %v4533_v58, %v4418_v30  ;;  %v13883_v34 = vpop.f32.mrb[23].mxu1 }
0x2b7a   :  { %v4538_v35 = vmul.f32 %v4537_v31, %v4537_v31 }
0x2b7c   :  { %v4539_v36 = vsel %vm28_vm1, %v4538_v35, 0.0 }
0x2b7d   :  { %4540 = vadd.xlane.f32.xlu1 %v4539_v36 }
0x2c0a   :  { %v4541_v37 = vpop.xlane.xlu1 %4540 }
0x2c0b   :  { %v4542_v38 = vrot.slane %v4541_v37, 4 }
0x2c0d   :  { %v4543_v39 = vadd.f32 %v4542_v38, %v4541_v37 }
0x2c0f   :  { %v4544_v40 = vrot.slane %v4543_v39, 2 }
0x2c11   :  { %v4545_v41 = vadd.f32 %v4544_v40, %v4543_v39 }
0x2c13   :  { %v4546_v42 = vrot.slane %v4545_v41, 1 }
0x2c15   :  { %v4547_v43 = vadd.f32 %v4546_v42, %v4545_v41 }
0x2c17   :  { %14117 = vpush %v4547_v43 }
0x2c48   :  { %s14118_s26 = spop %14117 }
0x2c49   :  { %v4549_v33 = vstv %s14118_s26 }
0x2c4a   :  { %14238 = vrsqrt.f32 %v4549_v33 }
0x2c54   :  { %v14239_v44 = vpop.eup %14238 }
0x2c55   :  { %v15327_v23 = vmul.f32 %v14239_v44, %v4537_v31 }
0x2c57   :  { %v4560_v47 = vrot.slane %v15327_v23, %v14503_v21  ;;  %v4553_v48 = vcombine.high %v15327_v23, %v15327_v23 }
0x2c59   :  { %v4576_v2 = vrot.slane %v4560_v47, %v14503_v21  ;;  %v4568_v49 = vcombine.high %v4560_v47, %v4560_v47  ;;  %v4567_v50 = vrot.slane %v4553_v48, %v14503_v21 }
0x2c5b   :  { %v4605_v51 = vrot.slane %v4576_v2, %v14466_v59  ;;  %v4590_v52 = vrot.slane %v4568_v49, %v14503_v21  ;;  %v4598_v53 = vcombine.high %v4576_v2, %v4576_v2  ;;  %v4583_v54 = vrot.slane %v4567_v50, %v14503_v21 }
0x2c5c   :  { %v4569_v55 = vcombine.high %v4567_v50, %v4567_v50 }
0x2c5d   :  { %v4642_v56 = vmul.f32 %v4605_v51, %v14479_v32  ;;  %v4609_v57 = vrot.slane %v4590_v52, %v14466_v59  ;;  %v4613_v60 = vrot.slane %v4598_v53, %v14466_v59  ;;  %v4600_v61 = vcombine.high %v4590_v52, %v4590_v52  ;;  %v15382_v51 = vld [vmem:[%s17397_s2 + $0x8] sm:$0xff] }
0x2c5e   :  { %v4621_v62 = vrot.slane %v4583_v54, %v14466_v59  ;;  %v4597_v1 = vrot.slane %v4569_v55, %v14503_v21  ;;  %v4599_v3 = vcombine.high %v4583_v54, %v4583_v54  ;;  %v4674_v52 = vmul.f32 %v15327_v23, %v14498_v63 }
0x2c5f   :  { %v4650_v4 = vsel %vm28_vm1, %v4642_v56, -inf  ;;  %v4643_v5 = vmul.f32 %v4609_v57, %v14479_v32  ;;  %v4644_v0 = vmul.f32 %v4613_v60, %v14479_v32  ;;  %v4617_v6 = vrot.slane %v4600_v61, %v14466_v59 }
0x2c60   :  { %4651 = vmax.xlane.f32.xlu0 %v4650_v4  ;;  %v4625_v10 = vrot.slane %v4597_v1, %v14466_v59  ;;  %v4601_v11 = vcombine.high %v4597_v1, %v4597_v1  ;;  %v4646_v14 = vmul.f32 %v4621_v62, %v14479_v32  ;;  %v4629_v15 = vrot.slane %v4599_v3, %v14466_v59 }
0x2c61   :  { %v4653_v7 = vsel %vm28_vm1, %v4643_v5, -inf  ;;  %v4645_v8 = vmul.f32 %v4617_v6, %v14479_v32  ;;  %v4656_v12 = vsel %vm28_vm1, %v4644_v0, -inf }
0x2c62   :  { %4654 = vmax.xlane.f32.xlu1 %v4653_v7  ;;  %v4647_v18 = vmul.f32 %v4625_v10, %v14479_v32  ;;  %v4633_v19 = vrot.slane %v4601_v11, %v14466_v59  ;;  %v4662_v20 = vsel %vm28_vm1, %v4646_v14, -inf  ;;  %v4648_v22 = vmul.f32 %v4629_v15, %v14479_v32 }
0x2c63   :  { %v4659_v17 = vsel %vm28_vm1, %v4645_v8, -inf }
0x2c64   :  { %4657 = vmax.xlane.f32.xlu0 %v4656_v12  ;;  %v4665_v24 = vsel %vm28_vm1, %v4647_v18, -inf  ;;  %v4649_v25 = vmul.f32 %v4633_v19, %v14479_v32  ;;  %v4668_v26 = vsel %vm28_vm1, %v4648_v22, -inf }
0x2c66   :  { %4660 = vmax.xlane.f32.xlu1 %v4659_v17  ;;  %v4671_v13 = vsel %vm28_vm1, %v4649_v25, -inf }
0x2c68   :  { %4663 = vmax.xlane.f32.xlu0 %v4662_v20 }
0x2c6a   :  { %4666 = vmax.xlane.f32.xlu1 %v4665_v24 }
0x2c6c   :  { %4669 = vmax.xlane.f32.xlu0 %v4668_v26 }
0x2c6e   :  { %4672 = vmax.xlane.f32.xlu1 %v4671_v13 }
0x2ced   :  { %v4652_v27 = vpop.xlane.xlu0 %4651 }
0x2cee   :  { %v4686_v29 = vrot.slane %v4652_v27, %v14487_v45 }
0x2cef   :  { %v4655_v28 = vpop.xlane.xlu1 %4654 }
0x2cf0   :  { %v4690_v30 = vrot.slane %v4655_v28, %v14487_v45 }
0x2cf1   :  { %v4658_v58 = vpop.xlane.xlu0 %4657 }
0x2cf2   :  { %v4715_v31 = vsel %vm866_vm10, %v4690_v30, %v4686_v29  ;;  %v4694_v34 = vrot.slane %v4658_v58, %v14487_v45 }
0x2cf3   :  { %v4661_v35 = vpop.xlane.xlu1 %4660 }
0x2cf4   :  { %v4716_v36 = vsel %vm867_vm11, %v4694_v34, %v4715_v31  ;;  %v4698_v37 = vrot.slane %v4661_v35, %v14487_v45 }
0x2cf5   :  { %v4664_v38 = vpop.xlane.xlu0 %4663 }
0x2cf6   :  { %v4717_v39 = vsel %vm869_vm12, %v4698_v37, %v4716_v36  ;;  %v4702_v40 = vrot.slane %v4664_v38, %v14487_v45 }
0x2cf7   :  { %v4667_v41 = vpop.xlane.xlu1 %4666 }
0x2cf8   :  { %v4718_v42 = vsel %vm871_vm13, %v4702_v40, %v4717_v39  ;;  %v4706_v43 = vrot.slane %v4667_v41, %v14487_v45 }
0x2cf9   :  { %v4670_v33 = vpop.xlane.xlu0 %4669 }
0x2cfa   :  { %v4719_v44 = vsel %vm873_vm14, %v4706_v43, %v4718_v42  ;;  %v4710_v47 = vrot.slane %v4670_v33, %v14487_v45 }
0x2cfb   :  { %v4673_v48 = vpop.xlane.xlu1 %4672 }
0x2cfc   :  { %v4714_v2 = vrot.slane %v4673_v48, %v14487_v45  ;;  %v4720_v49 = vsel %vm875_vm15, %v4710_v47, %v4719_v44 }
0x2cfe   :  { %v4721_v50 = vsel %vm877_vm2, %v4714_v2, %v4720_v49 }
0x2cff   :  { %13885 = vmatpush3.msra.mxu0 %v4721_v50 }
0x2d00   :  { %13887 = vmatmul.mubr.msk.f32.vlgmr.msra.gmra.mrb[24].mxu0 %vm28_vm1, %v14489_v46  ;;  %13894 = vmatprep.subr.mxu0 %v15382_v51 }
0x2d01   :  { %13896 = vmatprep.mubr.msk.f32.mxu0 %vm14346_vm0, %v15382_v51 }
0x2dd3   :  { %v4789_v53 = vpop.f32.mrb[24].mxu0 }
0x2dd4   :  { %v4793_v54 = vadd.f32 %v4789_v53, %v4674_v52  ;;  %v13888_v55 = vpop.f32.mrb[25].mxu0 }
0x2dd6   :  { %v4794_v56 = vmul.f32 %v4793_v54, %v4793_v54 }
0x2dd8   :  { %v4795_v57 = vsel %vm28_vm1, %v4794_v56, 0.0 }
0x2dd9   :  { %4796 = vadd.xlane.f32.xlu0 %v4795_v57 }
0x2e66   :  { %v4797_v60 = vpop.xlane.xlu0 %4796 }
0x2e67   :  { %v4798_v61 = vrot.slane %v4797_v60, 4 }
0x2e69   :  { %v4799_v62 = vadd.f32 %v4798_v61, %v4797_v60 }
0x2e6b   :  { %v4800_v1 = vrot.slane %v4799_v62, 2 }
0x2e6d   :  { %v4801_v3 = vadd.f32 %v4800_v1, %v4799_v62 }
0x2e6f   :  { %v4802_v4 = vrot.slane %v4801_v3, 1 }
0x2e71   :  { %v4803_v5 = vadd.f32 %v4802_v4, %v4801_v3 }
0x2e73   :  { %14119 = vpush %v4803_v5 }
0x2ea4   :  { %s14120_s28 = spop %14119 }
0x2ea5   :  { %v4805_v0 = vstv %s14120_s28 }
0x2ea6   :  { %14240 = vrsqrt.f32 %v4805_v0 }
0x2eb0   :  { %v14241_v6 = vpop.eup %14240 }
0x2eb1   :  { %v15390_v23 = vmul.f32 %v14241_v6, %v4793_v54 }
0x2eb3   :  { %v4816_v7 = vrot.slane %v15390_v23, %v14503_v21  ;;  %v4809_v8 = vcombine.high %v15390_v23, %v15390_v23 }
0x2eb5   :  { %v4832_v10 = vrot.slane %v4816_v7, %v14503_v21  ;;  %v4824_v11 = vcombine.high %v4816_v7, %v4816_v7  ;;  %v4823_v12 = vrot.slane %v4809_v8, %v14503_v21 }
0x2eb7   :  { %v4861_v14 = vrot.slane %v4832_v10, %v14466_v59  ;;  %v4846_v15 = vrot.slane %v4824_v11, %v14503_v21  ;;  %v4854_v17 = vcombine.high %v4832_v10, %v4832_v10  ;;  %v4839_v18 = vrot.slane %v4823_v12, %v14503_v21 }
0x2eb8   :  { %v4825_v19 = vcombine.high %v4823_v12, %v4823_v12 }
0x2eb9   :  { %v4898_v20 = vmul.f32 %v4861_v14, %v14479_v32  ;;  %v4865_v22 = vrot.slane %v4846_v15, %v14466_v59  ;;  %v4869_v24 = vrot.slane %v4854_v17, %v14466_v59  ;;  %v4856_v25 = vcombine.high %v4846_v15, %v4846_v15 }
0x2eba   :  { %v4877_v26 = vrot.slane %v4839_v18, %v14466_v59  ;;  %v4853_v13 = vrot.slane %v4825_v19, %v14503_v21  ;;  %v4855_v27 = vcombine.high %v4839_v18, %v4839_v18  ;;  %v4930_v15 = vmul.f32 %v15390_v23, %v14498_v63 }
0x2ebb   :  { %v4906_v28 = vsel %vm28_vm1, %v4898_v20, -inf  ;;  %v4899_v29 = vmul.f32 %v4865_v22, %v14479_v32  ;;  %v4900_v30 = vmul.f32 %v4869_v24, %v14479_v32  ;;  %v4873_v58 = vrot.slane %v4856_v25, %v14466_v59 }
0x2ebc   :  { %4907 = vmax.xlane.f32.xlu1 %v4906_v28  ;;  %v4881_v35 = vrot.slane %v4853_v13, %v14466_v59  ;;  %v4857_v36 = vcombine.high %v4853_v13, %v4853_v13  ;;  %v4902_v38 = vmul.f32 %v4877_v26, %v14479_v32  ;;  %v4885_v39 = vrot.slane %v4855_v27, %v14466_v59 }
0x2ebd   :  { %v4909_v31 = vsel %vm28_vm1, %v4899_v29, -inf  ;;  %v4901_v34 = vmul.f32 %v4873_v58, %v14479_v32  ;;  %v4912_v37 = vsel %vm28_vm1, %v4900_v30, -inf }
0x2ebe   :  { %4910 = vmax.xlane.f32.xlu0 %v4909_v31  ;;  %v4903_v41 = vmul.f32 %v4881_v35, %v14479_v32  ;;  %v4889_v42 = vrot.slane %v4857_v36, %v14466_v59  ;;  %v4918_v43 = vsel %vm28_vm1, %v4902_v38, -inf  ;;  %v4904_v33 = vmul.f32 %v4885_v39, %v14479_v32 }
0x2ebf   :  { %v4915_v40 = vsel %vm28_vm1, %v4901_v34, -inf }
0x2ec0   :  { %4913 = vmax.xlane.f32.xlu1 %v4912_v37  ;;  %v4921_v44 = vsel %vm28_vm1, %v4903_v41, -inf  ;;  %v4905_v47 = vmul.f32 %v4889_v42, %v14479_v32  ;;  %v4924_v48 = vsel %vm28_vm1, %v4904_v33, -inf }
0x2ec2   :  { %4916 = vmax.xlane.f32.xlu0 %v4915_v40  ;;  %v4927_v2 = vsel %vm28_vm1, %v4905_v47, -inf }
0x2ec4   :  { %4919 = vmax.xlane.f32.xlu1 %v4918_v43 }
0x2ec6   :  { %4922 = vmax.xlane.f32.xlu0 %v4921_v44 }
0x2ec8   :  { %4925 = vmax.xlane.f32.xlu1 %v4924_v48 }
0x2eca   :  { %4928 = vmax.xlane.f32.xlu0 %v4927_v2 }
0x2f49   :  { %v4908_v49 = vpop.xlane.xlu1 %4907 }
0x2f4a   :  { %v4942_v52 = vrot.slane %v4908_v49, %v14487_v45 }
0x2f4b   :  { %v4911_v50 = vpop.xlane.xlu0 %4910 }
0x2f4c   :  { %v4946_v53 = vrot.slane %v4911_v50, %v14487_v45 }
0x2f4d   :  { %v4914_v54 = vpop.xlane.xlu1 %4913 }
0x2f4e   :  { %v4971_v55 = vsel %vm866_vm10, %v4946_v53, %v4942_v52  ;;  %v4950_v56 = vrot.slane %v4914_v54, %v14487_v45 }
0x2f4f   :  { %v4917_v57 = vpop.xlane.xlu0 %4916 }
0x2f50   :  { %v4972_v60 = vsel %vm867_vm11, %v4950_v56, %v4971_v55  ;;  %v4954_v61 = vrot.slane %v4917_v57, %v14487_v45 }
0x2f51   :  { %v4920_v62 = vpop.xlane.xlu1 %4919 }
0x2f52   :  { %v4973_v1 = vsel %vm869_vm12, %v4954_v61, %v4972_v60  ;;  %v4958_v3 = vrot.slane %v4920_v62, %v14487_v45 }
0x2f53   :  { %v4923_v4 = vpop.xlane.xlu0 %4922 }
0x2f54   :  { %v4974_v5 = vsel %vm871_vm13, %v4958_v3, %v4973_v1  ;;  %v4962_v0 = vrot.slane %v4923_v4, %v14487_v45 }
0x2f55   :  { %v4926_v6 = vpop.xlane.xlu1 %4925 }
0x2f56   :  { %v4975_v7 = vsel %vm873_vm14, %v4962_v0, %v4974_v5  ;;  %v4966_v8 = vrot.slane %v4926_v6, %v14487_v45 }
0x2f57   :  { %v4929_v10 = vpop.xlane.xlu0 %4928 }
0x2f58   :  { %v4970_v11 = vrot.slane %v4929_v10, %v14487_v45  ;;  %v4976_v12 = vsel %vm875_vm15, %v4966_v8, %v4975_v7 }
0x2f5a   :  { %v4977_v14 = vsel %vm877_vm2, %v4970_v11, %v4976_v12 }
0x2f5b   :  { %13890 = vmatpush3.msra.mxu1 %v4977_v14 }
0x2f5c   :  { %13892 = vmatmul.mubr.msk.f32.vlgmr.msra.gmra.mrb[24].mxu1 %vm28_vm1, %v14489_v46  ;;  %13899 = vmatprep.subr.mxu1 %v15382_v51 }
0x2f5d   :  { %13901 = vmatprep.mubr.msk.f32.mxu1 %vm14346_vm0, %v15382_v51 }
0x302f   :  { %v5045_v17 = vpop.f32.mrb[24].mxu1 }
0x3030   :  { %v5049_v18 = vadd.f32 %v5045_v17, %v4930_v15  ;;  %v13893_v19 = vpop.f32.mrb[25].mxu1 }
0x3032   :  { %v5050_v20 = vmul.f32 %v5049_v18, %v5049_v18 }
0x3034   :  { %v5051_v22 = vsel %vm28_vm1, %v5050_v20, 0.0 }
0x3035   :  { %5052 = vadd.xlane.f32.xlu1 %v5051_v22 }
0x30c2   :  { %v5053_v24 = vpop.xlane.xlu1 %5052 }
0x30c3   :  { %v5054_v25 = vrot.slane %v5053_v24, 4 }
0x30c5   :  { %v5055_v26 = vadd.f32 %v5054_v25, %v5053_v24 }
0x30c7   :  { %v5056_v13 = vrot.slane %v5055_v26, 2 }
0x30c9   :  { %v5057_v27 = vadd.f32 %v5056_v13, %v5055_v26 }
0x30cb   :  { %v5058_v28 = vrot.slane %v5057_v27, 1 }
0x30cd   :  { %v5059_v29 = vadd.f32 %v5058_v28, %v5057_v27 }
0x30cf   :  { %14121 = vpush %v5059_v29 }
0x3100   :  { %s14122_s29 = spop %14121 }
0x3101   :  { %v5061_v30 = vstv %s14122_s29 }
0x3102   :  { %14242 = vrsqrt.f32 %v5061_v30 }
0x310c   :  { %v14243_v58 = vpop.eup %14242 }
0x310d   :  { %v15448_v23 = vmul.f32 %v14243_v58, %v5049_v18 }
0x310f   :  { %v5072_v31 = vrot.slane %v15448_v23, %v14503_v21  ;;  %v5065_v34 = vcombine.high %v15448_v23, %v15448_v23 }
0x3111   :  { %v5088_v35 = vrot.slane %v5072_v31, %v14503_v21  ;;  %v5080_v36 = vcombine.high %v5072_v31, %v5072_v31  ;;  %v5079_v37 = vrot.slane %v5065_v34, %v14503_v21 }
0x3113   :  { %v5117_v38 = vrot.slane %v5088_v35, %v14466_v59  ;;  %v5102_v39 = vrot.slane %v5080_v36, %v14503_v21  ;;  %v5110_v40 = vcombine.high %v5088_v35, %v5088_v35  ;;  %v5095_v41 = vrot.slane %v5079_v37, %v14503_v21 }
0x3114   :  { %v5081_v42 = vcombine.high %v5079_v37, %v5079_v37 }
0x3115   :  { %v5154_v43 = vmul.f32 %v5117_v38, %v14479_v32  ;;  %v5121_v33 = vrot.slane %v5102_v39, %v14466_v59  ;;  %v5125_v44 = vrot.slane %v5110_v40, %v14466_v59  ;;  %v5112_v47 = vcombine.high %v5102_v39, %v5102_v39 }
0x3116   :  { %v5133_v48 = vrot.slane %v5095_v41, %v14466_v59  ;;  %v5109_v2 = vrot.slane %v5081_v42, %v14503_v21  ;;  %v5111_v49 = vcombine.high %v5095_v41, %v5095_v41  ;;  %v5186_v39 = vmul.f32 %v15448_v23, %v14498_v63 }
0x3117   :  { %v5162_v50 = vsel %vm28_vm1, %v5154_v43, -inf  ;;  %v5155_v52 = vmul.f32 %v5121_v33, %v14479_v32  ;;  %v5156_v53 = vmul.f32 %v5125_v44, %v14479_v32  ;;  %v5129_v54 = vrot.slane %v5112_v47, %v14466_v59 }
0x3118   :  { %5163 = vmax.xlane.f32.xlu0 %v5162_v50  ;;  %v5137_v57 = vrot.slane %v5109_v2, %v14466_v59  ;;  %v5113_v60 = vcombine.high %v5109_v2, %v5109_v2  ;;  %v5158_v62 = vmul.f32 %v5133_v48, %v14479_v32  ;;  %v5141_v1 = vrot.slane %v5111_v49, %v14466_v59 }
0x3119   :  { %v5165_v55 = vsel %vm28_vm1, %v5155_v52, -inf  ;;  %v5157_v56 = vmul.f32 %v5129_v54, %v14479_v32  ;;  %v5168_v61 = vsel %vm28_vm1, %v5156_v53, -inf }
0x311a   :  { %5166 = vmax.xlane.f32.xlu1 %v5165_v55  ;;  %v5159_v4 = vmul.f32 %v5137_v57, %v14479_v32  ;;  %v5145_v5 = vrot.slane %v5113_v60, %v14466_v59  ;;  %v5174_v0 = vsel %vm28_vm1, %v5158_v62, -inf  ;;  %v5160_v6 = vmul.f32 %v5141_v1, %v14479_v32 }
0x311b   :  { %v5171_v3 = vsel %vm28_vm1, %v5157_v56, -inf }
0x311c   :  { %5169 = vmax.xlane.f32.xlu0 %v5168_v61  ;;  %v5177_v7 = vsel %vm28_vm1, %v5159_v4, -inf  ;;  %v5161_v8 = vmul.f32 %v5145_v5, %v14479_v32  ;;  %v5180_v10 = vsel %vm28_vm1, %v5160_v6, -inf }
0x311e   :  { %5172 = vmax.xlane.f32.xlu1 %v5171_v3  ;;  %v5183_v11 = vsel %vm28_vm1, %v5161_v8, -inf }
0x3120   :  { %5175 = vmax.xlane.f32.xlu0 %v5174_v0 }
0x3122   :  { %5178 = vmax.xlane.f32.xlu1 %v5177_v7 }
0x3124   :  { %5181 = vmax.xlane.f32.xlu0 %v5180_v10 }
0x3126   :  { %5184 = vmax.xlane.f32.xlu1 %v5183_v11 }
0x31a5   :  { %v5164_v12 = vpop.xlane.xlu0 %5163 }
0x31a6   :  { %v5198_v15 = vrot.slane %v5164_v12, %v14487_v45 }
0x31a7   :  { %v5167_v14 = vpop.xlane.xlu1 %5166 }
0x31a8   :  { %v5202_v17 = vrot.slane %v5167_v14, %v14487_v45 }
0x31a9   :  { %v5170_v18 = vpop.xlane.xlu0 %5169 }
0x31aa   :  { %v5227_v19 = vsel %vm866_vm10, %v5202_v17, %v5198_v15  ;;  %v5206_v20 = vrot.slane %v5170_v18, %v14487_v45 }
0x31ab   :  { %v5173_v22 = vpop.xlane.xlu1 %5172 }
0x31ac   :  { %v5228_v24 = vsel %vm867_vm11, %v5206_v20, %v5227_v19  ;;  %v5210_v25 = vrot.slane %v5173_v22, %v14487_v45 }
0x31ad   :  { %v5176_v26 = vpop.xlane.xlu0 %5175 }
0x31ae   :  { %v5229_v13 = vsel %vm869_vm12, %v5210_v25, %v5228_v24  ;;  %v5214_v27 = vrot.slane %v5176_v26, %v14487_v45 }
0x31af   :  { %v5179_v28 = vpop.xlane.xlu1 %5178 }
0x31b0   :  { %v5230_v29 = vsel %vm871_vm13, %v5214_v27, %v5229_v13  ;;  %v5218_v30 = vrot.slane %v5179_v28, %v14487_v45 }
0x31b1   :  { %v5182_v58 = vpop.xlane.xlu0 %5181 }
0x31b2   :  { %v5231_v31 = vsel %vm873_vm14, %v5218_v30, %v5230_v29  ;;  %v5222_v34 = vrot.slane %v5182_v58, %v14487_v45 }
0x31b3   :  { %v5185_v35 = vpop.xlane.xlu1 %5184 }
0x31b4   :  { %v5226_v36 = vrot.slane %v5185_v35, %v14487_v45  ;;  %v5232_v37 = vsel %vm875_vm15, %v5222_v34, %v5231_v31 }
0x31b6   :  { %v5233_v38 = vsel %vm877_vm2, %v5226_v36, %v5232_v37 }
0x31b7   :  { %13895 = vmatpush3.msra.mxu0 %v5233_v38 }
0x31b8   :  { %13897 = vmatmul.mubr.msk.f32.vlgmr.msra.gmra.mrb[26].mxu0 %vm28_vm1, %v14489_v46  ;;  %13904 = vmatprep.subr.mxu0 %v15382_v51 }
0x31b9   :  { %13906 = vmatprep.mubr.msk.f32.mxu0 %vm14346_vm0, %v15382_v51 }
0x328b   :  { %v5301_v40 = vpop.f32.mrb[26].mxu0 }
0x328c   :  { %v5305_v41 = vadd.f32 %v5301_v40, %v5186_v39  ;;  %v13898_v42 = vpop.f32.mrb[27].mxu0 }
0x328e   :  { %v5306_v43 = vmul.f32 %v5305_v41, %v5305_v41 }
0x3290   :  { %v5307_v33 = vsel %vm28_vm1, %v5306_v43, 0.0 }
0x3291   :  { %5308 = vadd.xlane.f32.xlu0 %v5307_v33 }
0x331e   :  { %v5309_v44 = vpop.xlane.xlu0 %5308 }
0x331f   :  { %v5310_v47 = vrot.slane %v5309_v44, 4 }
0x3321   :  { %v5311_v48 = vadd.f32 %v5310_v47, %v5309_v44 }
0x3323   :  { %v5312_v2 = vrot.slane %v5311_v48, 2 }
0x3325   :  { %v5313_v49 = vadd.f32 %v5312_v2, %v5311_v48 }
0x3327   :  { %v5314_v50 = vrot.slane %v5313_v49, 1 }
0x3329   :  { %v5315_v52 = vadd.f32 %v5314_v50, %v5313_v49 }
0x332b   :  { %14123 = vpush %v5315_v52 }
0x335c   :  { %s14124_s30 = spop %14123 }
0x335d   :  { %v5317_v53 = vstv %s14124_s30 }
0x335e   :  { %14244 = vrsqrt.f32 %v5317_v53 }
0x3368   :  { %v14245_v54 = vpop.eup %14244 }
0x3369   :  { %v15506_v23 = vmul.f32 %v14245_v54, %v5305_v41 }
0x336b   :  { %v5328_v55 = vrot.slane %v15506_v23, %v14503_v21  ;;  %v5321_v56 = vcombine.high %v15506_v23, %v15506_v23 }
0x336d   :  { %v5344_v57 = vrot.slane %v5328_v55, %v14503_v21  ;;  %v5336_v60 = vcombine.high %v5328_v55, %v5328_v55  ;;  %v5335_v61 = vrot.slane %v5321_v56, %v14503_v21 }
0x336f   :  { %v5373_v62 = vrot.slane %v5344_v57, %v14466_v59  ;;  %v5358_v1 = vrot.slane %v5336_v60, %v14503_v21  ;;  %v5366_v3 = vcombine.high %v5344_v57, %v5344_v57  ;;  %v5351_v4 = vrot.slane %v5335_v61, %v14503_v21 }
0x3370   :  { %v5337_v5 = vcombine.high %v5335_v61, %v5335_v61 }
0x3371   :  { %v5410_v0 = vmul.f32 %v5373_v62, %v14479_v32  ;;  %v5377_v6 = vrot.slane %v5358_v1, %v14466_v59  ;;  %v5381_v7 = vrot.slane %v5366_v3, %v14466_v59  ;;  %v5368_v8 = vcombine.high %v5358_v1, %v5358_v1 }
0x3372   :  { %v5389_v10 = vrot.slane %v5351_v4, %v14466_v59  ;;  %v5365_v11 = vrot.slane %v5337_v5, %v14503_v21  ;;  %v5367_v12 = vcombine.high %v5351_v4, %v5351_v4  ;;  %v5442_v1 = vmul.f32 %v15506_v23, %v14498_v63 }
0x3373   :  { %v5418_v14 = vsel %vm28_vm1, %v5410_v0, -inf  ;;  %v5411_v15 = vmul.f32 %v5377_v6, %v14479_v32  ;;  %v5412_v17 = vmul.f32 %v5381_v7, %v14479_v32  ;;  %v5385_v18 = vrot.slane %v5368_v8, %v14466_v59 }
0x3374   :  { %5419 = vmax.xlane.f32.xlu1 %v5418_v14  ;;  %v5393_v22 = vrot.slane %v5365_v11, %v14466_v59  ;;  %v5369_v24 = vcombine.high %v5365_v11, %v5365_v11  ;;  %v5414_v26 = vmul.f32 %v5389_v10, %v14479_v32  ;;  %v5397_v13 = vrot.slane %v5367_v12, %v14466_v59 }
0x3375   :  { %v5421_v19 = vsel %vm28_vm1, %v5411_v15, -inf  ;;  %v5413_v20 = vmul.f32 %v5385_v18, %v14479_v32  ;;  %v5424_v25 = vsel %vm28_vm1, %v5412_v17, -inf }
0x3376   :  { %5422 = vmax.xlane.f32.xlu0 %v5421_v19  ;;  %v5415_v28 = vmul.f32 %v5393_v22, %v14479_v32  ;;  %v5401_v29 = vrot.slane %v5369_v24, %v14466_v59  ;;  %v5430_v30 = vsel %vm28_vm1, %v5414_v26, -inf  ;;  %v5416_v58 = vmul.f32 %v5397_v13, %v14479_v32 }
0x3377   :  { %v5427_v27 = vsel %vm28_vm1, %v5413_v20, -inf }
0x3378   :  { %5425 = vmax.xlane.f32.xlu1 %v5424_v25  ;;  %v5433_v31 = vsel %vm28_vm1, %v5415_v28, -inf  ;;  %v5417_v34 = vmul.f32 %v5401_v29, %v14479_v32  ;;  %v5436_v35 = vsel %vm28_vm1, %v5416_v58, -inf }
0x337a   :  { %5428 = vmax.xlane.f32.xlu0 %v5427_v27  ;;  %v5439_v36 = vsel %vm28_vm1, %v5417_v34, -inf }
0x337c   :  { %5431 = vmax.xlane.f32.xlu1 %v5430_v30 }
0x337e   :  { %5434 = vmax.xlane.f32.xlu0 %v5433_v31 }
0x3380   :  { %5437 = vmax.xlane.f32.xlu1 %v5436_v35 }
0x3382   :  { %5440 = vmax.xlane.f32.xlu0 %v5439_v36 }
0x3401   :  { %v5420_v37 = vpop.xlane.xlu1 %5419 }
0x3402   :  { %v5454_v39 = vrot.slane %v5420_v37, %v14487_v45 }
0x3403   :  { %v5423_v38 = vpop.xlane.xlu0 %5422 }
0x3404   :  { %v5458_v40 = vrot.slane %v5423_v38, %v14487_v45 }
0x3405   :  { %v5426_v41 = vpop.xlane.xlu1 %5425 }
0x3406   :  { %v5483_v42 = vsel %vm866_vm10, %v5458_v40, %v5454_v39  ;;  %v5462_v43 = vrot.slane %v5426_v41, %v14487_v45 }
0x3407   :  { %v5429_v33 = vpop.xlane.xlu0 %5428 }
0x3408   :  { %v5484_v44 = vsel %vm867_vm11, %v5462_v43, %v5483_v42  ;;  %v5466_v47 = vrot.slane %v5429_v33, %v14487_v45 }
0x3409   :  { %v5432_v48 = vpop.xlane.xlu1 %5431 }
0x340a   :  { %v5485_v2 = vsel %vm869_vm12, %v5466_v47, %v5484_v44  ;;  %v5470_v49 = vrot.slane %v5432_v48, %v14487_v45 }
0x340b   :  { %v5435_v50 = vpop.xlane.xlu0 %5434 }
0x340c   :  { %v5486_v52 = vsel %vm871_vm13, %v5470_v49, %v5485_v2  ;;  %v5474_v53 = vrot.slane %v5435_v50, %v14487_v45 }
0x340d   :  { %v5438_v54 = vpop.xlane.xlu1 %5437 }
0x340e   :  { %v5487_v55 = vsel %vm873_vm14, %v5474_v53, %v5486_v52  ;;  %v5478_v56 = vrot.slane %v5438_v54, %v14487_v45 }
0x340f   :  { %v5441_v57 = vpop.xlane.xlu0 %5440 }
0x3410   :  { %v5482_v60 = vrot.slane %v5441_v57, %v14487_v45  ;;  %v5488_v61 = vsel %vm875_vm15, %v5478_v56, %v5487_v55 }
0x3412   :  { %v5489_v62 = vsel %vm877_vm2, %v5482_v60, %v5488_v61 }
0x3413   :  { %13900 = vmatpush3.msra.mxu1 %v5489_v62 }
0x3414   :  { %13902 = vmatmul.mubr.msk.f32.vlgmr.msra.gmra.mrb[26].mxu1 %vm28_vm1, %v14489_v46  ;;  %13909 = vmatprep.subr.mxu1 %v15382_v51 }
0x3415   :  { %13911 = vmatprep.mubr.msk.f32.mxu1 %vm14346_vm0, %v15382_v51 }
0x34e7   :  { %v5557_v3 = vpop.f32.mrb[26].mxu1 }
0x34e8   :  { %v5561_v4 = vadd.f32 %v5557_v3, %v5442_v1  ;;  %v13903_v5 = vpop.f32.mrb[27].mxu1 }
0x34ea   :  { %v5562_v0 = vmul.f32 %v5561_v4, %v5561_v4 }
0x34ec   :  { %v5563_v6 = vsel %vm28_vm1, %v5562_v0, 0.0 }
0x34ed   :  { %5564 = vadd.xlane.f32.xlu1 %v5563_v6 }
0x357a   :  { %v5565_v7 = vpop.xlane.xlu1 %5564 }
0x357b   :  { %v5566_v8 = vrot.slane %v5565_v7, 4 }
0x357d   :  { %v5567_v10 = vadd.f32 %v5566_v8, %v5565_v7 }
0x357f   :  { %v5568_v11 = vrot.slane %v5567_v10, 2 }
0x3581   :  { %v5569_v12 = vadd.f32 %v5568_v11, %v5567_v10 }
0x3583   :  { %v5570_v14 = vrot.slane %v5569_v12, 1 }
0x3585   :  { %v5571_v15 = vadd.f32 %v5570_v14, %v5569_v12 }
0x3587   :  { %14125 = vpush %v5571_v15 }
0x35b8   :  { %s14126_s3 = spop %14125 }
0x35b9   :  { %v5573_v17 = vstv %s14126_s3 }
0x35ba   :  { %14246 = vrsqrt.f32 %v5573_v17 }
0x35c4   :  { %v14247_v18 = vpop.eup %14246 }
0x35c5   :  { %v15564_v23 = vmul.f32 %v14247_v18, %v5561_v4 }
0x35c7   :  { %v5584_v19 = vrot.slane %v15564_v23, %v14503_v21  ;;  %v5577_v20 = vcombine.high %v15564_v23, %v15564_v23 }
0x35c9   :  { %v5600_v22 = vrot.slane %v5584_v19, %v14503_v21  ;;  %v5592_v24 = vcombine.high %v5584_v19, %v5584_v19  ;;  %v5591_v25 = vrot.slane %v5577_v20, %v14503_v21 }
0x35cb   :  { %v5629_v26 = vrot.slane %v5600_v22, %v14466_v59  ;;  %v5614_v13 = vrot.slane %v5592_v24, %v14503_v21  ;;  %v5622_v27 = vcombine.high %v5600_v22, %v5600_v22  ;;  %v5607_v28 = vrot.slane %v5591_v25, %v14503_v21 }
0x35cc   :  { %v5593_v29 = vcombine.high %v5591_v25, %v5591_v25 }
0x35cd   :  { %v5666_v30 = vmul.f32 %v5629_v26, %v14479_v32  ;;  %v5633_v58 = vrot.slane %v5614_v13, %v14466_v59  ;;  %v5637_v31 = vrot.slane %v5622_v27, %v14466_v59  ;;  %v5624_v34 = vcombine.high %v5614_v13, %v5614_v13 }
0x35ce   :  { %v5645_v35 = vrot.slane %v5607_v28, %v14466_v59  ;;  %v5621_v36 = vrot.slane %v5593_v29, %v14503_v21  ;;  %v5623_v37 = vcombine.high %v5607_v28, %v5607_v28  ;;  %v5698_v13 = vmul.f32 %v15564_v23, %v14498_v63 }
0x35cf   :  { %v5674_v38 = vsel %vm28_vm1, %v5666_v30, -inf  ;;  %v5667_v39 = vmul.f32 %v5633_v58, %v14479_v32  ;;  %v5668_v40 = vmul.f32 %v5637_v31, %v14479_v32  ;;  %v5641_v41 = vrot.slane %v5624_v34, %v14466_v59 }
0x35d0   :  { %5675 = vmax.xlane.f32.xlu0 %v5674_v38  ;;  %v5649_v33 = vrot.slane %v5621_v36, %v14466_v59  ;;  %v5625_v44 = vcombine.high %v5621_v36, %v5621_v36  ;;  %v5670_v48 = vmul.f32 %v5645_v35, %v14479_v32  ;;  %v5653_v2 = vrot.slane %v5623_v37, %v14466_v59 }
0x35d1   :  { %v5677_v42 = vsel %vm28_vm1, %v5667_v39, -inf  ;;  %v5669_v43 = vmul.f32 %v5641_v41, %v14479_v32  ;;  %v5680_v47 = vsel %vm28_vm1, %v5668_v40, -inf }
0x35d2   :  { %5678 = vmax.xlane.f32.xlu1 %v5677_v42  ;;  %v5671_v50 = vmul.f32 %v5649_v33, %v14479_v32  ;;  %v5657_v52 = vrot.slane %v5625_v44, %v14466_v59  ;;  %v5686_v53 = vsel %vm28_vm1, %v5670_v48, -inf  ;;  %v5672_v54 = vmul.f32 %v5653_v2, %v14479_v32 }
0x35d3   :  { %v5683_v49 = vsel %vm28_vm1, %v5669_v43, -inf }
0x35d4   :  { %5681 = vmax.xlane.f32.xlu0 %v5680_v47  ;;  %v5689_v55 = vsel %vm28_vm1, %v5671_v50, -inf  ;;  %v5673_v56 = vmul.f32 %v5657_v52, %v14479_v32  ;;  %v5692_v57 = vsel %vm28_vm1, %v5672_v54, -inf }
0x35d6   :  { %5684 = vmax.xlane.f32.xlu1 %v5683_v49  ;;  %v5695_v60 = vsel %vm28_vm1, %v5673_v56, -inf }
0x35d8   :  { %5687 = vmax.xlane.f32.xlu0 %v5686_v53 }
0x35da   :  { %5690 = vmax.xlane.f32.xlu1 %v5689_v55 }
0x35dc   :  { %5693 = vmax.xlane.f32.xlu0 %v5692_v57 }
0x35de   :  { %5696 = vmax.xlane.f32.xlu1 %v5695_v60 }
0x365d   :  { %v5676_v61 = vpop.xlane.xlu0 %5675 }
0x365e   :  { %v5710_v1 = vrot.slane %v5676_v61, %v14487_v45 }
0x365f   :  { %v5679_v62 = vpop.xlane.xlu1 %5678 }
0x3660   :  { %v5714_v3 = vrot.slane %v5679_v62, %v14487_v45 }
0x3661   :  { %v5682_v4 = vpop.xlane.xlu0 %5681 }
0x3662   :  { %v5739_v5 = vsel %vm866_vm10, %v5714_v3, %v5710_v1  ;;  %v5718_v0 = vrot.slane %v5682_v4, %v14487_v45 }
0x3663   :  { %v5685_v6 = vpop.xlane.xlu1 %5684 }
0x3664   :  { %v5740_v7 = vsel %vm867_vm11, %v5718_v0, %v5739_v5  ;;  %v5722_v8 = vrot.slane %v5685_v6, %v14487_v45 }
0x3665   :  { %v5688_v10 = vpop.xlane.xlu0 %5687 }
0x3666   :  { %v5741_v11 = vsel %vm869_vm12, %v5722_v8, %v5740_v7  ;;  %v5726_v12 = vrot.slane %v5688_v10, %v14487_v45 }
0x3667   :  { %v5691_v14 = vpop.xlane.xlu1 %5690 }
0x3668   :  { %v5742_v15 = vsel %vm871_vm13, %v5726_v12, %v5741_v11  ;;  %v5730_v17 = vrot.slane %v5691_v14, %v14487_v45 }
0x3669   :  { %v5694_v18 = vpop.xlane.xlu0 %5693 }
0x366a   :  { %v5743_v19 = vsel %vm873_vm14, %v5730_v17, %v5742_v15  ;;  %v5734_v20 = vrot.slane %v5694_v18, %v14487_v45 }
0x366b   :  { %v5697_v22 = vpop.xlane.xlu1 %5696 }
0x366c   :  { %v5738_v24 = vrot.slane %v5697_v22, %v14487_v45  ;;  %v5744_v25 = vsel %vm875_vm15, %v5734_v20, %v5743_v19 }
0x366e   :  { %v5745_v26 = vsel %vm877_vm2, %v5738_v24, %v5744_v25 }
0x366f   :  { %13905 = vmatpush3.msra.mxu0 %v5745_v26 }
0x3670   :  { %13907 = vmatmul.mubr.msk.f32.vlgmr.msra.gmra.mrb[28].mxu0 %vm28_vm1, %v14489_v46  ;;  %13914 = vmatprep.subr.mxu0 %v15382_v51 }
0x3671   :  { %13916 = vmatprep.mubr.msk.f32.mxu0 %vm14346_vm0, %v15382_v51 }
0x3743   :  { %v5813_v27 = vpop.f32.mrb[28].mxu0 }
0x3744   :  { %v5817_v28 = vadd.f32 %v5813_v27, %v5698_v13  ;;  %v13908_v29 = vpop.f32.mrb[29].mxu0 }
0x3746   :  { %v5818_v30 = vmul.f32 %v5817_v28, %v5817_v28 }
0x3748   :  { %v5819_v58 = vsel %vm28_vm1, %v5818_v30, 0.0 }
0x3749   :  { %5820 = vadd.xlane.f32.xlu0 %v5819_v58 }
0x37d6   :  { %v5821_v31 = vpop.xlane.xlu0 %5820 }
0x37d7   :  { %v5822_v34 = vrot.slane %v5821_v31, 4 }
0x37d9   :  { %v5823_v35 = vadd.f32 %v5822_v34, %v5821_v31 }
0x37db   :  { %v5824_v36 = vrot.slane %v5823_v35, 2 }
0x37dd   :  { %v5825_v37 = vadd.f32 %v5824_v36, %v5823_v35 }
0x37df   :  { %v5826_v38 = vrot.slane %v5825_v37, 1 }
0x37e1   :  { %v5827_v39 = vadd.f32 %v5826_v38, %v5825_v37 }
0x37e3   :  { %14127 = vpush %v5827_v39 }
0x3814   :  { %s14128_s5 = spop %14127 }
0x3815   :  { %v5829_v40 = vstv %s14128_s5 }
0x3816   :  { %14248 = vrsqrt.f32 %v5829_v40 }
0x3820   :  { %v14249_v41 = vpop.eup %14248 }
0x3821   :  { %v15622_v23 = vmul.f32 %v14249_v41, %v5817_v28 }
0x3823   :  { %v5840_v42 = vrot.slane %v15622_v23, %v14503_v21  ;;  %v5833_v43 = vcombine.high %v15622_v23, %v15622_v23 }
0x3825   :  { %v5856_v33 = vrot.slane %v5840_v42, %v14503_v21  ;;  %v5848_v44 = vcombine.high %v5840_v42, %v5840_v42  ;;  %v5847_v47 = vrot.slane %v5833_v43, %v14503_v21 }
0x3827   :  { %v5885_v48 = vrot.slane %v5856_v33, %v14466_v59  ;;  %v5870_v2 = vrot.slane %v5848_v44, %v14503_v21  ;;  %v5878_v49 = vcombine.high %v5856_v33, %v5856_v33  ;;  %v5863_v50 = vrot.slane %v5847_v47, %v14503_v21 }
0x3828   :  { %v5849_v52 = vcombine.high %v5847_v47, %v5847_v47 }
0x3829   :  { %v5922_v53 = vmul.f32 %v5885_v48, %v14479_v32  ;;  %v5889_v54 = vrot.slane %v5870_v2, %v14466_v59  ;;  %v5893_v55 = vrot.slane %v5878_v49, %v14466_v59  ;;  %v5880_v56 = vcombine.high %v5870_v2, %v5870_v2 }
0x382a   :  { %v5901_v57 = vrot.slane %v5863_v50, %v14466_v59  ;;  %v5877_v60 = vrot.slane %v5849_v52, %v14503_v21  ;;  %v5879_v61 = vcombine.high %v5863_v50, %v5863_v50  ;;  %v5954_v2 = vmul.f32 %v15622_v23, %v14498_v63 }
0x382b   :  { %v5930_v62 = vsel %vm28_vm1, %v5922_v53, -inf  ;;  %v5923_v1 = vmul.f32 %v5889_v54, %v14479_v32  ;;  %v5924_v3 = vmul.f32 %v5893_v55, %v14479_v32  ;;  %v5897_v4 = vrot.slane %v5880_v56, %v14466_v59 }
0x382c   :  { %5931 = vmax.xlane.f32.xlu1 %v5930_v62  ;;  %v5905_v6 = vrot.slane %v5877_v60, %v14466_v59  ;;  %v5881_v7 = vcombine.high %v5877_v60, %v5877_v60  ;;  %v5926_v10 = vmul.f32 %v5901_v57, %v14479_v32  ;;  %v5909_v11 = vrot.slane %v5879_v61, %v14466_v59 }
0x382d   :  { %v5933_v5 = vsel %vm28_vm1, %v5923_v1, -inf  ;;  %v5925_v0 = vmul.f32 %v5897_v4, %v14479_v32  ;;  %v5936_v8 = vsel %vm28_vm1, %v5924_v3, -inf }
0x382e   :  { %5934 = vmax.xlane.f32.xlu0 %v5933_v5  ;;  %v5927_v14 = vmul.f32 %v5905_v6, %v14479_v32  ;;  %v5913_v15 = vrot.slane %v5881_v7, %v14466_v59  ;;  %v5942_v17 = vsel %vm28_vm1, %v5926_v10, -inf  ;;  %v5928_v18 = vmul.f32 %v5909_v11, %v14479_v32 }
0x382f   :  { %v5939_v12 = vsel %vm28_vm1, %v5925_v0, -inf }
0x3830   :  { %5937 = vmax.xlane.f32.xlu1 %v5936_v8  ;;  %v5945_v19 = vsel %vm28_vm1, %v5927_v14, -inf  ;;  %v5929_v20 = vmul.f32 %v5913_v15, %v14479_v32  ;;  %v5948_v22 = vsel %vm28_vm1, %v5928_v18, -inf }
0x3832   :  { %5940 = vmax.xlane.f32.xlu0 %v5939_v12  ;;  %v5951_v24 = vsel %vm28_vm1, %v5929_v20, -inf }
0x3834   :  { %5943 = vmax.xlane.f32.xlu1 %v5942_v17 }
0x3836   :  { %5946 = vmax.xlane.f32.xlu0 %v5945_v19 }
0x3838   :  { %5949 = vmax.xlane.f32.xlu1 %v5948_v22 }
0x383a   :  { %5952 = vmax.xlane.f32.xlu0 %v5951_v24 }
0x38b9   :  { %v5932_v25 = vpop.xlane.xlu1 %5931 }
0x38ba   :  { %v5966_v13 = vrot.slane %v5932_v25, %v14487_v45 }
0x38bb   :  { %v5935_v26 = vpop.xlane.xlu0 %5934 }
0x38bc   :  { %v5970_v27 = vrot.slane %v5935_v26, %v14487_v45 }
0x38bd   :  { %v5938_v28 = vpop.xlane.xlu1 %5937 }
0x38be   :  { %v5995_v29 = vsel %vm866_vm10, %v5970_v27, %v5966_v13  ;;  %v5974_v30 = vrot.slane %v5938_v28, %v14487_v45 }
0x38bf   :  { %v5941_v58 = vpop.xlane.xlu0 %5940 }
0x38c0   :  { %v5996_v31 = vsel %vm867_vm11, %v5974_v30, %v5995_v29  ;;  %v5978_v34 = vrot.slane %v5941_v58, %v14487_v45 }
0x38c1   :  { %v5944_v35 = vpop.xlane.xlu1 %5943 }
0x38c2   :  { %v5997_v36 = vsel %vm869_vm12, %v5978_v34, %v5996_v31  ;;  %v5982_v37 = vrot.slane %v5944_v35, %v14487_v45 }
0x38c3   :  { %v5947_v38 = vpop.xlane.xlu0 %5946 }
0x38c4   :  { %v5998_v39 = vsel %vm871_vm13, %v5982_v37, %v5997_v36  ;;  %v5986_v40 = vrot.slane %v5947_v38, %v14487_v45 }
0x38c5   :  { %v5950_v41 = vpop.xlane.xlu1 %5949 }
0x38c6   :  { %v5999_v42 = vsel %vm873_vm14, %v5986_v40, %v5998_v39  ;;  %v5990_v43 = vrot.slane %v5950_v41, %v14487_v45 }
0x38c7   :  { %v5953_v33 = vpop.xlane.xlu0 %5952 }
0x38c8   :  { %v5994_v44 = vrot.slane %v5953_v33, %v14487_v45  ;;  %v6000_v47 = vsel %vm875_vm15, %v5990_v43, %v5999_v42 }
0x38ca   :  { %v6001_v48 = vsel %vm877_vm2, %v5994_v44, %v6000_v47 }
0x38cb   :  { %13910 = vmatpush3.msra.mxu1 %v6001_v48 }
0x38cc   :  { %13912 = vmatmul.mubr.msk.f32.vlgmr.msra.gmra.mrb[28].mxu1 %vm28_vm1, %v14489_v46  ;;  %13919 = vmatprep.subr.mxu1 %v15382_v51 }
0x38cd   :  { %13921 = vmatprep.mubr.msk.f32.mxu1 %vm14346_vm0, %v15382_v51 }
0x399f   :  { %v6069_v49 = vpop.f32.mrb[28].mxu1 }
0x39a0   :  { %v6073_v50 = vadd.f32 %v6069_v49, %v5954_v2  ;;  %v13913_v52 = vpop.f32.mrb[29].mxu1 }
0x39a2   :  { %v6074_v53 = vmul.f32 %v6073_v50, %v6073_v50 }
0x39a4   :  { %v6075_v54 = vsel %vm28_vm1, %v6074_v53, 0.0 }
0x39a5   :  { %6076 = vadd.xlane.f32.xlu1 %v6075_v54 }
0x3a32   :  { %v6077_v55 = vpop.xlane.xlu1 %6076 }
0x3a33   :  { %v6078_v56 = vrot.slane %v6077_v55, 4 }
0x3a35   :  { %v6079_v57 = vadd.f32 %v6078_v56, %v6077_v55 }
0x3a37   :  { %v6080_v60 = vrot.slane %v6079_v57, 2 }
0x3a39   :  { %v6081_v61 = vadd.f32 %v6080_v60, %v6079_v57 }
0x3a3b   :  { %v6082_v62 = vrot.slane %v6081_v61, 1 }
0x3a3d   :  { %v6083_v1 = vadd.f32 %v6082_v62, %v6081_v61 }
0x3a3f   :  { %14129 = vpush %v6083_v1 }
0x3a70   :  { %s14130_s6 = spop %14129 }
0x3a71   :  { %v6085_v51 = vstv %s14130_s6 }
0x3a72   :  { %14250 = vrsqrt.f32 %v6085_v51 }
0x3a7c   :  { %v14251_v3 = vpop.eup %14250 }
0x3a7d   :  { %v15680_v23 = vmul.f32 %v14251_v3, %v6073_v50 }
0x3a7f   :  { %v6096_v4 = vrot.slane %v15680_v23, %v14503_v21  ;;  %v6089_v5 = vcombine.high %v15680_v23, %v15680_v23 }
0x3a81   :  { %v6112_v0 = vrot.slane %v6096_v4, %v14503_v21  ;;  %v6104_v6 = vcombine.high %v6096_v4, %v6096_v4  ;;  %v6103_v7 = vrot.slane %v6089_v5, %v14503_v21 }
0x3a83   :  { %v6141_v8 = vrot.slane %v6112_v0, %v14466_v59  ;;  %v6126_v10 = vrot.slane %v6104_v6, %v14503_v21  ;;  %v6134_v11 = vcombine.high %v6112_v0, %v6112_v0  ;;  %v6119_v12 = vrot.slane %v6103_v7, %v14503_v21 }
0x3a84   :  { %v6105_v14 = vcombine.high %v6103_v7, %v6103_v7 }
0x3a85   :  { %v6178_v15 = vmul.f32 %v6141_v8, %v14479_v32  ;;  %v6145_v17 = vrot.slane %v6126_v10, %v14466_v59  ;;  %v6149_v18 = vrot.slane %v6134_v11, %v14466_v59  ;;  %v6136_v19 = vcombine.high %v6126_v10, %v6126_v10  ;;  %v15735_v8 = vld [vmem:[%s17397_s2 + $0x8] sm:$0xff] }
0x3a86   :  { %v6157_v20 = vrot.slane %v6119_v12, %v14466_v59  ;;  %v6133_v22 = vrot.slane %v6105_v14, %v14503_v21  ;;  %v6135_v24 = vcombine.high %v6119_v12, %v6119_v12  ;;  %v6210_v10 = vmul.f32 %v15680_v23, %v14498_v63 }
0x3a87   :  { %v6186_v25 = vsel %vm28_vm1, %v6178_v15, -inf  ;;  %v6179_v26 = vmul.f32 %v6145_v17, %v14479_v32  ;;  %v6180_v13 = vmul.f32 %v6149_v18, %v14479_v32  ;;  %v6153_v27 = vrot.slane %v6136_v19, %v14466_v59 }
0x3a88   :  { %6187 = vmax.xlane.f32.xlu0 %v6186_v25  ;;  %v6161_v30 = vrot.slane %v6133_v22, %v14466_v59  ;;  %v6137_v58 = vcombine.high %v6133_v22, %v6133_v22  ;;  %v6182_v34 = vmul.f32 %v6157_v20, %v14479_v32  ;;  %v6165_v35 = vrot.slane %v6135_v24, %v14466_v59 }
0x3a89   :  { %v6189_v28 = vsel %vm28_vm1, %v6179_v26, -inf  ;;  %v6181_v29 = vmul.f32 %v6153_v27, %v14479_v32  ;;  %v6192_v31 = vsel %vm28_vm1, %v6180_v13, -inf }
0x3a8a   :  { %6190 = vmax.xlane.f32.xlu1 %v6189_v28  ;;  %v6183_v37 = vmul.f32 %v6161_v30, %v14479_v32  ;;  %v6169_v38 = vrot.slane %v6137_v58, %v14466_v59  ;;  %v6198_v39 = vsel %vm28_vm1, %v6182_v34, -inf  ;;  %v6184_v40 = vmul.f32 %v6165_v35, %v14479_v32 }
0x3a8b   :  { %v6195_v36 = vsel %vm28_vm1, %v6181_v29, -inf }
0x3a8c   :  { %6193 = vmax.xlane.f32.xlu0 %v6192_v31  ;;  %v6201_v41 = vsel %vm28_vm1, %v6183_v37, -inf  ;;  %v6185_v42 = vmul.f32 %v6169_v38, %v14479_v32  ;;  %v6204_v43 = vsel %vm28_vm1, %v6184_v40, -inf }
0x3a8e   :  { %6196 = vmax.xlane.f32.xlu1 %v6195_v36  ;;  %v6207_v33 = vsel %vm28_vm1, %v6185_v42, -inf }
0x3a90   :  { %6199 = vmax.xlane.f32.xlu0 %v6198_v39 }
0x3a92   :  { %6202 = vmax.xlane.f32.xlu1 %v6201_v41 }
0x3a94   :  { %6205 = vmax.xlane.f32.xlu0 %v6204_v43 }
0x3a96   :  { %6208 = vmax.xlane.f32.xlu1 %v6207_v33 }
0x3b15   :  { %v6188_v44 = vpop.xlane.xlu0 %6187 }
0x3b16   :  { %v6222_v48 = vrot.slane %v6188_v44, %v14487_v45 }
0x3b17   :  { %v6191_v47 = vpop.xlane.xlu1 %6190 }
0x3b18   :  { %v6226_v2 = vrot.slane %v6191_v47, %v14487_v45 }
0x3b19   :  { %v6194_v49 = vpop.xlane.xlu0 %6193 }
0x3b1a   :  { %v6251_v50 = vsel %vm866_vm10, %v6226_v2, %v6222_v48  ;;  %v6230_v52 = vrot.slane %v6194_v49, %v14487_v45 }
0x3b1b   :  { %v6197_v53 = vpop.xlane.xlu1 %6196 }
0x3b1c   :  { %v6252_v54 = vsel %vm867_vm11, %v6230_v52, %v6251_v50  ;;  %v6234_v55 = vrot.slane %v6197_v53, %v14487_v45 }
0x3b1d   :  { %v6200_v56 = vpop.xlane.xlu0 %6199 }
0x3b1e   :  { %v6253_v57 = vsel %vm869_vm12, %v6234_v55, %v6252_v54  ;;  %v6238_v60 = vrot.slane %v6200_v56, %v14487_v45 }
0x3b1f   :  { %v6203_v61 = vpop.xlane.xlu1 %6202 }
0x3b20   :  { %v6254_v62 = vsel %vm871_vm13, %v6238_v60, %v6253_v57  ;;  %v6242_v1 = vrot.slane %v6203_v61, %v14487_v45 }
0x3b21   :  { %v6206_v51 = vpop.xlane.xlu0 %6205 }
0x3b22   :  { %v6255_v3 = vsel %vm873_vm14, %v6242_v1, %v6254_v62  ;;  %v6246_v4 = vrot.slane %v6206_v51, %v14487_v45 }
0x3b23   :  { %v6209_v5 = vpop.xlane.xlu1 %6208 }
0x3b24   :  { %v6250_v0 = vrot.slane %v6209_v5, %v14487_v45  ;;  %v6256_v6 = vsel %vm875_vm15, %v6246_v4, %v6255_v3 }
0x3b26   :  { %v6257_v7 = vsel %vm877_vm2, %v6250_v0, %v6256_v6 }
0x3b27   :  { %13915 = vmatpush3.msra.mxu0 %v6257_v7 }
0x3b28   :  { %13917 = vmatmul.mubr.msk.f32.vlgmr.msra.gmra.mrb[30].mxu0 %vm28_vm1, %v14489_v46  ;;  %13924 = vmatprep.subr.mxu0 %v15735_v8 }
0x3b29   :  { %13926 = vmatprep.mubr.msk.f32.mxu0 %vm14346_vm0, %v15735_v8 }
0x3bfb   :  { %v6325_v11 = vpop.f32.mrb[30].mxu0 }
0x3bfc   :  { %v6329_v12 = vadd.f32 %v6325_v11, %v6210_v10  ;;  %v13918_v14 = vpop.f32.mrb[31].mxu0 }
0x3bfe   :  { %v6330_v15 = vmul.f32 %v6329_v12, %v6329_v12 }
0x3c00   :  { %v6331_v17 = vsel %vm28_vm1, %v6330_v15, 0.0 }
0x3c01   :  { %6332 = vadd.xlane.f32.xlu0 %v6331_v17 }
0x3c8e   :  { %v6333_v18 = vpop.xlane.xlu0 %6332 }
0x3c8f   :  { %v6334_v19 = vrot.slane %v6333_v18, 4 }
0x3c91   :  { %v6335_v20 = vadd.f32 %v6334_v19, %v6333_v18 }
0x3c93   :  { %v6336_v22 = vrot.slane %v6335_v20, 2 }
0x3c95   :  { %v6337_v24 = vadd.f32 %v6336_v22, %v6335_v20 }
0x3c97   :  { %v6338_v25 = vrot.slane %v6337_v24, 1 }
0x3c99   :  { %v6339_v26 = vadd.f32 %v6338_v25, %v6337_v24 }
0x3c9b   :  { %14131 = vpush %v6339_v26 }
0x3ccc   :  { %s14132_s8 = spop %14131 }
0x3ccd   :  { %v6341_v13 = vstv %s14132_s8 }
0x3cce   :  { %14252 = vrsqrt.f32 %v6341_v13 }
0x3cd8   :  { %v14253_v27 = vpop.eup %14252 }
0x3cd9   :  { %v15743_v23 = vmul.f32 %v14253_v27, %v6329_v12 }
0x3cdb   :  { %v6352_v28 = vrot.slane %v15743_v23, %v14503_v21  ;;  %v6345_v29 = vcombine.high %v15743_v23, %v15743_v23 }
0x3cdd   :  { %v6368_v30 = vrot.slane %v6352_v28, %v14503_v21  ;;  %v6360_v58 = vcombine.high %v6352_v28, %v6352_v28  ;;  %v6359_v31 = vrot.slane %v6345_v29, %v14503_v21 }
0x3cdf   :  { %v6397_v34 = vrot.slane %v6368_v30, %v14466_v59  ;;  %v6382_v35 = vrot.slane %v6360_v58, %v14503_v21  ;;  %v6390_v36 = vcombine.high %v6368_v30, %v6368_v30  ;;  %v6375_v37 = vrot.slane %v6359_v31, %v14503_v21 }
0x3ce0   :  { %v6361_v38 = vcombine.high %v6359_v31, %v6359_v31 }
0x3ce1   :  { %v6434_v39 = vmul.f32 %v6397_v34, %v14479_v32  ;;  %v6401_v40 = vrot.slane %v6382_v35, %v14466_v59  ;;  %v6405_v41 = vrot.slane %v6390_v36, %v14466_v59  ;;  %v6392_v42 = vcombine.high %v6382_v35, %v6382_v35 }
0x3ce2   :  { %v6413_v43 = vrot.slane %v6375_v37, %v14466_v59  ;;  %v6389_v33 = vrot.slane %v6361_v38, %v14503_v21  ;;  %v6391_v44 = vcombine.high %v6375_v37, %v6375_v37  ;;  %v6466_v35 = vmul.f32 %v15743_v23, %v14498_v63 }
0x3ce3   :  { %v6442_v47 = vsel %vm28_vm1, %v6434_v39, -inf  ;;  %v6435_v48 = vmul.f32 %v6401_v40, %v14479_v32  ;;  %v6436_v2 = vmul.f32 %v6405_v41, %v14479_v32  ;;  %v6409_v49 = vrot.slane %v6392_v42, %v14466_v59 }
0x3ce4   :  { %6443 = vmax.xlane.f32.xlu1 %v6442_v47  ;;  %v6417_v53 = vrot.slane %v6389_v33, %v14466_v59  ;;  %v6393_v54 = vcombine.high %v6389_v33, %v6389_v33  ;;  %v6438_v56 = vmul.f32 %v6413_v43, %v14479_v32  ;;  %v6421_v57 = vrot.slane %v6391_v44, %v14466_v59 }
0x3ce5   :  { %v6445_v50 = vsel %vm28_vm1, %v6435_v48, -inf  ;;  %v6437_v52 = vmul.f32 %v6409_v49, %v14479_v32  ;;  %v6448_v55 = vsel %vm28_vm1, %v6436_v2, -inf }
0x3ce6   :  { %6446 = vmax.xlane.f32.xlu0 %v6445_v50  ;;  %v6439_v61 = vmul.f32 %v6417_v53, %v14479_v32  ;;  %v6425_v62 = vrot.slane %v6393_v54, %v14466_v59  ;;  %v6454_v1 = vsel %vm28_vm1, %v6438_v56, -inf  ;;  %v6440_v51 = vmul.f32 %v6421_v57, %v14479_v32 }
0x3ce7   :  { %v6451_v60 = vsel %vm28_vm1, %v6437_v52, -inf }
0x3ce8   :  { %6449 = vmax.xlane.f32.xlu1 %v6448_v55  ;;  %v6457_v3 = vsel %vm28_vm1, %v6439_v61, -inf  ;;  %v6441_v4 = vmul.f32 %v6425_v62, %v14479_v32  ;;  %v6460_v5 = vsel %vm28_vm1, %v6440_v51, -inf }
0x3cea   :  { %6452 = vmax.xlane.f32.xlu0 %v6451_v60  ;;  %v6463_v0 = vsel %vm28_vm1, %v6441_v4, -inf }
0x3cec   :  { %6455 = vmax.xlane.f32.xlu1 %v6454_v1 }
0x3cee   :  { %6458 = vmax.xlane.f32.xlu0 %v6457_v3 }
0x3cf0   :  { %6461 = vmax.xlane.f32.xlu1 %v6460_v5 }
0x3cf2   :  { %6464 = vmax.xlane.f32.xlu0 %v6463_v0 }
0x3d71   :  { %v6444_v6 = vpop.xlane.xlu1 %6443 }
0x3d72   :  { %v6478_v10 = vrot.slane %v6444_v6, %v14487_v45 }
0x3d73   :  { %v6447_v7 = vpop.xlane.xlu0 %6446 }
0x3d74   :  { %v6482_v11 = vrot.slane %v6447_v7, %v14487_v45 }
0x3d75   :  { %v6450_v12 = vpop.xlane.xlu1 %6449 }
0x3d76   :  { %v6507_v14 = vsel %vm866_vm10, %v6482_v11, %v6478_v10  ;;  %v6486_v15 = vrot.slane %v6450_v12, %v14487_v45 }
0x3d77   :  { %v6453_v17 = vpop.xlane.xlu0 %6452 }
0x3d78   :  { %v6508_v18 = vsel %vm867_vm11, %v6486_v15, %v6507_v14  ;;  %v6490_v19 = vrot.slane %v6453_v17, %v14487_v45 }
0x3d79   :  { %v6456_v20 = vpop.xlane.xlu1 %6455 }
0x3d7a   :  { %v6509_v22 = vsel %vm869_vm12, %v6490_v19, %v6508_v18  ;;  %v6494_v24 = vrot.slane %v6456_v20, %v14487_v45 }
0x3d7b   :  { %v6459_v25 = vpop.xlane.xlu0 %6458 }
0x3d7c   :  { %v6510_v26 = vsel %vm871_vm13, %v6494_v24, %v6509_v22  ;;  %v6498_v13 = vrot.slane %v6459_v25, %v14487_v45 }
0x3d7d   :  { %v6462_v27 = vpop.xlane.xlu1 %6461 }
0x3d7e   :  { %v6511_v28 = vsel %vm873_vm14, %v6498_v13, %v6510_v26  ;;  %v6502_v29 = vrot.slane %v6462_v27, %v14487_v45 }
0x3d7f   :  { %v6465_v30 = vpop.xlane.xlu0 %6464 }
0x3d80   :  { %v6506_v58 = vrot.slane %v6465_v30, %v14487_v45  ;;  %v6512_v31 = vsel %vm875_vm15, %v6502_v29, %v6511_v28 }
0x3d82   :  { %v6513_v34 = vsel %vm877_vm2, %v6506_v58, %v6512_v31 }
0x3d83   :  { %13920 = vmatpush3.msra.mxu1 %v6513_v34 }
0x3d84   :  { %13922 = vmatmul.mubr.msk.f32.vlgmr.msra.gmra.mrb[30].mxu1 %vm28_vm1, %v14489_v46  ;;  %13929 = vmatprep.subr.mxu1 %v15735_v8 }
0x3d85   :  { %13931 = vmatprep.mubr.msk.f32.mxu1 %vm14346_vm0, %v15735_v8 }
0x3e57   :  { %v6581_v36 = vpop.f32.mrb[30].mxu1 }
0x3e58   :  { %v6585_v37 = vadd.f32 %v6581_v36, %v6466_v35  ;;  %v13923_v38 = vpop.f32.mrb[31].mxu1 }
0x3e5a   :  { %v6586_v39 = vmul.f32 %v6585_v37, %v6585_v37 }
0x3e5c   :  { %v6587_v40 = vsel %vm28_vm1, %v6586_v39, 0.0 }
0x3e5d   :  { %6588 = vadd.xlane.f32.xlu1 %v6587_v40 }
0x3eea   :  { %v6589_v41 = vpop.xlane.xlu1 %6588 }
0x3eeb   :  { %v6590_v42 = vrot.slane %v6589_v41, 4 }
0x3eed   :  { %v6591_v43 = vadd.f32 %v6590_v42, %v6589_v41 }
0x3eef   :  { %v6592_v33 = vrot.slane %v6591_v43, 2 }
0x3ef1   :  { %v6593_v44 = vadd.f32 %v6592_v33, %v6591_v43 }
0x3ef3   :  { %v6594_v47 = vrot.slane %v6593_v44, 1 }
0x3ef5   :  { %v6595_v48 = vadd.f32 %v6594_v47, %v6593_v44 }
0x3ef7   :  { %14133 = vpush %v6595_v48 }
0x3f28   :  { %s14134_s9 = spop %14133 }
0x3f29   :  { %v6597_v2 = vstv %s14134_s9 }
0x3f2a   :  { %14254 = vrsqrt.f32 %v6597_v2 }
0x3f34   :  { %v14255_v49 = vpop.eup %14254 }
0x3f35   :  { %v15801_v23 = vmul.f32 %v14255_v49, %v6585_v37 }
0x3f37   :  { %v6608_v50 = vrot.slane %v15801_v23, %v14503_v21  ;;  %v6601_v52 = vcombine.high %v15801_v23, %v15801_v23 }
0x3f39   :  { %v6624_v53 = vrot.slane %v6608_v50, %v14503_v21  ;;  %v6616_v54 = vcombine.high %v6608_v50, %v6608_v50  ;;  %v6615_v55 = vrot.slane %v6601_v52, %v14503_v21 }
0x3f3b   :  { %v6653_v56 = vrot.slane %v6624_v53, %v14466_v59  ;;  %v6638_v57 = vrot.slane %v6616_v54, %v14503_v21  ;;  %v6646_v60 = vcombine.high %v6624_v53, %v6624_v53  ;;  %v6631_v61 = vrot.slane %v6615_v55, %v14503_v21 }
0x3f3c   :  { %v6617_v62 = vcombine.high %v6615_v55, %v6615_v55 }
0x3f3d   :  { %v6690_v1 = vmul.f32 %v6653_v56, %v14479_v32  ;;  %v6657_v51 = vrot.slane %v6638_v57, %v14466_v59  ;;  %v6661_v3 = vrot.slane %v6646_v60, %v14466_v59  ;;  %v6648_v4 = vcombine.high %v6638_v57, %v6638_v57 }
0x3f3e   :  { %v6669_v5 = vrot.slane %v6631_v61, %v14466_v59  ;;  %v6645_v0 = vrot.slane %v6617_v62, %v14503_v21  ;;  %v6647_v6 = vcombine.high %v6631_v61, %v6631_v61  ;;  %v6722_v57 = vmul.f32 %v15801_v23, %v14498_v63 }
0x3f3f   :  { %v6698_v7 = vsel %vm28_vm1, %v6690_v1, -inf  ;;  %v6691_v10 = vmul.f32 %v6657_v51, %v14479_v32  ;;  %v6692_v11 = vmul.f32 %v6661_v3, %v14479_v32  ;;  %v6665_v12 = vrot.slane %v6648_v4, %v14466_v59 }
0x3f40   :  { %6699 = vmax.xlane.f32.xlu0 %v6698_v7  ;;  %v6673_v17 = vrot.slane %v6645_v0, %v14466_v59  ;;  %v6649_v18 = vcombine.high %v6645_v0, %v6645_v0  ;;  %v6694_v20 = vmul.f32 %v6669_v5, %v14479_v32  ;;  %v6677_v22 = vrot.slane %v6647_v6, %v14466_v59 }
0x3f41   :  { %v6701_v14 = vsel %vm28_vm1, %v6691_v10, -inf  ;;  %v6693_v15 = vmul.f32 %v6665_v12, %v14479_v32  ;;  %v6704_v19 = vsel %vm28_vm1, %v6692_v11, -inf }
0x3f42   :  { %6702 = vmax.xlane.f32.xlu1 %v6701_v14  ;;  %v6695_v25 = vmul.f32 %v6673_v17, %v14479_v32  ;;  %v6681_v26 = vrot.slane %v6649_v18, %v14466_v59  ;;  %v6710_v13 = vsel %vm28_vm1, %v6694_v20, -inf  ;;  %v6696_v27 = vmul.f32 %v6677_v22, %v14479_v32 }
0x3f43   :  { %v6707_v24 = vsel %vm28_vm1, %v6693_v15, -inf }
0x3f44   :  { %6705 = vmax.xlane.f32.xlu0 %v6704_v19  ;;  %v6713_v28 = vsel %vm28_vm1, %v6695_v25, -inf  ;;  %v6697_v29 = vmul.f32 %v6681_v26, %v14479_v32  ;;  %v6716_v30 = vsel %vm28_vm1, %v6696_v27, -inf }
0x3f46   :  { %6708 = vmax.xlane.f32.xlu1 %v6707_v24  ;;  %v6719_v58 = vsel %vm28_vm1, %v6697_v29, -inf }
0x3f48   :  { %6711 = vmax.xlane.f32.xlu0 %v6710_v13 }
0x3f4a   :  { %6714 = vmax.xlane.f32.xlu1 %v6713_v28 }
0x3f4c   :  { %6717 = vmax.xlane.f32.xlu0 %v6716_v30 }
0x3f4e   :  { %6720 = vmax.xlane.f32.xlu1 %v6719_v58 }
0x3fcd   :  { %v6700_v31 = vpop.xlane.xlu0 %6699 }
0x3fce   :  { %v6734_v35 = vrot.slane %v6700_v31, %v14487_v45 }
0x3fcf   :  { %v6703_v34 = vpop.xlane.xlu1 %6702 }
0x3fd0   :  { %v6738_v36 = vrot.slane %v6703_v34, %v14487_v45 }
0x3fd1   :  { %v6706_v37 = vpop.xlane.xlu0 %6705 }
0x3fd2   :  { %v6763_v38 = vsel %vm866_vm10, %v6738_v36, %v6734_v35  ;;  %v6742_v39 = vrot.slane %v6706_v37, %v14487_v45 }
0x3fd3   :  { %v6709_v40 = vpop.xlane.xlu1 %6708 }
0x3fd4   :  { %v6764_v41 = vsel %vm867_vm11, %v6742_v39, %v6763_v38  ;;  %v6746_v42 = vrot.slane %v6709_v40, %v14487_v45 }
0x3fd5   :  { %v6712_v43 = vpop.xlane.xlu0 %6711 }
0x3fd6   :  { %v6765_v33 = vsel %vm869_vm12, %v6746_v42, %v6764_v41  ;;  %v6750_v44 = vrot.slane %v6712_v43, %v14487_v45 }
0x3fd7   :  { %v6715_v47 = vpop.xlane.xlu1 %6714 }
0x3fd8   :  { %v6766_v48 = vsel %vm871_vm13, %v6750_v44, %v6765_v33  ;;  %v6754_v2 = vrot.slane %v6715_v47, %v14487_v45 }
0x3fd9   :  { %v6718_v49 = vpop.xlane.xlu0 %6717 }
0x3fda   :  { %v6767_v50 = vsel %vm873_vm14, %v6754_v2, %v6766_v48  ;;  %v6758_v52 = vrot.slane %v6718_v49, %v14487_v45 }
0x3fdb   :  { %v6721_v53 = vpop.xlane.xlu1 %6720 }
0x3fdc   :  { %v6762_v54 = vrot.slane %v6721_v53, %v14487_v45  ;;  %v6768_v55 = vsel %vm875_vm15, %v6758_v52, %v6767_v50 }
0x3fde   :  { %v6769_v56 = vsel %vm877_vm2, %v6762_v54, %v6768_v55 }
0x3fdf   :  { %13925 = vmatpush3.msra.mxu0 %v6769_v56 }
0x3fe0   :  { %13927 = vmatmul.mubr.msk.f32.vlgmr.msra.gmra.mrb[32].mxu0 %vm28_vm1, %v14489_v46  ;;  %13934 = vmatprep.subr.mxu0 %v15735_v8 }
0x3fe1   :  { %13936 = vmatprep.mubr.msk.f32.mxu0 %vm14346_vm0, %v15735_v8 }
0x40b3   :  { %v6837_v60 = vpop.f32.mrb[32].mxu0 }
0x40b4   :  { %v6841_v61 = vadd.f32 %v6837_v60, %v6722_v57  ;;  %v13928_v62 = vpop.f32.mrb[33].mxu0 }
0x40b6   :  { %v6842_v1 = vmul.f32 %v6841_v61, %v6841_v61 }
0x40b8   :  { %v6843_v51 = vsel %vm28_vm1, %v6842_v1, 0.0 }
0x40b9   :  { %6844 = vadd.xlane.f32.xlu0 %v6843_v51 }
0x4146   :  { %v6845_v3 = vpop.xlane.xlu0 %6844 }
0x4147   :  { %v6846_v4 = vrot.slane %v6845_v3, 4 }
0x4149   :  { %v6847_v5 = vadd.f32 %v6846_v4, %v6845_v3 }
0x414b   :  { %v6848_v0 = vrot.slane %v6847_v5, 2 }
0x414d   :  { %v6849_v6 = vadd.f32 %v6848_v0, %v6847_v5 }
0x414f   :  { %v6850_v7 = vrot.slane %v6849_v6, 1 }
0x4151   :  { %v6851_v10 = vadd.f32 %v6850_v7, %v6849_v6 }
0x4153   :  { %14135 = vpush %v6851_v10 }
0x4184   :  { %s14136_s10 = spop %14135 }
0x4185   :  { %v6853_v11 = vstv %s14136_s10 }
0x4186   :  { %14256 = vrsqrt.f32 %v6853_v11 }
0x4190   :  { %v14257_v12 = vpop.eup %14256 }
0x4191   :  { %v15859_v23 = vmul.f32 %v14257_v12, %v6841_v61 }
0x4193   :  { %v6864_v14 = vrot.slane %v15859_v23, %v14503_v21  ;;  %v6857_v15 = vcombine.high %v15859_v23, %v15859_v23 }
0x4195   :  { %v6880_v17 = vrot.slane %v6864_v14, %v14503_v21  ;;  %v6872_v18 = vcombine.high %v6864_v14, %v6864_v14  ;;  %v6871_v19 = vrot.slane %v6857_v15, %v14503_v21 }
0x4197   :  { %v6909_v20 = vrot.slane %v6880_v17, %v14466_v59  ;;  %v6894_v22 = vrot.slane %v6872_v18, %v14503_v21  ;;  %v6902_v24 = vcombine.high %v6880_v17, %v6880_v17  ;;  %v6887_v25 = vrot.slane %v6871_v19, %v14503_v21 }
0x4198   :  { %v6873_v26 = vcombine.high %v6871_v19, %v6871_v19 }
0x4199   :  { %v6946_v13 = vmul.f32 %v6909_v20, %v14479_v32  ;;  %v6913_v27 = vrot.slane %v6894_v22, %v14466_v59  ;;  %v6917_v28 = vrot.slane %v6902_v24, %v14466_v59  ;;  %v6904_v29 = vcombine.high %v6894_v22, %v6894_v22 }
0x419a   :  { %v6925_v30 = vrot.slane %v6887_v25, %v14466_v59  ;;  %v6901_v58 = vrot.slane %v6873_v26, %v14503_v21  ;;  %v6903_v31 = vcombine.high %v6887_v25, %v6887_v25  ;;  %v6978_v22 = vmul.f32 %v15859_v23, %v14498_v63 }
0x419b   :  { %v6954_v34 = vsel %vm28_vm1, %v6946_v13, -inf  ;;  %v6947_v35 = vmul.f32 %v6913_v27, %v14479_v32  ;;  %v6948_v36 = vmul.f32 %v6917_v28, %v14479_v32  ;;  %v6921_v37 = vrot.slane %v6904_v29, %v14466_v59 }
0x419c   :  { %6955 = vmax.xlane.f32.xlu1 %v6954_v34  ;;  %v6929_v40 = vrot.slane %v6901_v58, %v14466_v59  ;;  %v6905_v41 = vcombine.high %v6901_v58, %v6901_v58  ;;  %v6950_v43 = vmul.f32 %v6925_v30, %v14479_v32  ;;  %v6933_v33 = vrot.slane %v6903_v31, %v14466_v59 }
0x419d   :  { %v6957_v38 = vsel %vm28_vm1, %v6947_v35, -inf  ;;  %v6949_v39 = vmul.f32 %v6921_v37, %v14479_v32  ;;  %v6960_v42 = vsel %vm28_vm1, %v6948_v36, -inf }
0x419e   :  { %6958 = vmax.xlane.f32.xlu0 %v6957_v38  ;;  %v6951_v47 = vmul.f32 %v6929_v40, %v14479_v32  ;;  %v6937_v48 = vrot.slane %v6905_v41, %v14466_v59  ;;  %v6966_v2 = vsel %vm28_vm1, %v6950_v43, -inf  ;;  %v6952_v49 = vmul.f32 %v6933_v33, %v14479_v32 }
0x419f   :  { %v6963_v44 = vsel %vm28_vm1, %v6949_v39, -inf }
0x41a0   :  { %6961 = vmax.xlane.f32.xlu1 %v6960_v42  ;;  %v6969_v50 = vsel %vm28_vm1, %v6951_v47, -inf  ;;  %v6953_v52 = vmul.f32 %v6937_v48, %v14479_v32  ;;  %v6972_v53 = vsel %vm28_vm1, %v6952_v49, -inf }
0x41a2   :  { %6964 = vmax.xlane.f32.xlu0 %v6963_v44  ;;  %v6975_v54 = vsel %vm28_vm1, %v6953_v52, -inf }
0x41a4   :  { %6967 = vmax.xlane.f32.xlu1 %v6966_v2 }
0x41a6   :  { %6970 = vmax.xlane.f32.xlu0 %v6969_v50 }
0x41a8   :  { %6973 = vmax.xlane.f32.xlu1 %v6972_v53 }
0x41aa   :  { %6976 = vmax.xlane.f32.xlu0 %v6975_v54 }
0x4229   :  { %v6956_v55 = vpop.xlane.xlu1 %6955 }
0x422a   :  { %v6990_v57 = vrot.slane %v6956_v55, %v14487_v45 }
0x422b   :  { %v6959_v56 = vpop.xlane.xlu0 %6958 }
0x422c   :  { %v6994_v60 = vrot.slane %v6959_v56, %v14487_v45 }
0x422d   :  { %v6962_v61 = vpop.xlane.xlu1 %6961 }
0x422e   :  { %v7019_v62 = vsel %vm866_vm10, %v6994_v60, %v6990_v57  ;;  %v6998_v1 = vrot.slane %v6962_v61, %v14487_v45 }
0x422f   :  { %v6965_v51 = vpop.xlane.xlu0 %6964 }
0x4230   :  { %v7020_v3 = vsel %vm867_vm11, %v6998_v1, %v7019_v62  ;;  %v7002_v4 = vrot.slane %v6965_v51, %v14487_v45 }
0x4231   :  { %v6968_v5 = vpop.xlane.xlu1 %6967 }
0x4232   :  { %v7021_v0 = vsel %vm869_vm12, %v7002_v4, %v7020_v3  ;;  %v7006_v6 = vrot.slane %v6968_v5, %v14487_v45 }
0x4233   :  { %v6971_v7 = vpop.xlane.xlu0 %6970 }
0x4234   :  { %v7022_v10 = vsel %vm871_vm13, %v7006_v6, %v7021_v0  ;;  %v7010_v11 = vrot.slane %v6971_v7, %v14487_v45 }
0x4235   :  { %v6974_v12 = vpop.xlane.xlu1 %6973 }
0x4236   :  { %v7023_v14 = vsel %vm873_vm14, %v7010_v11, %v7022_v10  ;;  %v7014_v15 = vrot.slane %v6974_v12, %v14487_v45 }
0x4237   :  { %v6977_v17 = vpop.xlane.xlu0 %6976 }
0x4238   :  { %v7018_v18 = vrot.slane %v6977_v17, %v14487_v45  ;;  %v7024_v19 = vsel %vm875_vm15, %v7014_v15, %v7023_v14 }
0x423a   :  { %v7025_v20 = vsel %vm877_vm2, %v7018_v18, %v7024_v19 }
0x423b   :  { %13930 = vmatpush3.msra.mxu1 %v7025_v20 }
0x423c   :  { %13932 = vmatmul.mubr.msk.f32.vlgmr.msra.gmra.mrb[32].mxu1 %vm28_vm1, %v14489_v46  ;;  %13939 = vmatprep.subr.mxu1 %v15735_v8 }
0x423d   :  { %13941 = vmatprep.mubr.msk.f32.mxu1 %vm14346_vm0, %v15735_v8 }
0x430f   :  { %v7093_v24 = vpop.f32.mrb[32].mxu1 }
0x4310   :  { %v7097_v25 = vadd.f32 %v7093_v24, %v6978_v22  ;;  %v13933_v26 = vpop.f32.mrb[33].mxu1 }
0x4312   :  { %v7098_v13 = vmul.f32 %v7097_v25, %v7097_v25 }
0x4314   :  { %v7099_v27 = vsel %vm28_vm1, %v7098_v13, 0.0 }
0x4315   :  { %7100 = vadd.xlane.f32.xlu1 %v7099_v27 }
0x43a2   :  { %v7101_v28 = vpop.xlane.xlu1 %7100 }
0x43a3   :  { %v7102_v29 = vrot.slane %v7101_v28, 4 }
0x43a5   :  { %v7103_v30 = vadd.f32 %v7102_v29, %v7101_v28 }
0x43a7   :  { %v7104_v58 = vrot.slane %v7103_v30, 2 }
0x43a9   :  { %v7105_v31 = vadd.f32 %v7104_v58, %v7103_v30 }
0x43ab   :  { %v7106_v34 = vrot.slane %v7105_v31, 1 }
0x43ad   :  { %v7107_v35 = vadd.f32 %v7106_v34, %v7105_v31 }
0x43af   :  { %14137 = vpush %v7107_v35 }
0x43e0   :  { %s14138_s11 = spop %14137 }
0x43e1   :  { %v7109_v36 = vstv %s14138_s11 }
0x43e2   :  { %14258 = vrsqrt.f32 %v7109_v36 }
0x43ec   :  { %v14259_v37 = vpop.eup %14258 }
0x43ed   :  { %v15917_v23 = vmul.f32 %v14259_v37, %v7097_v25 }
0x43ef   :  { %v7120_v38 = vrot.slane %v15917_v23, %v14503_v21  ;;  %v7113_v39 = vcombine.high %v15917_v23, %v15917_v23 }
0x43f1   :  { %v7136_v40 = vrot.slane %v7120_v38, %v14503_v21  ;;  %v7128_v41 = vcombine.high %v7120_v38, %v7120_v38  ;;  %v7127_v42 = vrot.slane %v7113_v39, %v14503_v21 }
0x43f3   :  { %v7165_v43 = vrot.slane %v7136_v40, %v14466_v59  ;;  %v7150_v33 = vrot.slane %v7128_v41, %v14503_v21  ;;  %v7158_v44 = vcombine.high %v7136_v40, %v7136_v40  ;;  %v7143_v47 = vrot.slane %v7127_v42, %v14503_v21 }
0x43f4   :  { %v7129_v48 = vcombine.high %v7127_v42, %v7127_v42 }
0x43f5   :  { %v7202_v2 = vmul.f32 %v7165_v43, %v14479_v32  ;;  %v7169_v49 = vrot.slane %v7150_v33, %v14466_v59  ;;  %v7173_v50 = vrot.slane %v7158_v44, %v14466_v59  ;;  %v7160_v52 = vcombine.high %v7150_v33, %v7150_v33 }
0x43f6   :  { %v7181_v53 = vrot.slane %v7143_v47, %v14466_v59  ;;  %v7157_v54 = vrot.slane %v7129_v48, %v14503_v21  ;;  %v7159_v55 = vcombine.high %v7143_v47, %v7143_v47  ;;  %v7234_v33 = vmul.f32 %v15917_v23, %v14498_v63 }
0x43f7   :  { %v7210_v56 = vsel %vm28_vm1, %v7202_v2, -inf  ;;  %v7203_v57 = vmul.f32 %v7169_v49, %v14479_v32  ;;  %v7204_v60 = vmul.f32 %v7173_v50, %v14479_v32  ;;  %v7177_v61 = vrot.slane %v7160_v52, %v14466_v59 }
0x43f8   :  { %7211 = vmax.xlane.f32.xlu0 %v7210_v56  ;;  %v7185_v51 = vrot.slane %v7157_v54, %v14466_v59  ;;  %v7161_v3 = vcombine.high %v7157_v54, %v7157_v54  ;;  %v7206_v5 = vmul.f32 %v7181_v53, %v14479_v32  ;;  %v7189_v0 = vrot.slane %v7159_v55, %v14466_v59 }
0x43f9   :  { %v7213_v62 = vsel %vm28_vm1, %v7203_v57, -inf  ;;  %v7205_v1 = vmul.f32 %v7177_v61, %v14479_v32  ;;  %v7216_v4 = vsel %vm28_vm1, %v7204_v60, -inf }
0x43fa   :  { %7214 = vmax.xlane.f32.xlu1 %v7213_v62  ;;  %v7207_v7 = vmul.f32 %v7185_v51, %v14479_v32  ;;  %v7193_v10 = vrot.slane %v7161_v3, %v14466_v59  ;;  %v7222_v11 = vsel %vm28_vm1, %v7206_v5, -inf  ;;  %v7208_v12 = vmul.f32 %v7189_v0, %v14479_v32 }
0x43fb   :  { %v7219_v6 = vsel %vm28_vm1, %v7205_v1, -inf }
0x43fc   :  { %7217 = vmax.xlane.f32.xlu0 %v7216_v4  ;;  %v7225_v14 = vsel %vm28_vm1, %v7207_v7, -inf  ;;  %v7209_v15 = vmul.f32 %v7193_v10, %v14479_v32  ;;  %v7228_v17 = vsel %vm28_vm1, %v7208_v12, -inf }
0x43fe   :  { %7220 = vmax.xlane.f32.xlu1 %v7219_v6  ;;  %v7231_v18 = vsel %vm28_vm1, %v7209_v15, -inf }
0x4400   :  { %7223 = vmax.xlane.f32.xlu0 %v7222_v11 }
0x4402   :  { %7226 = vmax.xlane.f32.xlu1 %v7225_v14 }
0x4404   :  { %7229 = vmax.xlane.f32.xlu0 %v7228_v17 }
0x4406   :  { %7232 = vmax.xlane.f32.xlu1 %v7231_v18 }
0x4485   :  { %v7212_v19 = vpop.xlane.xlu0 %7211 }
0x4486   :  { %v7246_v22 = vrot.slane %v7212_v19, %v14487_v45 }
0x4487   :  { %v7215_v20 = vpop.xlane.xlu1 %7214 }
0x4488   :  { %v7250_v24 = vrot.slane %v7215_v20, %v14487_v45 }
0x4489   :  { %v7218_v25 = vpop.xlane.xlu0 %7217 }
0x448a   :  { %v7275_v26 = vsel %vm866_vm10, %v7250_v24, %v7246_v22  ;;  %v7254_v13 = vrot.slane %v7218_v25, %v14487_v45 }
0x448b   :  { %v7221_v27 = vpop.xlane.xlu1 %7220 }
0x448c   :  { %v7276_v28 = vsel %vm867_vm11, %v7254_v13, %v7275_v26  ;;  %v7258_v29 = vrot.slane %v7221_v27, %v14487_v45 }
0x448d   :  { %v7224_v30 = vpop.xlane.xlu0 %7223 }
0x448e   :  { %v7277_v58 = vsel %vm869_vm12, %v7258_v29, %v7276_v28  ;;  %v7262_v31 = vrot.slane %v7224_v30, %v14487_v45 }
0x448f   :  { %v7227_v34 = vpop.xlane.xlu1 %7226 }
0x4490   :  { %v7278_v35 = vsel %vm871_vm13, %v7262_v31, %v7277_v58  ;;  %v7266_v36 = vrot.slane %v7227_v34, %v14487_v45 }
0x4491   :  { %v7230_v37 = vpop.xlane.xlu0 %7229 }
0x4492   :  { %v7279_v38 = vsel %vm873_vm14, %v7266_v36, %v7278_v35  ;;  %v7270_v39 = vrot.slane %v7230_v37, %v14487_v45 }
0x4493   :  { %v7233_v40 = vpop.xlane.xlu1 %7232 }
0x4494   :  { %v7274_v41 = vrot.slane %v7233_v40, %v14487_v45  ;;  %v7280_v42 = vsel %vm875_vm15, %v7270_v39, %v7279_v38 }
0x4496   :  { %v7281_v43 = vsel %vm877_vm2, %v7274_v41, %v7280_v42 }
0x4497   :  { %13935 = vmatpush3.msra.mxu0 %v7281_v43 }
0x4498   :  { %13937 = vmatmul.mubr.msk.f32.vlgmr.msra.gmra.mrb[34].mxu0 %vm28_vm1, %v14489_v46  ;;  %13944 = vmatprep.subr.mxu0 %v15735_v8 }
0x4499   :  { %13946 = vmatprep.mubr.msk.f32.mxu0 %vm14346_vm0, %v15735_v8 }
0x456b   :  { %v7349_v44 = vpop.f32.mrb[34].mxu0 }
0x456c   :  { %v7353_v47 = vadd.f32 %v7349_v44, %v7234_v33  ;;  %v13938_v48 = vpop.f32.mrb[35].mxu0 }
0x456e   :  { %v7354_v2 = vmul.f32 %v7353_v47, %v7353_v47 }
0x4570   :  { %v7355_v49 = vsel %vm28_vm1, %v7354_v2, 0.0 }
0x4571   :  { %7356 = vadd.xlane.f32.xlu0 %v7355_v49 }
0x45fe   :  { %v7357_v50 = vpop.xlane.xlu0 %7356 }
0x45ff   :  { %v7358_v52 = vrot.slane %v7357_v50, 4 }
0x4601   :  { %v7359_v53 = vadd.f32 %v7358_v52, %v7357_v50 }
0x4603   :  { %v7360_v54 = vrot.slane %v7359_v53, 2 }
0x4605   :  { %v7361_v55 = vadd.f32 %v7360_v54, %v7359_v53 }
0x4607   :  { %v7362_v56 = vrot.slane %v7361_v55, 1 }
0x4609   :  { %v7363_v57 = vadd.f32 %v7362_v56, %v7361_v55 }
0x460b   :  { %14139 = vpush %v7363_v57 }
0x463c   :  { %s14140_s12 = spop %14139 }
0x463d   :  { %v7365_v60 = vstv %s14140_s12 }
0x463e   :  { %14260 = vrsqrt.f32 %v7365_v60 }
0x4648   :  { %v14261_v61 = vpop.eup %14260 }
0x4649   :  { %v15975_v23 = vmul.f32 %v14261_v61, %v7353_v47 }
0x464b   :  { %v7376_v62 = vrot.slane %v15975_v23, %v14503_v21  ;;  %v7369_v1 = vcombine.high %v15975_v23, %v15975_v23 }
0x464d   :  { %v7392_v51 = vrot.slane %v7376_v62, %v14503_v21  ;;  %v7384_v3 = vcombine.high %v7376_v62, %v7376_v62  ;;  %v7383_v4 = vrot.slane %v7369_v1, %v14503_v21 }
0x464f   :  { %v7421_v5 = vrot.slane %v7392_v51, %v14466_v59  ;;  %v7406_v0 = vrot.slane %v7384_v3, %v14503_v21  ;;  %v7414_v6 = vcombine.high %v7392_v51, %v7392_v51  ;;  %v7399_v7 = vrot.slane %v7383_v4, %v14503_v21 }
0x4650   :  { %v7385_v10 = vcombine.high %v7383_v4, %v7383_v4 }
0x4651   :  { %v7458_v11 = vmul.f32 %v7421_v5, %v14479_v32  ;;  %v7425_v12 = vrot.slane %v7406_v0, %v14466_v59  ;;  %v7429_v14 = vrot.slane %v7414_v6, %v14466_v59  ;;  %v7416_v15 = vcombine.high %v7406_v0, %v7406_v0 }
0x4652   :  { %v7437_v17 = vrot.slane %v7399_v7, %v14466_v59  ;;  %v7413_v18 = vrot.slane %v7385_v10, %v14503_v21  ;;  %v7415_v19 = vcombine.high %v7399_v7, %v7399_v7  ;;  %v7490_v0 = vmul.f32 %v15975_v23, %v14498_v63 }
0x4653   :  { %v7466_v20 = vsel %vm28_vm1, %v7458_v11, -inf  ;;  %v7459_v22 = vmul.f32 %v7425_v12, %v14479_v32  ;;  %v7460_v24 = vmul.f32 %v7429_v14, %v14479_v32  ;;  %v7433_v25 = vrot.slane %v7416_v15, %v14466_v59 }
0x4654   :  { %7467 = vmax.xlane.f32.xlu1 %v7466_v20  ;;  %v7441_v27 = vrot.slane %v7413_v18, %v14466_v59  ;;  %v7417_v28 = vcombine.high %v7413_v18, %v7413_v18  ;;  %v7462_v30 = vmul.f32 %v7437_v17, %v14479_v32  ;;  %v7445_v58 = vrot.slane %v7415_v19, %v14466_v59 }
0x4655   :  { %v7469_v26 = vsel %vm28_vm1, %v7459_v22, -inf  ;;  %v7461_v13 = vmul.f32 %v7433_v25, %v14479_v32  ;;  %v7472_v29 = vsel %vm28_vm1, %v7460_v24, -inf }
0x4656   :  { %7470 = vmax.xlane.f32.xlu0 %v7469_v26  ;;  %v7463_v34 = vmul.f32 %v7441_v27, %v14479_v32  ;;  %v7449_v35 = vrot.slane %v7417_v28, %v14466_v59  ;;  %v7478_v36 = vsel %vm28_vm1, %v7462_v30, -inf  ;;  %v7464_v37 = vmul.f32 %v7445_v58, %v14479_v32 }
0x4657   :  { %v7475_v31 = vsel %vm28_vm1, %v7461_v13, -inf }
0x4658   :  { %7473 = vmax.xlane.f32.xlu1 %v7472_v29  ;;  %v7481_v38 = vsel %vm28_vm1, %v7463_v34, -inf  ;;  %v7465_v39 = vmul.f32 %v7449_v35, %v14479_v32  ;;  %v7484_v40 = vsel %vm28_vm1, %v7464_v37, -inf }
0x465a   :  { %7476 = vmax.xlane.f32.xlu0 %v7475_v31  ;;  %v7487_v41 = vsel %vm28_vm1, %v7465_v39, -inf }
0x465c   :  { %7479 = vmax.xlane.f32.xlu1 %v7478_v36 }
0x465e   :  { %7482 = vmax.xlane.f32.xlu0 %v7481_v38 }
0x4660   :  { %7485 = vmax.xlane.f32.xlu1 %v7484_v40 }
0x4662   :  { %7488 = vmax.xlane.f32.xlu0 %v7487_v41 }
0x46e1   :  { %v7468_v42 = vpop.xlane.xlu1 %7467 }
0x46e2   :  { %v7502_v33 = vrot.slane %v7468_v42, %v14487_v45 }
0x46e3   :  { %v7471_v43 = vpop.xlane.xlu0 %7470 }
0x46e4   :  { %v7506_v44 = vrot.slane %v7471_v43, %v14487_v45 }
0x46e5   :  { %v7474_v47 = vpop.xlane.xlu1 %7473 }
0x46e6   :  { %v7531_v48 = vsel %vm866_vm10, %v7506_v44, %v7502_v33  ;;  %v7510_v2 = vrot.slane %v7474_v47, %v14487_v45 }
0x46e7   :  { %v7477_v49 = vpop.xlane.xlu0 %7476 }
0x46e8   :  { %v7532_v50 = vsel %vm867_vm11, %v7510_v2, %v7531_v48  ;;  %v7514_v52 = vrot.slane %v7477_v49, %v14487_v45 }
0x46e9   :  { %v7480_v53 = vpop.xlane.xlu1 %7479 }
0x46ea   :  { %v7533_v54 = vsel %vm869_vm12, %v7514_v52, %v7532_v50  ;;  %v7518_v55 = vrot.slane %v7480_v53, %v14487_v45 }
0x46eb   :  { %v7483_v56 = vpop.xlane.xlu0 %7482 }
0x46ec   :  { %v7534_v57 = vsel %vm871_vm13, %v7518_v55, %v7533_v54  ;;  %v7522_v60 = vrot.slane %v7483_v56, %v14487_v45 }
0x46ed   :  { %v7486_v61 = vpop.xlane.xlu1 %7485 }
0x46ee   :  { %v7535_v62 = vsel %vm873_vm14, %v7522_v60, %v7534_v57  ;;  %v7526_v1 = vrot.slane %v7486_v61, %v14487_v45 }
0x46ef   :  { %v7489_v51 = vpop.xlane.xlu0 %7488 }
0x46f0   :  { %v7530_v3 = vrot.slane %v7489_v51, %v14487_v45  ;;  %v7536_v4 = vsel %vm875_vm15, %v7526_v1, %v7535_v62 }
0x46f2   :  { %v7537_v5 = vsel %vm877_vm2, %v7530_v3, %v7536_v4 }
0x46f3   :  { %13940 = vmatpush3.msra.mxu1 %v7537_v5 }
0x46f4   :  { %13942 = vmatmul.mubr.msk.f32.vlgmr.msra.gmra.mrb[34].mxu1 %vm28_vm1, %v14489_v46  ;;  %13949 = vmatprep.subr.mxu1 %v15735_v8 }
0x46f5   :  { %13951 = vmatprep.mubr.msk.f32.mxu1 %vm14346_vm0, %v15735_v8 }
0x47c7   :  { %v7605_v6 = vpop.f32.mrb[34].mxu1 }
0x47c8   :  { %v7609_v7 = vadd.f32 %v7605_v6, %v7490_v0  ;;  %v13943_v10 = vpop.f32.mrb[35].mxu1 }
0x47ca   :  { %v7610_v11 = vmul.f32 %v7609_v7, %v7609_v7 }
0x47cc   :  { %v7611_v12 = vsel %vm28_vm1, %v7610_v11, 0.0 }
0x47cd   :  { %7612 = vadd.xlane.f32.xlu1 %v7611_v12 }
0x485a   :  { %v7613_v14 = vpop.xlane.xlu1 %7612 }
0x485b   :  { %v7614_v15 = vrot.slane %v7613_v14, 4 }
0x485d   :  { %v7615_v17 = vadd.f32 %v7614_v15, %v7613_v14 }
0x485f   :  { %v7616_v18 = vrot.slane %v7615_v17, 2 }
0x4861   :  { %v7617_v19 = vadd.f32 %v7616_v18, %v7615_v17 }
0x4863   :  { %v7618_v20 = vrot.slane %v7617_v19, 1 }
0x4865   :  { %v7619_v22 = vadd.f32 %v7618_v20, %v7617_v19 }
0x4867   :  { %14141 = vpush %v7619_v22 }
0x4898   :  { %s14142_s13 = spop %14141 }
0x4899   :  { %v7621_v8 = vstv %s14142_s13 }
0x489a   :  { %14262 = vrsqrt.f32 %v7621_v8 }
0x48a4   :  { %v14263_v24 = vpop.eup %14262 }
0x48a5   :  { %v16033_v23 = vmul.f32 %v14263_v24, %v7609_v7 }
0x48a7   :  { %v7632_v25 = vrot.slane %v16033_v23, %v14503_v21  ;;  %v7625_v26 = vcombine.high %v16033_v23, %v16033_v23 }
0x48a9   :  { %v7648_v13 = vrot.slane %v7632_v25, %v14503_v21  ;;  %v7640_v27 = vcombine.high %v7632_v25, %v7632_v25  ;;  %v7639_v28 = vrot.slane %v7625_v26, %v14503_v21 }
0x48ab   :  { %v7677_v29 = vrot.slane %v7648_v13, %v14466_v59  ;;  %v7662_v30 = vrot.slane %v7640_v27, %v14503_v21  ;;  %v7670_v58 = vcombine.high %v7648_v13, %v7648_v13  ;;  %v7655_v31 = vrot.slane %v7639_v28, %v14503_v21 }
0x48ac   :  { %v7641_v34 = vcombine.high %v7639_v28, %v7639_v28 }
0x48ad   :  { %v7714_v35 = vmul.f32 %v7677_v29, %v14479_v32  ;;  %v7681_v36 = vrot.slane %v7662_v30, %v14466_v59  ;;  %v7685_v37 = vrot.slane %v7670_v58, %v14466_v59  ;;  %v7672_v38 = vcombine.high %v7662_v30, %v7662_v30  ;;  %v16088_v29 = vld [vmem:[%s17397_s2 + $0x8] sm:$0xff] }
0x48ae   :  { %v7693_v39 = vrot.slane %v7655_v31, %v14466_v59  ;;  %v7669_v40 = vrot.slane %v7641_v34, %v14503_v21  ;;  %v7671_v41 = vcombine.high %v7655_v31, %v7655_v31  ;;  %v7746_v30 = vmul.f32 %v16033_v23, %v14498_v63 }
0x48af   :  { %v7722_v42 = vsel %vm28_vm1, %v7714_v35, -inf  ;;  %v7715_v43 = vmul.f32 %v7681_v36, %v14479_v32  ;;  %v7716_v33 = vmul.f32 %v7685_v37, %v14479_v32  ;;  %v7689_v44 = vrot.slane %v7672_v38, %v14466_v59 }
0x48b0   :  { %7723 = vmax.xlane.f32.xlu0 %v7722_v42  ;;  %v7697_v2 = vrot.slane %v7669_v40, %v14466_v59  ;;  %v7673_v49 = vcombine.high %v7669_v40, %v7669_v40  ;;  %v7718_v52 = vmul.f32 %v7693_v39, %v14479_v32  ;;  %v7701_v53 = vrot.slane %v7671_v41, %v14466_v59 }
0x48b1   :  { %v7725_v47 = vsel %vm28_vm1, %v7715_v43, -inf  ;;  %v7717_v48 = vmul.f32 %v7689_v44, %v14479_v32  ;;  %v7728_v50 = vsel %vm28_vm1, %v7716_v33, -inf }
0x48b2   :  { %7726 = vmax.xlane.f32.xlu1 %v7725_v47  ;;  %v7719_v55 = vmul.f32 %v7697_v2, %v14479_v32  ;;  %v7705_v56 = vrot.slane %v7673_v49, %v14466_v59  ;;  %v7734_v57 = vsel %vm28_vm1, %v7718_v52, -inf  ;;  %v7720_v60 = vmul.f32 %v7701_v53, %v14479_v32 }
0x48b3   :  { %v7731_v54 = vsel %vm28_vm1, %v7717_v48, -inf }
0x48b4   :  { %7729 = vmax.xlane.f32.xlu0 %v7728_v50  ;;  %v7737_v61 = vsel %vm28_vm1, %v7719_v55, -inf  ;;  %v7721_v62 = vmul.f32 %v7705_v56, %v14479_v32  ;;  %v7740_v1 = vsel %vm28_vm1, %v7720_v60, -inf }
0x48b6   :  { %7732 = vmax.xlane.f32.xlu1 %v7731_v54  ;;  %v7743_v51 = vsel %vm28_vm1, %v7721_v62, -inf }
0x48b8   :  { %7735 = vmax.xlane.f32.xlu0 %v7734_v57 }
0x48ba   :  { %7738 = vmax.xlane.f32.xlu1 %v7737_v61 }
0x48bc   :  { %7741 = vmax.xlane.f32.xlu0 %v7740_v1 }
0x48be   :  { %7744 = vmax.xlane.f32.xlu1 %v7743_v51 }
0x493d   :  { %v7724_v3 = vpop.xlane.xlu0 %7723 }
0x493e   :  { %v7758_v5 = vrot.slane %v7724_v3, %v14487_v45 }
0x493f   :  { %v7727_v4 = vpop.xlane.xlu1 %7726 }
0x4940   :  { %v7762_v0 = vrot.slane %v7727_v4, %v14487_v45 }
0x4941   :  { %v7730_v6 = vpop.xlane.xlu0 %7729 }
0x4942   :  { %v7787_v7 = vsel %vm866_vm10, %v7762_v0, %v7758_v5  ;;  %v7766_v10 = vrot.slane %v7730_v6, %v14487_v45 }
0x4943   :  { %v7733_v11 = vpop.xlane.xlu1 %7732 }
0x4944   :  { %v7788_v12 = vsel %vm867_vm11, %v7766_v10, %v7787_v7  ;;  %v7770_v14 = vrot.slane %v7733_v11, %v14487_v45 }
0x4945   :  { %v7736_v15 = vpop.xlane.xlu0 %7735 }
0x4946   :  { %v7789_v17 = vsel %vm869_vm12, %v7770_v14, %v7788_v12  ;;  %v7774_v18 = vrot.slane %v7736_v15, %v14487_v45 }
0x4947   :  { %v7739_v19 = vpop.xlane.xlu1 %7738 }
0x4948   :  { %v7790_v20 = vsel %vm871_vm13, %v7774_v18, %v7789_v17  ;;  %v7778_v22 = vrot.slane %v7739_v19, %v14487_v45 }
0x4949   :  { %v7742_v8 = vpop.xlane.xlu0 %7741 }
0x494a   :  { %v7791_v24 = vsel %vm873_vm14, %v7778_v22, %v7790_v20  ;;  %v7782_v25 = vrot.slane %v7742_v8, %v14487_v45 }
0x494b   :  { %v7745_v26 = vpop.xlane.xlu1 %7744 }
0x494c   :  { %v7786_v13 = vrot.slane %v7745_v26, %v14487_v45  ;;  %v7792_v27 = vsel %vm875_vm15, %v7782_v25, %v7791_v24 }
0x494e   :  { %v7793_v28 = vsel %vm877_vm2, %v7786_v13, %v7792_v27 }
0x494f   :  { %13945 = vmatpush3.msra.mxu0 %v7793_v28 }
0x4950   :  { %13947 = vmatmul.mubr.msk.f32.vlgmr.msra.gmra.mrb[36].mxu0 %vm28_vm1, %v14489_v46  ;;  %13954 = vmatprep.subr.mxu0 %v16088_v29 }
0x4951   :  { %13956 = vmatprep.mubr.msk.f32.mxu0 %vm14346_vm0, %v16088_v29 }
0x4a23   :  { %v7861_v58 = vpop.f32.mrb[36].mxu0 }
0x4a24   :  { %v7865_v31 = vadd.f32 %v7861_v58, %v7746_v30  ;;  %v13948_v34 = vpop.f32.mrb[37].mxu0 }
0x4a26   :  { %v7866_v35 = vmul.f32 %v7865_v31, %v7865_v31 }
0x4a28   :  { %v7867_v36 = vsel %vm28_vm1, %v7866_v35, 0.0 }
0x4a29   :  { %7868 = vadd.xlane.f32.xlu0 %v7867_v36 }
0x4ab6   :  { %v7869_v37 = vpop.xlane.xlu0 %7868 }
0x4ab7   :  { %v7870_v38 = vrot.slane %v7869_v37, 4 }
0x4ab9   :  { %v7871_v39 = vadd.f32 %v7870_v38, %v7869_v37 }
0x4abb   :  { %v7872_v40 = vrot.slane %v7871_v39, 2 }
0x4abd   :  { %v7873_v41 = vadd.f32 %v7872_v40, %v7871_v39 }
0x4abf   :  { %v7874_v42 = vrot.slane %v7873_v41, 1 }
0x4ac1   :  { %v7875_v43 = vadd.f32 %v7874_v42, %v7873_v41 }
0x4ac3   :  { %14143 = vpush %v7875_v43 }
0x4af4   :  { %s14144_s16 = spop %14143 }
0x4af5   :  { %v7877_v33 = vstv %s14144_s16 }
0x4af6   :  { %14264 = vrsqrt.f32 %v7877_v33 }
0x4b00   :  { %v14265_v44 = vpop.eup %14264 }
0x4b01   :  { %v16096_v23 = vmul.f32 %v14265_v44, %v7865_v31 }
0x4b03   :  { %v7888_v47 = vrot.slane %v16096_v23, %v14503_v21  ;;  %v7881_v48 = vcombine.high %v16096_v23, %v16096_v23 }
0x4b05   :  { %v7904_v2 = vrot.slane %v7888_v47, %v14503_v21  ;;  %v7896_v49 = vcombine.high %v7888_v47, %v7888_v47  ;;  %v7895_v50 = vrot.slane %v7881_v48, %v14503_v21 }
0x4b07   :  { %v7933_v52 = vrot.slane %v7904_v2, %v14466_v59  ;;  %v7918_v53 = vrot.slane %v7896_v49, %v14503_v21  ;;  %v7926_v54 = vcombine.high %v7904_v2, %v7904_v2  ;;  %v7911_v55 = vrot.slane %v7895_v50, %v14503_v21 }
0x4b08   :  { %v7897_v56 = vcombine.high %v7895_v50, %v7895_v50 }
0x4b09   :  { %v7970_v57 = vmul.f32 %v7933_v52, %v14479_v32  ;;  %v7937_v60 = vrot.slane %v7918_v53, %v14466_v59  ;;  %v7941_v61 = vrot.slane %v7926_v54, %v14466_v59  ;;  %v7928_v62 = vcombine.high %v7918_v53, %v7918_v53 }
0x4b0a   :  { %v7949_v1 = vrot.slane %v7911_v55, %v14466_v59  ;;  %v7925_v51 = vrot.slane %v7897_v56, %v14503_v21  ;;  %v7927_v3 = vcombine.high %v7911_v55, %v7911_v55  ;;  %v8002_v53 = vmul.f32 %v16096_v23, %v14498_v63 }
0x4b0b   :  { %v7978_v4 = vsel %vm28_vm1, %v7970_v57, -inf  ;;  %v7971_v5 = vmul.f32 %v7937_v60, %v14479_v32  ;;  %v7972_v0 = vmul.f32 %v7941_v61, %v14479_v32  ;;  %v7945_v6 = vrot.slane %v7928_v62, %v14466_v59 }
0x4b0c   :  { %7979 = vmax.xlane.f32.xlu1 %v7978_v4  ;;  %v7953_v11 = vrot.slane %v7925_v51, %v14466_v59  ;;  %v7929_v12 = vcombine.high %v7925_v51, %v7925_v51  ;;  %v7974_v15 = vmul.f32 %v7949_v1, %v14479_v32  ;;  %v7957_v17 = vrot.slane %v7927_v3, %v14466_v59 }
0x4b0d   :  { %v7981_v7 = vsel %vm28_vm1, %v7971_v5, -inf  ;;  %v7973_v10 = vmul.f32 %v7945_v6, %v14479_v32  ;;  %v7984_v14 = vsel %vm28_vm1, %v7972_v0, -inf }
0x4b0e   :  { %7982 = vmax.xlane.f32.xlu0 %v7981_v7  ;;  %v7975_v19 = vmul.f32 %v7953_v11, %v14479_v32  ;;  %v7961_v20 = vrot.slane %v7929_v12, %v14466_v59  ;;  %v7990_v22 = vsel %vm28_vm1, %v7974_v15, -inf  ;;  %v7976_v8 = vmul.f32 %v7957_v17, %v14479_v32 }
0x4b0f   :  { %v7987_v18 = vsel %vm28_vm1, %v7973_v10, -inf }
0x4b10   :  { %7985 = vmax.xlane.f32.xlu1 %v7984_v14  ;;  %v7993_v24 = vsel %vm28_vm1, %v7975_v19, -inf  ;;  %v7977_v25 = vmul.f32 %v7961_v20, %v14479_v32  ;;  %v7996_v26 = vsel %vm28_vm1, %v7976_v8, -inf }
0x4b12   :  { %7988 = vmax.xlane.f32.xlu0 %v7987_v18  ;;  %v7999_v13 = vsel %vm28_vm1, %v7977_v25, -inf }
0x4b14   :  { %7991 = vmax.xlane.f32.xlu1 %v7990_v22 }
0x4b16   :  { %7994 = vmax.xlane.f32.xlu0 %v7993_v24 }
0x4b18   :  { %7997 = vmax.xlane.f32.xlu1 %v7996_v26 }
0x4b1a   :  { %8000 = vmax.xlane.f32.xlu0 %v7999_v13 }
0x4b99   :  { %v7980_v27 = vpop.xlane.xlu1 %7979 }
0x4b9a   :  { %v8014_v30 = vrot.slane %v7980_v27, %v14487_v45 }
0x4b9b   :  { %v7983_v28 = vpop.xlane.xlu0 %7982 }
0x4b9c   :  { %v8018_v58 = vrot.slane %v7983_v28, %v14487_v45 }
0x4b9d   :  { %v7986_v31 = vpop.xlane.xlu1 %7985 }
0x4b9e   :  { %v8043_v34 = vsel %vm866_vm10, %v8018_v58, %v8014_v30  ;;  %v8022_v35 = vrot.slane %v7986_v31, %v14487_v45 }
0x4b9f   :  { %v7989_v36 = vpop.xlane.xlu0 %7988 }
0x4ba0   :  { %v8044_v37 = vsel %vm867_vm11, %v8022_v35, %v8043_v34  ;;  %v8026_v38 = vrot.slane %v7989_v36, %v14487_v45 }
0x4ba1   :  { %v7992_v39 = vpop.xlane.xlu1 %7991 }
0x4ba2   :  { %v8045_v40 = vsel %vm869_vm12, %v8026_v38, %v8044_v37  ;;  %v8030_v41 = vrot.slane %v7992_v39, %v14487_v45 }
0x4ba3   :  { %v7995_v42 = vpop.xlane.xlu0 %7994 }
0x4ba4   :  { %v8046_v43 = vsel %vm871_vm13, %v8030_v41, %v8045_v40  ;;  %v8034_v33 = vrot.slane %v7995_v42, %v14487_v45 }
0x4ba5   :  { %v7998_v44 = vpop.xlane.xlu1 %7997 }
0x4ba6   :  { %v8047_v47 = vsel %vm873_vm14, %v8034_v33, %v8046_v43  ;;  %v8038_v48 = vrot.slane %v7998_v44, %v14487_v45 }
0x4ba7   :  { %v8001_v2 = vpop.xlane.xlu0 %8000 }
0x4ba8   :  { %v8042_v49 = vrot.slane %v8001_v2, %v14487_v45  ;;  %v8048_v50 = vsel %vm875_vm15, %v8038_v48, %v8047_v47 }
0x4baa   :  { %v8049_v52 = vsel %vm877_vm2, %v8042_v49, %v8048_v50 }
0x4bab   :  { %13950 = vmatpush3.msra.mxu1 %v8049_v52 }
0x4bac   :  { %13952 = vmatmul.mubr.msk.f32.vlgmr.msra.gmra.mrb[36].mxu1 %vm28_vm1, %v14489_v46  ;;  %13959 = vmatprep.subr.mxu1 %v16088_v29 }
0x4bad   :  { %13961 = vmatprep.mubr.msk.f32.mxu1 %vm14346_vm0, %v16088_v29 }
0x4c7f   :  { %v8117_v54 = vpop.f32.mrb[36].mxu1 }
0x4c80   :  { %v8121_v55 = vadd.f32 %v8117_v54, %v8002_v53  ;;  %v13953_v56 = vpop.f32.mrb[37].mxu1 }
0x4c82   :  { %v8122_v57 = vmul.f32 %v8121_v55, %v8121_v55 }
0x4c84   :  { %v8123_v60 = vsel %vm28_vm1, %v8122_v57, 0.0 }
0x4c85   :  { %8124 = vadd.xlane.f32.xlu1 %v8123_v60 }
0x4d12   :  { %v8125_v61 = vpop.xlane.xlu1 %8124 }
0x4d13   :  { %v8126_v62 = vrot.slane %v8125_v61, 4 }
0x4d15   :  { %v8127_v1 = vadd.f32 %v8126_v62, %v8125_v61 }
0x4d17   :  { %v8128_v51 = vrot.slane %v8127_v1, 2 }
0x4d19   :  { %v8129_v3 = vadd.f32 %v8128_v51, %v8127_v1 }
0x4d1b   :  { %v8130_v4 = vrot.slane %v8129_v3, 1 }
0x4d1d   :  { %v8131_v5 = vadd.f32 %v8130_v4, %v8129_v3 }
0x4d1f   :  { %14145 = vpush %v8131_v5 }
0x4d50   :  { %s14146_s17 = spop %14145 }
0x4d51   :  { %v8133_v0 = vstv %s14146_s17 }
0x4d52   :  { %14266 = vrsqrt.f32 %v8133_v0 }
0x4d5c   :  { %v14267_v6 = vpop.eup %14266 }
0x4d5d   :  { %v16154_v23 = vmul.f32 %v14267_v6, %v8121_v55 }
0x4d5f   :  { %v8144_v7 = vrot.slane %v16154_v23, %v14503_v21  ;;  %v8137_v10 = vcombine.high %v16154_v23, %v16154_v23 }
0x4d61   :  { %v8160_v11 = vrot.slane %v8144_v7, %v14503_v21  ;;  %v8152_v12 = vcombine.high %v8144_v7, %v8144_v7  ;;  %v8151_v14 = vrot.slane %v8137_v10, %v14503_v21 }
0x4d63   :  { %v8189_v15 = vrot.slane %v8160_v11, %v14466_v59  ;;  %v8174_v17 = vrot.slane %v8152_v12, %v14503_v21  ;;  %v8182_v18 = vcombine.high %v8160_v11, %v8160_v11  ;;  %v8167_v19 = vrot.slane %v8151_v14, %v14503_v21 }
0x4d64   :  { %v8153_v20 = vcombine.high %v8151_v14, %v8151_v14 }
0x4d65   :  { %v8226_v22 = vmul.f32 %v8189_v15, %v14479_v32  ;;  %v8193_v8 = vrot.slane %v8174_v17, %v14466_v59  ;;  %v8197_v24 = vrot.slane %v8182_v18, %v14466_v59  ;;  %v8184_v25 = vcombine.high %v8174_v17, %v8174_v17 }
0x4d66   :  { %v8205_v26 = vrot.slane %v8167_v19, %v14466_v59  ;;  %v8181_v13 = vrot.slane %v8153_v20, %v14503_v21  ;;  %v8183_v27 = vcombine.high %v8167_v19, %v8167_v19  ;;  %v8258_v17 = vmul.f32 %v16154_v23, %v14498_v63 }
0x4d67   :  { %v8234_v28 = vsel %vm28_vm1, %v8226_v22, -inf  ;;  %v8227_v30 = vmul.f32 %v8193_v8, %v14479_v32  ;;  %v8228_v58 = vmul.f32 %v8197_v24, %v14479_v32  ;;  %v8201_v31 = vrot.slane %v8184_v25, %v14466_v59 }
0x4d68   :  { %8235 = vmax.xlane.f32.xlu0 %v8234_v28  ;;  %v8209_v36 = vrot.slane %v8181_v13, %v14466_v59  ;;  %v8185_v37 = vcombine.high %v8181_v13, %v8181_v13  ;;  %v8230_v39 = vmul.f32 %v8205_v26, %v14479_v32  ;;  %v8213_v40 = vrot.slane %v8183_v27, %v14466_v59 }
0x4d69   :  { %v8237_v34 = vsel %vm28_vm1, %v8227_v30, -inf  ;;  %v8229_v35 = vmul.f32 %v8201_v31, %v14479_v32  ;;  %v8240_v38 = vsel %vm28_vm1, %v8228_v58, -inf }
0x4d6a   :  { %8238 = vmax.xlane.f32.xlu1 %v8237_v34  ;;  %v8231_v42 = vmul.f32 %v8209_v36, %v14479_v32  ;;  %v8217_v43 = vrot.slane %v8185_v37, %v14466_v59  ;;  %v8246_v33 = vsel %vm28_vm1, %v8230_v39, -inf  ;;  %v8232_v44 = vmul.f32 %v8213_v40, %v14479_v32 }
0x4d6b   :  { %v8243_v41 = vsel %vm28_vm1, %v8229_v35, -inf }
0x4d6c   :  { %8241 = vmax.xlane.f32.xlu0 %v8240_v38  ;;  %v8249_v47 = vsel %vm28_vm1, %v8231_v42, -inf  ;;  %v8233_v48 = vmul.f32 %v8217_v43, %v14479_v32  ;;  %v8252_v2 = vsel %vm28_vm1, %v8232_v44, -inf }
0x4d6e   :  { %8244 = vmax.xlane.f32.xlu1 %v8243_v41  ;;  %v8255_v49 = vsel %vm28_vm1, %v8233_v48, -inf }
0x4d70   :  { %8247 = vmax.xlane.f32.xlu0 %v8246_v33 }
0x4d72   :  { %8250 = vmax.xlane.f32.xlu1 %v8249_v47 }
0x4d74   :  { %8253 = vmax.xlane.f32.xlu0 %v8252_v2 }
0x4d76   :  { %8256 = vmax.xlane.f32.xlu1 %v8255_v49 }
0x4df5   :  { %v8236_v50 = vpop.xlane.xlu0 %8235 }
0x4df6   :  { %v8270_v53 = vrot.slane %v8236_v50, %v14487_v45 }
0x4df7   :  { %v8239_v52 = vpop.xlane.xlu1 %8238 }
0x4df8   :  { %v8274_v54 = vrot.slane %v8239_v52, %v14487_v45 }
0x4df9   :  { %v8242_v55 = vpop.xlane.xlu0 %8241 }
0x4dfa   :  { %v8299_v56 = vsel %vm866_vm10, %v8274_v54, %v8270_v53  ;;  %v8278_v57 = vrot.slane %v8242_v55, %v14487_v45 }
0x4dfb   :  { %v8245_v60 = vpop.xlane.xlu1 %8244 }
0x4dfc   :  { %v8300_v61 = vsel %vm867_vm11, %v8278_v57, %v8299_v56  ;;  %v8282_v62 = vrot.slane %v8245_v60, %v14487_v45 }
0x4dfd   :  { %v8248_v1 = vpop.xlane.xlu0 %8247 }
0x4dfe   :  { %v8301_v51 = vsel %vm869_vm12, %v8282_v62, %v8300_v61  ;;  %v8286_v3 = vrot.slane %v8248_v1, %v14487_v45 }
0x4dff   :  { %v8251_v4 = vpop.xlane.xlu1 %8250 }
0x4e00   :  { %v8302_v5 = vsel %vm871_vm13, %v8286_v3, %v8301_v51  ;;  %v8290_v0 = vrot.slane %v8251_v4, %v14487_v45 }
0x4e01   :  { %v8254_v6 = vpop.xlane.xlu0 %8253 }
0x4e02   :  { %v8303_v7 = vsel %vm873_vm14, %v8290_v0, %v8302_v5  ;;  %v8294_v10 = vrot.slane %v8254_v6, %v14487_v45 }
0x4e03   :  { %v8257_v11 = vpop.xlane.xlu1 %8256 }
0x4e04   :  { %v8298_v12 = vrot.slane %v8257_v11, %v14487_v45  ;;  %v8304_v14 = vsel %vm875_vm15, %v8294_v10, %v8303_v7 }
0x4e06   :  { %v8305_v15 = vsel %vm877_vm2, %v8298_v12, %v8304_v14 }
0x4e07   :  { %13955 = vmatpush3.msra.mxu0 %v8305_v15 }
0x4e08   :  { %13957 = vmatmul.mubr.msk.f32.vlgmr.msra.gmra.mrb[38].mxu0 %vm28_vm1, %v14489_v46  ;;  %13964 = vmatprep.subr.mxu0 %v16088_v29 }
0x4e09   :  { %13966 = vmatprep.mubr.msk.f32.mxu0 %vm14346_vm0, %v16088_v29 }
0x4edb   :  { %v8373_v18 = vpop.f32.mrb[38].mxu0 }
0x4edc   :  { %v8377_v19 = vadd.f32 %v8373_v18, %v8258_v17  ;;  %v13958_v20 = vpop.f32.mrb[39].mxu0 }
0x4ede   :  { %v8378_v22 = vmul.f32 %v8377_v19, %v8377_v19 }
0x4ee0   :  { %v8379_v8 = vsel %vm28_vm1, %v8378_v22, 0.0 }
0x4ee1   :  { %8380 = vadd.xlane.f32.xlu0 %v8379_v8 }
0x4f6e   :  { %v8381_v24 = vpop.xlane.xlu0 %8380 }
0x4f6f   :  { %v8382_v25 = vrot.slane %v8381_v24, 4 }
0x4f71   :  { %v8383_v26 = vadd.f32 %v8382_v25, %v8381_v24 }
0x4f73   :  { %v8384_v13 = vrot.slane %v8383_v26, 2 }
0x4f75   :  { %v8385_v27 = vadd.f32 %v8384_v13, %v8383_v26 }
0x4f77   :  { %v8386_v28 = vrot.slane %v8385_v27, 1 }
0x4f79   :  { %v8387_v30 = vadd.f32 %v8386_v28, %v8385_v27 }
0x4f7b   :  { %14147 = vpush %v8387_v30 }
0x4fac   :  { %s14148_s18 = spop %14147 }
0x4fad   :  { %v8389_v58 = vstv %s14148_s18 }
0x4fae   :  { %14268 = vrsqrt.f32 %v8389_v58 }
0x4fb8   :  { %v14269_v31 = vpop.eup %14268 }
0x4fb9   :  { %v16212_v23 = vmul.f32 %v14269_v31, %v8377_v19 }
0x4fbb   :  { %v8400_v34 = vrot.slane %v16212_v23, %v14503_v21  ;;  %v8393_v35 = vcombine.high %v16212_v23, %v16212_v23 }
0x4fbd   :  { %v8416_v36 = vrot.slane %v8400_v34, %v14503_v21  ;;  %v8408_v37 = vcombine.high %v8400_v34, %v8400_v34  ;;  %v8407_v38 = vrot.slane %v8393_v35, %v14503_v21 }
0x4fbf   :  { %v8445_v39 = vrot.slane %v8416_v36, %v14466_v59  ;;  %v8430_v40 = vrot.slane %v8408_v37, %v14503_v21  ;;  %v8438_v41 = vcombine.high %v8416_v36, %v8416_v36  ;;  %v8423_v42 = vrot.slane %v8407_v38, %v14503_v21 }
0x4fc0   :  { %v8409_v43 = vcombine.high %v8407_v38, %v8407_v38 }
0x4fc1   :  { %v8482_v33 = vmul.f32 %v8445_v39, %v14479_v32  ;;  %v8449_v44 = vrot.slane %v8430_v40, %v14466_v59  ;;  %v8453_v47 = vrot.slane %v8438_v41, %v14466_v59  ;;  %v8440_v48 = vcombine.high %v8430_v40, %v8430_v40 }
0x4fc2   :  { %v8461_v2 = vrot.slane %v8423_v42, %v14466_v59  ;;  %v8437_v49 = vrot.slane %v8409_v43, %v14503_v21  ;;  %v8439_v50 = vcombine.high %v8423_v42, %v8423_v42  ;;  %v8514_v40 = vmul.f32 %v16212_v23, %v14498_v63 }
0x4fc3   :  { %v8490_v52 = vsel %vm28_vm1, %v8482_v33, -inf  ;;  %v8483_v53 = vmul.f32 %v8449_v44, %v14479_v32  ;;  %v8484_v54 = vmul.f32 %v8453_v47, %v14479_v32  ;;  %v8457_v55 = vrot.slane %v8440_v48, %v14466_v59 }
0x4fc4   :  { %8491 = vmax.xlane.f32.xlu1 %v8490_v52  ;;  %v8465_v60 = vrot.slane %v8437_v49, %v14466_v59  ;;  %v8441_v61 = vcombine.high %v8437_v49, %v8437_v49  ;;  %v8486_v1 = vmul.f32 %v8461_v2, %v14479_v32  ;;  %v8469_v51 = vrot.slane %v8439_v50, %v14466_v59 }
0x4fc5   :  { %v8493_v56 = vsel %vm28_vm1, %v8483_v53, -inf  ;;  %v8485_v57 = vmul.f32 %v8457_v55, %v14479_v32  ;;  %v8496_v62 = vsel %vm28_vm1, %v8484_v54, -inf }
0x4fc6   :  { %8494 = vmax.xlane.f32.xlu0 %v8493_v56  ;;  %v8487_v4 = vmul.f32 %v8465_v60, %v14479_v32  ;;  %v8473_v5 = vrot.slane %v8441_v61, %v14466_v59  ;;  %v8502_v0 = vsel %vm28_vm1, %v8486_v1, -inf  ;;  %v8488_v6 = vmul.f32 %v8469_v51, %v14479_v32 }
0x4fc7   :  { %v8499_v3 = vsel %vm28_vm1, %v8485_v57, -inf }
0x4fc8   :  { %8497 = vmax.xlane.f32.xlu1 %v8496_v62  ;;  %v8505_v7 = vsel %vm28_vm1, %v8487_v4, -inf  ;;  %v8489_v10 = vmul.f32 %v8473_v5, %v14479_v32  ;;  %v8508_v11 = vsel %vm28_vm1, %v8488_v6, -inf }
0x4fca   :  { %8500 = vmax.xlane.f32.xlu0 %v8499_v3  ;;  %v8511_v12 = vsel %vm28_vm1, %v8489_v10, -inf }
0x4fcc   :  { %8503 = vmax.xlane.f32.xlu1 %v8502_v0 }
0x4fce   :  { %8506 = vmax.xlane.f32.xlu0 %v8505_v7 }
0x4fd0   :  { %8509 = vmax.xlane.f32.xlu1 %v8508_v11 }
0x4fd2   :  { %8512 = vmax.xlane.f32.xlu0 %v8511_v12 }
0x5051   :  { %v8492_v14 = vpop.xlane.xlu1 %8491 }
0x5052   :  { %v8526_v17 = vrot.slane %v8492_v14, %v14487_v45 }
0x5053   :  { %v8495_v15 = vpop.xlane.xlu0 %8494 }
0x5054   :  { %v8530_v18 = vrot.slane %v8495_v15, %v14487_v45 }
0x5055   :  { %v8498_v19 = vpop.xlane.xlu1 %8497 }
0x5056   :  { %v8555_v20 = vsel %vm866_vm10, %v8530_v18, %v8526_v17  ;;  %v8534_v22 = vrot.slane %v8498_v19, %v14487_v45 }
0x5057   :  { %v8501_v8 = vpop.xlane.xlu0 %8500 }
0x5058   :  { %v8556_v24 = vsel %vm867_vm11, %v8534_v22, %v8555_v20  ;;  %v8538_v25 = vrot.slane %v8501_v8, %v14487_v45 }
0x5059   :  { %v8504_v26 = vpop.xlane.xlu1 %8503 }
0x505a   :  { %v8557_v13 = vsel %vm869_vm12, %v8538_v25, %v8556_v24  ;;  %v8542_v27 = vrot.slane %v8504_v26, %v14487_v45 }
0x505b   :  { %v8507_v28 = vpop.xlane.xlu0 %8506 }
0x505c   :  { %v8558_v30 = vsel %vm871_vm13, %v8542_v27, %v8557_v13  ;;  %v8546_v58 = vrot.slane %v8507_v28, %v14487_v45 }
0x505d   :  { %v8510_v31 = vpop.xlane.xlu1 %8509 }
0x505e   :  { %v8559_v34 = vsel %vm873_vm14, %v8546_v58, %v8558_v30  ;;  %v8550_v35 = vrot.slane %v8510_v31, %v14487_v45 }
0x505f   :  { %v8513_v36 = vpop.xlane.xlu0 %8512 }
0x5060   :  { %v8554_v37 = vrot.slane %v8513_v36, %v14487_v45  ;;  %v8560_v38 = vsel %vm875_vm15, %v8550_v35, %v8559_v34 }
0x5062   :  { %v8561_v39 = vsel %vm877_vm2, %v8554_v37, %v8560_v38 }
0x5063   :  { %13960 = vmatpush3.msra.mxu1 %v8561_v39 }
0x5064   :  { %13962 = vmatmul.mubr.msk.f32.vlgmr.msra.gmra.mrb[38].mxu1 %vm28_vm1, %v14489_v46  ;;  %13969 = vmatprep.subr.mxu1 %v16088_v29 }
0x5065   :  { %13971 = vmatprep.mubr.msk.f32.mxu1 %vm14346_vm0, %v16088_v29 }
0x5137   :  { %v8629_v41 = vpop.f32.mrb[38].mxu1 }
0x5138   :  { %v8633_v42 = vadd.f32 %v8629_v41, %v8514_v40  ;;  %v13963_v43 = vpop.f32.mrb[39].mxu1 }
0x513a   :  { %v8634_v33 = vmul.f32 %v8633_v42, %v8633_v42 }
0x513c   :  { %v8635_v44 = vsel %vm28_vm1, %v8634_v33, 0.0 }
0x513d   :  { %8636 = vadd.xlane.f32.xlu1 %v8635_v44 }
0x51ca   :  { %v8637_v47 = vpop.xlane.xlu1 %8636 }
0x51cb   :  { %v8638_v48 = vrot.slane %v8637_v47, 4 }
0x51cd   :  { %v8639_v2 = vadd.f32 %v8638_v48, %v8637_v47 }
0x51cf   :  { %v8640_v49 = vrot.slane %v8639_v2, 2 }
0x51d1   :  { %v8641_v50 = vadd.f32 %v8640_v49, %v8639_v2 }
0x51d3   :  { %v8642_v52 = vrot.slane %v8641_v50, 1 }
0x51d5   :  { %v8643_v53 = vadd.f32 %v8642_v52, %v8641_v50 }
0x51d7   :  { %14149 = vpush %v8643_v53 }
0x5208   :  { %s14150_s19 = spop %14149 }
0x5209   :  { %v8645_v54 = vstv %s14150_s19 }
0x520a   :  { %14270 = vrsqrt.f32 %v8645_v54 }
0x5214   :  { %v14271_v55 = vpop.eup %14270 }
0x5215   :  { %v16270_v23 = vmul.f32 %v14271_v55, %v8633_v42 }
0x5217   :  { %v8656_v56 = vrot.slane %v16270_v23, %v14503_v21  ;;  %v8649_v57 = vcombine.high %v16270_v23, %v16270_v23 }
0x5219   :  { %v8672_v60 = vrot.slane %v8656_v56, %v14503_v21  ;;  %v8664_v61 = vcombine.high %v8656_v56, %v8656_v56  ;;  %v8663_v62 = vrot.slane %v8649_v57, %v14503_v21 }
0x521b   :  { %v8701_v1 = vrot.slane %v8672_v60, %v14466_v59  ;;  %v8686_v51 = vrot.slane %v8664_v61, %v14503_v21  ;;  %v8694_v3 = vcombine.high %v8672_v60, %v8672_v60  ;;  %v8679_v4 = vrot.slane %v8663_v62, %v14503_v21 }
0x521c   :  { %v8665_v5 = vcombine.high %v8663_v62, %v8663_v62 }
0x521d   :  { %v8738_v0 = vmul.f32 %v8701_v1, %v14479_v32  ;;  %v8705_v6 = vrot.slane %v8686_v51, %v14466_v59  ;;  %v8709_v7 = vrot.slane %v8694_v3, %v14466_v59  ;;  %v8696_v10 = vcombine.high %v8686_v51, %v8686_v51 }
0x521e   :  { %v8717_v11 = vrot.slane %v8679_v4, %v14466_v59  ;;  %v8693_v12 = vrot.slane %v8665_v5, %v14503_v21  ;;  %v8695_v14 = vcombine.high %v8679_v4, %v8679_v4  ;;  %v8770_v51 = vmul.f32 %v16270_v23, %v14498_v63 }
0x521f   :  { %v8746_v15 = vsel %vm28_vm1, %v8738_v0, -inf  ;;  %v8739_v17 = vmul.f32 %v8705_v6, %v14479_v32  ;;  %v8740_v18 = vmul.f32 %v8709_v7, %v14479_v32  ;;  %v8713_v19 = vrot.slane %v8696_v10, %v14466_v59 }
0x5220   :  { %8747 = vmax.xlane.f32.xlu0 %v8746_v15  ;;  %v8721_v8 = vrot.slane %v8693_v12, %v14466_v59  ;;  %v8697_v24 = vcombine.high %v8693_v12, %v8693_v12  ;;  %v8742_v26 = vmul.f32 %v8717_v11, %v14479_v32  ;;  %v8725_v13 = vrot.slane %v8695_v14, %v14466_v59 }
0x5221   :  { %v8749_v20 = vsel %vm28_vm1, %v8739_v17, -inf  ;;  %v8741_v22 = vmul.f32 %v8713_v19, %v14479_v32  ;;  %v8752_v25 = vsel %vm28_vm1, %v8740_v18, -inf }
0x5222   :  { %8750 = vmax.xlane.f32.xlu1 %v8749_v20  ;;  %v8743_v28 = vmul.f32 %v8721_v8, %v14479_v32  ;;  %v8729_v30 = vrot.slane %v8697_v24, %v14466_v59  ;;  %v8758_v58 = vsel %vm28_vm1, %v8742_v26, -inf  ;;  %v8744_v31 = vmul.f32 %v8725_v13, %v14479_v32 }
0x5223   :  { %v8755_v27 = vsel %vm28_vm1, %v8741_v22, -inf }
0x5224   :  { %8753 = vmax.xlane.f32.xlu0 %v8752_v25  ;;  %v8761_v34 = vsel %vm28_vm1, %v8743_v28, -inf  ;;  %v8745_v35 = vmul.f32 %v8729_v30, %v14479_v32  ;;  %v8764_v36 = vsel %vm28_vm1, %v8744_v31, -inf }
0x5226   :  { %8756 = vmax.xlane.f32.xlu1 %v8755_v27  ;;  %v8767_v37 = vsel %vm28_vm1, %v8745_v35, -inf }
0x5228   :  { %8759 = vmax.xlane.f32.xlu0 %v8758_v58 }
0x522a   :  { %8762 = vmax.xlane.f32.xlu1 %v8761_v34 }
0x522c   :  { %8765 = vmax.xlane.f32.xlu0 %v8764_v36 }
0x522e   :  { %8768 = vmax.xlane.f32.xlu1 %v8767_v37 }
0x52ad   :  { %v8748_v38 = vpop.xlane.xlu0 %8747 }
0x52ae   :  { %v8782_v40 = vrot.slane %v8748_v38, %v14487_v45 }
0x52af   :  { %v8751_v39 = vpop.xlane.xlu1 %8750 }
0x52b0   :  { %v8786_v41 = vrot.slane %v8751_v39, %v14487_v45 }
0x52b1   :  { %v8754_v42 = vpop.xlane.xlu0 %8753 }
0x52b2   :  { %v8811_v43 = vsel %vm866_vm10, %v8786_v41, %v8782_v40  ;;  %v8790_v33 = vrot.slane %v8754_v42, %v14487_v45 }
0x52b3   :  { %v8757_v44 = vpop.xlane.xlu1 %8756 }
0x52b4   :  { %v8812_v47 = vsel %vm867_vm11, %v8790_v33, %v8811_v43  ;;  %v8794_v48 = vrot.slane %v8757_v44, %v14487_v45 }
0x52b5   :  { %v8760_v2 = vpop.xlane.xlu0 %8759 }
0x52b6   :  { %v8813_v49 = vsel %vm869_vm12, %v8794_v48, %v8812_v47  ;;  %v8798_v50 = vrot.slane %v8760_v2, %v14487_v45 }
0x52b7   :  { %v8763_v52 = vpop.xlane.xlu1 %8762 }
0x52b8   :  { %v8814_v53 = vsel %vm871_vm13, %v8798_v50, %v8813_v49  ;;  %v8802_v54 = vrot.slane %v8763_v52, %v14487_v45 }
0x52b9   :  { %v8766_v55 = vpop.xlane.xlu0 %8765 }
0x52ba   :  { %v8815_v56 = vsel %vm873_vm14, %v8802_v54, %v8814_v53  ;;  %v8806_v57 = vrot.slane %v8766_v55, %v14487_v45 }
0x52bb   :  { %v8769_v60 = vpop.xlane.xlu1 %8768 }
0x52bc   :  { %v8810_v61 = vrot.slane %v8769_v60, %v14487_v45  ;;  %v8816_v62 = vsel %vm875_vm15, %v8806_v57, %v8815_v56 }
0x52be   :  { %v8817_v1 = vsel %vm877_vm2, %v8810_v61, %v8816_v62 }
0x52bf   :  { %13965 = vmatpush3.msra.mxu0 %v8817_v1 }
0x52c0   :  { %13967 = vmatmul.mubr.msk.f32.vlgmr.msra.gmra.mrb[40].mxu0 %vm28_vm1, %v14489_v46  ;;  %13974 = vmatprep.subr.mxu0 %v16088_v29 }
0x52c1   :  { %13976 = vmatprep.mubr.msk.f32.mxu0 %vm14346_vm0, %v16088_v29 }
0x5393   :  { %v8885_v3 = vpop.f32.mrb[40].mxu0 }
0x5394   :  { %v8889_v4 = vadd.f32 %v8885_v3, %v8770_v51  ;;  %v13968_v5 = vpop.f32.mrb[41].mxu0 }
0x5396   :  { %v8890_v0 = vmul.f32 %v8889_v4, %v8889_v4 }
0x5398   :  { %v8891_v6 = vsel %vm28_vm1, %v8890_v0, 0.0 }
0x5399   :  { %8892 = vadd.xlane.f32.xlu0 %v8891_v6 }
0x5426   :  { %v8893_v7 = vpop.xlane.xlu0 %8892 }
0x5427   :  { %v8894_v10 = vrot.slane %v8893_v7, 4 }
0x5429   :  { %v8895_v11 = vadd.f32 %v8894_v10, %v8893_v7 }
0x542b   :  { %v8896_v12 = vrot.slane %v8895_v11, 2 }
0x542d   :  { %v8897_v14 = vadd.f32 %v8896_v12, %v8895_v11 }
0x542f   :  { %v8898_v15 = vrot.slane %v8897_v14, 1 }
0x5431   :  { %v8899_v17 = vadd.f32 %v8898_v15, %v8897_v14 }
0x5433   :  { %14151 = vpush %v8899_v17 }
0x5464   :  { %s14152_s20 = spop %14151 }
0x5465   :  { %v8901_v18 = vstv %s14152_s20 }
0x5466   :  { %14272 = vrsqrt.f32 %v8901_v18 }
0x5470   :  { %v14273_v19 = vpop.eup %14272 }
0x5471   :  { %v16328_v23 = vmul.f32 %v14273_v19, %v8889_v4 }
0x5473   :  { %v8912_v20 = vrot.slane %v16328_v23, %v14503_v21  ;;  %v8905_v22 = vcombine.high %v16328_v23, %v16328_v23 }
0x5475   :  { %v8928_v8 = vrot.slane %v8912_v20, %v14503_v21  ;;  %v8920_v24 = vcombine.high %v8912_v20, %v8912_v20  ;;  %v8919_v25 = vrot.slane %v8905_v22, %v14503_v21 }
0x5477   :  { %v8957_v26 = vrot.slane %v8928_v8, %v14466_v59  ;;  %v8942_v13 = vrot.slane %v8920_v24, %v14503_v21  ;;  %v8950_v27 = vcombine.high %v8928_v8, %v8928_v8  ;;  %v8935_v28 = vrot.slane %v8919_v25, %v14503_v21 }
0x5478   :  { %v8921_v30 = vcombine.high %v8919_v25, %v8919_v25 }
0x5479   :  { %v8994_v58 = vmul.f32 %v8957_v26, %v14479_v32  ;;  %v8961_v31 = vrot.slane %v8942_v13, %v14466_v59  ;;  %v8965_v34 = vrot.slane %v8950_v27, %v14466_v59  ;;  %v8952_v35 = vcombine.high %v8942_v13, %v8942_v13 }
0x547a   :  { %v8973_v36 = vrot.slane %v8935_v28, %v14466_v59  ;;  %v8949_v37 = vrot.slane %v8921_v30, %v14503_v21  ;;  %v8951_v38 = vcombine.high %v8935_v28, %v8935_v28  ;;  %v9026_v13 = vmul.f32 %v16328_v23, %v14498_v63 }
0x547b   :  { %v9002_v39 = vsel %vm28_vm1, %v8994_v58, -inf  ;;  %v8995_v40 = vmul.f32 %v8961_v31, %v14479_v32  ;;  %v8996_v41 = vmul.f32 %v8965_v34, %v14479_v32  ;;  %v8969_v42 = vrot.slane %v8952_v35, %v14466_v59 }
0x547c   :  { %9003 = vmax.xlane.f32.xlu1 %v9002_v39  ;;  %v8977_v44 = vrot.slane %v8949_v37, %v14466_v59  ;;  %v8953_v47 = vcombine.high %v8949_v37, %v8949_v37  ;;  %v8998_v2 = vmul.f32 %v8973_v36, %v14479_v32  ;;  %v8981_v49 = vrot.slane %v8951_v38, %v14466_v59 }
0x547d   :  { %v9005_v43 = vsel %vm28_vm1, %v8995_v40, -inf  ;;  %v8997_v33 = vmul.f32 %v8969_v42, %v14479_v32  ;;  %v9008_v48 = vsel %vm28_vm1, %v8996_v41, -inf }
0x547e   :  { %9006 = vmax.xlane.f32.xlu0 %v9005_v43  ;;  %v8999_v52 = vmul.f32 %v8977_v44, %v14479_v32  ;;  %v8985_v53 = vrot.slane %v8953_v47, %v14466_v59  ;;  %v9014_v54 = vsel %vm28_vm1, %v8998_v2, -inf  ;;  %v9000_v55 = vmul.f32 %v8981_v49, %v14479_v32 }
0x547f   :  { %v9011_v50 = vsel %vm28_vm1, %v8997_v33, -inf }
0x5480   :  { %9009 = vmax.xlane.f32.xlu1 %v9008_v48  ;;  %v9017_v56 = vsel %vm28_vm1, %v8999_v52, -inf  ;;  %v9001_v57 = vmul.f32 %v8985_v53, %v14479_v32  ;;  %v9020_v60 = vsel %vm28_vm1, %v9000_v55, -inf }
0x5482   :  { %9012 = vmax.xlane.f32.xlu0 %v9011_v50  ;;  %v9023_v61 = vsel %vm28_vm1, %v9001_v57, -inf }
0x5484   :  { %9015 = vmax.xlane.f32.xlu1 %v9014_v54 }
0x5486   :  { %9018 = vmax.xlane.f32.xlu0 %v9017_v56 }
0x5488   :  { %9021 = vmax.xlane.f32.xlu1 %v9020_v60 }
0x548a   :  { %9024 = vmax.xlane.f32.xlu0 %v9023_v61 }
0x5509   :  { %v9004_v62 = vpop.xlane.xlu1 %9003 }
0x550a   :  { %v9038_v51 = vrot.slane %v9004_v62, %v14487_v45 }
0x550b   :  { %v9007_v1 = vpop.xlane.xlu0 %9006 }
0x550c   :  { %v9042_v3 = vrot.slane %v9007_v1, %v14487_v45 }
0x550d   :  { %v9010_v4 = vpop.xlane.xlu1 %9009 }
0x550e   :  { %v9067_v5 = vsel %vm866_vm10, %v9042_v3, %v9038_v51  ;;  %v9046_v0 = vrot.slane %v9010_v4, %v14487_v45 }
0x550f   :  { %v9013_v6 = vpop.xlane.xlu0 %9012 }
0x5510   :  { %v9068_v7 = vsel %vm867_vm11, %v9046_v0, %v9067_v5  ;;  %v9050_v10 = vrot.slane %v9013_v6, %v14487_v45 }
0x5511   :  { %v9016_v11 = vpop.xlane.xlu1 %9015 }
0x5512   :  { %v9069_v12 = vsel %vm869_vm12, %v9050_v10, %v9068_v7  ;;  %v9054_v14 = vrot.slane %v9016_v11, %v14487_v45 }
0x5513   :  { %v9019_v15 = vpop.xlane.xlu0 %9018 }
0x5514   :  { %v9070_v17 = vsel %vm871_vm13, %v9054_v14, %v9069_v12  ;;  %v9058_v18 = vrot.slane %v9019_v15, %v14487_v45 }
0x5515   :  { %v9022_v19 = vpop.xlane.xlu1 %9021 }
0x5516   :  { %v9071_v20 = vsel %vm873_vm14, %v9058_v18, %v9070_v17  ;;  %v9062_v22 = vrot.slane %v9022_v19, %v14487_v45 }
0x5517   :  { %v9025_v8 = vpop.xlane.xlu0 %9024 }
0x5518   :  { %v9066_v24 = vrot.slane %v9025_v8, %v14487_v45  ;;  %v9072_v25 = vsel %vm875_vm15, %v9062_v22, %v9071_v20 }
0x551a   :  { %v9073_v26 = vsel %vm877_vm2, %v9066_v24, %v9072_v25 }
0x551b   :  { %13970 = vmatpush3.msra.mxu1 %v9073_v26 }
0x551c   :  { %13972 = vmatmul.mubr.msk.f32.vlgmr.msra.gmra.mrb[40].mxu1 %vm28_vm1, %v14489_v46  ;;  %13979 = vmatprep.subr.mxu1 %v16088_v29 }
0x551d   :  { %13981 = vmatprep.mubr.msk.f32.mxu1 %vm14346_vm0, %v16088_v29 }
0x55ef   :  { %v9141_v27 = vpop.f32.mrb[40].mxu1 }
0x55f0   :  { %v9145_v28 = vadd.f32 %v9141_v27, %v9026_v13  ;;  %v13973_v30 = vpop.f32.mrb[41].mxu1 }
0x55f2   :  { %v9146_v58 = vmul.f32 %v9145_v28, %v9145_v28 }
0x55f4   :  { %v9147_v31 = vsel %vm28_vm1, %v9146_v58, 0.0 }
0x55f5   :  { %9148 = vadd.xlane.f32.xlu1 %v9147_v31 }
0x5682   :  { %v9149_v34 = vpop.xlane.xlu1 %9148 }
0x5683   :  { %v9150_v35 = vrot.slane %v9149_v34, 4 }
0x5685   :  { %v9151_v36 = vadd.f32 %v9150_v35, %v9149_v34 }
0x5687   :  { %v9152_v37 = vrot.slane %v9151_v36, 2 }
0x5689   :  { %v9153_v38 = vadd.f32 %v9152_v37, %v9151_v36 }
0x568b   :  { %v9154_v39 = vrot.slane %v9153_v38, 1 }
0x568d   :  { %v9155_v40 = vadd.f32 %v9154_v39, %v9153_v38 }
0x568f   :  { %14153 = vpush %v9155_v40 }
0x56c0   :  { %s14154_s21 = spop %14153 }
0x56c1   :  { %v9157_v29 = vstv %s14154_s21 }
0x56c2   :  { %14274 = vrsqrt.f32 %v9157_v29 }
0x56cc   :  { %v14275_v41 = vpop.eup %14274 }
0x56cd   :  { %v16386_v23 = vmul.f32 %v14275_v41, %v9145_v28 }
0x56cf   :  { %v9168_v42 = vrot.slane %v16386_v23, %v14503_v21  ;;  %v9161_v43 = vcombine.high %v16386_v23, %v16386_v23 }
0x56d1   :  { %v9184_v33 = vrot.slane %v9168_v42, %v14503_v21  ;;  %v9176_v44 = vcombine.high %v9168_v42, %v9168_v42  ;;  %v9175_v47 = vrot.slane %v9161_v43, %v14503_v21 }
0x56d3   :  { %v9213_v48 = vrot.slane %v9184_v33, %v14466_v59  ;;  %v9198_v2 = vrot.slane %v9176_v44, %v14503_v21  ;;  %v9206_v49 = vcombine.high %v9184_v33, %v9184_v33  ;;  %v9191_v50 = vrot.slane %v9175_v47, %v14503_v21 }
0x56d4   :  { %v9177_v52 = vcombine.high %v9175_v47, %v9175_v47 }
0x56d5   :  { %v9250_v53 = vmul.f32 %v9213_v48, %v14479_v32  ;;  %v9217_v54 = vrot.slane %v9198_v2, %v14466_v59  ;;  %v9221_v55 = vrot.slane %v9206_v49, %v14466_v59  ;;  %v9208_v56 = vcombine.high %v9198_v2, %v9198_v2  ;;  %v16441_v48 = vld [vmem:[%s17397_s2 + $0x8] sm:$0xff] }
0x56d6   :  { %v9229_v57 = vrot.slane %v9191_v50, %v14466_v59  ;;  %v9205_v60 = vrot.slane %v9177_v52, %v14503_v21  ;;  %v9207_v61 = vcombine.high %v9191_v50, %v9191_v50  ;;  %v9282_v2 = vmul.f32 %v16386_v23, %v14498_v63 }
0x56d7   :  { %v9258_v62 = vsel %vm28_vm1, %v9250_v53, -inf  ;;  %v9251_v1 = vmul.f32 %v9217_v54, %v14479_v32  ;;  %v9252_v51 = vmul.f32 %v9221_v55, %v14479_v32  ;;  %v9225_v3 = vrot.slane %v9208_v56, %v14466_v59 }
0x56d8   :  { %9259 = vmax.xlane.f32.xlu0 %v9258_v62  ;;  %v9233_v0 = vrot.slane %v9205_v60, %v14466_v59  ;;  %v9209_v6 = vcombine.high %v9205_v60, %v9205_v60  ;;  %v9254_v10 = vmul.f32 %v9229_v57, %v14479_v32  ;;  %v9237_v11 = vrot.slane %v9207_v61, %v14466_v59 }
0x56d9   :  { %v9261_v4 = vsel %vm28_vm1, %v9251_v1, -inf  ;;  %v9253_v5 = vmul.f32 %v9225_v3, %v14479_v32  ;;  %v9264_v7 = vsel %vm28_vm1, %v9252_v51, -inf }
0x56da   :  { %9262 = vmax.xlane.f32.xlu1 %v9261_v4  ;;  %v9255_v14 = vmul.f32 %v9233_v0, %v14479_v32  ;;  %v9241_v15 = vrot.slane %v9209_v6, %v14466_v59  ;;  %v9270_v17 = vsel %vm28_vm1, %v9254_v10, -inf  ;;  %v9256_v18 = vmul.f32 %v9237_v11, %v14479_v32 }
0x56db   :  { %v9267_v12 = vsel %vm28_vm1, %v9253_v5, -inf }
0x56dc   :  { %9265 = vmax.xlane.f32.xlu0 %v9264_v7  ;;  %v9273_v19 = vsel %vm28_vm1, %v9255_v14, -inf  ;;  %v9257_v20 = vmul.f32 %v9241_v15, %v14479_v32  ;;  %v9276_v22 = vsel %vm28_vm1, %v9256_v18, -inf }
0x56de   :  { %9268 = vmax.xlane.f32.xlu1 %v9267_v12  ;;  %v9279_v8 = vsel %vm28_vm1, %v9257_v20, -inf }
0x56e0   :  { %9271 = vmax.xlane.f32.xlu0 %v9270_v17 }
0x56e2   :  { %9274 = vmax.xlane.f32.xlu1 %v9273_v19 }
0x56e4   :  { %9277 = vmax.xlane.f32.xlu0 %v9276_v22 }
0x56e6   :  { %9280 = vmax.xlane.f32.xlu1 %v9279_v8 }
0x5765   :  { %v9260_v24 = vpop.xlane.xlu0 %9259 }
0x5766   :  { %v9294_v26 = vrot.slane %v9260_v24, %v14487_v45 }
0x5767   :  { %v9263_v25 = vpop.xlane.xlu1 %9262 }
0x5768   :  { %v9298_v13 = vrot.slane %v9263_v25, %v14487_v45 }
0x5769   :  { %v9266_v27 = vpop.xlane.xlu0 %9265 }
0x576a   :  { %v9323_v28 = vsel %vm866_vm10, %v9298_v13, %v9294_v26  ;;  %v9302_v30 = vrot.slane %v9266_v27, %v14487_v45 }
0x576b   :  { %v9269_v58 = vpop.xlane.xlu1 %9268 }
0x576c   :  { %v9324_v31 = vsel %vm867_vm11, %v9302_v30, %v9323_v28  ;;  %v9306_v34 = vrot.slane %v9269_v58, %v14487_v45 }
0x576d   :  { %v9272_v35 = vpop.xlane.xlu0 %9271 }
0x576e   :  { %v9325_v36 = vsel %vm869_vm12, %v9306_v34, %v9324_v31  ;;  %v9310_v37 = vrot.slane %v9272_v35, %v14487_v45 }
0x576f   :  { %v9275_v38 = vpop.xlane.xlu1 %9274 }
0x5770   :  { %v9326_v39 = vsel %vm871_vm13, %v9310_v37, %v9325_v36  ;;  %v9314_v40 = vrot.slane %v9275_v38, %v14487_v45 }
0x5771   :  { %v9278_v29 = vpop.xlane.xlu0 %9277 }
0x5772   :  { %v9327_v41 = vsel %vm873_vm14, %v9314_v40, %v9326_v39  ;;  %v9318_v42 = vrot.slane %v9278_v29, %v14487_v45 }
0x5773   :  { %v9281_v43 = vpop.xlane.xlu1 %9280 }
0x5774   :  { %v9322_v33 = vrot.slane %v9281_v43, %v14487_v45  ;;  %v9328_v44 = vsel %vm875_vm15, %v9318_v42, %v9327_v41 }
0x5776   :  { %v9329_v47 = vsel %vm877_vm2, %v9322_v33, %v9328_v44 }
0x5777   :  { %13975 = vmatpush3.msra.mxu0 %v9329_v47 }
0x5778   :  { %13977 = vmatmul.mubr.msk.f32.vlgmr.msra.gmra.mrb[42].mxu0 %vm28_vm1, %v14489_v46  ;;  %13984 = vmatprep.subr.mxu0 %v16441_v48 }
0x5779   :  { %13986 = vmatprep.mubr.msk.f32.mxu0 %vm14346_vm0, %v16441_v48 }
0x584b   :  { %v9397_v49 = vpop.f32.mrb[42].mxu0 }
0x584c   :  { %v9401_v50 = vadd.f32 %v9397_v49, %v9282_v2  ;;  %v13978_v52 = vpop.f32.mrb[43].mxu0 }
0x584e   :  { %v9402_v53 = vmul.f32 %v9401_v50, %v9401_v50 }
0x5850   :  { %v9403_v54 = vsel %vm28_vm1, %v9402_v53, 0.0 }
0x5851   :  { %9404 = vadd.xlane.f32.xlu0 %v9403_v54 }
0x58de   :  { %v9405_v55 = vpop.xlane.xlu0 %9404 }
0x58df   :  { %v9406_v56 = vrot.slane %v9405_v55, 4 }
0x58e1   :  { %v9407_v57 = vadd.f32 %v9406_v56, %v9405_v55 }
0x58e3   :  { %v9408_v60 = vrot.slane %v9407_v57, 2 }
0x58e5   :  { %v9409_v61 = vadd.f32 %v9408_v60, %v9407_v57 }
0x58e7   :  { %v9410_v62 = vrot.slane %v9409_v61, 1 }
0x58e9   :  { %v9411_v1 = vadd.f32 %v9410_v62, %v9409_v61 }
0x58eb   :  { %14155 = vpush %v9411_v1 }
0x591c   :  { %s14156_s24 = spop %14155 }
0x591d   :  { %v9413_v51 = vstv %s14156_s24 }
0x591e   :  { %14276 = vrsqrt.f32 %v9413_v51 }
0x5928   :  { %v14277_v3 = vpop.eup %14276 }
0x5929   :  { %v16449_v23 = vmul.f32 %v14277_v3, %v9401_v50 }
0x592b   :  { %v9424_v4 = vrot.slane %v16449_v23, %v14503_v21  ;;  %v9417_v5 = vcombine.high %v16449_v23, %v16449_v23 }
0x592d   :  { %v9440_v0 = vrot.slane %v9424_v4, %v14503_v21  ;;  %v9432_v6 = vcombine.high %v9424_v4, %v9424_v4  ;;  %v9431_v7 = vrot.slane %v9417_v5, %v14503_v21 }
0x592f   :  { %v9469_v10 = vrot.slane %v9440_v0, %v14466_v59  ;;  %v9454_v11 = vrot.slane %v9432_v6, %v14503_v21  ;;  %v9462_v12 = vcombine.high %v9440_v0, %v9440_v0  ;;  %v9447_v14 = vrot.slane %v9431_v7, %v14503_v21 }
0x5930   :  { %v9433_v15 = vcombine.high %v9431_v7, %v9431_v7 }
0x5931   :  { %v9506_v17 = vmul.f32 %v9469_v10, %v14479_v32  ;;  %v9473_v18 = vrot.slane %v9454_v11, %v14466_v59  ;;  %v9477_v19 = vrot.slane %v9462_v12, %v14466_v59  ;;  %v9464_v20 = vcombine.high %v9454_v11, %v9454_v11 }
0x5932   :  { %v9485_v22 = vrot.slane %v9447_v14, %v14466_v59  ;;  %v9461_v8 = vrot.slane %v9433_v15, %v14503_v21  ;;  %v9463_v24 = vcombine.high %v9447_v14, %v9447_v14  ;;  %v9538_v11 = vmul.f32 %v16449_v23, %v14498_v63 }
0x5933   :  { %v9514_v25 = vsel %vm28_vm1, %v9506_v17, -inf  ;;  %v9507_v26 = vmul.f32 %v9473_v18, %v14479_v32  ;;  %v9508_v13 = vmul.f32 %v9477_v19, %v14479_v32  ;;  %v9481_v27 = vrot.slane %v9464_v20, %v14466_v59 }
0x5934   :  { %9515 = vmax.xlane.f32.xlu1 %v9514_v25  ;;  %v9489_v58 = vrot.slane %v9461_v8, %v14466_v59  ;;  %v9465_v31 = vcombine.high %v9461_v8, %v9461_v8  ;;  %v9510_v35 = vmul.f32 %v9485_v22, %v14479_v32  ;;  %v9493_v36 = vrot.slane %v9463_v24, %v14466_v59 }
0x5935   :  { %v9517_v28 = vsel %vm28_vm1, %v9507_v26, -inf  ;;  %v9509_v30 = vmul.f32 %v9481_v27, %v14479_v32  ;;  %v9520_v34 = vsel %vm28_vm1, %v9508_v13, -inf }
0x5936   :  { %9518 = vmax.xlane.f32.xlu0 %v9517_v28  ;;  %v9511_v38 = vmul.f32 %v9489_v58, %v14479_v32  ;;  %v9497_v39 = vrot.slane %v9465_v31, %v14466_v59  ;;  %v9526_v40 = vsel %vm28_vm1, %v9510_v35, -inf  ;;  %v9512_v29 = vmul.f32 %v9493_v36, %v14479_v32 }
0x5937   :  { %v9523_v37 = vsel %vm28_vm1, %v9509_v30, -inf }
0x5938   :  { %9521 = vmax.xlane.f32.xlu1 %v9520_v34  ;;  %v9529_v41 = vsel %vm28_vm1, %v9511_v38, -inf  ;;  %v9513_v42 = vmul.f32 %v9497_v39, %v14479_v32  ;;  %v9532_v43 = vsel %vm28_vm1, %v9512_v29, -inf }
0x593a   :  { %9524 = vmax.xlane.f32.xlu0 %v9523_v37  ;;  %v9535_v33 = vsel %vm28_vm1, %v9513_v42, -inf }
0x593c   :  { %9527 = vmax.xlane.f32.xlu1 %v9526_v40 }
0x593e   :  { %9530 = vmax.xlane.f32.xlu0 %v9529_v41 }
0x5940   :  { %9533 = vmax.xlane.f32.xlu1 %v9532_v43 }
0x5942   :  { %9536 = vmax.xlane.f32.xlu0 %v9535_v33 }
0x59c1   :  { %v9516_v44 = vpop.xlane.xlu1 %9515 }
0x59c2   :  { %v9550_v2 = vrot.slane %v9516_v44, %v14487_v45 }
0x59c3   :  { %v9519_v47 = vpop.xlane.xlu0 %9518 }
0x59c4   :  { %v9554_v49 = vrot.slane %v9519_v47, %v14487_v45 }
0x59c5   :  { %v9522_v50 = vpop.xlane.xlu1 %9521 }
0x59c6   :  { %v9579_v52 = vsel %vm866_vm10, %v9554_v49, %v9550_v2  ;;  %v9558_v53 = vrot.slane %v9522_v50, %v14487_v45 }
0x59c7   :  { %v9525_v54 = vpop.xlane.xlu0 %9524 }
0x59c8   :  { %v9580_v55 = vsel %vm867_vm11, %v9558_v53, %v9579_v52  ;;  %v9562_v56 = vrot.slane %v9525_v54, %v14487_v45 }
0x59c9   :  { %v9528_v57 = vpop.xlane.xlu1 %9527 }
0x59ca   :  { %v9581_v60 = vsel %vm869_vm12, %v9562_v56, %v9580_v55  ;;  %v9566_v61 = vrot.slane %v9528_v57, %v14487_v45 }
0x59cb   :  { %v9531_v62 = vpop.xlane.xlu0 %9530 }
0x59cc   :  { %v9582_v1 = vsel %vm871_vm13, %v9566_v61, %v9581_v60  ;;  %v9570_v51 = vrot.slane %v9531_v62, %v14487_v45 }
0x59cd   :  { %v9534_v3 = vpop.xlane.xlu1 %9533 }
0x59ce   :  { %v9583_v4 = vsel %vm873_vm14, %v9570_v51, %v9582_v1  ;;  %v9574_v5 = vrot.slane %v9534_v3, %v14487_v45 }
0x59cf   :  { %v9537_v0 = vpop.xlane.xlu0 %9536 }
0x59d0   :  { %v9578_v6 = vrot.slane %v9537_v0, %v14487_v45  ;;  %v9584_v7 = vsel %vm875_vm15, %v9574_v5, %v9583_v4 }
0x59d2   :  { %v9585_v10 = vsel %vm877_vm2, %v9578_v6, %v9584_v7 }
0x59d3   :  { %13980 = vmatpush3.msra.mxu1 %v9585_v10 }
0x59d4   :  { %13982 = vmatmul.mubr.msk.f32.vlgmr.msra.gmra.mrb[42].mxu1 %vm28_vm1, %v14489_v46  ;;  %13989 = vmatprep.subr.mxu1 %v16441_v48 }
0x59d5   :  { %13991 = vmatprep.mubr.msk.f32.mxu1 %vm14346_vm0, %v16441_v48 }
0x5aa7   :  { %v9653_v12 = vpop.f32.mrb[42].mxu1 }
0x5aa8   :  { %v9657_v14 = vadd.f32 %v9653_v12, %v9538_v11  ;;  %v13983_v15 = vpop.f32.mrb[43].mxu1 }
0x5aaa   :  { %v9658_v17 = vmul.f32 %v9657_v14, %v9657_v14 }
0x5aac   :  { %v9659_v18 = vsel %vm28_vm1, %v9658_v17, 0.0 }
0x5aad   :  { %9660 = vadd.xlane.f32.xlu1 %v9659_v18 }
0x5b3a   :  { %v9661_v19 = vpop.xlane.xlu1 %9660 }
0x5b3b   :  { %v9662_v20 = vrot.slane %v9661_v19, 4 }
0x5b3d   :  { %v9663_v22 = vadd.f32 %v9662_v20, %v9661_v19 }
0x5b3f   :  { %v9664_v8 = vrot.slane %v9663_v22, 2 }
0x5b41   :  { %v9665_v24 = vadd.f32 %v9664_v8, %v9663_v22 }
0x5b43   :  { %v9666_v25 = vrot.slane %v9665_v24, 1 }
0x5b45   :  { %v9667_v26 = vadd.f32 %v9666_v25, %v9665_v24 }
0x5b47   :  { %14157 = vpush %v9667_v26 }
0x5b78   :  { %s14158_s25 = spop %14157 }
0x5b79   :  { %v9669_v13 = vstv %s14158_s25 }
0x5b7a   :  { %14278 = vrsqrt.f32 %v9669_v13 }
0x5b84   :  { %v14279_v27 = vpop.eup %14278 }
0x5b85   :  { %v16507_v23 = vmul.f32 %v14279_v27, %v9657_v14 }
0x5b87   :  { %v9680_v28 = vrot.slane %v16507_v23, %v14503_v21  ;;  %v9673_v30 = vcombine.high %v16507_v23, %v16507_v23 }
0x5b89   :  { %v9696_v58 = vrot.slane %v9680_v28, %v14503_v21  ;;  %v9688_v31 = vcombine.high %v9680_v28, %v9680_v28  ;;  %v9687_v34 = vrot.slane %v9673_v30, %v14503_v21 }
0x5b8b   :  { %v9725_v35 = vrot.slane %v9696_v58, %v14466_v59  ;;  %v9710_v36 = vrot.slane %v9688_v31, %v14503_v21  ;;  %v9718_v37 = vcombine.high %v9696_v58, %v9696_v58  ;;  %v9703_v38 = vrot.slane %v9687_v34, %v14503_v21 }
0x5b8c   :  { %v9689_v39 = vcombine.high %v9687_v34, %v9687_v34 }
0x5b8d   :  { %v9762_v40 = vmul.f32 %v9725_v35, %v14479_v32  ;;  %v9729_v29 = vrot.slane %v9710_v36, %v14466_v59  ;;  %v9733_v41 = vrot.slane %v9718_v37, %v14466_v59  ;;  %v9720_v42 = vcombine.high %v9710_v36, %v9710_v36 }
0x5b8e   :  { %v9741_v43 = vrot.slane %v9703_v38, %v14466_v59  ;;  %v9717_v33 = vrot.slane %v9689_v39, %v14503_v21  ;;  %v9719_v44 = vcombine.high %v9703_v38, %v9703_v38  ;;  %v9794_v36 = vmul.f32 %v16507_v23, %v14498_v63 }
0x5b8f   :  { %v9770_v47 = vsel %vm28_vm1, %v9762_v40, -inf  ;;  %v9763_v2 = vmul.f32 %v9729_v29, %v14479_v32  ;;  %v9764_v49 = vmul.f32 %v9733_v41, %v14479_v32  ;;  %v9737_v50 = vrot.slane %v9720_v42, %v14466_v59 }
0x5b90   :  { %9771 = vmax.xlane.f32.xlu0 %v9770_v47  ;;  %v9745_v54 = vrot.slane %v9717_v33, %v14466_v59  ;;  %v9721_v55 = vcombine.high %v9717_v33, %v9717_v33  ;;  %v9766_v57 = vmul.f32 %v9741_v43, %v14479_v32  ;;  %v9749_v60 = vrot.slane %v9719_v44, %v14466_v59 }
0x5b91   :  { %v9773_v52 = vsel %vm28_vm1, %v9763_v2, -inf  ;;  %v9765_v53 = vmul.f32 %v9737_v50, %v14479_v32  ;;  %v9776_v56 = vsel %vm28_vm1, %v9764_v49, -inf }
0x5b92   :  { %9774 = vmax.xlane.f32.xlu1 %v9773_v52  ;;  %v9767_v62 = vmul.f32 %v9745_v54, %v14479_v32  ;;  %v9753_v1 = vrot.slane %v9721_v55, %v14466_v59  ;;  %v9782_v51 = vsel %vm28_vm1, %v9766_v57, -inf  ;;  %v9768_v3 = vmul.f32 %v9749_v60, %v14479_v32 }
0x5b93   :  { %v9779_v61 = vsel %vm28_vm1, %v9765_v53, -inf }
0x5b94   :  { %9777 = vmax.xlane.f32.xlu0 %v9776_v56  ;;  %v9785_v4 = vsel %vm28_vm1, %v9767_v62, -inf  ;;  %v9769_v5 = vmul.f32 %v9753_v1, %v14479_v32  ;;  %v9788_v0 = vsel %vm28_vm1, %v9768_v3, -inf }
0x5b96   :  { %9780 = vmax.xlane.f32.xlu1 %v9779_v61  ;;  %v9791_v6 = vsel %vm28_vm1, %v9769_v5, -inf }
0x5b98   :  { %9783 = vmax.xlane.f32.xlu0 %v9782_v51 }
0x5b9a   :  { %9786 = vmax.xlane.f32.xlu1 %v9785_v4 }
0x5b9c   :  { %9789 = vmax.xlane.f32.xlu0 %v9788_v0 }
0x5b9e   :  { %9792 = vmax.xlane.f32.xlu1 %v9791_v6 }
0x5c1d   :  { %v9772_v7 = vpop.xlane.xlu0 %9771 }
0x5c1e   :  { %v9806_v11 = vrot.slane %v9772_v7, %v14487_v45 }
0x5c1f   :  { %v9775_v10 = vpop.xlane.xlu1 %9774 }
0x5c20   :  { %v9810_v12 = vrot.slane %v9775_v10, %v14487_v45 }
0x5c21   :  { %v9778_v14 = vpop.xlane.xlu0 %9777 }
0x5c22   :  { %v9835_v15 = vsel %vm866_vm10, %v9810_v12, %v9806_v11  ;;  %v9814_v17 = vrot.slane %v9778_v14, %v14487_v45 }
0x5c23   :  { %v9781_v18 = vpop.xlane.xlu1 %9780 }
0x5c24   :  { %v9836_v19 = vsel %vm867_vm11, %v9814_v17, %v9835_v15  ;;  %v9818_v20 = vrot.slane %v9781_v18, %v14487_v45 }
0x5c25   :  { %v9784_v22 = vpop.xlane.xlu0 %9783 }
0x5c26   :  { %v9837_v8 = vsel %vm869_vm12, %v9818_v20, %v9836_v19  ;;  %v9822_v24 = vrot.slane %v9784_v22, %v14487_v45 }
0x5c27   :  { %v9787_v25 = vpop.xlane.xlu1 %9786 }
0x5c28   :  { %v9838_v26 = vsel %vm871_vm13, %v9822_v24, %v9837_v8  ;;  %v9826_v13 = vrot.slane %v9787_v25, %v14487_v45 }
0x5c29   :  { %v9790_v27 = vpop.xlane.xlu0 %9789 }
0x5c2a   :  { %v9839_v28 = vsel %vm873_vm14, %v9826_v13, %v9838_v26  ;;  %v9830_v30 = vrot.slane %v9790_v27, %v14487_v45 }
0x5c2b   :  { %v9793_v58 = vpop.xlane.xlu1 %9792 }
0x5c2c   :  { %v9834_v31 = vrot.slane %v9793_v58, %v14487_v45  ;;  %v9840_v34 = vsel %vm875_vm15, %v9830_v30, %v9839_v28 }
0x5c2e   :  { %v9841_v35 = vsel %vm877_vm2, %v9834_v31, %v9840_v34 }
0x5c2f   :  { %13985 = vmatpush3.msra.mxu0 %v9841_v35 }
0x5c30   :  { %13987 = vmatmul.mubr.msk.f32.vlgmr.msra.gmra.mrb[44].mxu0 %vm28_vm1, %v14489_v46  ;;  %13994 = vmatprep.subr.mxu0 %v16441_v48 }
0x5c31   :  { %13996 = vmatprep.mubr.msk.f32.mxu0 %vm14346_vm0, %v16441_v48 }
0x5d03   :  { %v9909_v37 = vpop.f32.mrb[44].mxu0 }
0x5d04   :  { %v9913_v38 = vadd.f32 %v9909_v37, %v9794_v36  ;;  %v13988_v39 = vpop.f32.mrb[45].mxu0 }
0x5d06   :  { %v9914_v40 = vmul.f32 %v9913_v38, %v9913_v38 }
0x5d08   :  { %v9915_v29 = vsel %vm28_vm1, %v9914_v40, 0.0 }
0x5d09   :  { %9916 = vadd.xlane.f32.xlu0 %v9915_v29 }
0x5d96   :  { %v9917_v41 = vpop.xlane.xlu0 %9916 }
0x5d97   :  { %v9918_v42 = vrot.slane %v9917_v41, 4 }
0x5d99   :  { %v9919_v43 = vadd.f32 %v9918_v42, %v9917_v41 }
0x5d9b   :  { %v9920_v33 = vrot.slane %v9919_v43, 2 }
0x5d9d   :  { %v9921_v44 = vadd.f32 %v9920_v33, %v9919_v43 }
0x5d9f   :  { %v9922_v47 = vrot.slane %v9921_v44, 1 }
0x5da1   :  { %v9923_v2 = vadd.f32 %v9922_v47, %v9921_v44 }
0x5da3   :  { %14159 = vpush %v9923_v2 }
0x5dd4   :  { %s14160_s26 = spop %14159 }
0x5dd5   :  { %v9925_v49 = vstv %s14160_s26 }
0x5dd6   :  { %14280 = vrsqrt.f32 %v9925_v49 }
0x5de0   :  { %v14281_v50 = vpop.eup %14280 }
0x5de1   :  { %v16565_v23 = vmul.f32 %v14281_v50, %v9913_v38 }
0x5de3   :  { %v9936_v52 = vrot.slane %v16565_v23, %v14503_v21  ;;  %v9929_v53 = vcombine.high %v16565_v23, %v16565_v23 }
0x5de5   :  { %v9952_v54 = vrot.slane %v9936_v52, %v14503_v21  ;;  %v9944_v55 = vcombine.high %v9936_v52, %v9936_v52  ;;  %v9943_v56 = vrot.slane %v9929_v53, %v14503_v21 }
0x5de7   :  { %v9981_v57 = vrot.slane %v9952_v54, %v14466_v59  ;;  %v9966_v60 = vrot.slane %v9944_v55, %v14503_v21  ;;  %v9974_v61 = vcombine.high %v9952_v54, %v9952_v54  ;;  %v9959_v62 = vrot.slane %v9943_v56, %v14503_v21 }
0x5de8   :  { %v9945_v1 = vcombine.high %v9943_v56, %v9943_v56 }
0x5de9   :  { %v10018_v51 = vmul.f32 %v9981_v57, %v14479_v32  ;;  %v9985_v3 = vrot.slane %v9966_v60, %v14466_v59  ;;  %v9989_v4 = vrot.slane %v9974_v61, %v14466_v59  ;;  %v9976_v5 = vcombine.high %v9966_v60, %v9966_v60 }
0x5dea   :  { %v9997_v0 = vrot.slane %v9959_v62, %v14466_v59  ;;  %v9973_v6 = vrot.slane %v9945_v1, %v14503_v21  ;;  %v9975_v7 = vcombine.high %v9959_v62, %v9959_v62  ;;  %v10050_v60 = vmul.f32 %v16565_v23, %v14498_v63 }
0x5deb   :  { %v10026_v10 = vsel %vm28_vm1, %v10018_v51, -inf  ;;  %v10019_v11 = vmul.f32 %v9985_v3, %v14479_v32  ;;  %v10020_v12 = vmul.f32 %v9989_v4, %v14479_v32  ;;  %v9993_v14 = vrot.slane %v9976_v5, %v14466_v59 }
0x5dec   :  { %10027 = vmax.xlane.f32.xlu1 %v10026_v10  ;;  %v10001_v18 = vrot.slane %v9973_v6, %v14466_v59  ;;  %v9977_v19 = vcombine.high %v9973_v6, %v9973_v6  ;;  %v10022_v22 = vmul.f32 %v9997_v0, %v14479_v32  ;;  %v10005_v8 = vrot.slane %v9975_v7, %v14466_v59 }
0x5ded   :  { %v10029_v15 = vsel %vm28_vm1, %v10019_v11, -inf  ;;  %v10021_v17 = vmul.f32 %v9993_v14, %v14479_v32  ;;  %v10032_v20 = vsel %vm28_vm1, %v10020_v12, -inf }
0x5dee   :  { %10030 = vmax.xlane.f32.xlu0 %v10029_v15  ;;  %v10023_v25 = vmul.f32 %v10001_v18, %v14479_v32  ;;  %v10009_v26 = vrot.slane %v9977_v19, %v14466_v59  ;;  %v10038_v13 = vsel %vm28_vm1, %v10022_v22, -inf  ;;  %v10024_v27 = vmul.f32 %v10005_v8, %v14479_v32 }
0x5def   :  { %v10035_v24 = vsel %vm28_vm1, %v10021_v17, -inf }
0x5df0   :  { %10033 = vmax.xlane.f32.xlu1 %v10032_v20  ;;  %v10041_v28 = vsel %vm28_vm1, %v10023_v25, -inf  ;;  %v10025_v30 = vmul.f32 %v10009_v26, %v14479_v32  ;;  %v10044_v58 = vsel %vm28_vm1, %v10024_v27, -inf }
0x5df2   :  { %10036 = vmax.xlane.f32.xlu0 %v10035_v24  ;;  %v10047_v31 = vsel %vm28_vm1, %v10025_v30, -inf }
0x5df4   :  { %10039 = vmax.xlane.f32.xlu1 %v10038_v13 }
0x5df6   :  { %10042 = vmax.xlane.f32.xlu0 %v10041_v28 }
0x5df8   :  { %10045 = vmax.xlane.f32.xlu1 %v10044_v58 }
0x5dfa   :  { %10048 = vmax.xlane.f32.xlu0 %v10047_v31 }
0x5e79   :  { %v10028_v34 = vpop.xlane.xlu1 %10027 }
0x5e7a   :  { %v10062_v36 = vrot.slane %v10028_v34, %v14487_v45 }
0x5e7b   :  { %v10031_v35 = vpop.xlane.xlu0 %10030 }
0x5e7c   :  { %v10066_v37 = vrot.slane %v10031_v35, %v14487_v45 }
0x5e7d   :  { %v10034_v38 = vpop.xlane.xlu1 %10033 }
0x5e7e   :  { %v10091_v39 = vsel %vm866_vm10, %v10066_v37, %v10062_v36  ;;  %v10070_v40 = vrot.slane %v10034_v38, %v14487_v45 }
0x5e7f   :  { %v10037_v29 = vpop.xlane.xlu0 %10036 }
0x5e80   :  { %v10092_v41 = vsel %vm867_vm11, %v10070_v40, %v10091_v39  ;;  %v10074_v42 = vrot.slane %v10037_v29, %v14487_v45 }
0x5e81   :  { %v10040_v43 = vpop.xlane.xlu1 %10039 }
0x5e82   :  { %v10093_v33 = vsel %vm869_vm12, %v10074_v42, %v10092_v41  ;;  %v10078_v44 = vrot.slane %v10040_v43, %v14487_v45 }
0x5e83   :  { %v10043_v47 = vpop.xlane.xlu0 %10042 }
0x5e84   :  { %v10094_v2 = vsel %vm871_vm13, %v10078_v44, %v10093_v33  ;;  %v10082_v49 = vrot.slane %v10043_v47, %v14487_v45 }
0x5e85   :  { %v10046_v50 = vpop.xlane.xlu1 %10045 }
0x5e86   :  { %v10095_v52 = vsel %vm873_vm14, %v10082_v49, %v10094_v2  ;;  %v10086_v53 = vrot.slane %v10046_v50, %v14487_v45 }
0x5e87   :  { %v10049_v54 = vpop.xlane.xlu0 %10048 }
0x5e88   :  { %v10090_v55 = vrot.slane %v10049_v54, %v14487_v45  ;;  %v10096_v56 = vsel %vm875_vm15, %v10086_v53, %v10095_v52 }
0x5e8a   :  { %v10097_v57 = vsel %vm877_vm2, %v10090_v55, %v10096_v56 }
0x5e8b   :  { %13990 = vmatpush3.msra.mxu1 %v10097_v57 }
0x5e8c   :  { %13992 = vmatmul.mubr.msk.f32.vlgmr.msra.gmra.mrb[44].mxu1 %vm28_vm1, %v14489_v46  ;;  %13999 = vmatprep.subr.mxu1 %v16441_v48 }
0x5e8d   :  { %14001 = vmatprep.mubr.msk.f32.mxu1 %vm14346_vm0, %v16441_v48 }
0x5f5f   :  { %v10165_v61 = vpop.f32.mrb[44].mxu1 }
0x5f60   :  { %v10169_v62 = vadd.f32 %v10165_v61, %v10050_v60  ;;  %v13993_v1 = vpop.f32.mrb[45].mxu1 }
0x5f62   :  { %v10170_v51 = vmul.f32 %v10169_v62, %v10169_v62 }
0x5f64   :  { %v10171_v3 = vsel %vm28_vm1, %v10170_v51, 0.0 }
0x5f65   :  { %10172 = vadd.xlane.f32.xlu1 %v10171_v3 }
0x5ff2   :  { %v10173_v4 = vpop.xlane.xlu1 %10172 }
0x5ff3   :  { %v10174_v5 = vrot.slane %v10173_v4, 4 }
0x5ff5   :  { %v10175_v0 = vadd.f32 %v10174_v5, %v10173_v4 }
0x5ff7   :  { %v10176_v6 = vrot.slane %v10175_v0, 2 }
0x5ff9   :  { %v10177_v7 = vadd.f32 %v10176_v6, %v10175_v0 }
0x5ffb   :  { %v10178_v10 = vrot.slane %v10177_v7, 1 }
0x5ffd   :  { %v10179_v11 = vadd.f32 %v10178_v10, %v10177_v7 }
0x5fff   :  { %14161 = vpush %v10179_v11 }
0x6030   :  { %s14162_s1 = spop %14161 }
0x6031   :  { %v10181_v12 = vstv %s14162_s1 }
0x6032   :  { %14282 = vrsqrt.f32 %v10181_v12 }
0x603c   :  { %v14283_v14 = vpop.eup %14282 }
0x603d   :  { %v16623_v23 = vmul.f32 %v14283_v14, %v10169_v62 }
0x603f   :  { %v10192_v15 = vrot.slane %v16623_v23, %v14503_v21  ;;  %v10185_v17 = vcombine.high %v16623_v23, %v16623_v23 }
0x6041   :  { %v10208_v18 = vrot.slane %v10192_v15, %v14503_v21  ;;  %v10200_v19 = vcombine.high %v10192_v15, %v10192_v15  ;;  %v10199_v20 = vrot.slane %v10185_v17, %v14503_v21 }
0x6043   :  { %v10237_v22 = vrot.slane %v10208_v18, %v14466_v59  ;;  %v10222_v8 = vrot.slane %v10200_v19, %v14503_v21  ;;  %v10230_v24 = vcombine.high %v10208_v18, %v10208_v18  ;;  %v10215_v25 = vrot.slane %v10199_v20, %v14503_v21 }
0x6044   :  { %v10201_v26 = vcombine.high %v10199_v20, %v10199_v20 }
0x6045   :  { %v10274_v13 = vmul.f32 %v10237_v22, %v14479_v32  ;;  %v10241_v27 = vrot.slane %v10222_v8, %v14466_v59  ;;  %v10245_v28 = vrot.slane %v10230_v24, %v14466_v59  ;;  %v10232_v30 = vcombine.high %v10222_v8, %v10222_v8 }
0x6046   :  { %v10253_v58 = vrot.slane %v10215_v25, %v14466_v59  ;;  %v10229_v31 = vrot.slane %v10201_v26, %v14503_v21  ;;  %v10231_v34 = vcombine.high %v10215_v25, %v10215_v25  ;;  %v10306_v8 = vmul.f32 %v16623_v23, %v14498_v63 }
0x6047   :  { %v10282_v35 = vsel %vm28_vm1, %v10274_v13, -inf  ;;  %v10275_v36 = vmul.f32 %v10241_v27, %v14479_v32  ;;  %v10276_v37 = vmul.f32 %v10245_v28, %v14479_v32  ;;  %v10249_v38 = vrot.slane %v10232_v30, %v14466_v59 }
0x6048   :  { %10283 = vmax.xlane.f32.xlu0 %v10282_v35  ;;  %v10257_v29 = vrot.slane %v10229_v31, %v14466_v59  ;;  %v10233_v41 = vcombine.high %v10229_v31, %v10229_v31  ;;  %v10278_v43 = vmul.f32 %v10253_v58, %v14479_v32  ;;  %v10261_v33 = vrot.slane %v10231_v34, %v14466_v59 }
0x6049   :  { %v10285_v39 = vsel %vm28_vm1, %v10275_v36, -inf  ;;  %v10277_v40 = vmul.f32 %v10249_v38, %v14479_v32  ;;  %v10288_v42 = vsel %vm28_vm1, %v10276_v37, -inf }
0x604a   :  { %10286 = vmax.xlane.f32.xlu1 %v10285_v39  ;;  %v10279_v47 = vmul.f32 %v10257_v29, %v14479_v32  ;;  %v10265_v2 = vrot.slane %v10233_v41, %v14466_v59  ;;  %v10294_v49 = vsel %vm28_vm1, %v10278_v43, -inf  ;;  %v10280_v50 = vmul.f32 %v10261_v33, %v14479_v32 }
0x604b   :  { %v10291_v44 = vsel %vm28_vm1, %v10277_v40, -inf }
0x604c   :  { %10289 = vmax.xlane.f32.xlu0 %v10288_v42  ;;  %v10297_v52 = vsel %vm28_vm1, %v10279_v47, -inf  ;;  %v10281_v53 = vmul.f32 %v10265_v2, %v14479_v32  ;;  %v10300_v54 = vsel %vm28_vm1, %v10280_v50, -inf }
0x604e   :  { %10292 = vmax.xlane.f32.xlu1 %v10291_v44  ;;  %v10303_v55 = vsel %vm28_vm1, %v10281_v53, -inf }
0x6050   :  { %10295 = vmax.xlane.f32.xlu0 %v10294_v49 }
0x6052   :  { %10298 = vmax.xlane.f32.xlu1 %v10297_v52 }
0x6054   :  { %10301 = vmax.xlane.f32.xlu0 %v10300_v54 }
0x6056   :  { %10304 = vmax.xlane.f32.xlu1 %v10303_v55 }
0x60d5   :  { %v10284_v56 = vpop.xlane.xlu0 %10283 }
0x60d6   :  { %v10318_v60 = vrot.slane %v10284_v56, %v14487_v45 }
0x60d7   :  { %v10287_v57 = vpop.xlane.xlu1 %10286 }
0x60d8   :  { %v10322_v61 = vrot.slane %v10287_v57, %v14487_v45 }
0x60d9   :  { %v10290_v62 = vpop.xlane.xlu0 %10289 }
0x60da   :  { %v10347_v1 = vsel %vm866_vm10, %v10322_v61, %v10318_v60  ;;  %v10326_v51 = vrot.slane %v10290_v62, %v14487_v45 }
0x60db   :  { %v10293_v3 = vpop.xlane.xlu1 %10292 }
0x60dc   :  { %v10348_v4 = vsel %vm867_vm11, %v10326_v51, %v10347_v1  ;;  %v10330_v5 = vrot.slane %v10293_v3, %v14487_v45 }
0x60dd   :  { %v10296_v0 = vpop.xlane.xlu0 %10295 }
0x60de   :  { %v10349_v6 = vsel %vm869_vm12, %v10330_v5, %v10348_v4  ;;  %v10334_v7 = vrot.slane %v10296_v0, %v14487_v45 }
0x60df   :  { %v10299_v10 = vpop.xlane.xlu1 %10298 }
0x60e0   :  { %v10350_v11 = vsel %vm871_vm13, %v10334_v7, %v10349_v6  ;;  %v10338_v12 = vrot.slane %v10299_v10, %v14487_v45 }
0x60e1   :  { %v10302_v14 = vpop.xlane.xlu0 %10301 }
0x60e2   :  { %v10351_v15 = vsel %vm873_vm14, %v10338_v12, %v10350_v11  ;;  %v10342_v17 = vrot.slane %v10302_v14, %v14487_v45 }
0x60e3   :  { %v10305_v18 = vpop.xlane.xlu1 %10304 }
0x60e4   :  { %v10346_v19 = vrot.slane %v10305_v18, %v14487_v45  ;;  %v10352_v20 = vsel %vm875_vm15, %v10342_v17, %v10351_v15 }
0x60e6   :  { %v10353_v22 = vsel %vm877_vm2, %v10346_v19, %v10352_v20 }
0x60e7   :  { %13995 = vmatpush3.msra.mxu0 %v10353_v22 }
0x60e8   :  { %13997 = vmatmul.mubr.msk.f32.vlgmr.msra.gmra.mrb[46].mxu0 %vm28_vm1, %v14489_v46  ;;  %14004 = vmatprep.subr.mxu0 %v16441_v48 }
0x60e9   :  { %14006 = vmatprep.mubr.msk.f32.mxu0 %vm14346_vm0, %v16441_v48 }
0x61bb   :  { %v10421_v24 = vpop.f32.mrb[46].mxu0 }
0x61bc   :  { %v10425_v25 = vadd.f32 %v10421_v24, %v10306_v8  ;;  %v13998_v26 = vpop.f32.mrb[47].mxu0 }
0x61be   :  { %v10426_v13 = vmul.f32 %v10425_v25, %v10425_v25 }
0x61c0   :  { %v10427_v27 = vsel %vm28_vm1, %v10426_v13, 0.0 }
0x61c1   :  { %10428 = vadd.xlane.f32.xlu0 %v10427_v27 }
0x624e   :  { %v10429_v28 = vpop.xlane.xlu0 %10428 }
0x624f   :  { %v10430_v30 = vrot.slane %v10429_v28, 4 }
0x6251   :  { %v10431_v58 = vadd.f32 %v10430_v30, %v10429_v28 }
0x6253   :  { %v10432_v31 = vrot.slane %v10431_v58, 2 }
0x6255   :  { %v10433_v34 = vadd.f32 %v10432_v31, %v10431_v58 }
0x6257   :  { %v10434_v35 = vrot.slane %v10433_v34, 1 }
0x6259   :  { %v10435_v36 = vadd.f32 %v10434_v35, %v10433_v34 }
0x625b   :  { %14163 = vpush %v10435_v36 }
0x628c   :  { %s14164_s27 = spop %14163 }
0x628d   :  { %v10437_v37 = vstv %s14164_s27 }
0x628e   :  { %14284 = vrsqrt.f32 %v10437_v37 }
0x6298   :  { %v14285_v38 = vpop.eup %14284 }
0x6299   :  { %v16681_v23 = vmul.f32 %v14285_v38, %v10425_v25 }
0x629b   :  { %v10448_v39 = vrot.slane %v16681_v23, %v14503_v21  ;;  %v10441_v40 = vcombine.high %v16681_v23, %v16681_v23 }
0x629d   :  { %v10464_v29 = vrot.slane %v10448_v39, %v14503_v21  ;;  %v10456_v41 = vcombine.high %v10448_v39, %v10448_v39  ;;  %v10455_v42 = vrot.slane %v10441_v40, %v14503_v21 }
0x629f   :  { %v10493_v43 = vrot.slane %v10464_v29, %v14466_v59  ;;  %v10478_v33 = vrot.slane %v10456_v41, %v14503_v21  ;;  %v10486_v44 = vcombine.high %v10464_v29, %v10464_v29  ;;  %v10471_v47 = vrot.slane %v10455_v42, %v14503_v21 }
0x62a0   :  { %v10457_v2 = vcombine.high %v10455_v42, %v10455_v42 }
0x62a1   :  { %v10530_v49 = vmul.f32 %v10493_v43, %v14479_v32  ;;  %v10497_v50 = vrot.slane %v10478_v33, %v14466_v59  ;;  %v10501_v52 = vrot.slane %v10486_v44, %v14466_v59  ;;  %v10488_v53 = vcombine.high %v10478_v33, %v10478_v33 }
0x62a2   :  { %v10509_v54 = vrot.slane %v10471_v47, %v14466_v59  ;;  %v10485_v55 = vrot.slane %v10457_v2, %v14503_v21  ;;  %v10487_v56 = vcombine.high %v10471_v47, %v10471_v47  ;;  %v10562_v33 = vmul.f32 %v16681_v23, %v14498_v63 }
0x62a3   :  { %v10538_v57 = vsel %vm28_vm1, %v10530_v49, -inf  ;;  %v10531_v60 = vmul.f32 %v10497_v50, %v14479_v32  ;;  %v10532_v61 = vmul.f32 %v10501_v52, %v14479_v32  ;;  %v10505_v62 = vrot.slane %v10488_v53, %v14466_v59 }
0x62a4   :  { %10539 = vmax.xlane.f32.xlu1 %v10538_v57  ;;  %v10513_v3 = vrot.slane %v10485_v55, %v14466_v59  ;;  %v10489_v4 = vcombine.high %v10485_v55, %v10485_v55  ;;  %v10534_v0 = vmul.f32 %v10509_v54, %v14479_v32  ;;  %v10517_v6 = vrot.slane %v10487_v56, %v14466_v59 }
0x62a5   :  { %v10541_v1 = vsel %vm28_vm1, %v10531_v60, -inf  ;;  %v10533_v51 = vmul.f32 %v10505_v62, %v14479_v32  ;;  %v10544_v5 = vsel %vm28_vm1, %v10532_v61, -inf }
0x62a6   :  { %10542 = vmax.xlane.f32.xlu0 %v10541_v1  ;;  %v10535_v10 = vmul.f32 %v10513_v3, %v14479_v32  ;;  %v10521_v11 = vrot.slane %v10489_v4, %v14466_v59  ;;  %v10550_v12 = vsel %vm28_vm1, %v10534_v0, -inf  ;;  %v10536_v14 = vmul.f32 %v10517_v6, %v14479_v32 }
0x62a7   :  { %v10547_v7 = vsel %vm28_vm1, %v10533_v51, -inf }
0x62a8   :  { %10545 = vmax.xlane.f32.xlu1 %v10544_v5  ;;  %v10553_v15 = vsel %vm28_vm1, %v10535_v10, -inf  ;;  %v10537_v17 = vmul.f32 %v10521_v11, %v14479_v32  ;;  %v10556_v18 = vsel %vm28_vm1, %v10536_v14, -inf }
0x62aa   :  { %10548 = vmax.xlane.f32.xlu0 %v10547_v7  ;;  %v10559_v19 = vsel %vm28_vm1, %v10537_v17, -inf }
0x62ac   :  { %10551 = vmax.xlane.f32.xlu1 %v10550_v12 }
0x62ae   :  { %10554 = vmax.xlane.f32.xlu0 %v10553_v15 }
0x62b0   :  { %10557 = vmax.xlane.f32.xlu1 %v10556_v18 }
0x62b2   :  { %10560 = vmax.xlane.f32.xlu0 %v10559_v19 }
0x6331   :  { %v10540_v20 = vpop.xlane.xlu1 %10539 }
0x6332   :  { %v10574_v8 = vrot.slane %v10540_v20, %v14487_v45 }
0x6333   :  { %v10543_v22 = vpop.xlane.xlu0 %10542 }
0x6334   :  { %v10578_v24 = vrot.slane %v10543_v22, %v14487_v45 }
0x6335   :  { %v10546_v25 = vpop.xlane.xlu1 %10545 }
0x6336   :  { %v10603_v26 = vsel %vm866_vm10, %v10578_v24, %v10574_v8  ;;  %v10582_v13 = vrot.slane %v10546_v25, %v14487_v45 }
0x6337   :  { %v10549_v27 = vpop.xlane.xlu0 %10548 }
0x6338   :  { %v10604_v28 = vsel %vm867_vm11, %v10582_v13, %v10603_v26  ;;  %v10586_v30 = vrot.slane %v10549_v27, %v14487_v45 }
0x6339   :  { %v10552_v58 = vpop.xlane.xlu1 %10551 }
0x633a   :  { %v10605_v31 = vsel %vm869_vm12, %v10586_v30, %v10604_v28  ;;  %v10590_v34 = vrot.slane %v10552_v58, %v14487_v45 }
0x633b   :  { %v10555_v35 = vpop.xlane.xlu0 %10554 }
0x633c   :  { %v10606_v36 = vsel %vm871_vm13, %v10590_v34, %v10605_v31  ;;  %v10594_v37 = vrot.slane %v10555_v35, %v14487_v45 }
0x633d   :  { %v10558_v38 = vpop.xlane.xlu1 %10557 }
0x633e   :  { %v10607_v39 = vsel %vm873_vm14, %v10594_v37, %v10606_v36  ;;  %v10598_v40 = vrot.slane %v10558_v38, %v14487_v45 }
0x633f   :  { %v10561_v29 = vpop.xlane.xlu0 %10560 }
0x6340   :  { %v10602_v41 = vrot.slane %v10561_v29, %v14487_v45  ;;  %v10608_v42 = vsel %vm875_vm15, %v10598_v40, %v10607_v39 }
0x6342   :  { %v10609_v43 = vsel %vm877_vm2, %v10602_v41, %v10608_v42 }
0x6343   :  { %14000 = vmatpush3.msra.mxu1 %v10609_v43 }
0x6344   :  { %14002 = vmatmul.mubr.msk.f32.vlgmr.msra.gmra.mrb[46].mxu1 %vm28_vm1, %v14489_v46  ;;  %14009 = vmatprep.subr.mxu1 %v16441_v48 }
0x6345   :  { %14011 = vmatprep.mubr.msk.f32.mxu1 %vm14346_vm0, %v16441_v48 }
0x6417   :  { %v10677_v44 = vpop.f32.mrb[46].mxu1 }
0x6418   :  { %v10681_v47 = vadd.f32 %v10677_v44, %v10562_v33  ;;  %v14003_v2 = vpop.f32.mrb[47].mxu1 }
0x641a   :  { %v10682_v49 = vmul.f32 %v10681_v47, %v10681_v47 }
0x641c   :  { %v10683_v50 = vsel %vm28_vm1, %v10682_v49, 0.0 }
0x641d   :  { %10684 = vadd.xlane.f32.xlu1 %v10683_v50 }
0x64aa   :  { %v10685_v52 = vpop.xlane.xlu1 %10684 }
0x64ab   :  { %v10686_v53 = vrot.slane %v10685_v52, 4 }
0x64ad   :  { %v10687_v54 = vadd.f32 %v10686_v53, %v10685_v52 }
0x64af   :  { %v10688_v55 = vrot.slane %v10687_v54, 2 }
0x64b1   :  { %v10689_v56 = vadd.f32 %v10688_v55, %v10687_v54 }
0x64b3   :  { %v10690_v57 = vrot.slane %v10689_v56, 1 }
0x64b5   :  { %v10691_v60 = vadd.f32 %v10690_v57, %v10689_v56 }
0x64b7   :  { %14165 = vpush %v10691_v60 }
0x64e8   :  { %s14166_s28 = spop %14165 }
0x64e9   :  { %v10693_v48 = vstv %s14166_s28 }
0x64ea   :  { %14286 = vrsqrt.f32 %v10693_v48 }
0x64f4   :  { %v14287_v61 = vpop.eup %14286 }
0x64f5   :  { %v16739_v23 = vmul.f32 %v14287_v61, %v10681_v47 }
0x64f7   :  { %v10704_v62 = vrot.slane %v16739_v23, %v14503_v21  ;;  %v10697_v1 = vcombine.high %v16739_v23, %v16739_v23 }
0x64f9   :  { %v10720_v51 = vrot.slane %v10704_v62, %v14503_v21  ;;  %v10712_v3 = vcombine.high %v10704_v62, %v10704_v62  ;;  %v10711_v4 = vrot.slane %v10697_v1, %v14503_v21 }
0x64fb   :  { %v10749_v5 = vrot.slane %v10720_v51, %v14466_v59  ;;  %v10734_v0 = vrot.slane %v10712_v3, %v14503_v21  ;;  %v10742_v6 = vcombine.high %v10720_v51, %v10720_v51  ;;  %v10727_v7 = vrot.slane %v10711_v4, %v14503_v21 }
0x64fc   :  { %v10713_v10 = vcombine.high %v10711_v4, %v10711_v4 }
0x64fd   :  { %v10786_v11 = vmul.f32 %v10749_v5, %v14479_v32  ;;  %v10753_v12 = vrot.slane %v10734_v0, %v14466_v59  ;;  %v10757_v14 = vrot.slane %v10742_v6, %v14466_v59  ;;  %v10744_v15 = vcombine.high %v10734_v0, %v10734_v0  ;;  %v16794_v5 = vld [vmem:[%s17397_s2 + $0x8] sm:$0xff] }
0x64fe   :  { %v10765_v17 = vrot.slane %v10727_v7, %v14466_v59  ;;  %v10741_v18 = vrot.slane %v10713_v10, %v14503_v21  ;;  %v10743_v19 = vcombine.high %v10727_v7, %v10727_v7  ;;  %v10818_v0 = vmul.f32 %v16739_v23, %v14498_v63 }
0x64ff   :  { %v10794_v20 = vsel %vm28_vm1, %v10786_v11, -inf  ;;  %v10787_v22 = vmul.f32 %v10753_v12, %v14479_v32  ;;  %v10788_v8 = vmul.f32 %v10757_v14, %v14479_v32  ;;  %v10761_v24 = vrot.slane %v10744_v15, %v14466_v59 }
0x6500   :  { %10795 = vmax.xlane.f32.xlu0 %v10794_v20  ;;  %v10769_v13 = vrot.slane %v10741_v18, %v14466_v59  ;;  %v10745_v27 = vcombine.high %v10741_v18, %v10741_v18  ;;  %v10790_v30 = vmul.f32 %v10765_v17, %v14479_v32  ;;  %v10773_v58 = vrot.slane %v10743_v19, %v14466_v59 }
0x6501   :  { %v10797_v25 = vsel %vm28_vm1, %v10787_v22, -inf  ;;  %v10789_v26 = vmul.f32 %v10761_v24, %v14479_v32  ;;  %v10800_v28 = vsel %vm28_vm1, %v10788_v8, -inf }
0x6502   :  { %10798 = vmax.xlane.f32.xlu1 %v10797_v25  ;;  %v10791_v34 = vmul.f32 %v10769_v13, %v14479_v32  ;;  %v10777_v35 = vrot.slane %v10745_v27, %v14466_v59  ;;  %v10806_v36 = vsel %vm28_vm1, %v10790_v30, -inf  ;;  %v10792_v37 = vmul.f32 %v10773_v58, %v14479_v32 }
0x6503   :  { %v10803_v31 = vsel %vm28_vm1, %v10789_v26, -inf }
0x6504   :  { %10801 = vmax.xlane.f32.xlu0 %v10800_v28  ;;  %v10809_v38 = vsel %vm28_vm1, %v10791_v34, -inf  ;;  %v10793_v39 = vmul.f32 %v10777_v35, %v14479_v32  ;;  %v10812_v40 = vsel %vm28_vm1, %v10792_v37, -inf }
0x6506   :  { %10804 = vmax.xlane.f32.xlu1 %v10803_v31  ;;  %v10815_v29 = vsel %vm28_vm1, %v10793_v39, -inf }
0x6508   :  { %10807 = vmax.xlane.f32.xlu0 %v10806_v36 }
0x650a   :  { %10810 = vmax.xlane.f32.xlu1 %v10809_v38 }
0x650c   :  { %10813 = vmax.xlane.f32.xlu0 %v10812_v40 }
0x650e   :  { %10816 = vmax.xlane.f32.xlu1 %v10815_v29 }
0x658d   :  { %v10796_v41 = vpop.xlane.xlu0 %10795 }
0x658e   :  { %v10830_v43 = vrot.slane %v10796_v41, %v14487_v45 }
0x658f   :  { %v10799_v42 = vpop.xlane.xlu1 %10798 }
0x6590   :  { %v10834_v33 = vrot.slane %v10799_v42, %v14487_v45 }
0x6591   :  { %v10802_v44 = vpop.xlane.xlu0 %10801 }
0x6592   :  { %v10859_v47 = vsel %vm866_vm10, %v10834_v33, %v10830_v43  ;;  %v10838_v2 = vrot.slane %v10802_v44, %v14487_v45 }
0x6593   :  { %v10805_v49 = vpop.xlane.xlu1 %10804 }
0x6594   :  { %v10860_v50 = vsel %vm867_vm11, %v10838_v2, %v10859_v47  ;;  %v10842_v52 = vrot.slane %v10805_v49, %v14487_v45 }
0x6595   :  { %v10808_v53 = vpop.xlane.xlu0 %10807 }
0x6596   :  { %v10861_v54 = vsel %vm869_vm12, %v10842_v52, %v10860_v50  ;;  %v10846_v55 = vrot.slane %v10808_v53, %v14487_v45 }
0x6597   :  { %v10811_v56 = vpop.xlane.xlu1 %10810 }
0x6598   :  { %v10862_v57 = vsel %vm871_vm13, %v10846_v55, %v10861_v54  ;;  %v10850_v60 = vrot.slane %v10811_v56, %v14487_v45 }
0x6599   :  { %v10814_v48 = vpop.xlane.xlu0 %10813 }
0x659a   :  { %v10863_v61 = vsel %vm873_vm14, %v10850_v60, %v10862_v57  ;;  %v10854_v62 = vrot.slane %v10814_v48, %v14487_v45 }
0x659b   :  { %v10817_v1 = vpop.xlane.xlu1 %10816 }
0x659c   :  { %v10864_v51 = vsel %vm875_vm15, %v10854_v62, %v10863_v61  ;;  %v10858_v3 = vrot.slane %v10817_v1, %v14487_v45 }
0x659e   :  { %v10865_v4 = vsel %vm877_vm2, %v10858_v3, %v10864_v51 }
0x659f   :  { %14005 = vmatpush3.msra.mxu0 %v10865_v4 }
0x65a0   :  { %14007 = vmatmul.mubr.msk.f32.vlgmr.msra.gmra.mrb[48].mxu0 %vm28_vm1, %v14489_v46  ;;  %14014 = vmatprep.subr.mxu0 %v16794_v5 }
0x65a1   :  { %14016 = vmatprep.mubr.msk.f32.mxu0 %vm14346_vm0, %v16794_v5 }
0x6673   :  { %v10933_v6 = vpop.f32.mrb[48].mxu0 }
0x6674   :  { %v10937_v7 = vadd.f32 %v10933_v6, %v10818_v0  ;;  %v14008_v10 = vpop.f32.mrb[49].mxu0 }
0x6676   :  { %v10938_v11 = vmul.f32 %v10937_v7, %v10937_v7 }
0x6678   :  { %v10939_v12 = vsel %vm28_vm1, %v10938_v11, 0.0 }
0x6679   :  { %10940 = vadd.xlane.f32.xlu0 %v10939_v12 }
0x6706   :  { %v10941_v14 = vpop.xlane.xlu0 %10940 }
0x6707   :  { %v10942_v15 = vrot.slane %v10941_v14, 4 }
0x6709   :  { %v10943_v17 = vadd.f32 %v10942_v15, %v10941_v14 }
0x670b   :  { %v10944_v18 = vrot.slane %v10943_v17, 2 }
0x670d   :  { %v10945_v19 = vadd.f32 %v10944_v18, %v10943_v17 }
0x670f   :  { %v10946_v20 = vrot.slane %v10945_v19, 1 }
0x6711   :  { %v10947_v22 = vadd.f32 %v10946_v20, %v10945_v19 }
0x6713   :  { %14167 = vpush %v10947_v22 }
0x6744   :  { %s14168_s3 = spop %14167 }
0x6745   :  { %v10949_v8 = vstv %s14168_s3 }
0x6746   :  { %14288 = vrsqrt.f32 %v10949_v8 }
0x6750   :  { %v14289_v24 = vpop.eup %14288 }
0x6751   :  { %v16802_v23 = vmul.f32 %v14289_v24, %v10937_v7 }
0x6753   :  { %v10960_v25 = vrot.slane %v16802_v23, %v14503_v21  ;;  %v10953_v26 = vcombine.high %v16802_v23, %v16802_v23 }
0x6755   :  { %v10976_v13 = vrot.slane %v10960_v25, %v14503_v21  ;;  %v10968_v27 = vcombine.high %v10960_v25, %v10960_v25  ;;  %v10967_v28 = vrot.slane %v10953_v26, %v14503_v21 }
0x6757   :  { %v11005_v30 = vrot.slane %v10976_v13, %v14466_v59  ;;  %v10990_v58 = vrot.slane %v10968_v27, %v14503_v21  ;;  %v10998_v31 = vcombine.high %v10976_v13, %v10976_v13  ;;  %v10983_v34 = vrot.slane %v10967_v28, %v14503_v21 }
0x6758   :  { %v10969_v35 = vcombine.high %v10967_v28, %v10967_v28 }
0x6759   :  { %v11042_v36 = vmul.f32 %v11005_v30, %v14479_v32  ;;  %v11009_v37 = vrot.slane %v10990_v58, %v14466_v59  ;;  %v11013_v38 = vrot.slane %v10998_v31, %v14466_v59  ;;  %v11000_v39 = vcombine.high %v10990_v58, %v10990_v58 }
0x675a   :  { %v11021_v40 = vrot.slane %v10983_v34, %v14466_v59  ;;  %v10997_v29 = vrot.slane %v10969_v35, %v14503_v21  ;;  %v10999_v41 = vcombine.high %v10983_v34, %v10983_v34  ;;  %v11074_v58 = vmul.f32 %v16802_v23, %v14498_v63 }
0x675b   :  { %v11050_v42 = vsel %vm28_vm1, %v11042_v36, -inf  ;;  %v11043_v43 = vmul.f32 %v11009_v37, %v14479_v32  ;;  %v11044_v33 = vmul.f32 %v11013_v38, %v14479_v32  ;;  %v11017_v44 = vrot.slane %v11000_v39, %v14466_v59 }
0x675c   :  { %11051 = vmax.xlane.f32.xlu1 %v11050_v42  ;;  %v11025_v49 = vrot.slane %v10997_v29, %v14466_v59  ;;  %v11001_v50 = vcombine.high %v10997_v29, %v10997_v29  ;;  %v11046_v53 = vmul.f32 %v11021_v40, %v14479_v32  ;;  %v11029_v54 = vrot.slane %v10999_v41, %v14466_v59 }
0x675d   :  { %v11053_v47 = vsel %vm28_vm1, %v11043_v43, -inf  ;;  %v11045_v2 = vmul.f32 %v11017_v44, %v14479_v32  ;;  %v11056_v52 = vsel %vm28_vm1, %v11044_v33, -inf }
0x675e   :  { %11054 = vmax.xlane.f32.xlu0 %v11053_v47  ;;  %v11047_v56 = vmul.f32 %v11025_v49, %v14479_v32  ;;  %v11033_v57 = vrot.slane %v11001_v50, %v14466_v59  ;;  %v11062_v60 = vsel %vm28_vm1, %v11046_v53, -inf  ;;  %v11048_v48 = vmul.f32 %v11029_v54, %v14479_v32 }
0x675f   :  { %v11059_v55 = vsel %vm28_vm1, %v11045_v2, -inf }
0x6760   :  { %11057 = vmax.xlane.f32.xlu1 %v11056_v52  ;;  %v11065_v61 = vsel %vm28_vm1, %v11047_v56, -inf  ;;  %v11049_v62 = vmul.f32 %v11033_v57, %v14479_v32  ;;  %v11068_v1 = vsel %vm28_vm1, %v11048_v48, -inf }
0x6762   :  { %11060 = vmax.xlane.f32.xlu0 %v11059_v55  ;;  %v11071_v51 = vsel %vm28_vm1, %v11049_v62, -inf }
0x6764   :  { %11063 = vmax.xlane.f32.xlu1 %v11062_v60 }
0x6766   :  { %11066 = vmax.xlane.f32.xlu0 %v11065_v61 }
0x6768   :  { %11069 = vmax.xlane.f32.xlu1 %v11068_v1 }
0x676a   :  { %11072 = vmax.xlane.f32.xlu0 %v11071_v51 }
0x67e9   :  { %v11052_v3 = vpop.xlane.xlu1 %11051 }
0x67ea   :  { %v11086_v0 = vrot.slane %v11052_v3, %v14487_v45 }
0x67eb   :  { %v11055_v4 = vpop.xlane.xlu0 %11054 }
0x67ec   :  { %v11090_v6 = vrot.slane %v11055_v4, %v14487_v45 }
0x67ed   :  { %v11058_v7 = vpop.xlane.xlu1 %11057 }
0x67ee   :  { %v11115_v10 = vsel %vm866_vm10, %v11090_v6, %v11086_v0  ;;  %v11094_v11 = vrot.slane %v11058_v7, %v14487_v45 }
0x67ef   :  { %v11061_v12 = vpop.xlane.xlu0 %11060 }
0x67f0   :  { %v11116_v14 = vsel %vm867_vm11, %v11094_v11, %v11115_v10  ;;  %v11098_v15 = vrot.slane %v11061_v12, %v14487_v45 }
0x67f1   :  { %v11064_v17 = vpop.xlane.xlu1 %11063 }
0x67f2   :  { %v11117_v18 = vsel %vm869_vm12, %v11098_v15, %v11116_v14  ;;  %v11102_v19 = vrot.slane %v11064_v17, %v14487_v45 }
0x67f3   :  { %v11067_v20 = vpop.xlane.xlu0 %11066 }
0x67f4   :  { %v11118_v22 = vsel %vm871_vm13, %v11102_v19, %v11117_v18  ;;  %v11106_v8 = vrot.slane %v11067_v20, %v14487_v45 }
0x67f5   :  { %v11070_v24 = vpop.xlane.xlu1 %11069 }
0x67f6   :  { %v11119_v25 = vsel %vm873_vm14, %v11106_v8, %v11118_v22  ;;  %v11110_v26 = vrot.slane %v11070_v24, %v14487_v45 }
0x67f7   :  { %v11073_v13 = vpop.xlane.xlu0 %11072 }
0x67f8   :  { %v11120_v27 = vsel %vm875_vm15, %v11110_v26, %v11119_v25  ;;  %v11114_v28 = vrot.slane %v11073_v13, %v14487_v45 }
0x67fa   :  { %v11121_v30 = vsel %vm877_vm2, %v11114_v28, %v11120_v27 }
0x67fb   :  { %14010 = vmatpush3.msra.mxu1 %v11121_v30 }
0x67fc   :  { %14012 = vmatmul.mubr.msk.f32.vlgmr.msra.gmra.mrb[48].mxu1 %vm28_vm1, %v14489_v46  ;;  %14019 = vmatprep.subr.mxu1 %v16794_v5 }
0x67fd   :  { %14021 = vmatprep.mubr.msk.f32.mxu1 %vm14346_vm0, %v16794_v5 }
0x68cf   :  { %v11189_v31 = vpop.f32.mrb[48].mxu1 }
0x68d0   :  { %v11193_v34 = vadd.f32 %v11189_v31, %v11074_v58  ;;  %v14013_v35 = vpop.f32.mrb[49].mxu1 }
0x68d2   :  { %v11194_v36 = vmul.f32 %v11193_v34, %v11193_v34 }
0x68d4   :  { %v11195_v37 = vsel %vm28_vm1, %v11194_v36, 0.0 }
0x68d5   :  { %11196 = vadd.xlane.f32.xlu1 %v11195_v37 }
0x6962   :  { %v11197_v38 = vpop.xlane.xlu1 %11196 }
0x6963   :  { %v11198_v39 = vrot.slane %v11197_v38, 4 }
0x6965   :  { %v11199_v40 = vadd.f32 %v11198_v39, %v11197_v38 }
0x6967   :  { %v11200_v29 = vrot.slane %v11199_v40, 2 }
0x6969   :  { %v11201_v41 = vadd.f32 %v11200_v29, %v11199_v40 }
0x696b   :  { %v11202_v42 = vrot.slane %v11201_v41, 1 }
0x696d   :  { %v11203_v43 = vadd.f32 %v11202_v42, %v11201_v41 }
0x696f   :  { %14169 = vpush %v11203_v43 }
0x69a0   :  { %s14170_s5 = spop %14169 }
0x69a1   :  { %v11205_v33 = vstv %s14170_s5 }
0x69a2   :  { %14290 = vrsqrt.f32 %v11205_v33 }
0x69ac   :  { %v14291_v44 = vpop.eup %14290 }
0x69ad   :  { %v16860_v23 = vmul.f32 %v14291_v44, %v11193_v34 }
0x69af   :  { %v11216_v47 = vrot.slane %v16860_v23, %v14503_v21  ;;  %v11209_v2 = vcombine.high %v16860_v23, %v16860_v23 }
0x69b1   :  { %v11232_v49 = vrot.slane %v11216_v47, %v14503_v21  ;;  %v11224_v50 = vcombine.high %v11216_v47, %v11216_v47  ;;  %v11223_v52 = vrot.slane %v11209_v2, %v14503_v21 }
0x69b3   :  { %v11261_v53 = vrot.slane %v11232_v49, %v14466_v59  ;;  %v11246_v54 = vrot.slane %v11224_v50, %v14503_v21  ;;  %v11254_v55 = vcombine.high %v11232_v49, %v11232_v49  ;;  %v11239_v56 = vrot.slane %v11223_v52, %v14503_v21 }
0x69b4   :  { %v11225_v57 = vcombine.high %v11223_v52, %v11223_v52 }
0x69b5   :  { %v11298_v60 = vmul.f32 %v11261_v53, %v14479_v32  ;;  %v11265_v48 = vrot.slane %v11246_v54, %v14466_v59  ;;  %v11269_v61 = vrot.slane %v11254_v55, %v14466_v59  ;;  %v11256_v62 = vcombine.high %v11246_v54, %v11246_v54 }
0x69b6   :  { %v11277_v1 = vrot.slane %v11239_v56, %v14466_v59  ;;  %v11253_v51 = vrot.slane %v11225_v57, %v14503_v21  ;;  %v11255_v3 = vcombine.high %v11239_v56, %v11239_v56  ;;  %v11330_v54 = vmul.f32 %v16860_v23, %v14498_v63 }
0x69b7   :  { %v11306_v4 = vsel %vm28_vm1, %v11298_v60, -inf  ;;  %v11299_v0 = vmul.f32 %v11265_v48, %v14479_v32  ;;  %v11300_v6 = vmul.f32 %v11269_v61, %v14479_v32  ;;  %v11273_v7 = vrot.slane %v11256_v62, %v14466_v59 }
0x69b8   :  { %11307 = vmax.xlane.f32.xlu0 %v11306_v4  ;;  %v11281_v12 = vrot.slane %v11253_v51, %v14466_v59  ;;  %v11257_v14 = vcombine.high %v11253_v51, %v11253_v51  ;;  %v11302_v17 = vmul.f32 %v11277_v1, %v14479_v32  ;;  %v11285_v18 = vrot.slane %v11255_v3, %v14466_v59 }
0x69b9   :  { %v11309_v10 = vsel %vm28_vm1, %v11299_v0, -inf  ;;  %v11301_v11 = vmul.f32 %v11273_v7, %v14479_v32  ;;  %v11312_v15 = vsel %vm28_vm1, %v11300_v6, -inf }
0x69ba   :  { %11310 = vmax.xlane.f32.xlu1 %v11309_v10  ;;  %v11303_v20 = vmul.f32 %v11281_v12, %v14479_v32  ;;  %v11289_v22 = vrot.slane %v11257_v14, %v14466_v59  ;;  %v11318_v8 = vsel %vm28_vm1, %v11302_v17, -inf  ;;  %v11304_v24 = vmul.f32 %v11285_v18, %v14479_v32 }
0x69bb   :  { %v11315_v19 = vsel %vm28_vm1, %v11301_v11, -inf }
0x69bc   :  { %11313 = vmax.xlane.f32.xlu0 %v11312_v15  ;;  %v11321_v25 = vsel %vm28_vm1, %v11303_v20, -inf  ;;  %v11305_v26 = vmul.f32 %v11289_v22, %v14479_v32  ;;  %v11324_v13 = vsel %vm28_vm1, %v11304_v24, -inf }
0x69be   :  { %11316 = vmax.xlane.f32.xlu1 %v11315_v19  ;;  %v11327_v27 = vsel %vm28_vm1, %v11305_v26, -inf }
0x69c0   :  { %11319 = vmax.xlane.f32.xlu0 %v11318_v8 }
0x69c2   :  { %11322 = vmax.xlane.f32.xlu1 %v11321_v25 }
0x69c4   :  { %11325 = vmax.xlane.f32.xlu0 %v11324_v13 }
0x69c6   :  { %11328 = vmax.xlane.f32.xlu1 %v11327_v27 }
0x6a45   :  { %v11308_v28 = vpop.xlane.xlu0 %11307 }
0x6a46   :  { %v11342_v58 = vrot.slane %v11308_v28, %v14487_v45 }
0x6a47   :  { %v11311_v30 = vpop.xlane.xlu1 %11310 }
0x6a48   :  { %v11346_v31 = vrot.slane %v11311_v30, %v14487_v45 }
0x6a49   :  { %v11314_v34 = vpop.xlane.xlu0 %11313 }
0x6a4a   :  { %v11371_v35 = vsel %vm866_vm10, %v11346_v31, %v11342_v58  ;;  %v11350_v36 = vrot.slane %v11314_v34, %v14487_v45 }
0x6a4b   :  { %v11317_v37 = vpop.xlane.xlu1 %11316 }
0x6a4c   :  { %v11372_v38 = vsel %vm867_vm11, %v11350_v36, %v11371_v35  ;;  %v11354_v39 = vrot.slane %v11317_v37, %v14487_v45 }
0x6a4d   :  { %v11320_v40 = vpop.xlane.xlu0 %11319 }
0x6a4e   :  { %v11373_v29 = vsel %vm869_vm12, %v11354_v39, %v11372_v38  ;;  %v11358_v41 = vrot.slane %v11320_v40, %v14487_v45 }
0x6a4f   :  { %v11323_v42 = vpop.xlane.xlu1 %11322 }
0x6a50   :  { %v11374_v43 = vsel %vm871_vm13, %v11358_v41, %v11373_v29  ;;  %v11362_v33 = vrot.slane %v11323_v42, %v14487_v45 }
0x6a51   :  { %v11326_v44 = vpop.xlane.xlu0 %11325 }
0x6a52   :  { %v11375_v47 = vsel %vm873_vm14, %v11362_v33, %v11374_v43  ;;  %v11366_v2 = vrot.slane %v11326_v44, %v14487_v45 }
0x6a53   :  { %v11329_v49 = vpop.xlane.xlu1 %11328 }
0x6a54   :  { %v11376_v50 = vsel %vm875_vm15, %v11366_v2, %v11375_v47  ;;  %v11370_v52 = vrot.slane %v11329_v49, %v14487_v45 }
0x6a56   :  { %v11377_v53 = vsel %vm877_vm2, %v11370_v52, %v11376_v50 }
0x6a57   :  { %14015 = vmatpush3.msra.mxu0 %v11377_v53 }
0x6a58   :  { %14017 = vmatmul.mubr.msk.f32.vlgmr.msra.gmra.mrb[50].mxu0 %vm28_vm1, %v14489_v46  ;;  %14024 = vmatprep.subr.mxu0 %v16794_v5 }
0x6a59   :  { %14026 = vmatprep.mubr.msk.f32.mxu0 %vm14346_vm0, %v16794_v5 }
0x6b2b   :  { %v11445_v55 = vpop.f32.mrb[50].mxu0 }
0x6b2c   :  { %v11449_v56 = vadd.f32 %v11445_v55, %v11330_v54  ;;  %v14018_v57 = vpop.f32.mrb[51].mxu0 }
0x6b2e   :  { %v11450_v60 = vmul.f32 %v11449_v56, %v11449_v56 }
0x6b30   :  { %v11451_v48 = vsel %vm28_vm1, %v11450_v60, 0.0 }
0x6b31   :  { %11452 = vadd.xlane.f32.xlu0 %v11451_v48 }
0x6bbe   :  { %v11453_v61 = vpop.xlane.xlu0 %11452 }
0x6bbf   :  { %v11454_v62 = vrot.slane %v11453_v61, 4 }
0x6bc1   :  { %v11455_v1 = vadd.f32 %v11454_v62, %v11453_v61 }
0x6bc3   :  { %v11456_v51 = vrot.slane %v11455_v1, 2 }
0x6bc5   :  { %v11457_v3 = vadd.f32 %v11456_v51, %v11455_v1 }
0x6bc7   :  { %v11458_v4 = vrot.slane %v11457_v3, 1 }
0x6bc9   :  { %v11459_v0 = vadd.f32 %v11458_v4, %v11457_v3 }
0x6bcb   :  { %14171 = vpush %v11459_v0 }
0x6bfc   :  { %s14172_s6 = spop %14171 }
0x6bfd   :  { %v11461_v6 = vstv %s14172_s6 }
0x6bfe   :  { %14292 = vrsqrt.f32 %v11461_v6 }
0x6c08   :  { %v14293_v7 = vpop.eup %14292 }
0x6c09   :  { %v16918_v23 = vmul.f32 %v14293_v7, %v11449_v56 }
0x6c0b   :  { %v11472_v10 = vrot.slane %v16918_v23, %v14503_v21  ;;  %v11465_v11 = vcombine.high %v16918_v23, %v16918_v23 }
0x6c0d   :  { %v11488_v12 = vrot.slane %v11472_v10, %v14503_v21  ;;  %v11480_v14 = vcombine.high %v11472_v10, %v11472_v10  ;;  %v11479_v15 = vrot.slane %v11465_v11, %v14503_v21 }
0x6c0f   :  { %v11517_v17 = vrot.slane %v11488_v12, %v14466_v59  ;;  %v11502_v18 = vrot.slane %v11480_v14, %v14503_v21  ;;  %v11510_v19 = vcombine.high %v11488_v12, %v11488_v12  ;;  %v11495_v20 = vrot.slane %v11479_v15, %v14503_v21 }
0x6c10   :  { %v11481_v22 = vcombine.high %v11479_v15, %v11479_v15 }
0x6c11   :  { %v11554_v8 = vmul.f32 %v11517_v17, %v14479_v32  ;;  %v11521_v24 = vrot.slane %v11502_v18, %v14466_v59  ;;  %v11525_v25 = vrot.slane %v11510_v19, %v14466_v59  ;;  %v11512_v26 = vcombine.high %v11502_v18, %v11502_v18 }
0x6c12   :  { %v11533_v13 = vrot.slane %v11495_v20, %v14466_v59  ;;  %v11509_v27 = vrot.slane %v11481_v22, %v14503_v21  ;;  %v11511_v28 = vcombine.high %v11495_v20, %v11495_v20  ;;  %v11586_v18 = vmul.f32 %v16918_v23, %v14498_v63 }
0x6c13   :  { %v11562_v30 = vsel %vm28_vm1, %v11554_v8, -inf  ;;  %v11555_v58 = vmul.f32 %v11521_v24, %v14479_v32  ;;  %v11556_v31 = vmul.f32 %v11525_v25, %v14479_v32  ;;  %v11529_v34 = vrot.slane %v11512_v26, %v14466_v59 }
0x6c14   :  { %11563 = vmax.xlane.f32.xlu1 %v11562_v30  ;;  %v11537_v37 = vrot.slane %v11509_v27, %v14466_v59  ;;  %v11513_v38 = vcombine.high %v11509_v27, %v11509_v27  ;;  %v11558_v40 = vmul.f32 %v11533_v13, %v14479_v32  ;;  %v11541_v29 = vrot.slane %v11511_v28, %v14466_v59 }
0x6c15   :  { %v11565_v35 = vsel %vm28_vm1, %v11555_v58, -inf  ;;  %v11557_v36 = vmul.f32 %v11529_v34, %v14479_v32  ;;  %v11568_v39 = vsel %vm28_vm1, %v11556_v31, -inf }
0x6c16   :  { %11566 = vmax.xlane.f32.xlu0 %v11565_v35  ;;  %v11559_v42 = vmul.f32 %v11537_v37, %v14479_v32  ;;  %v11545_v43 = vrot.slane %v11513_v38, %v14466_v59  ;;  %v11574_v33 = vsel %vm28_vm1, %v11558_v40, -inf  ;;  %v11560_v44 = vmul.f32 %v11541_v29, %v14479_v32 }
0x6c17   :  { %v11571_v41 = vsel %vm28_vm1, %v11557_v36, -inf }
0x6c18   :  { %11569 = vmax.xlane.f32.xlu1 %v11568_v39  ;;  %v11577_v47 = vsel %vm28_vm1, %v11559_v42, -inf  ;;  %v11561_v2 = vmul.f32 %v11545_v43, %v14479_v32  ;;  %v11580_v49 = vsel %vm28_vm1, %v11560_v44, -inf }
0x6c1a   :  { %11572 = vmax.xlane.f32.xlu0 %v11571_v41  ;;  %v11583_v50 = vsel %vm28_vm1, %v11561_v2, -inf }
0x6c1c   :  { %11575 = vmax.xlane.f32.xlu1 %v11574_v33 }
0x6c1e   :  { %11578 = vmax.xlane.f32.xlu0 %v11577_v47 }
0x6c20   :  { %11581 = vmax.xlane.f32.xlu1 %v11580_v49 }
0x6c22   :  { %11584 = vmax.xlane.f32.xlu0 %v11583_v50 }
0x6ca1   :  { %v11564_v52 = vpop.xlane.xlu1 %11563 }
0x6ca2   :  { %v11598_v54 = vrot.slane %v11564_v52, %v14487_v45 }
0x6ca3   :  { %v11567_v53 = vpop.xlane.xlu0 %11566 }
0x6ca4   :  { %v11602_v55 = vrot.slane %v11567_v53, %v14487_v45 }
0x6ca5   :  { %v11570_v56 = vpop.xlane.xlu1 %11569 }
0x6ca6   :  { %v11627_v57 = vsel %vm866_vm10, %v11602_v55, %v11598_v54  ;;  %v11606_v60 = vrot.slane %v11570_v56, %v14487_v45 }
0x6ca7   :  { %v11573_v48 = vpop.xlane.xlu0 %11572 }
0x6ca8   :  { %v11628_v61 = vsel %vm867_vm11, %v11606_v60, %v11627_v57  ;;  %v11610_v62 = vrot.slane %v11573_v48, %v14487_v45 }
0x6ca9   :  { %v11576_v1 = vpop.xlane.xlu1 %11575 }
0x6caa   :  { %v11629_v51 = vsel %vm869_vm12, %v11610_v62, %v11628_v61  ;;  %v11614_v3 = vrot.slane %v11576_v1, %v14487_v45 }
0x6cab   :  { %v11579_v4 = vpop.xlane.xlu0 %11578 }
0x6cac   :  { %v11630_v0 = vsel %vm871_vm13, %v11614_v3, %v11629_v51  ;;  %v11618_v6 = vrot.slane %v11579_v4, %v14487_v45 }
0x6cad   :  { %v11582_v7 = vpop.xlane.xlu1 %11581 }
0x6cae   :  { %v11631_v10 = vsel %vm873_vm14, %v11618_v6, %v11630_v0  ;;  %v11622_v11 = vrot.slane %v11582_v7, %v14487_v45 }
0x6caf   :  { %v11585_v12 = vpop.xlane.xlu0 %11584 }
0x6cb0   :  { %v11632_v14 = vsel %vm875_vm15, %v11622_v11, %v11631_v10  ;;  %v11626_v15 = vrot.slane %v11585_v12, %v14487_v45 }
0x6cb2   :  { %v11633_v17 = vsel %vm877_vm2, %v11626_v15, %v11632_v14 }
0x6cb3   :  { %14020 = vmatpush3.msra.mxu1 %v11633_v17 }
0x6cb4   :  { %14022 = vmatmul.mubr.msk.f32.vlgmr.msra.gmra.mrb[50].mxu1 %vm28_vm1, %v14489_v46  ;;  %14029 = vmatprep.subr.mxu1 %v16794_v5 }
0x6cb5   :  { %14031 = vmatprep.mubr.msk.f32.mxu1 %vm14346_vm0, %v16794_v5 }
0x6d87   :  { %v11701_v19 = vpop.f32.mrb[50].mxu1 }
0x6d88   :  { %v11705_v20 = vadd.f32 %v11701_v19, %v11586_v18  ;;  %v14023_v22 = vpop.f32.mrb[51].mxu1 }
0x6d8a   :  { %v11706_v8 = vmul.f32 %v11705_v20, %v11705_v20 }
0x6d8c   :  { %v11707_v24 = vsel %vm28_vm1, %v11706_v8, 0.0 }
0x6d8d   :  { %11708 = vadd.xlane.f32.xlu1 %v11707_v24 }
0x6e1a   :  { %v11709_v25 = vpop.xlane.xlu1 %11708 }
0x6e1b   :  { %v11710_v26 = vrot.slane %v11709_v25, 4 }
0x6e1d   :  { %v11711_v13 = vadd.f32 %v11710_v26, %v11709_v25 }
0x6e1f   :  { %v11712_v27 = vrot.slane %v11711_v13, 2 }
0x6e21   :  { %v11713_v28 = vadd.f32 %v11712_v27, %v11711_v13 }
0x6e23   :  { %v11714_v30 = vrot.slane %v11713_v28, 1 }
0x6e25   :  { %v11715_v58 = vadd.f32 %v11714_v30, %v11713_v28 }
0x6e27   :  { %14173 = vpush %v11715_v58 }
0x6e58   :  { %s14174_s0 = spop %14173 }
0x6e59   :  { %v11717_v31 = vstv %s14174_s0 }
0x6e5a   :  { %14294 = vrsqrt.f32 %v11717_v31 }
0x6e64   :  { %v14295_v34 = vpop.eup %14294 }
0x6e65   :  { %v16976_v23 = vmul.f32 %v14295_v34, %v11705_v20 }
0x6e67   :  { %v11728_v35 = vrot.slane %v16976_v23, %v14503_v21  ;;  %v11721_v36 = vcombine.high %v16976_v23, %v16976_v23 }
0x6e69   :  { %v11744_v37 = vrot.slane %v11728_v35, %v14503_v21  ;;  %v11736_v38 = vcombine.high %v11728_v35, %v11728_v35  ;;  %v11735_v39 = vrot.slane %v11721_v36, %v14503_v21 }
0x6e6b   :  { %v11773_v40 = vrot.slane %v11744_v37, %v14466_v59  ;;  %v11758_v29 = vrot.slane %v11736_v38, %v14503_v21  ;;  %v11766_v41 = vcombine.high %v11744_v37, %v11744_v37  ;;  %v11751_v42 = vrot.slane %v11735_v39, %v14503_v21 }
0x6e6c   :  { %v11737_v43 = vcombine.high %v11735_v39, %v11735_v39 }
0x6e6d   :  { %v11810_v33 = vmul.f32 %v11773_v40, %v14479_v32  ;;  %v11777_v44 = vrot.slane %v11758_v29, %v14466_v59  ;;  %v11781_v47 = vrot.slane %v11766_v41, %v14466_v59  ;;  %v11768_v2 = vcombine.high %v11758_v29, %v11758_v29 }
0x6e6e   :  { %v11789_v49 = vrot.slane %v11751_v42, %v14466_v59  ;;  %v11765_v50 = vrot.slane %v11737_v43, %v14503_v21  ;;  %v11767_v52 = vcombine.high %v11751_v42, %v11751_v42  ;;  %v11842_v29 = vmul.f32 %v16976_v23, %v14498_v63 }
0x6e6f   :  { %v11818_v53 = vsel %vm28_vm1, %v11810_v33, -inf  ;;  %v11811_v54 = vmul.f32 %v11777_v44, %v14479_v32  ;;  %v11812_v55 = vmul.f32 %v11781_v47, %v14479_v32  ;;  %v11785_v56 = vrot.slane %v11768_v2, %v14466_v59 }
0x6e70   :  { %11819 = vmax.xlane.f32.xlu0 %v11818_v53  ;;  %v11793_v48 = vrot.slane %v11765_v50, %v14466_v59  ;;  %v11769_v61 = vcombine.high %v11765_v50, %v11765_v50  ;;  %v11814_v1 = vmul.f32 %v11789_v49, %v14479_v32  ;;  %v11797_v51 = vrot.slane %v11767_v52, %v14466_v59 }
0x6e71   :  { %v11821_v57 = vsel %vm28_vm1, %v11811_v54, -inf  ;;  %v11813_v60 = vmul.f32 %v11785_v56, %v14479_v32  ;;  %v11824_v62 = vsel %vm28_vm1, %v11812_v55, -inf }
0x6e72   :  { %11822 = vmax.xlane.f32.xlu1 %v11821_v57  ;;  %v11815_v4 = vmul.f32 %v11793_v48, %v14479_v32  ;;  %v11801_v0 = vrot.slane %v11769_v61, %v14466_v59  ;;  %v11830_v6 = vsel %vm28_vm1, %v11814_v1, -inf  ;;  %v11816_v7 = vmul.f32 %v11797_v51, %v14479_v32 }
0x6e73   :  { %v11827_v3 = vsel %vm28_vm1, %v11813_v60, -inf }
0x6e74   :  { %11825 = vmax.xlane.f32.xlu0 %v11824_v62  ;;  %v11833_v10 = vsel %vm28_vm1, %v11815_v4, -inf  ;;  %v11817_v11 = vmul.f32 %v11801_v0, %v14479_v32  ;;  %v11836_v12 = vsel %vm28_vm1, %v11816_v7, -inf }
0x6e76   :  { %11828 = vmax.xlane.f32.xlu1 %v11827_v3  ;;  %v11839_v14 = vsel %vm28_vm1, %v11817_v11, -inf }
0x6e78   :  { %11831 = vmax.xlane.f32.xlu0 %v11830_v6 }
0x6e7a   :  { %11834 = vmax.xlane.f32.xlu1 %v11833_v10 }
0x6e7c   :  { %11837 = vmax.xlane.f32.xlu0 %v11836_v12 }
0x6e7e   :  { %11840 = vmax.xlane.f32.xlu1 %v11839_v14 }
0x6efd   :  { %v11820_v15 = vpop.xlane.xlu0 %11819 }
0x6efe   :  { %v11854_v18 = vrot.slane %v11820_v15, %v14487_v45 }
0x6eff   :  { %v11823_v17 = vpop.xlane.xlu1 %11822 }
0x6f00   :  { %v11858_v19 = vrot.slane %v11823_v17, %v14487_v45 }
0x6f01   :  { %v11826_v20 = vpop.xlane.xlu0 %11825 }
0x6f02   :  { %v11883_v22 = vsel %vm866_vm10, %v11858_v19, %v11854_v18  ;;  %v11862_v8 = vrot.slane %v11826_v20, %v14487_v45 }
0x6f03   :  { %v11829_v24 = vpop.xlane.xlu1 %11828 }
0x6f04   :  { %v11884_v25 = vsel %vm867_vm11, %v11862_v8, %v11883_v22  ;;  %v11866_v26 = vrot.slane %v11829_v24, %v14487_v45 }
0x6f05   :  { %v11832_v13 = vpop.xlane.xlu0 %11831 }
0x6f06   :  { %v11885_v27 = vsel %vm869_vm12, %v11866_v26, %v11884_v25  ;;  %v11870_v28 = vrot.slane %v11832_v13, %v14487_v45 }
0x6f07   :  { %v11835_v30 = vpop.xlane.xlu1 %11834 }
0x6f08   :  { %v11886_v58 = vsel %vm871_vm13, %v11870_v28, %v11885_v27  ;;  %v11874_v31 = vrot.slane %v11835_v30, %v14487_v45 }
0x6f09   :  { %v11838_v34 = vpop.xlane.xlu0 %11837 }
0x6f0a   :  { %v11887_v35 = vsel %vm873_vm14, %v11874_v31, %v11886_v58  ;;  %v11878_v36 = vrot.slane %v11838_v34, %v14487_v45 }
0x6f0b   :  { %v11841_v37 = vpop.xlane.xlu1 %11840 }
0x6f0c   :  { %v11888_v38 = vsel %vm875_vm15, %v11878_v36, %v11887_v35  ;;  %v11882_v39 = vrot.slane %v11841_v37, %v14487_v45 }
0x6f0e   :  { %v11889_v40 = vsel %vm877_vm2, %v11882_v39, %v11888_v38 }
0x6f0f   :  { %14025 = vmatpush3.msra.mxu0 %v11889_v40 }
0x6f10   :  { %14027 = vmatmul.mubr.msk.f32.vlgmr.msra.gmra.mrb[52].mxu0 %vm28_vm1, %v14489_v46  ;;  %14034 = vmatprep.subr.mxu0 %v16794_v5 }
0x6f11   :  { %14036 = vmatprep.mubr.msk.f32.mxu0 %vm14346_vm0, %v16794_v5 }
0x6fe3   :  { %v11957_v41 = vpop.f32.mrb[52].mxu0 }
0x6fe4   :  { %v11961_v42 = vadd.f32 %v11957_v41, %v11842_v29  ;;  %v14028_v43 = vpop.f32.mrb[53].mxu0 }
0x6fe6   :  { %v11962_v33 = vmul.f32 %v11961_v42, %v11961_v42 }
0x6fe8   :  { %v11963_v44 = vsel %vm28_vm1, %v11962_v33, 0.0 }
0x6fe9   :  { %11964 = vadd.xlane.f32.xlu0 %v11963_v44 }
0x7076   :  { %v11965_v47 = vpop.xlane.xlu0 %11964 }
0x7077   :  { %v11966_v2 = vrot.slane %v11965_v47, 4 }
0x7079   :  { %v11967_v49 = vadd.f32 %v11966_v2, %v11965_v47 }
0x707b   :  { %v11968_v50 = vrot.slane %v11967_v49, 2 }
0x707d   :  { %v11969_v52 = vadd.f32 %v11968_v50, %v11967_v49 }
0x707f   :  { %v11970_v53 = vrot.slane %v11969_v52, 1 }
0x7081   :  { %v11971_v54 = vadd.f32 %v11970_v53, %v11969_v52 }
0x7083   :  { %14175 = vpush %v11971_v54 }
0x70b4   :  { %s14176_s7 = spop %14175 }
0x70b5   :  { %v11973_v55 = vstv %s14176_s7 }
0x70b6   :  { %14296 = vrsqrt.f32 %v11973_v55 }
0x70c0   :  { %v14297_v56 = vpop.eup %14296 }
0x70c1   :  { %v17034_v23 = vmul.f32 %v14297_v56, %v11961_v42 }
0x70c3   :  { %v11984_v57 = vrot.slane %v17034_v23, %v14503_v21  ;;  %v11977_v60 = vcombine.high %v17034_v23, %v17034_v23 }
0x70c5   :  { %v12000_v48 = vrot.slane %v11984_v57, %v14503_v21  ;;  %v11992_v61 = vcombine.high %v11984_v57, %v11984_v57  ;;  %v11991_v62 = vrot.slane %v11977_v60, %v14503_v21 }
0x70c7   :  { %v12029_v1 = vrot.slane %v12000_v48, %v14466_v59  ;;  %v12014_v51 = vrot.slane %v11992_v61, %v14503_v21  ;;  %v12022_v3 = vcombine.high %v12000_v48, %v12000_v48  ;;  %v12007_v4 = vrot.slane %v11991_v62, %v14503_v21 }
0x70c8   :  { %v11993_v0 = vcombine.high %v11991_v62, %v11991_v62 }
0x70c9   :  { %v12066_v6 = vmul.f32 %v12029_v1, %v14479_v32  ;;  %v12033_v7 = vrot.slane %v12014_v51, %v14466_v59  ;;  %v12037_v10 = vrot.slane %v12022_v3, %v14466_v59  ;;  %v12024_v11 = vcombine.high %v12014_v51, %v12014_v51 }
0x70ca   :  { %v12045_v12 = vrot.slane %v12007_v4, %v14466_v59  ;;  %v12021_v14 = vrot.slane %v11993_v0, %v14503_v21  ;;  %v12023_v15 = vcombine.high %v12007_v4, %v12007_v4  ;;  %v12098_v51 = vmul.f32 %v17034_v23, %v14498_v63 }
0x70cb   :  { %v12074_v17 = vsel %vm28_vm1, %v12066_v6, -inf  ;;  %v12067_v18 = vmul.f32 %v12033_v7, %v14479_v32  ;;  %v12068_v19 = vmul.f32 %v12037_v10, %v14479_v32  ;;  %v12041_v20 = vrot.slane %v12024_v11, %v14466_v59 }
0x70cc   :  { %12075 = vmax.xlane.f32.xlu1 %v12074_v17  ;;  %v12049_v24 = vrot.slane %v12021_v14, %v14466_v59  ;;  %v12025_v25 = vcombine.high %v12021_v14, %v12021_v14  ;;  %v12070_v13 = vmul.f32 %v12045_v12, %v14479_v32  ;;  %v12053_v27 = vrot.slane %v12023_v15, %v14466_v59 }
0x70cd   :  { %v12077_v22 = vsel %vm28_vm1, %v12067_v18, -inf  ;;  %v12069_v8 = vmul.f32 %v12041_v20, %v14479_v32  ;;  %v12080_v26 = vsel %vm28_vm1, %v12068_v19, -inf }
0x70ce   :  { %12078 = vmax.xlane.f32.xlu0 %v12077_v22  ;;  %v12071_v30 = vmul.f32 %v12049_v24, %v14479_v32  ;;  %v12057_v58 = vrot.slane %v12025_v25, %v14466_v59  ;;  %v12086_v31 = vsel %vm28_vm1, %v12070_v13, -inf  ;;  %v12072_v34 = vmul.f32 %v12053_v27, %v14479_v32 }
0x70cf   :  { %v12083_v28 = vsel %vm28_vm1, %v12069_v8, -inf }
0x70d0   :  { %12081 = vmax.xlane.f32.xlu1 %v12080_v26  ;;  %v12089_v35 = vsel %vm28_vm1, %v12071_v30, -inf  ;;  %v12073_v36 = vmul.f32 %v12057_v58, %v14479_v32  ;;  %v12092_v37 = vsel %vm28_vm1, %v12072_v34, -inf }
0x70d2   :  { %12084 = vmax.xlane.f32.xlu0 %v12083_v28  ;;  %v12095_v38 = vsel %vm28_vm1, %v12073_v36, -inf }
0x70d4   :  { %12087 = vmax.xlane.f32.xlu1 %v12086_v31 }
0x70d6   :  { %12090 = vmax.xlane.f32.xlu0 %v12089_v35 }
0x70d8   :  { %12093 = vmax.xlane.f32.xlu1 %v12092_v37 }
0x70da   :  { %12096 = vmax.xlane.f32.xlu0 %v12095_v38 }
0x7159   :  { %v12076_v39 = vpop.xlane.xlu1 %12075 }
0x715a   :  { %v12110_v29 = vrot.slane %v12076_v39, %v14487_v45 }
0x715b   :  { %v12079_v40 = vpop.xlane.xlu0 %12078 }
0x715c   :  { %v12114_v41 = vrot.slane %v12079_v40, %v14487_v45 }
0x715d   :  { %v12082_v42 = vpop.xlane.xlu1 %12081 }
0x715e   :  { %v12139_v43 = vsel %vm866_vm10, %v12114_v41, %v12110_v29  ;;  %v12118_v33 = vrot.slane %v12082_v42, %v14487_v45 }
0x715f   :  { %v12085_v44 = vpop.xlane.xlu0 %12084 }
0x7160   :  { %v12140_v47 = vsel %vm867_vm11, %v12118_v33, %v12139_v43  ;;  %v12122_v2 = vrot.slane %v12085_v44, %v14487_v45 }
0x7161   :  { %v12088_v49 = vpop.xlane.xlu1 %12087 }
0x7162   :  { %v12141_v50 = vsel %vm869_vm12, %v12122_v2, %v12140_v47  ;;  %v12126_v52 = vrot.slane %v12088_v49, %v14487_v45 }
0x7163   :  { %v12091_v53 = vpop.xlane.xlu0 %12090 }
0x7164   :  { %v12142_v54 = vsel %vm871_vm13, %v12126_v52, %v12141_v50  ;;  %v12130_v55 = vrot.slane %v12091_v53, %v14487_v45 }
0x7165   :  { %v12094_v56 = vpop.xlane.xlu1 %12093 }
0x7166   :  { %v12143_v57 = vsel %vm873_vm14, %v12130_v55, %v12142_v54  ;;  %v12134_v60 = vrot.slane %v12094_v56, %v14487_v45 }
0x7167   :  { %v12097_v48 = vpop.xlane.xlu0 %12096 }
0x7168   :  { %v12144_v61 = vsel %vm875_vm15, %v12134_v60, %v12143_v57  ;;  %v12138_v62 = vrot.slane %v12097_v48, %v14487_v45 }
0x716a   :  { %v12145_v1 = vsel %vm877_vm2, %v12138_v62, %v12144_v61 }
0x716b   :  { %14030 = vmatpush3.msra.mxu1 %v12145_v1 }
0x716c   :  { %14032 = vmatmul.mubr.msk.f32.vlgmr.msra.gmra.mrb[52].mxu1 %vm28_vm1, %v14489_v46  ;;  %14039 = vmatprep.subr.mxu1 %v16794_v5 }
0x716d   :  { %14041 = vmatprep.mubr.msk.f32.mxu1 %vm14346_vm0, %v16794_v5 }
0x723f   :  { %v12213_v3 = vpop.f32.mrb[52].mxu1 }
0x7240   :  { %v12217_v4 = vadd.f32 %v12213_v3, %v12098_v51  ;;  %v14033_v0 = vpop.f32.mrb[53].mxu1 }
0x7242   :  { %v12218_v6 = vmul.f32 %v12217_v4, %v12217_v4 }
0x7244   :  { %v12219_v7 = vsel %vm28_vm1, %v12218_v6, 0.0 }
0x7245   :  { %12220 = vadd.xlane.f32.xlu1 %v12219_v7 }
0x72d2   :  { %v12221_v10 = vpop.xlane.xlu1 %12220 }
0x72d3   :  { %v12222_v11 = vrot.slane %v12221_v10, 4 }
0x72d5   :  { %v12223_v12 = vadd.f32 %v12222_v11, %v12221_v10 }
0x72d7   :  { %v12224_v14 = vrot.slane %v12223_v12, 2 }
0x72d9   :  { %v12225_v15 = vadd.f32 %v12224_v14, %v12223_v12 }
0x72db   :  { %v12226_v17 = vrot.slane %v12225_v15, 1 }
0x72dd   :  { %v12227_v18 = vadd.f32 %v12226_v17, %v12225_v15 }
0x72df   :  { %14177 = vpush %v12227_v18 }
0x7310   :  { %s14178_s8 = spop %14177 }
0x7311   :  { %v12229_v5 = vstv %s14178_s8 }
0x7312   :  { %14298 = vrsqrt.f32 %v12229_v5 }
0x731c   :  { %v14299_v19 = vpop.eup %14298 }
0x731d   :  { %v17092_v23 = vmul.f32 %v14299_v19, %v12217_v4 }
0x731f   :  { %v12240_v20 = vrot.slane %v17092_v23, %v14503_v21  ;;  %v12233_v22 = vcombine.high %v17092_v23, %v17092_v23 }
0x7321   :  { %v12256_v8 = vrot.slane %v12240_v20, %v14503_v21  ;;  %v12248_v24 = vcombine.high %v12240_v20, %v12240_v20  ;;  %v12247_v25 = vrot.slane %v12233_v22, %v14503_v21 }
0x7323   :  { %v12285_v26 = vrot.slane %v12256_v8, %v14466_v59  ;;  %v12270_v13 = vrot.slane %v12248_v24, %v14503_v21  ;;  %v12278_v27 = vcombine.high %v12256_v8, %v12256_v8  ;;  %v12263_v28 = vrot.slane %v12247_v25, %v14503_v21 }
0x7324   :  { %v12249_v30 = vcombine.high %v12247_v25, %v12247_v25 }
0x7325   :  { %v12322_v58 = vmul.f32 %v12285_v26, %v14479_v32  ;;  %v12289_v31 = vrot.slane %v12270_v13, %v14466_v59  ;;  %v12293_v34 = vrot.slane %v12278_v27, %v14466_v59  ;;  %v12280_v35 = vcombine.high %v12270_v13, %v12270_v13  ;;  %v17147_v26 = vld [vmem:[%s17397_s2 + $0x8] sm:$0xff] }
0x7326   :  { %v12301_v36 = vrot.slane %v12263_v28, %v14466_v59  ;;  %v12277_v37 = vrot.slane %v12249_v30, %v14503_v21  ;;  %v12279_v38 = vcombine.high %v12263_v28, %v12263_v28  ;;  %v12354_v13 = vmul.f32 %v17092_v23, %v14498_v63 }
0x7327   :  { %v12330_v39 = vsel %vm28_vm1, %v12322_v58, -inf  ;;  %v12323_v40 = vmul.f32 %v12289_v31, %v14479_v32  ;;  %v12324_v29 = vmul.f32 %v12293_v34, %v14479_v32  ;;  %v12297_v41 = vrot.slane %v12280_v35, %v14466_v59 }
0x7328   :  { %12331 = vmax.xlane.f32.xlu0 %v12330_v39  ;;  %v12305_v33 = vrot.slane %v12277_v37, %v14466_v59  ;;  %v12281_v44 = vcombine.high %v12277_v37, %v12277_v37  ;;  %v12326_v2 = vmul.f32 %v12301_v36, %v14479_v32  ;;  %v12309_v49 = vrot.slane %v12279_v38, %v14466_v59 }
0x7329   :  { %v12333_v42 = vsel %vm28_vm1, %v12323_v40, -inf  ;;  %v12325_v43 = vmul.f32 %v12297_v41, %v14479_v32  ;;  %v12336_v47 = vsel %vm28_vm1, %v12324_v29, -inf }
0x732a   :  { %12334 = vmax.xlane.f32.xlu1 %v12333_v42  ;;  %v12327_v52 = vmul.f32 %v12305_v33, %v14479_v32  ;;  %v12313_v53 = vrot.slane %v12281_v44, %v14466_v59  ;;  %v12342_v54 = vsel %vm28_vm1, %v12326_v2, -inf  ;;  %v12328_v55 = vmul.f32 %v12309_v49, %v14479_v32 }
0x732b   :  { %v12339_v50 = vsel %vm28_vm1, %v12325_v43, -inf }
0x732c   :  { %12337 = vmax.xlane.f32.xlu0 %v12336_v47  ;;  %v12345_v56 = vsel %vm28_vm1, %v12327_v52, -inf  ;;  %v12329_v57 = vmul.f32 %v12313_v53, %v14479_v32  ;;  %v12348_v60 = vsel %vm28_vm1, %v12328_v55, -inf }
0x732e   :  { %12340 = vmax.xlane.f32.xlu1 %v12339_v50  ;;  %v12351_v48 = vsel %vm28_vm1, %v12329_v57, -inf }
0x7330   :  { %12343 = vmax.xlane.f32.xlu0 %v12342_v54 }
0x7332   :  { %12346 = vmax.xlane.f32.xlu1 %v12345_v56 }
0x7334   :  { %12349 = vmax.xlane.f32.xlu0 %v12348_v60 }
0x7336   :  { %12352 = vmax.xlane.f32.xlu1 %v12351_v48 }
0x73b5   :  { %v12332_v61 = vpop.xlane.xlu0 %12331 }
0x73b6   :  { %v12366_v1 = vrot.slane %v12332_v61, %v14487_v45 }
0x73b7   :  { %v12335_v62 = vpop.xlane.xlu1 %12334 }
0x73b8   :  { %v12370_v51 = vrot.slane %v12335_v62, %v14487_v45 }
0x73b9   :  { %v12338_v3 = vpop.xlane.xlu0 %12337 }
0x73ba   :  { %v12395_v4 = vsel %vm866_vm10, %v12370_v51, %v12366_v1  ;;  %v12374_v0 = vrot.slane %v12338_v3, %v14487_v45 }
0x73bb   :  { %v12341_v6 = vpop.xlane.xlu1 %12340 }
0x73bc   :  { %v12396_v7 = vsel %vm867_vm11, %v12374_v0, %v12395_v4  ;;  %v12378_v10 = vrot.slane %v12341_v6, %v14487_v45 }
0x73bd   :  { %v12344_v11 = vpop.xlane.xlu0 %12343 }
0x73be   :  { %v12397_v12 = vsel %vm869_vm12, %v12378_v10, %v12396_v7  ;;  %v12382_v14 = vrot.slane %v12344_v11, %v14487_v45 }
0x73bf   :  { %v12347_v15 = vpop.xlane.xlu1 %12346 }
0x73c0   :  { %v12398_v17 = vsel %vm871_vm13, %v12382_v14, %v12397_v12  ;;  %v12386_v18 = vrot.slane %v12347_v15, %v14487_v45 }
0x73c1   :  { %v12350_v5 = vpop.xlane.xlu0 %12349 }
0x73c2   :  { %v12399_v19 = vsel %vm873_vm14, %v12386_v18, %v12398_v17  ;;  %v12390_v20 = vrot.slane %v12350_v5, %v14487_v45 }
0x73c3   :  { %v12353_v22 = vpop.xlane.xlu1 %12352 }
0x73c4   :  { %v12400_v8 = vsel %vm875_vm15, %v12390_v20, %v12399_v19  ;;  %v12394_v24 = vrot.slane %v12353_v22, %v14487_v45 }
0x73c6   :  { %v12401_v25 = vsel %vm877_vm2, %v12394_v24, %v12400_v8 }
0x73c7   :  { %14035 = vmatpush3.msra.mxu0 %v12401_v25 }
0x73c8   :  { %14037 = vmatmul.mubr.msk.f32.vlgmr.msra.gmra.mrb[54].mxu0 %vm28_vm1, %v14489_v46  ;;  %14044 = vmatprep.subr.mxu0 %v17147_v26 }
0x73c9   :  { %14046 = vmatprep.mubr.msk.f32.mxu0 %vm14346_vm0, %v17147_v26 }
0x749b   :  { %v12469_v27 = vpop.f32.mrb[54].mxu0 }
0x749c   :  { %v12473_v28 = vadd.f32 %v12469_v27, %v12354_v13  ;;  %v14038_v30 = vpop.f32.mrb[55].mxu0 }
0x749e   :  { %v12474_v58 = vmul.f32 %v12473_v28, %v12473_v28 }
0x74a0   :  { %v12475_v31 = vsel %vm28_vm1, %v12474_v58, 0.0 }
0x74a1   :  { %12476 = vadd.xlane.f32.xlu0 %v12475_v31 }
0x752e   :  { %v12477_v34 = vpop.xlane.xlu0 %12476 }
0x752f   :  { %v12478_v35 = vrot.slane %v12477_v34, 4 }
0x7531   :  { %v12479_v36 = vadd.f32 %v12478_v35, %v12477_v34 }
0x7533   :  { %v12480_v37 = vrot.slane %v12479_v36, 2 }
0x7535   :  { %v12481_v38 = vadd.f32 %v12480_v37, %v12479_v36 }
0x7537   :  { %v12482_v39 = vrot.slane %v12481_v38, 1 }
0x7539   :  { %v12483_v40 = vadd.f32 %v12482_v39, %v12481_v38 }
0x753b   :  { %14179 = vpush %v12483_v40 }
0x756c   :  { %s14180_s11 = spop %14179 }
0x756d   :  { %v12485_v29 = vstv %s14180_s11 }
0x756e   :  { %14300 = vrsqrt.f32 %v12485_v29 }
0x7578   :  { %v14301_v41 = vpop.eup %14300 }
0x7579   :  { %v17155_v23 = vmul.f32 %v14301_v41, %v12473_v28 }
0x757b   :  { %v12496_v42 = vrot.slane %v17155_v23, %v14503_v21  ;;  %v12489_v43 = vcombine.high %v17155_v23, %v17155_v23 }
0x757d   :  { %v12512_v33 = vrot.slane %v12496_v42, %v14503_v21  ;;  %v12504_v44 = vcombine.high %v12496_v42, %v12496_v42  ;;  %v12503_v47 = vrot.slane %v12489_v43, %v14503_v21 }
0x757f   :  { %v12541_v2 = vrot.slane %v12512_v33, %v14466_v59  ;;  %v12526_v49 = vrot.slane %v12504_v44, %v14503_v21  ;;  %v12534_v50 = vcombine.high %v12512_v33, %v12512_v33  ;;  %v12519_v52 = vrot.slane %v12503_v47, %v14503_v21 }
0x7580   :  { %v12505_v53 = vcombine.high %v12503_v47, %v12503_v47 }
0x7581   :  { %v12578_v54 = vmul.f32 %v12541_v2, %v14479_v32  ;;  %v12545_v55 = vrot.slane %v12526_v49, %v14466_v59  ;;  %v12549_v56 = vrot.slane %v12534_v50, %v14466_v59  ;;  %v12536_v57 = vcombine.high %v12526_v49, %v12526_v49 }
0x7582   :  { %v12557_v60 = vrot.slane %v12519_v52, %v14466_v59  ;;  %v12533_v48 = vrot.slane %v12505_v53, %v14503_v21  ;;  %v12535_v61 = vcombine.high %v12519_v52, %v12519_v52  ;;  %v12610_v49 = vmul.f32 %v17155_v23, %v14498_v63 }
0x7583   :  { %v12586_v62 = vsel %vm28_vm1, %v12578_v54, -inf  ;;  %v12579_v1 = vmul.f32 %v12545_v55, %v14479_v32  ;;  %v12580_v51 = vmul.f32 %v12549_v56, %v14479_v32  ;;  %v12553_v3 = vrot.slane %v12536_v57, %v14466_v59 }
0x7584   :  { %12587 = vmax.xlane.f32.xlu1 %v12586_v62  ;;  %v12561_v6 = vrot.slane %v12533_v48, %v14466_v59  ;;  %v12537_v7 = vcombine.high %v12533_v48, %v12533_v48  ;;  %v12582_v11 = vmul.f32 %v12557_v60, %v14479_v32  ;;  %v12565_v12 = vrot.slane %v12535_v61, %v14466_v59 }
0x7585   :  { %v12589_v4 = vsel %vm28_vm1, %v12579_v1, -inf  ;;  %v12581_v0 = vmul.f32 %v12553_v3, %v14479_v32  ;;  %v12592_v10 = vsel %vm28_vm1, %v12580_v51, -inf }
0x7586   :  { %12590 = vmax.xlane.f32.xlu0 %v12589_v4  ;;  %v12583_v15 = vmul.f32 %v12561_v6, %v14479_v32  ;;  %v12569_v17 = vrot.slane %v12537_v7, %v14466_v59  ;;  %v12598_v18 = vsel %vm28_vm1, %v12582_v11, -inf  ;;  %v12584_v5 = vmul.f32 %v12565_v12, %v14479_v32 }
0x7587   :  { %v12595_v14 = vsel %vm28_vm1, %v12581_v0, -inf }
0x7588   :  { %12593 = vmax.xlane.f32.xlu1 %v12592_v10  ;;  %v12601_v19 = vsel %vm28_vm1, %v12583_v15, -inf  ;;  %v12585_v20 = vmul.f32 %v12569_v17, %v14479_v32  ;;  %v12604_v22 = vsel %vm28_vm1, %v12584_v5, -inf }
0x758a   :  { %12596 = vmax.xlane.f32.xlu0 %v12595_v14  ;;  %v12607_v8 = vsel %vm28_vm1, %v12585_v20, -inf }
0x758c   :  { %12599 = vmax.xlane.f32.xlu1 %v12598_v18 }
0x758e   :  { %12602 = vmax.xlane.f32.xlu0 %v12601_v19 }
0x7590   :  { %12605 = vmax.xlane.f32.xlu1 %v12604_v22 }
0x7592   :  { %12608 = vmax.xlane.f32.xlu0 %v12607_v8 }
0x7611   :  { %v12588_v24 = vpop.xlane.xlu1 %12587 }
0x7612   :  { %v12622_v13 = vrot.slane %v12588_v24, %v14487_v45 }
0x7613   :  { %v12591_v25 = vpop.xlane.xlu0 %12590 }
0x7614   :  { %v12626_v27 = vrot.slane %v12591_v25, %v14487_v45 }
0x7615   :  { %v12594_v28 = vpop.xlane.xlu1 %12593 }
0x7616   :  { %v12651_v30 = vsel %vm866_vm10, %v12626_v27, %v12622_v13  ;;  %v12630_v58 = vrot.slane %v12594_v28, %v14487_v45 }
0x7617   :  { %v12597_v31 = vpop.xlane.xlu0 %12596 }
0x7618   :  { %v12652_v34 = vsel %vm867_vm11, %v12630_v58, %v12651_v30  ;;  %v12634_v35 = vrot.slane %v12597_v31, %v14487_v45 }
0x7619   :  { %v12600_v36 = vpop.xlane.xlu1 %12599 }
0x761a   :  { %v12653_v37 = vsel %vm869_vm12, %v12634_v35, %v12652_v34  ;;  %v12638_v38 = vrot.slane %v12600_v36, %v14487_v45 }
0x761b   :  { %v12603_v39 = vpop.xlane.xlu0 %12602 }
0x761c   :  { %v12654_v40 = vsel %vm871_vm13, %v12638_v38, %v12653_v37  ;;  %v12642_v29 = vrot.slane %v12603_v39, %v14487_v45 }
0x761d   :  { %v12606_v41 = vpop.xlane.xlu1 %12605 }
0x761e   :  { %v12655_v42 = vsel %vm873_vm14, %v12642_v29, %v12654_v40  ;;  %v12646_v43 = vrot.slane %v12606_v41, %v14487_v45 }
0x761f   :  { %v12609_v33 = vpop.xlane.xlu0 %12608 }
0x7620   :  { %v12656_v44 = vsel %vm875_vm15, %v12646_v43, %v12655_v42  ;;  %v12650_v47 = vrot.slane %v12609_v33, %v14487_v45 }
0x7622   :  { %v12657_v2 = vsel %vm877_vm2, %v12650_v47, %v12656_v44 }
0x7623   :  { %14040 = vmatpush3.msra.mxu1 %v12657_v2 }
0x7624   :  { %14042 = vmatmul.mubr.msk.f32.vlgmr.msra.gmra.mrb[54].mxu1 %vm28_vm1, %v14489_v46  ;;  %14049 = vmatprep.subr.mxu1 %v17147_v26 }
0x7625   :  { %14051 = vmatprep.mubr.msk.f32.mxu1 %vm14346_vm0, %v17147_v26 }
0x76f7   :  { %v12725_v50 = vpop.f32.mrb[54].mxu1 }
0x76f8   :  { %v12729_v52 = vadd.f32 %v12725_v50, %v12610_v49  ;;  %v14043_v53 = vpop.f32.mrb[55].mxu1 }
0x76fa   :  { %v12730_v54 = vmul.f32 %v12729_v52, %v12729_v52 }
0x76fc   :  { %v12731_v55 = vsel %vm28_vm1, %v12730_v54, 0.0 }
0x76fd   :  { %12732 = vadd.xlane.f32.xlu1 %v12731_v55 }
0x778a   :  { %v12733_v56 = vpop.xlane.xlu1 %12732 }
0x778b   :  { %v12734_v57 = vrot.slane %v12733_v56, 4 }
0x778d   :  { %v12735_v60 = vadd.f32 %v12734_v57, %v12733_v56 }
0x778f   :  { %v12736_v48 = vrot.slane %v12735_v60, 2 }
0x7791   :  { %v12737_v61 = vadd.f32 %v12736_v48, %v12735_v60 }
0x7793   :  { %v12738_v62 = vrot.slane %v12737_v61, 1 }
0x7795   :  { %v12739_v1 = vadd.f32 %v12738_v62, %v12737_v61 }
0x7797   :  { %14181 = vpush %v12739_v1 }
0x77c8   :  { %s14182_s12 = spop %14181 }
0x77c9   :  { %v12741_v51 = vstv %s14182_s12 }
0x77ca   :  { %14302 = vrsqrt.f32 %v12741_v51 }
0x77d4   :  { %v14303_v3 = vpop.eup %14302 }
0x77d5   :  { %v17213_v23 = vmul.f32 %v14303_v3, %v12729_v52 }
0x77d7   :  { %v12752_v4 = vrot.slane %v17213_v23, %v14503_v21  ;;  %v12745_v0 = vcombine.high %v17213_v23, %v17213_v23 }
0x77d9   :  { %v12768_v6 = vrot.slane %v12752_v4, %v14503_v21  ;;  %v12760_v7 = vcombine.high %v12752_v4, %v12752_v4  ;;  %v12759_v10 = vrot.slane %v12745_v0, %v14503_v21 }
0x77db   :  { %v12797_v11 = vrot.slane %v12768_v6, %v14466_v59  ;;  %v12782_v12 = vrot.slane %v12760_v7, %v14503_v21  ;;  %v12790_v14 = vcombine.high %v12768_v6, %v12768_v6  ;;  %v12775_v15 = vrot.slane %v12759_v10, %v14503_v21 }
0x77dc   :  { %v12761_v17 = vcombine.high %v12759_v10, %v12759_v10 }
0x77dd   :  { %v12834_v18 = vmul.f32 %v12797_v11, %v14479_v32  ;;  %v12801_v5 = vrot.slane %v12782_v12, %v14466_v59  ;;  %v12805_v19 = vrot.slane %v12790_v14, %v14466_v59  ;;  %v12792_v20 = vcombine.high %v12782_v12, %v12782_v12 }
0x77de   :  { %v12813_v22 = vrot.slane %v12775_v15, %v14466_v59  ;;  %v12789_v8 = vrot.slane %v12761_v17, %v14503_v21  ;;  %v12791_v24 = vcombine.high %v12775_v15, %v12775_v15  ;;  %v12866_v12 = vmul.f32 %v17213_v23, %v14498_v63 }
0x77df   :  { %v12842_v25 = vsel %vm28_vm1, %v12834_v18, -inf  ;;  %v12835_v13 = vmul.f32 %v12801_v5, %v14479_v32  ;;  %v12836_v27 = vmul.f32 %v12805_v19, %v14479_v32  ;;  %v12809_v28 = vrot.slane %v12792_v20, %v14466_v59 }
0x77e0   :  { %12843 = vmax.xlane.f32.xlu0 %v12842_v25  ;;  %v12817_v31 = vrot.slane %v12789_v8, %v14466_v59  ;;  %v12793_v34 = vcombine.high %v12789_v8, %v12789_v8  ;;  %v12838_v36 = vmul.f32 %v12813_v22, %v14479_v32  ;;  %v12821_v37 = vrot.slane %v12791_v24, %v14466_v59 }
0x77e1   :  { %v12845_v30 = vsel %vm28_vm1, %v12835_v13, -inf  ;;  %v12837_v58 = vmul.f32 %v12809_v28, %v14479_v32  ;;  %v12848_v35 = vsel %vm28_vm1, %v12836_v27, -inf }
0x77e2   :  { %12846 = vmax.xlane.f32.xlu1 %v12845_v30  ;;  %v12839_v39 = vmul.f32 %v12817_v31, %v14479_v32  ;;  %v12825_v40 = vrot.slane %v12793_v34, %v14466_v59  ;;  %v12854_v29 = vsel %vm28_vm1, %v12838_v36, -inf  ;;  %v12840_v41 = vmul.f32 %v12821_v37, %v14479_v32 }
0x77e3   :  { %v12851_v38 = vsel %vm28_vm1, %v12837_v58, -inf }
0x77e4   :  { %12849 = vmax.xlane.f32.xlu0 %v12848_v35  ;;  %v12857_v42 = vsel %vm28_vm1, %v12839_v39, -inf  ;;  %v12841_v43 = vmul.f32 %v12825_v40, %v14479_v32  ;;  %v12860_v33 = vsel %vm28_vm1, %v12840_v41, -inf }
0x77e6   :  { %12852 = vmax.xlane.f32.xlu1 %v12851_v38  ;;  %v12863_v44 = vsel %vm28_vm1, %v12841_v43, -inf }
0x77e8   :  { %12855 = vmax.xlane.f32.xlu0 %v12854_v29 }
0x77ea   :  { %12858 = vmax.xlane.f32.xlu1 %v12857_v42 }
0x77ec   :  { %12861 = vmax.xlane.f32.xlu0 %v12860_v33 }
0x77ee   :  { %12864 = vmax.xlane.f32.xlu1 %v12863_v44 }
0x786d   :  { %v12844_v47 = vpop.xlane.xlu0 %12843 }
0x786e   :  { %v12878_v49 = vrot.slane %v12844_v47, %v14487_v45 }
0x786f   :  { %v12847_v2 = vpop.xlane.xlu1 %12846 }
0x7870   :  { %v12882_v50 = vrot.slane %v12847_v2, %v14487_v45 }
0x7871   :  { %v12850_v52 = vpop.xlane.xlu0 %12849 }
0x7872   :  { %v12907_v53 = vsel %vm866_vm10, %v12882_v50, %v12878_v49  ;;  %v12886_v54 = vrot.slane %v12850_v52, %v14487_v45 }
0x7873   :  { %v12853_v55 = vpop.xlane.xlu1 %12852 }
0x7874   :  { %v12908_v56 = vsel %vm867_vm11, %v12886_v54, %v12907_v53  ;;  %v12890_v57 = vrot.slane %v12853_v55, %v14487_v45 }
0x7875   :  { %v12856_v60 = vpop.xlane.xlu0 %12855 }
0x7876   :  { %v12909_v48 = vsel %vm869_vm12, %v12890_v57, %v12908_v56  ;;  %v12894_v61 = vrot.slane %v12856_v60, %v14487_v45 }
0x7877   :  { %v12859_v62 = vpop.xlane.xlu1 %12858 }
0x7878   :  { %v12910_v1 = vsel %vm871_vm13, %v12894_v61, %v12909_v48  ;;  %v12898_v51 = vrot.slane %v12859_v62, %v14487_v45 }
0x7879   :  { %v12862_v3 = vpop.xlane.xlu0 %12861 }
0x787a   :  { %v12911_v4 = vsel %vm873_vm14, %v12898_v51, %v12910_v1  ;;  %v12902_v0 = vrot.slane %v12862_v3, %v14487_v45 }
0x787b   :  { %v12865_v6 = vpop.xlane.xlu1 %12864 }
0x787c   :  { %v12912_v7 = vsel %vm875_vm15, %v12902_v0, %v12911_v4  ;;  %v12906_v10 = vrot.slane %v12865_v6, %v14487_v45 }
0x787e   :  { %v12913_v11 = vsel %vm877_vm2, %v12906_v10, %v12912_v7 }
0x787f   :  { %14045 = vmatpush3.msra.mxu0 %v12913_v11 }
0x7880   :  { %14047 = vmatmul.mubr.msk.f32.vlgmr.msra.gmra.mrb[56].mxu0 %vm28_vm1, %v14489_v46  ;;  %14054 = vmatprep.subr.mxu0 %v17147_v26 }
0x7881   :  { %14056 = vmatprep.mubr.msk.f32.mxu0 %vm14346_vm0, %v17147_v26  ;;  %vm13520_vm0 = vcmask 253952  }
0x7953   :  { %v12981_v14 = vpop.f32.mrb[56].mxu0 }
0x7954   :  { %v12985_v15 = vadd.f32 %v12981_v14, %v12866_v12  ;;  %v14048_v17 = vpop.f32.mrb[57].mxu0 }
0x7956   :  { %v12986_v18 = vmul.f32 %v12985_v15, %v12985_v15 }
0x7958   :  { %v12987_v5 = vsel %vm28_vm1, %v12986_v18, 0.0 }
0x7959   :  { %12988 = vadd.xlane.f32.xlu0 %v12987_v5 }
0x79e6   :  { %v12989_v19 = vpop.xlane.xlu0 %12988 }
0x79e7   :  { %v12990_v20 = vrot.slane %v12989_v19, 4 }
0x79e9   :  { %v12991_v22 = vadd.f32 %v12990_v20, %v12989_v19 }
0x79eb   :  { %v12992_v8 = vrot.slane %v12991_v22, 2 }
0x79ed   :  { %v12993_v24 = vadd.f32 %v12992_v8, %v12991_v22 }
0x79ef   :  { %v12994_v25 = vrot.slane %v12993_v24, 1 }
0x79f1   :  { %v12995_v13 = vadd.f32 %v12994_v25, %v12993_v24 }
0x79f3   :  { %14183 = vpush %v12995_v13 }
0x7a24   :  { %s14184_s13 = spop %14183 }
0x7a25   :  { %v12997_v26 = vstv %s14184_s13 }
0x7a26   :  { %14304 = vrsqrt.f32 %v12997_v26 }
0x7a30   :  { %v14305_v27 = vpop.eup %14304 }
0x7a31   :  { %v17271_v23 = vmul.f32 %v14305_v27, %v12985_v15 }
0x7a33   :  { %v13008_v28 = vrot.slane %v17271_v23, %v14503_v21  ;;  %v13001_v30 = vcombine.high %v17271_v23, %v17271_v23 }
0x7a35   :  { %v13024_v58 = vrot.slane %v13008_v28, %v14503_v21  ;;  %v13016_v31 = vcombine.high %v13008_v28, %v13008_v28  ;;  %v13015_v34 = vrot.slane %v13001_v30, %v14503_v21 }
0x7a37   :  { %v13053_v35 = vrot.slane %v13024_v58, %v14466_v59  ;;  %v13038_v36 = vrot.slane %v13016_v31, %v14503_v21  ;;  %v13046_v37 = vcombine.high %v13024_v58, %v13024_v58  ;;  %v13031_v38 = vrot.slane %v13015_v34, %v14503_v21 }
0x7a38   :  { %v13017_v39 = vcombine.high %v13015_v34, %v13015_v34 }
0x7a39   :  { %v13090_v40 = vmul.f32 %v13053_v35, %v14479_v32  ;;  %v13057_v29 = vrot.slane %v13038_v36, %v14466_v59  ;;  %v13061_v41 = vrot.slane %v13046_v37, %v14466_v59  ;;  %v13048_v42 = vcombine.high %v13038_v36, %v13038_v36 }
0x7a3a   :  { %v13069_v43 = vrot.slane %v13031_v38, %v14466_v59  ;;  %v13045_v33 = vrot.slane %v13017_v39, %v14503_v21  ;;  %v13047_v44 = vcombine.high %v13031_v38, %v13031_v38  ;;  %v13122_v35 = vmul.f32 %v17271_v23, %v14498_v63 }
0x7a3b   :  { %v13098_v47 = vsel %vm28_vm1, %v13090_v40, -inf  ;;  %v13091_v2 = vmul.f32 %v13057_v29, %v14479_v32  ;;  %v13092_v49 = vmul.f32 %v13061_v41, %v14479_v32  ;;  %v13065_v50 = vrot.slane %v13048_v42, %v14466_v59 }
0x7a3c   :  { %13099 = vmax.xlane.f32.xlu1 %v13098_v47  ;;  %v13073_v54 = vrot.slane %v13045_v33, %v14466_v59  ;;  %v13049_v55 = vcombine.high %v13045_v33, %v13045_v33  ;;  %v13094_v57 = vmul.f32 %v13069_v43, %v14479_v32  ;;  %v13077_v60 = vrot.slane %v13047_v44, %v14466_v59 }
0x7a3d   :  { %v13101_v52 = vsel %vm28_vm1, %v13091_v2, -inf  ;;  %v13093_v53 = vmul.f32 %v13065_v50, %v14479_v32  ;;  %v13104_v56 = vsel %vm28_vm1, %v13092_v49, -inf }
0x7a3e   :  { %13102 = vmax.xlane.f32.xlu0 %v13101_v52  ;;  %v13095_v61 = vmul.f32 %v13073_v54, %v14479_v32  ;;  %v13081_v62 = vrot.slane %v13049_v55, %v14466_v59  ;;  %v13110_v1 = vsel %vm28_vm1, %v13094_v57, -inf  ;;  %v13096_v51 = vmul.f32 %v13077_v60, %v14479_v32 }
0x7a3f   :  { %v13107_v48 = vsel %vm28_vm1, %v13093_v53, -inf }
0x7a40   :  { %13105 = vmax.xlane.f32.xlu1 %v13104_v56  ;;  %v13113_v3 = vsel %vm28_vm1, %v13095_v61, -inf  ;;  %v13097_v4 = vmul.f32 %v13081_v62, %v14479_v32  ;;  %v13116_v0 = vsel %vm28_vm1, %v13096_v51, -inf }
0x7a42   :  { %13108 = vmax.xlane.f32.xlu0 %v13107_v48  ;;  %v13119_v6 = vsel %vm28_vm1, %v13097_v4, -inf }
0x7a44   :  { %13111 = vmax.xlane.f32.xlu1 %v13110_v1 }
0x7a46   :  { %13114 = vmax.xlane.f32.xlu0 %v13113_v3 }
0x7a48   :  { %13117 = vmax.xlane.f32.xlu1 %v13116_v0 }
0x7a4a   :  { %13120 = vmax.xlane.f32.xlu0 %v13119_v6 }
0x7ac9   :  { %v13100_v7 = vpop.xlane.xlu1 %13099 }
0x7aca   :  { %v13134_v11 = vrot.slane %v13100_v7, %v14487_v45 }
0x7acb   :  { %v13103_v10 = vpop.xlane.xlu0 %13102 }
0x7acc   :  { %v13138_v12 = vrot.slane %v13103_v10, %v14487_v45 }
0x7acd   :  { %v13106_v14 = vpop.xlane.xlu1 %13105 }
0x7ace   :  { %v13163_v15 = vsel %vm866_vm10, %v13138_v12, %v13134_v11  ;;  %v13142_v17 = vrot.slane %v13106_v14, %v14487_v45 }
0x7acf   :  { %v13109_v18 = vpop.xlane.xlu0 %13108 }
0x7ad0   :  { %v13164_v5 = vsel %vm867_vm11, %v13142_v17, %v13163_v15  ;;  %v13146_v19 = vrot.slane %v13109_v18, %v14487_v45 }
0x7ad1   :  { %v13112_v20 = vpop.xlane.xlu1 %13111 }
0x7ad2   :  { %v13165_v22 = vsel %vm869_vm12, %v13146_v19, %v13164_v5  ;;  %v13150_v8 = vrot.slane %v13112_v20, %v14487_v45 }
0x7ad3   :  { %v13115_v24 = vpop.xlane.xlu0 %13114 }
0x7ad4   :  { %v13166_v25 = vsel %vm871_vm13, %v13150_v8, %v13165_v22  ;;  %v13154_v13 = vrot.slane %v13115_v24, %v14487_v45 }
0x7ad5   :  { %v13118_v26 = vpop.xlane.xlu1 %13117 }
0x7ad6   :  { %v13167_v27 = vsel %vm873_vm14, %v13154_v13, %v13166_v25  ;;  %v13158_v28 = vrot.slane %v13118_v26, %v14487_v45 }
0x7ad7   :  { %v13121_v30 = vpop.xlane.xlu0 %13120 }
0x7ad8   :  { %v13168_v58 = vsel %vm875_vm15, %v13158_v28, %v13167_v27  ;;  %v13162_v31 = vrot.slane %v13121_v30, %v14487_v45 }
0x7ada   :  { %v13169_v34 = vsel %vm877_vm2, %v13162_v31, %v13168_v58 }
0x7adb   :  { %14050 = vmatpush3.msra.mxu1 %v13169_v34 }
0x7adc   :  { %14052 = vmatmul.mubr.msk.f32.vlgmr.msra.gmra.mrb[56].mxu1 %vm28_vm1, %v14489_v46 }
0x7baf   :  { %v13237_v36 = vpop.f32.mrb[56].mxu1 }
0x7bb0   :  { %v13241_v37 = vadd.f32 %v13237_v36, %v13122_v35  ;;  %v14053_v38 = vpop.f32.mrb[57].mxu1 }
0x7bb2   :  { %v13242_v39 = vmul.f32 %v13241_v37, %v13241_v37 }
0x7bb4   :  { %v13243_v40 = vsel %vm28_vm1, %v13242_v39, 0.0 }
0x7bb5   :  { %13244 = vadd.xlane.f32.xlu1 %v13243_v40 }
0x7c42   :  { %v13245_v29 = vpop.xlane.xlu1 %13244 }
0x7c43   :  { %v13246_v41 = vrot.slane %v13245_v29, 4 }
0x7c45   :  { %v13247_v42 = vadd.f32 %v13246_v41, %v13245_v29 }
0x7c47   :  { %v13248_v43 = vrot.slane %v13247_v42, 2 }
0x7c49   :  { %v13249_v33 = vadd.f32 %v13248_v43, %v13247_v42 }
0x7c4b   :  { %v13250_v44 = vrot.slane %v13249_v33, 1 }
0x7c4d   :  { %v13251_v47 = vadd.f32 %v13250_v44, %v13249_v33 }
0x7c4f   :  { %14185 = vpush %v13251_v47 }
0x7c80   :  { %s14186_s14 = spop %14185 }
0x7c81   :  { %v13253_v2 = vstv %s14186_s14 }
0x7c82   :  { %14306 = vrsqrt.f32 %v13253_v2 }
0x7c8c   :  { %v14307_v49 = vpop.eup %14306 }
0x7c8d   :  { %v17326_v23 = vmul.f32 %v14307_v49, %v13241_v37 }
0x7c8f   :  { %v13264_v50 = vrot.slane %v17326_v23, %v14503_v21  ;;  %v13257_v52 = vcombine.high %v17326_v23, %v17326_v23 }
0x7c91   :  { %v13280_v53 = vrot.slane %v13264_v50, %v14503_v21  ;;  %v13272_v54 = vcombine.high %v13264_v50, %v13264_v50  ;;  %v13271_v55 = vrot.slane %v13257_v52, %v14503_v21 }
0x7c93   :  { %v13309_v56 = vrot.slane %v13280_v53, %v14466_v59  ;;  %v13294_v57 = vrot.slane %v13272_v54, %v14503_v21  ;;  %v13302_v60 = vcombine.high %v13280_v53, %v13280_v53  ;;  %v13287_v48 = vrot.slane %v13271_v55, %v14503_v21 }
0x7c94   :  { %v13273_v61 = vcombine.high %v13271_v55, %v13271_v55  ;;  %v13378_v53 = vmul.f32 %v17326_v23, %v14498_v63 }
0x7c95   :  { %v13346_v62 = vmul.f32 %v13309_v56, %v14479_v32  ;;  %v13313_v1 = vrot.slane %v13294_v57, %v14466_v59  ;;  %v13317_v51 = vrot.slane %v13302_v60, %v14466_v59  ;;  %v13304_v3 = vcombine.high %v13294_v57, %v13294_v57 }
0x7c96   :  { %v13325_v4 = vrot.slane %v13287_v48, %v14466_v59  ;;  %v13301_v0 = vrot.slane %v13273_v61, %v14503_v21  ;;  %v13303_v6 = vcombine.high %v13287_v48, %v13287_v48 }
0x7c97   :  { %v13354_v7 = vsel %vm28_vm1, %v13346_v62, -inf  ;;  %v13347_v10 = vmul.f32 %v13313_v1, %v14479_v32  ;;  %v13348_v11 = vmul.f32 %v13317_v51, %v14479_v32  ;;  %v13321_v12 = vrot.slane %v13304_v3, %v14466_v59 }
0x7c98   :  { %13355 = vmax.xlane.f32.xlu0 %v13354_v7  ;;  %v13329_v17 = vrot.slane %v13301_v0, %v14466_v59  ;;  %v13305_v18 = vcombine.high %v13301_v0, %v13301_v0  ;;  %v13350_v5 = vmul.f32 %v13325_v4, %v14479_v32  ;;  %v13333_v19 = vrot.slane %v13303_v6, %v14466_v59 }
0x7c99   :  { %v13357_v14 = vsel %vm28_vm1, %v13347_v10, -inf  ;;  %v13349_v15 = vmul.f32 %v13321_v12, %v14479_v32  ;;  %v13360_v21 = vsel %vm28_vm1, %v13348_v11, -inf }
0x7c9a   :  { %13358 = vmax.xlane.f32.xlu1 %v13357_v14  ;;  %v13351_v22 = vmul.f32 %v13329_v17, %v14479_v32  ;;  %v13337_v8 = vrot.slane %v13305_v18, %v14466_v59  ;;  %v13366_v24 = vsel %vm28_vm1, %v13350_v5, -inf  ;;  %v13352_v25 = vmul.f32 %v13333_v19, %v14479_v32 }
0x7c9b   :  { %v13363_v20 = vsel %vm28_vm1, %v13349_v15, -inf }
0x7c9c   :  { %13361 = vmax.xlane.f32.xlu0 %v13360_v21  ;;  %v13369_v13 = vsel %vm28_vm1, %v13351_v22, -inf  ;;  %v13353_v26 = vmul.f32 %v13337_v8, %v14479_v32  ;;  %v13372_v27 = vsel %vm28_vm1, %v13352_v25, -inf }
0x7c9e   :  { %13364 = vmax.xlane.f32.xlu1 %v13363_v20  ;;  %v13375_v28 = vsel %vm28_vm1, %v13353_v26, -inf }
0x7ca0   :  { %13367 = vmax.xlane.f32.xlu0 %v13366_v24 }
0x7ca2   :  { %13370 = vmax.xlane.f32.xlu1 %v13369_v13 }
0x7ca4   :  { %13373 = vmax.xlane.f32.xlu0 %v13372_v27 }
0x7ca6   :  { %13376 = vmax.xlane.f32.xlu1 %v13375_v28 }
0x7cb7   :  { %13517 = vrot.lane.b32.xlu1 %v14456_v9, %s14350_s15 }
0x7d25   :  { %v13356_v59 = vpop.xlane.xlu0 %13355 }
0x7d26   :  { %v13390_v58 = vrot.slane %v13356_v59, %v14487_v45 }
0x7d27   :  { %v13359_v30 = vpop.xlane.xlu1 %13358 }
0x7d28   :  { %v13394_v31 = vrot.slane %v13359_v30, %v14487_v45 }
0x7d29   :  { %v13362_v34 = vpop.xlane.xlu0 %13361 }
0x7d2a   :  { %v13419_v35 = vsel %vm866_vm10, %v13394_v31, %v13390_v58  ;;  %v13398_v32 = vrot.slane %v13362_v34, %v14487_v45 }
0x7d2b   :  { %v13365_v36 = vpop.xlane.xlu1 %13364 }
0x7d2c   :  { %v13420_v37 = vsel %vm867_vm11, %v13398_v32, %v13419_v35  ;;  %v13402_v38 = vrot.slane %v13365_v36, %v14487_v45 }
0x7d2d   :  { %v13368_v39 = vpop.xlane.xlu0 %13367 }
0x7d2e   :  { %v13421_v40 = vsel %vm869_vm12, %v13402_v38, %v13420_v37  ;;  %v13406_v9 = vrot.slane %v13368_v39, %v14487_v45 }
0x7d2f   :  { %v13371_v29 = vpop.xlane.xlu1 %13370 }
0x7d30   :  { %v13422_v41 = vsel %vm871_vm13, %v13406_v9, %v13421_v40  ;;  %v13410_v42 = vrot.slane %v13371_v29, %v14487_v45 }
0x7d31   :  { %v13374_v43 = vpop.xlane.xlu0 %13373 }
0x7d32   :  { %v13423_v33 = vsel %vm873_vm14, %v13410_v42, %v13422_v41  ;;  %v13414_v44 = vrot.slane %v13374_v43, %v14487_v45 }
0x7d33   :  { %v13377_v47 = vpop.xlane.xlu1 %13376 }
0x7d34   :  { %v13424_v2 = vsel %vm875_vm15, %v13414_v44, %v13423_v33  ;;  %v13418_v49 = vrot.slane %v13377_v47, %v14487_v45 }
0x7d36   :  { %v13425_v50 = vsel %vm877_vm2, %v13418_v49, %v13424_v2 }
0x7d37   :  { %14055 = vmatpush3.msra.mxu0 %v13425_v50  ;;  %v13518_v52 = vpop.permute.xlu1 %13517 }
0x7d38   :  { %13521 = vst.msk [vmem:[%s17397_s2 + $0x1] sm:$0x1] %vm13520_vm0, %v13518_v52  ;;  %14057 = vmatmul.mubr.msk.f32.vlgmr.msra.gmra.mrb[58].mxu0 %vm28_vm1, %v14489_v46 }
0x7e0b   :  { %v13493_v54 = vpop.f32.mrb[58].mxu0 }
0x7e0c   :  { %v13497_v55 = vadd.f32 %v13493_v54, %v13378_v53  ;;  %v14058_v56 = vpop.f32.mrb[59].mxu0 }
0x7e0e   :  { %v13498_v57 = vmul.f32 %v13497_v55, %v13497_v55 }
0x7e10   :  { %v13499_v45 = vsel %vm28_vm1, %v13498_v57, 0.0 }
0x7e11   :  { %13500 = vadd.xlane.f32.xlu0 %v13499_v45 }
0x7e27   :  { %13525 = vrot.lane.b32.xlu0 %v14429_v16, %s14348_s4 }
0x7e9e   :  { %v13501_v60 = vpop.xlane.xlu0 %13500 }
0x7e9f   :  { %v13502_v48 = vrot.slane %v13501_v60, 4 }
0x7ea1   :  { %v13503_v61 = vadd.f32 %v13502_v48, %v13501_v60 }
0x7ea2   :  { %v13526_v62 = vpop.permute.xlu0 %13525 }
0x7ea3   :  { %v13504_v1 = vrot.slane %v13503_v61, 2  ;;  %13528 = vst.msk [vmem:[%s17397_s2 + $0x3] sm:$0x1] %vm13522_vm5, %v13526_v62 }
0x7ea5   :  { %v13505_v46 = vadd.f32 %v13504_v1, %v13503_v61 }
0x7ea7   :  { %v13506_v63 = vrot.slane %v13505_v46, 1 }
0x7ea9   :  { %v13507_v23 = vadd.f32 %v13506_v63, %v13505_v46 }
0x7eab   :  { %14187 = vpush %v13507_v23 }
0x7edc   :  { %s14188_s20 = spop %14187 }
0x7edd   :  { %v13509_v51 = vstv %s14188_s20 }
0x7ede   :  { %14308 = vrsqrt.f32 %v13509_v51 }
0x7ee8   :  { %v14309_v3 = vpop.eup %14308 }
0x7ee9   :  { %v13511_v4 = vmul.f32 %v14309_v3, %v13497_v55 }
0x7eeb   :  { %13529 = vst.msk [vmem:[%s17397_s2 + $0x8] sm:$0xff] %vm28_vm1, %v13511_v4 }
0x7eec   :  { %13534 = vsyncpa [#allocation3], 1 }

</bundles_post_ra>
